<compile_context>
chip_gen: v7x
topology: tpu7x:2x2x1
jax: 0.10.0
libtpu: 0.0.40
codegen_flags: <defaults>
</compile_context>

<pallas_src>
import functools

import jax
import jax.numpy as jnp
from jax.experimental import pallas as pl
from jax.experimental.pallas import tpu as pltpu


# ------------------------------ Pallas kernel -------------------------------

def fused_aux_kernel(p1_ref, wc_ref, s0_ref, w1_ref, s1_ref, wh_ref, bh_ref,
                     wcy_ref, bcy_ref, out_ref, *, n_batch, n_spatial, num_classes):
    """avg_pool+conv0+BN0+ReLU -> conv1(5x5)+BN1+ReLU -> adaptive pool -> FC heads (+C->Y)."""
    # stage 1: pooling, 1x1 conv and BN0 scale all folded into wc (144,128).
    h = jnp.maximum(
        jnp.dot(p1_ref[...], wc_ref[...], preferred_element_type=jnp.float32)
        + s0_ref[...], 0.0)                                      # (25*m2, 128) f32

    # stage 2: 5x5 conv as 25 tile-aligned matmuls; bf16 weights, f32 accumulation.
    n_taps = w1_ref.shape[0]                                     # 25
    c_out = w1_ref.shape[2]                                      # 768
    m2 = n_batch * n_spatial                                     # conv1 output rows
    acc = jnp.zeros((m2, c_out), jnp.float32)
    for k in range(n_taps):                                      # unrolled, MXU-only body
        lhs = h[k * m2:(k + 1) * m2, :].astype(jnp.bfloat16)     # aligned (m2,128) slice
        acc = acc + jnp.dot(lhs, w1_ref[k], preferred_element_type=jnp.float32)
    g = jnp.maximum(acc + s1_ref[...], 0.0)                      # (m2, 768)

    # stage 3: adaptive_avg_pool((1,1)) as VPU adds (rows are spatial-major, batch-minor).
    feat = g[0:n_batch, :]
    for sp in range(1, n_spatial):
        feat = feat + g[sp * n_batch:(sp + 1) * n_batch, :]
    feat = feat * (1.0 / n_spatial)                              # (n_batch, 768)

    # fused FC heads ([class logits | attrs] in one matmul) + C->Y via zero-padded weight.
    heads = jnp.dot(feat, wh_ref[...],
                    preferred_element_type=jnp.float32) + bh_ref[...]   # (n_batch, nc+na)
    attrs = heads[:, num_classes:]                                      # (n_batch, na)
    cy = jnp.dot(attrs, wcy_ref[...],
                 preferred_element_type=jnp.float32) + bcy_ref[...]     # zeros on attr cols
    out_ref[...] = heads + cy


# -------------------------------- JAX glue ----------------------------------

def _full_spec(shape):
    nd = len(shape)
    return pl.BlockSpec(shape, lambda i, _nd=nd: (0,) * _nd)


def _extract_patches(x, ksize, stride):
    """x: (N,H,W,C) -> (N,Ho,Wo,ksize*ksize*C); flatten order (kh, kw, c)."""
    N, H, W, C = x.shape
    Ho = (H - ksize) // stride + 1
    Wo = (W - ksize) // stride + 1
    ih = (jnp.arange(Ho) * stride)[:, None] + jnp.arange(ksize)[None, :]
    iw = (jnp.arange(Wo) * stride)[:, None] + jnp.arange(ksize)[None, :]
    p = x[:, ih]                                   # (N, Ho, k, W, C)
    p = p[:, :, :, iw]                             # (N, Ho, k, Wo, k, C)
    p = jnp.transpose(p, (0, 1, 3, 2, 4, 5))       # (N, Ho, Wo, kh, kw, C)
    return p.reshape(N, Ho, Wo, ksize * ksize * C)


def prepare_kernel_params(params):
    """One-time folding/packing of raw module parameters into the fused-kernel layout."""
    f32 = jnp.float32
    n_pool = 36  # 6x6 avg-pool window
    # pool + conv0 + BN0-scale folded into a single dense matrix.
    w_comb = jnp.tile(params["w0"] * params["bn0_scale"], (n_pool, 1)) / float(n_pool)
    # conv1 with BN1-scale folded, bf16, tap-major (25, 128, 768).
    w1 = (params["w1"] * params["bn1_scale"]).reshape(25, 128, -1).astype(jnp.bfloat16)
    # Concatenated head weights: [class logits | attributes].
    w_heads = jnp.concatenate([params["w_fc0"], params["w_attr"]], axis=1)
    b_heads = jnp.concatenate([params["b_fc0"], params["b_attr"]], axis=1)
    # C->Y weight zero-padded so its matmul lands directly in the packed head buffer.
    na = params["w_attr"].shape[1]
    w_cy_pad = jnp.concatenate([params["w_cy"], jnp.zeros((na, na), f32)], axis=1)
    b_cy_pad = jnp.concatenate([params["b_cy"], jnp.zeros((1, na), f32)], axis=1)
    return dict(w_comb=w_comb, shift0=params["bn0_shift"],
                w1=w1, shift1=params["bn1_shift"],
                w_heads=w_heads, b_heads=b_heads,
                w_cy_pad=w_cy_pad, b_cy_pad=b_cy_pad)


def inception_aux_forward(x_nhwc, kparams, *, num_classes, n_attributes):
    f32 = jnp.float32
    N = x_nhwc.shape[0]

    # Stage-1 patches, pre-ordered for in-kernel 5x5 consumption:
    # row (k*m2 + sp*N + n) is the avg-pool patch feeding stage-1 output pixel
    # (oh2+kh, ow2+kw) of sample n, where k=(kh,kw) is the conv1 tap and
    # sp=(oh2,ow2) the conv1 output pixel.
    P = _extract_patches(x_nhwc, ksize=6, stride=2)              # (N, 6, 6, 144)
    Ho, Wo = P.shape[1], P.shape[2]
    Ho2, Wo2 = Ho - 4, Wo - 4                                    # 5x5 VALID conv
    n_spatial = Ho2 * Wo2
    m2 = N * n_spatial
    rows = []
    for kh in range(5):
        for kw in range(5):
            blk = P[:, kh:kh + Ho2, kw:kw + Wo2, :]              # (N, Ho2, Wo2, 144)
            rows.append(jnp.transpose(blk, (1, 2, 0, 3)).reshape(m2, -1))
    p1 = jnp.concatenate(rows, axis=0)                           # (25*m2, 144) f32

    n_heads = num_classes + n_attributes
    kernel = functools.partial(fused_aux_kernel, n_batch=N, n_spatial=n_spatial,
                               num_classes=num_classes)
    out = pl.pallas_call(
        kernel,
        out_shape=jax.ShapeDtypeStruct((N, n_heads), f32),
        grid=(1,),
        in_specs=[_full_spec(p1.shape),
                  _full_spec(kparams["w_comb"].shape),
                  _full_spec(kparams["shift0"].shape),
                  _full_spec(kparams["w1"].shape),
                  _full_spec(kparams["shift1"].shape),
                  _full_spec(kparams["w_heads"].shape),
                  _full_spec(kparams["b_heads"].shape),
                  _full_spec(kparams["w_cy_pad"].shape),
                  _full_spec(kparams["b_cy_pad"].shape)],
        out_specs=_full_spec((N, n_heads)),
        compiler_params=pltpu.CompilerParams(
            dimension_semantics=("arbitrary",),
            vmem_limit_bytes=32 * 1024 * 1024),
    )(p1, kparams["w_comb"], kparams["shift0"], kparams["w1"], kparams["shift1"],
      kparams["w_heads"], kparams["b_heads"], kparams["w_cy_pad"], kparams["b_cy_pad"])

    # Packed (N, nc+na) buffer -> PyTorch-style output list (splits outside the kernel).
    out0 = out[:, :num_classes]
    return [out0] + [out[:, num_classes + i:num_classes + i + 1]
                     for i in range(n_attributes)]


# --------------------------- raw parameter init ------------------------------

def init_params(key, in_channels, num_classes, n_attributes):
    f32 = jnp.float32
    eps = 1e-3
    ks = jax.random.split(key, 13)

    def rnd(k, shape, std):
        return std * jax.random.normal(k, shape, dtype=f32)

    # conv0: 1x1 conv, in_channels -> 128 (stored (Cin, 128)); BN0 folded to scale/shift.
    w0 = rnd(ks[0], (in_channels, 128), 0.1)
    g0 = 1.0 + rnd(ks[1], (1, 128), 0.1)
    b0 = rnd(ks[2], (1, 128), 0.1)
    m0 = rnd(ks[3], (1, 128), 0.05)
    v0 = 1.0 + 0.1 * jnp.abs(jax.random.normal(ks[4], (1, 128), dtype=f32))
    bn0_scale = g0 / jnp.sqrt(v0 + eps)
    bn0_shift = b0 - m0 * bn0_scale

    # conv1: 5x5 conv, 128 -> 768 (stored (5*5*128, 768), (kh,kw,c) order), stddev=0.01.
    w1 = rnd(ks[5], (5 * 5 * 128, 768), 0.01)
    g1 = 1.0 + rnd(ks[6], (1, 768), 0.1)
    b1 = rnd(ks[7], (1, 768), 0.1)
    m1 = rnd(ks[8], (1, 768), 0.05)
    v1 = 1.0 + 0.1 * jnp.abs(jax.random.normal(ks[9], (1, 768), dtype=f32))
    bn1_scale = g1 / jnp.sqrt(v1 + eps)
    bn1_shift = b1 - m1 * bn1_scale

    # FC heads (stddev=0.001 as in module), stored (in, out); biases zero.
    w_fc0 = rnd(ks[10], (768, num_classes), 0.001)
    b_fc0 = jnp.zeros((1, num_classes), f32)
    w_attr = rnd(ks[11], (768, n_attributes), 0.001)
    b_attr = jnp.zeros((1, n_attributes), f32)
    # connect_CY head: n_attributes -> num_classes.
    w_cy = rnd(ks[12], (n_attributes, num_classes), 0.01)
    b_cy = jnp.zeros((1, num_classes), f32)

    return dict(w0=w0, bn0_scale=bn0_scale, bn0_shift=bn0_shift,
                w1=w1, bn1_scale=bn1_scale, bn1_shift=bn1_shift,
                w_fc0=w_fc0, b_fc0=b_fc0, w_attr=w_attr, b_attr=b_attr,
                w_cy=w_cy, b_cy=b_cy)


# ---------------------- plain-JAX f32 reference (unfused) --------------------

def reference_forward(x_nhwc, params, num_classes, n_attributes):
    hp = jax.lax.Precision.HIGHEST
    x = jax.lax.reduce_window(x_nhwc, 0.0, jax.lax.add,
                              (1, 6, 6, 1), (1, 2, 2, 1), "VALID") / 36.0
    h = jnp.einsum("nhwc,cd->nhwd", x, params["w0"], precision=hp)
    h = jnp.maximum(h * params["bn0_scale"] + params["bn0_shift"], 0.0)
    w1 = params["w1"].reshape(5, 5, 128, -1)                     # HWIO
    g = jax.lax.conv_general_dilated(h, w1, (1, 1), "VALID",
                                     dimension_numbers=("NHWC", "HWIO", "NHWC"),
                                     precision=hp)
    g = jnp.maximum(g * params["bn1_scale"] + params["bn1_shift"], 0.0)
    feat = g.mean(axis=(1, 2))
    out0 = jnp.dot(feat, params["w_fc0"], precision=hp) + params["b_fc0"]
    attrs = jnp.dot(feat, params["w_attr"], precision=hp) + params["b_attr"]
    out0 = out0 + jnp.dot(attrs, params["w_cy"], precision=hp) + params["b_cy"]
    return out0, attrs


if __name__ == "__main__":
    key = jax.random.PRNGKey(0)
    kx, kp = jax.random.split(key)

    N, C, Hs, Ws = 2, 4, 16, 16
    num_classes, n_attributes = 10, 4

    # PyTorch reference input is NCHW; kernel layout is NHWC.
    x_nchw = jax.random.normal(kx, (N, C, Hs, Ws), dtype=jnp.float32)
    x_nhwc = jnp.transpose(x_nchw, (0, 2, 3, 1))

    params = init_params(kp, C, num_classes, n_attributes)
    kparams = prepare_kernel_params(params)          # one-time weight folding/packing

    fwd = jax.jit(functools.partial(inception_aux_forward,
                                    num_classes=num_classes,
                                    n_attributes=n_attributes))
    outs = fwd(x_nhwc, kparams)
    outs = jax.block_until_ready(outs)

    assert outs[0].shape == (N, num_classes)
    assert all(o.shape == (N, 1) for o in outs[1:])

    # Numerical check against the unfused f32 reference (validates fusion + bf16 weights).
    ref_out0, ref_attrs = reference_forward(x_nhwc, params, num_classes, n_attributes)
    got_attrs = jnp.concatenate(outs[1:], axis=1)
    assert bool(jnp.allclose(outs[0], ref_out0, rtol=5e-2, atol=2e-4)), "class logits mismatch"
    assert bool(jnp.allclose(got_attrs, ref_attrs, rtol=5e-2, atol=2e-4)), "attr preds mismatch"

    print("KERNEL_OK")
</pallas_src>

<mosaic_0001>
module attributes {stable_mosaic.version = 11 : i64} {
  func.func @fused_aux_kernel(%arg0: i32, %arg1: memref<200x144xf32, #tpu.memory_space<vmem>>, %arg2: memref<144x128xf32, #tpu.memory_space<vmem>>, %arg3: memref<1x128xf32, #tpu.memory_space<vmem>>, %arg4: memref<25x128x768xbf16, #tpu.memory_space<vmem>>, %arg5: memref<1x768xf32, #tpu.memory_space<vmem>>, %arg6: memref<768x14xf32, #tpu.memory_space<vmem>>, %arg7: memref<1x14xf32, #tpu.memory_space<vmem>>, %arg8: memref<4x14xf32, #tpu.memory_space<vmem>>, %arg9: memref<1x14xf32, #tpu.memory_space<vmem>>, %arg10: memref<2x14xf32, #tpu.memory_space<vmem>>) attributes {dimension_semantics = [#tpu.dimension_semantics<arbitrary>], iteration_bounds = array<i64: 1>, scalar_prefetch = 0 : i64, scratch_operands = 0 : i64, tpu.core_type = #tpu.core_type<tc>, window_params = [{pipeline_mode = #tpu.pipeline_mode<synchronous>, transform_indices = @transform_0, window_bounds = array<i64: 200, 144>}, {pipeline_mode = #tpu.pipeline_mode<synchronous>, transform_indices = @transform_1, window_bounds = array<i64: 144, 128>}, {pipeline_mode = #tpu.pipeline_mode<synchronous>, transform_indices = @transform_2, window_bounds = array<i64: 1, 128>}, {pipeline_mode = #tpu.pipeline_mode<synchronous>, transform_indices = @transform_3, window_bounds = array<i64: 25, 128, 768>}, {pipeline_mode = #tpu.pipeline_mode<synchronous>, transform_indices = @transform_4, window_bounds = array<i64: 1, 768>}, {pipeline_mode = #tpu.pipeline_mode<synchronous>, transform_indices = @transform_5, window_bounds = array<i64: 768, 14>}, {pipeline_mode = #tpu.pipeline_mode<synchronous>, transform_indices = @transform_6, window_bounds = array<i64: 1, 14>}, {pipeline_mode = #tpu.pipeline_mode<synchronous>, transform_indices = @transform_7, window_bounds = array<i64: 4, 14>}, {pipeline_mode = #tpu.pipeline_mode<synchronous>, transform_indices = @transform_8, window_bounds = array<i64: 1, 14>}, {pipeline_mode = #tpu.pipeline_mode<synchronous>, transform_indices = @transform_9, window_bounds = array<i64: 2, 14>}]} {
    %c0 = arith.constant 0 : index
    %c0_0 = arith.constant 0 : index
    %0 = vector.load %arg1[%c0, %c0_0] : memref<200x144xf32, #tpu.memory_space<vmem>>, vector<200x144xf32>
    %c0_1 = arith.constant 0 : index
    %c0_2 = arith.constant 0 : index
    %1 = vector.load %arg2[%c0_1, %c0_2] : memref<144x128xf32, #tpu.memory_space<vmem>>, vector<144x128xf32>
    %cst = arith.constant dense<0.000000e+00> : vector<200x128xf32>
    %2 = tpu.matmul %0, %1, %cst {dimension_numbers = #tpu.dot_dimension_numbers<[1], [0], [0], [1], [0, 0, 1, 1], [], []>} : vector<200x144xf32>, vector<144x128xf32>, vector<200x128xf32> -> vector<200x128xf32>
    %c0_3 = arith.constant 0 : index
    %c0_4 = arith.constant 0 : index
    %3 = vector.load %arg3[%c0_3, %c0_4] : memref<1x128xf32, #tpu.memory_space<vmem>>, vector<1x128xf32>
    %4 = vector.broadcast %3 : vector<1x128xf32> to vector<200x128xf32>
    %5 = arith.addf %2, %4 : vector<200x128xf32>
    %cst_5 = arith.constant 0.000000e+00 : f32
    %6 = vector.broadcast %cst_5 : f32 to vector<200x128xf32>
    %7 = arith.maximumf %5, %6 : vector<200x128xf32>
    %cst_6 = arith.constant 0.000000e+00 : f32
    %8 = vector.broadcast %cst_6 : f32 to vector<8x768xf32>
    %9 = vector.extract_strided_slice %7 {offsets = [0, 0], sizes = [8, 128], strides = [1, 1]} : vector<200x128xf32> to vector<8x128xf32>
    %10 = arith.truncf %9 : vector<8x128xf32> to vector<8x128xbf16>
    %c0_7 = arith.constant 0 : index
    %c0_8 = arith.constant 0 : index
    %c0_9 = arith.constant 0 : index
    %11 = vector.load %arg4[%c0_7, %c0_8, %c0_9] : memref<25x128x768xbf16, #tpu.memory_space<vmem>>, vector<1x128x768xbf16>
    %12 = vector.shape_cast %11 : vector<1x128x768xbf16> to vector<128x768xbf16>
    %cst_10 = arith.constant dense<0.000000e+00> : vector<8x768xf32>
    %13 = tpu.matmul %10, %12, %cst_10 {dimension_numbers = #tpu.dot_dimension_numbers<[1], [0], [0], [1], [0, 0, 1, 1], [], []>} : vector<8x128xbf16>, vector<128x768xbf16>, vector<8x768xf32> -> vector<8x768xf32>
    %14 = arith.addf %8, %13 : vector<8x768xf32>
    %15 = vector.extract_strided_slice %7 {offsets = [8, 0], sizes = [8, 128], strides = [1, 1]} : vector<200x128xf32> to vector<8x128xf32>
    %16 = arith.truncf %15 : vector<8x128xf32> to vector<8x128xbf16>
    %c1 = arith.constant 1 : index
    %c0_11 = arith.constant 0 : index
    %c0_12 = arith.constant 0 : index
    %17 = vector.load %arg4[%c1, %c0_11, %c0_12] : memref<25x128x768xbf16, #tpu.memory_space<vmem>>, vector<1x128x768xbf16>
    %18 = vector.shape_cast %17 : vector<1x128x768xbf16> to vector<128x768xbf16>
    %cst_13 = arith.constant dense<0.000000e+00> : vector<8x768xf32>
    %19 = tpu.matmul %16, %18, %cst_13 {dimension_numbers = #tpu.dot_dimension_numbers<[1], [0], [0], [1], [0, 0, 1, 1], [], []>} : vector<8x128xbf16>, vector<128x768xbf16>, vector<8x768xf32> -> vector<8x768xf32>
    %20 = arith.addf %14, %19 : vector<8x768xf32>
    %21 = vector.extract_strided_slice %7 {offsets = [16, 0], sizes = [8, 128], strides = [1, 1]} : vector<200x128xf32> to vector<8x128xf32>
    %22 = arith.truncf %21 : vector<8x128xf32> to vector<8x128xbf16>
    %c2 = arith.constant 2 : index
    %c0_14 = arith.constant 0 : index
    %c0_15 = arith.constant 0 : index
    %23 = vector.load %arg4[%c2, %c0_14, %c0_15] : memref<25x128x768xbf16, #tpu.memory_space<vmem>>, vector<1x128x768xbf16>
    %24 = vector.shape_cast %23 : vector<1x128x768xbf16> to vector<128x768xbf16>
    %cst_16 = arith.constant dense<0.000000e+00> : vector<8x768xf32>
    %25 = tpu.matmul %22, %24, %cst_16 {dimension_numbers = #tpu.dot_dimension_numbers<[1], [0], [0], [1], [0, 0, 1, 1], [], []>} : vector<8x128xbf16>, vector<128x768xbf16>, vector<8x768xf32> -> vector<8x768xf32>
    %26 = arith.addf %20, %25 : vector<8x768xf32>
    %27 = vector.extract_strided_slice %7 {offsets = [24, 0], sizes = [8, 128], strides = [1, 1]} : vector<200x128xf32> to vector<8x128xf32>
    %28 = arith.truncf %27 : vector<8x128xf32> to vector<8x128xbf16>
    %c3 = arith.constant 3 : index
    %c0_17 = arith.constant 0 : index
    %c0_18 = arith.constant 0 : index
    %29 = vector.load %arg4[%c3, %c0_17, %c0_18] : memref<25x128x768xbf16, #tpu.memory_space<vmem>>, vector<1x128x768xbf16>
    %30 = vector.shape_cast %29 : vector<1x128x768xbf16> to vector<128x768xbf16>
    %cst_19 = arith.constant dense<0.000000e+00> : vector<8x768xf32>
    %31 = tpu.matmul %28, %30, %cst_19 {dimension_numbers = #tpu.dot_dimension_numbers<[1], [0], [0], [1], [0, 0, 1, 1], [], []>} : vector<8x128xbf16>, vector<128x768xbf16>, vector<8x768xf32> -> vector<8x768xf32>
    %32 = arith.addf %26, %31 : vector<8x768xf32>
    %33 = vector.extract_strided_slice %7 {offsets = [32, 0], sizes = [8, 128], strides = [1, 1]} : vector<200x128xf32> to vector<8x128xf32>
    %34 = arith.truncf %33 : vector<8x128xf32> to vector<8x128xbf16>
    %c4 = arith.constant 4 : index
    %c0_20 = arith.constant 0 : index
    %c0_21 = arith.constant 0 : index
    %35 = vector.load %arg4[%c4, %c0_20, %c0_21] : memref<25x128x768xbf16, #tpu.memory_space<vmem>>, vector<1x128x768xbf16>
    %36 = vector.shape_cast %35 : vector<1x128x768xbf16> to vector<128x768xbf16>
    %cst_22 = arith.constant dense<0.000000e+00> : vector<8x768xf32>
    %37 = tpu.matmul %34, %36, %cst_22 {dimension_numbers = #tpu.dot_dimension_numbers<[1], [0], [0], [1], [0, 0, 1, 1], [], []>} : vector<8x128xbf16>, vector<128x768xbf16>, vector<8x768xf32> -> vector<8x768xf32>
    %38 = arith.addf %32, %37 : vector<8x768xf32>
    %39 = vector.extract_strided_slice %7 {offsets = [40, 0], sizes = [8, 128], strides = [1, 1]} : vector<200x128xf32> to vector<8x128xf32>
    %40 = arith.truncf %39 : vector<8x128xf32> to vector<8x128xbf16>
    %c5 = arith.constant 5 : index
    %c0_23 = arith.constant 0 : index
    %c0_24 = arith.constant 0 : index
    %41 = vector.load %arg4[%c5, %c0_23, %c0_24] : memref<25x128x768xbf16, #tpu.memory_space<vmem>>, vector<1x128x768xbf16>
    %42 = vector.shape_cast %41 : vector<1x128x768xbf16> to vector<128x768xbf16>
    %cst_25 = arith.constant dense<0.000000e+00> : vector<8x768xf32>
    %43 = tpu.matmul %40, %42, %cst_25 {dimension_numbers = #tpu.dot_dimension_numbers<[1], [0], [0], [1], [0, 0, 1, 1], [], []>} : vector<8x128xbf16>, vector<128x768xbf16>, vector<8x768xf32> -> vector<8x768xf32>
    %44 = arith.addf %38, %43 : vector<8x768xf32>
    %45 = vector.extract_strided_slice %7 {offsets = [48, 0], sizes = [8, 128], strides = [1, 1]} : vector<200x128xf32> to vector<8x128xf32>
    %46 = arith.truncf %45 : vector<8x128xf32> to vector<8x128xbf16>
    %c6 = arith.constant 6 : index
    %c0_26 = arith.constant 0 : index
    %c0_27 = arith.constant 0 : index
    %47 = vector.load %arg4[%c6, %c0_26, %c0_27] : memref<25x128x768xbf16, #tpu.memory_space<vmem>>, vector<1x128x768xbf16>
    %48 = vector.shape_cast %47 : vector<1x128x768xbf16> to vector<128x768xbf16>
    %cst_28 = arith.constant dense<0.000000e+00> : vector<8x768xf32>
    %49 = tpu.matmul %46, %48, %cst_28 {dimension_numbers = #tpu.dot_dimension_numbers<[1], [0], [0], [1], [0, 0, 1, 1], [], []>} : vector<8x128xbf16>, vector<128x768xbf16>, vector<8x768xf32> -> vector<8x768xf32>
    %50 = arith.addf %44, %49 : vector<8x768xf32>
    %51 = vector.extract_strided_slice %7 {offsets = [56, 0], sizes = [8, 128], strides = [1, 1]} : vector<200x128xf32> to vector<8x128xf32>
    %52 = arith.truncf %51 : vector<8x128xf32> to vector<8x128xbf16>
    %c7 = arith.constant 7 : index
    %c0_29 = arith.constant 0 : index
    %c0_30 = arith.constant 0 : index
    %53 = vector.load %arg4[%c7, %c0_29, %c0_30] : memref<25x128x768xbf16, #tpu.memory_space<vmem>>, vector<1x128x768xbf16>
    %54 = vector.shape_cast %53 : vector<1x128x768xbf16> to vector<128x768xbf16>
    %cst_31 = arith.constant dense<0.000000e+00> : vector<8x768xf32>
    %55 = tpu.matmul %52, %54, %cst_31 {dimension_numbers = #tpu.dot_dimension_numbers<[1], [0], [0], [1], [0, 0, 1, 1], [], []>} : vector<8x128xbf16>, vector<128x768xbf16>, vector<8x768xf32> -> vector<8x768xf32>
    %56 = arith.addf %50, %55 : vector<8x768xf32>
    %57 = vector.extract_strided_slice %7 {offsets = [64, 0], sizes = [8, 128], strides = [1, 1]} : vector<200x128xf32> to vector<8x128xf32>
    %58 = arith.truncf %57 : vector<8x128xf32> to vector<8x128xbf16>
    %c8 = arith.constant 8 : index
    %c0_32 = arith.constant 0 : index
    %c0_33 = arith.constant 0 : index
    %59 = vector.load %arg4[%c8, %c0_32, %c0_33] : memref<25x128x768xbf16, #tpu.memory_space<vmem>>, vector<1x128x768xbf16>
    %60 = vector.shape_cast %59 : vector<1x128x768xbf16> to vector<128x768xbf16>
    %cst_34 = arith.constant dense<0.000000e+00> : vector<8x768xf32>
    %61 = tpu.matmul %58, %60, %cst_34 {dimension_numbers = #tpu.dot_dimension_numbers<[1], [0], [0], [1], [0, 0, 1, 1], [], []>} : vector<8x128xbf16>, vector<128x768xbf16>, vector<8x768xf32> -> vector<8x768xf32>
    %62 = arith.addf %56, %61 : vector<8x768xf32>
    %63 = vector.extract_strided_slice %7 {offsets = [72, 0], sizes = [8, 128], strides = [1, 1]} : vector<200x128xf32> to vector<8x128xf32>
    %64 = arith.truncf %63 : vector<8x128xf32> to vector<8x128xbf16>
    %c9 = arith.constant 9 : index
    %c0_35 = arith.constant 0 : index
    %c0_36 = arith.constant 0 : index
    %65 = vector.load %arg4[%c9, %c0_35, %c0_36] : memref<25x128x768xbf16, #tpu.memory_space<vmem>>, vector<1x128x768xbf16>
    %66 = vector.shape_cast %65 : vector<1x128x768xbf16> to vector<128x768xbf16>
    %cst_37 = arith.constant dense<0.000000e+00> : vector<8x768xf32>
    %67 = tpu.matmul %64, %66, %cst_37 {dimension_numbers = #tpu.dot_dimension_numbers<[1], [0], [0], [1], [0, 0, 1, 1], [], []>} : vector<8x128xbf16>, vector<128x768xbf16>, vector<8x768xf32> -> vector<8x768xf32>
    %68 = arith.addf %62, %67 : vector<8x768xf32>
    %69 = vector.extract_strided_slice %7 {offsets = [80, 0], sizes = [8, 128], strides = [1, 1]} : vector<200x128xf32> to vector<8x128xf32>
    %70 = arith.truncf %69 : vector<8x128xf32> to vector<8x128xbf16>
    %c10 = arith.constant 10 : index
    %c0_38 = arith.constant 0 : index
    %c0_39 = arith.constant 0 : index
    %71 = vector.load %arg4[%c10, %c0_38, %c0_39] : memref<25x128x768xbf16, #tpu.memory_space<vmem>>, vector<1x128x768xbf16>
    %72 = vector.shape_cast %71 : vector<1x128x768xbf16> to vector<128x768xbf16>
    %cst_40 = arith.constant dense<0.000000e+00> : vector<8x768xf32>
    %73 = tpu.matmul %70, %72, %cst_40 {dimension_numbers = #tpu.dot_dimension_numbers<[1], [0], [0], [1], [0, 0, 1, 1], [], []>} : vector<8x128xbf16>, vector<128x768xbf16>, vector<8x768xf32> -> vector<8x768xf32>
    %74 = arith.addf %68, %73 : vector<8x768xf32>
    %75 = vector.extract_strided_slice %7 {offsets = [88, 0], sizes = [8, 128], strides = [1, 1]} : vector<200x128xf32> to vector<8x128xf32>
    %76 = arith.truncf %75 : vector<8x128xf32> to vector<8x128xbf16>
    %c11 = arith.constant 11 : index
    %c0_41 = arith.constant 0 : index
    %c0_42 = arith.constant 0 : index
    %77 = vector.load %arg4[%c11, %c0_41, %c0_42] : memref<25x128x768xbf16, #tpu.memory_space<vmem>>, vector<1x128x768xbf16>
    %78 = vector.shape_cast %77 : vector<1x128x768xbf16> to vector<128x768xbf16>
    %cst_43 = arith.constant dense<0.000000e+00> : vector<8x768xf32>
    %79 = tpu.matmul %76, %78, %cst_43 {dimension_numbers = #tpu.dot_dimension_numbers<[1], [0], [0], [1], [0, 0, 1, 1], [], []>} : vector<8x128xbf16>, vector<128x768xbf16>, vector<8x768xf32> -> vector<8x768xf32>
    %80 = arith.addf %74, %79 : vector<8x768xf32>
    %81 = vector.extract_strided_slice %7 {offsets = [96, 0], sizes = [8, 128], strides = [1, 1]} : vector<200x128xf32> to vector<8x128xf32>
    %82 = arith.truncf %81 : vector<8x128xf32> to vector<8x128xbf16>
    %c12 = arith.constant 12 : index
    %c0_44 = arith.constant 0 : index
    %c0_45 = arith.constant 0 : index
    %83 = vector.load %arg4[%c12, %c0_44, %c0_45] : memref<25x128x768xbf16, #tpu.memory_space<vmem>>, vector<1x128x768xbf16>
    %84 = vector.shape_cast %83 : vector<1x128x768xbf16> to vector<128x768xbf16>
    %cst_46 = arith.constant dense<0.000000e+00> : vector<8x768xf32>
    %85 = tpu.matmul %82, %84, %cst_46 {dimension_numbers = #tpu.dot_dimension_numbers<[1], [0], [0], [1], [0, 0, 1, 1], [], []>} : vector<8x128xbf16>, vector<128x768xbf16>, vector<8x768xf32> -> vector<8x768xf32>
    %86 = arith.addf %80, %85 : vector<8x768xf32>
    %87 = vector.extract_strided_slice %7 {offsets = [104, 0], sizes = [8, 128], strides = [1, 1]} : vector<200x128xf32> to vector<8x128xf32>
    %88 = arith.truncf %87 : vector<8x128xf32> to vector<8x128xbf16>
    %c13 = arith.constant 13 : index
    %c0_47 = arith.constant 0 : index
    %c0_48 = arith.constant 0 : index
    %89 = vector.load %arg4[%c13, %c0_47, %c0_48] : memref<25x128x768xbf16, #tpu.memory_space<vmem>>, vector<1x128x768xbf16>
    %90 = vector.shape_cast %89 : vector<1x128x768xbf16> to vector<128x768xbf16>
    %cst_49 = arith.constant dense<0.000000e+00> : vector<8x768xf32>
    %91 = tpu.matmul %88, %90, %cst_49 {dimension_numbers = #tpu.dot_dimension_numbers<[1], [0], [0], [1], [0, 0, 1, 1], [], []>} : vector<8x128xbf16>, vector<128x768xbf16>, vector<8x768xf32> -> vector<8x768xf32>
    %92 = arith.addf %86, %91 : vector<8x768xf32>
    %93 = vector.extract_strided_slice %7 {offsets = [112, 0], sizes = [8, 128], strides = [1, 1]} : vector<200x128xf32> to vector<8x128xf32>
    %94 = arith.truncf %93 : vector<8x128xf32> to vector<8x128xbf16>
    %c14 = arith.constant 14 : index
    %c0_50 = arith.constant 0 : index
    %c0_51 = arith.constant 0 : index
    %95 = vector.load %arg4[%c14, %c0_50, %c0_51] : memref<25x128x768xbf16, #tpu.memory_space<vmem>>, vector<1x128x768xbf16>
    %96 = vector.shape_cast %95 : vector<1x128x768xbf16> to vector<128x768xbf16>
    %cst_52 = arith.constant dense<0.000000e+00> : vector<8x768xf32>
    %97 = tpu.matmul %94, %96, %cst_52 {dimension_numbers = #tpu.dot_dimension_numbers<[1], [0], [0], [1], [0, 0, 1, 1], [], []>} : vector<8x128xbf16>, vector<128x768xbf16>, vector<8x768xf32> -> vector<8x768xf32>
    %98 = arith.addf %92, %97 : vector<8x768xf32>
    %99 = vector.extract_strided_slice %7 {offsets = [120, 0], sizes = [8, 128], strides = [1, 1]} : vector<200x128xf32> to vector<8x128xf32>
    %100 = arith.truncf %99 : vector<8x128xf32> to vector<8x128xbf16>
    %c15 = arith.constant 15 : index
    %c0_53 = arith.constant 0 : index
    %c0_54 = arith.constant 0 : index
    %101 = vector.load %arg4[%c15, %c0_53, %c0_54] : memref<25x128x768xbf16, #tpu.memory_space<vmem>>, vector<1x128x768xbf16>
    %102 = vector.shape_cast %101 : vector<1x128x768xbf16> to vector<128x768xbf16>
    %cst_55 = arith.constant dense<0.000000e+00> : vector<8x768xf32>
    %103 = tpu.matmul %100, %102, %cst_55 {dimension_numbers = #tpu.dot_dimension_numbers<[1], [0], [0], [1], [0, 0, 1, 1], [], []>} : vector<8x128xbf16>, vector<128x768xbf16>, vector<8x768xf32> -> vector<8x768xf32>
    %104 = arith.addf %98, %103 : vector<8x768xf32>
    %105 = vector.extract_strided_slice %7 {offsets = [128, 0], sizes = [8, 128], strides = [1, 1]} : vector<200x128xf32> to vector<8x128xf32>
    %106 = arith.truncf %105 : vector<8x128xf32> to vector<8x128xbf16>
    %c16 = arith.constant 16 : index
    %c0_56 = arith.constant 0 : index
    %c0_57 = arith.constant 0 : index
    %107 = vector.load %arg4[%c16, %c0_56, %c0_57] : memref<25x128x768xbf16, #tpu.memory_space<vmem>>, vector<1x128x768xbf16>
    %108 = vector.shape_cast %107 : vector<1x128x768xbf16> to vector<128x768xbf16>
    %cst_58 = arith.constant dense<0.000000e+00> : vector<8x768xf32>
    %109 = tpu.matmul %106, %108, %cst_58 {dimension_numbers = #tpu.dot_dimension_numbers<[1], [0], [0], [1], [0, 0, 1, 1], [], []>} : vector<8x128xbf16>, vector<128x768xbf16>, vector<8x768xf32> -> vector<8x768xf32>
    %110 = arith.addf %104, %109 : vector<8x768xf32>
    %111 = vector.extract_strided_slice %7 {offsets = [136, 0], sizes = [8, 128], strides = [1, 1]} : vector<200x128xf32> to vector<8x128xf32>
    %112 = arith.truncf %111 : vector<8x128xf32> to vector<8x128xbf16>
    %c17 = arith.constant 17 : index
    %c0_59 = arith.constant 0 : index
    %c0_60 = arith.constant 0 : index
    %113 = vector.load %arg4[%c17, %c0_59, %c0_60] : memref<25x128x768xbf16, #tpu.memory_space<vmem>>, vector<1x128x768xbf16>
    %114 = vector.shape_cast %113 : vector<1x128x768xbf16> to vector<128x768xbf16>
    %cst_61 = arith.constant dense<0.000000e+00> : vector<8x768xf32>
    %115 = tpu.matmul %112, %114, %cst_61 {dimension_numbers = #tpu.dot_dimension_numbers<[1], [0], [0], [1], [0, 0, 1, 1], [], []>} : vector<8x128xbf16>, vector<128x768xbf16>, vector<8x768xf32> -> vector<8x768xf32>
    %116 = arith.addf %110, %115 : vector<8x768xf32>
    %117 = vector.extract_strided_slice %7 {offsets = [144, 0], sizes = [8, 128], strides = [1, 1]} : vector<200x128xf32> to vector<8x128xf32>
    %118 = arith.truncf %117 : vector<8x128xf32> to vector<8x128xbf16>
    %c18 = arith.constant 18 : index
    %c0_62 = arith.constant 0 : index
    %c0_63 = arith.constant 0 : index
    %119 = vector.load %arg4[%c18, %c0_62, %c0_63] : memref<25x128x768xbf16, #tpu.memory_space<vmem>>, vector<1x128x768xbf16>
    %120 = vector.shape_cast %119 : vector<1x128x768xbf16> to vector<128x768xbf16>
    %cst_64 = arith.constant dense<0.000000e+00> : vector<8x768xf32>
    %121 = tpu.matmul %118, %120, %cst_64 {dimension_numbers = #tpu.dot_dimension_numbers<[1], [0], [0], [1], [0, 0, 1, 1], [], []>} : vector<8x128xbf16>, vector<128x768xbf16>, vector<8x768xf32> -> vector<8x768xf32>
    %122 = arith.addf %116, %121 : vector<8x768xf32>
    %123 = vector.extract_strided_slice %7 {offsets = [152, 0], sizes = [8, 128], strides = [1, 1]} : vector<200x128xf32> to vector<8x128xf32>
    %124 = arith.truncf %123 : vector<8x128xf32> to vector<8x128xbf16>
    %c19 = arith.constant 19 : index
    %c0_65 = arith.constant 0 : index
    %c0_66 = arith.constant 0 : index
    %125 = vector.load %arg4[%c19, %c0_65, %c0_66] : memref<25x128x768xbf16, #tpu.memory_space<vmem>>, vector<1x128x768xbf16>
    %126 = vector.shape_cast %125 : vector<1x128x768xbf16> to vector<128x768xbf16>
    %cst_67 = arith.constant dense<0.000000e+00> : vector<8x768xf32>
    %127 = tpu.matmul %124, %126, %cst_67 {dimension_numbers = #tpu.dot_dimension_numbers<[1], [0], [0], [1], [0, 0, 1, 1], [], []>} : vector<8x128xbf16>, vector<128x768xbf16>, vector<8x768xf32> -> vector<8x768xf32>
    %128 = arith.addf %122, %127 : vector<8x768xf32>
    %129 = vector.extract_strided_slice %7 {offsets = [160, 0], sizes = [8, 128], strides = [1, 1]} : vector<200x128xf32> to vector<8x128xf32>
    %130 = arith.truncf %129 : vector<8x128xf32> to vector<8x128xbf16>
    %c20 = arith.constant 20 : index
    %c0_68 = arith.constant 0 : index
    %c0_69 = arith.constant 0 : index
    %131 = vector.load %arg4[%c20, %c0_68, %c0_69] : memref<25x128x768xbf16, #tpu.memory_space<vmem>>, vector<1x128x768xbf16>
    %132 = vector.shape_cast %131 : vector<1x128x768xbf16> to vector<128x768xbf16>
    %cst_70 = arith.constant dense<0.000000e+00> : vector<8x768xf32>
    %133 = tpu.matmul %130, %132, %cst_70 {dimension_numbers = #tpu.dot_dimension_numbers<[1], [0], [0], [1], [0, 0, 1, 1], [], []>} : vector<8x128xbf16>, vector<128x768xbf16>, vector<8x768xf32> -> vector<8x768xf32>
    %134 = arith.addf %128, %133 : vector<8x768xf32>
    %135 = vector.extract_strided_slice %7 {offsets = [168, 0], sizes = [8, 128], strides = [1, 1]} : vector<200x128xf32> to vector<8x128xf32>
    %136 = arith.truncf %135 : vector<8x128xf32> to vector<8x128xbf16>
    %c21 = arith.constant 21 : index
    %c0_71 = arith.constant 0 : index
    %c0_72 = arith.constant 0 : index
    %137 = vector.load %arg4[%c21, %c0_71, %c0_72] : memref<25x128x768xbf16, #tpu.memory_space<vmem>>, vector<1x128x768xbf16>
    %138 = vector.shape_cast %137 : vector<1x128x768xbf16> to vector<128x768xbf16>
    %cst_73 = arith.constant dense<0.000000e+00> : vector<8x768xf32>
    %139 = tpu.matmul %136, %138, %cst_73 {dimension_numbers = #tpu.dot_dimension_numbers<[1], [0], [0], [1], [0, 0, 1, 1], [], []>} : vector<8x128xbf16>, vector<128x768xbf16>, vector<8x768xf32> -> vector<8x768xf32>
    %140 = arith.addf %134, %139 : vector<8x768xf32>
    %141 = vector.extract_strided_slice %7 {offsets = [176, 0], sizes = [8, 128], strides = [1, 1]} : vector<200x128xf32> to vector<8x128xf32>
    %142 = arith.truncf %141 : vector<8x128xf32> to vector<8x128xbf16>
    %c22 = arith.constant 22 : index
    %c0_74 = arith.constant 0 : index
    %c0_75 = arith.constant 0 : index
    %143 = vector.load %arg4[%c22, %c0_74, %c0_75] : memref<25x128x768xbf16, #tpu.memory_space<vmem>>, vector<1x128x768xbf16>
    %144 = vector.shape_cast %143 : vector<1x128x768xbf16> to vector<128x768xbf16>
    %cst_76 = arith.constant dense<0.000000e+00> : vector<8x768xf32>
    %145 = tpu.matmul %142, %144, %cst_76 {dimension_numbers = #tpu.dot_dimension_numbers<[1], [0], [0], [1], [0, 0, 1, 1], [], []>} : vector<8x128xbf16>, vector<128x768xbf16>, vector<8x768xf32> -> vector<8x768xf32>
    %146 = arith.addf %140, %145 : vector<8x768xf32>
    %147 = vector.extract_strided_slice %7 {offsets = [184, 0], sizes = [8, 128], strides = [1, 1]} : vector<200x128xf32> to vector<8x128xf32>
    %148 = arith.truncf %147 : vector<8x128xf32> to vector<8x128xbf16>
    %c23 = arith.constant 23 : index
    %c0_77 = arith.constant 0 : index
    %c0_78 = arith.constant 0 : index
    %149 = vector.load %arg4[%c23, %c0_77, %c0_78] : memref<25x128x768xbf16, #tpu.memory_space<vmem>>, vector<1x128x768xbf16>
    %150 = vector.shape_cast %149 : vector<1x128x768xbf16> to vector<128x768xbf16>
    %cst_79 = arith.constant dense<0.000000e+00> : vector<8x768xf32>
    %151 = tpu.matmul %148, %150, %cst_79 {dimension_numbers = #tpu.dot_dimension_numbers<[1], [0], [0], [1], [0, 0, 1, 1], [], []>} : vector<8x128xbf16>, vector<128x768xbf16>, vector<8x768xf32> -> vector<8x768xf32>
    %152 = arith.addf %146, %151 : vector<8x768xf32>
    %153 = vector.extract_strided_slice %7 {offsets = [192, 0], sizes = [8, 128], strides = [1, 1]} : vector<200x128xf32> to vector<8x128xf32>
    %154 = arith.truncf %153 : vector<8x128xf32> to vector<8x128xbf16>
    %c24 = arith.constant 24 : index
    %c0_80 = arith.constant 0 : index
    %c0_81 = arith.constant 0 : index
    %155 = vector.load %arg4[%c24, %c0_80, %c0_81] : memref<25x128x768xbf16, #tpu.memory_space<vmem>>, vector<1x128x768xbf16>
    %156 = vector.shape_cast %155 : vector<1x128x768xbf16> to vector<128x768xbf16>
    %cst_82 = arith.constant dense<0.000000e+00> : vector<8x768xf32>
    %157 = tpu.matmul %154, %156, %cst_82 {dimension_numbers = #tpu.dot_dimension_numbers<[1], [0], [0], [1], [0, 0, 1, 1], [], []>} : vector<8x128xbf16>, vector<128x768xbf16>, vector<8x768xf32> -> vector<8x768xf32>
    %158 = arith.addf %152, %157 : vector<8x768xf32>
    %c0_83 = arith.constant 0 : index
    %c0_84 = arith.constant 0 : index
    %159 = vector.load %arg5[%c0_83, %c0_84] : memref<1x768xf32, #tpu.memory_space<vmem>>, vector<1x768xf32>
    %160 = vector.broadcast %159 : vector<1x768xf32> to vector<8x768xf32>
    %161 = arith.addf %158, %160 : vector<8x768xf32>
    %cst_85 = arith.constant 0.000000e+00 : f32
    %162 = vector.broadcast %cst_85 : f32 to vector<8x768xf32>
    %163 = arith.maximumf %161, %162 : vector<8x768xf32>
    %164 = vector.extract_strided_slice %163 {offsets = [0, 0], sizes = [2, 768], strides = [1, 1]} : vector<8x768xf32> to vector<2x768xf32>
    %165 = vector.extract_strided_slice %163 {offsets = [2, 0], sizes = [2, 768], strides = [1, 1]} : vector<8x768xf32> to vector<2x768xf32>
    %166 = arith.addf %164, %165 : vector<2x768xf32>
    %167 = vector.extract_strided_slice %163 {offsets = [4, 0], sizes = [2, 768], strides = [1, 1]} : vector<8x768xf32> to vector<2x768xf32>
    %168 = arith.addf %166, %167 : vector<2x768xf32>
    %169 = vector.extract_strided_slice %163 {offsets = [6, 0], sizes = [2, 768], strides = [1, 1]} : vector<8x768xf32> to vector<2x768xf32>
    %170 = arith.addf %168, %169 : vector<2x768xf32>
    %cst_86 = arith.constant 2.500000e-01 : f32
    %171 = vector.broadcast %cst_86 : f32 to vector<2x768xf32>
    %172 = arith.mulf %170, %171 : vector<2x768xf32>
    %c0_87 = arith.constant 0 : index
    %c0_88 = arith.constant 0 : index
    %173 = vector.load %arg6[%c0_87, %c0_88] : memref<768x14xf32, #tpu.memory_space<vmem>>, vector<768x14xf32>
    %cst_89 = arith.constant dense<0.000000e+00> : vector<2x14xf32>
    %174 = tpu.matmul %172, %173, %cst_89 {dimension_numbers = #tpu.dot_dimension_numbers<[1], [0], [0], [1], [0, 0, 1, 1], [], []>} : vector<2x768xf32>, vector<768x14xf32>, vector<2x14xf32> -> vector<2x14xf32>
    %c0_90 = arith.constant 0 : index
    %c0_91 = arith.constant 0 : index
    %175 = vector.load %arg7[%c0_90, %c0_91] : memref<1x14xf32, #tpu.memory_space<vmem>>, vector<1x14xf32>
    %176 = vector.broadcast %175 : vector<1x14xf32> to vector<2x14xf32>
    %177 = arith.addf %174, %176 : vector<2x14xf32>
    %178 = vector.extract_strided_slice %177 {offsets = [0, 10], sizes = [2, 4], strides = [1, 1]} : vector<2x14xf32> to vector<2x4xf32>
    %c0_92 = arith.constant 0 : index
    %c0_93 = arith.constant 0 : index
    %179 = vector.load %arg8[%c0_92, %c0_93] : memref<4x14xf32, #tpu.memory_space<vmem>>, vector<4x14xf32>
    %cst_94 = arith.constant dense<0.000000e+00> : vector<2x14xf32>
    %180 = tpu.matmul %178, %179, %cst_94 {dimension_numbers = #tpu.dot_dimension_numbers<[1], [0], [0], [1], [0, 0, 1, 1], [], []>} : vector<2x4xf32>, vector<4x14xf32>, vector<2x14xf32> -> vector<2x14xf32>
    %c0_95 = arith.constant 0 : index
    %c0_96 = arith.constant 0 : index
    %181 = vector.load %arg9[%c0_95, %c0_96] : memref<1x14xf32, #tpu.memory_space<vmem>>, vector<1x14xf32>
    %182 = vector.broadcast %181 : vector<1x14xf32> to vector<2x14xf32>
    %183 = arith.addf %180, %182 : vector<2x14xf32>
    %184 = arith.addf %177, %183 : vector<2x14xf32>
    %c0_97 = arith.constant 0 : index
    %c0_98 = arith.constant 0 : index
    %185 = vector.load %arg10[%c0_97, %c0_98] : memref<2x14xf32, #tpu.memory_space<vmem>>, vector<2x14xf32>
    tpu.vector_store %arg10[%c0_97, %c0_98], %184 {strides = array<i32>} : memref<2x14xf32, #tpu.memory_space<vmem>>, vector<2x14xf32>,
    return
  }
  func.func @transform_0(%arg0: i32) -> (i32, i32) {
    %c0_i32 = arith.constant 0 : i32
    %c0_i32_0 = arith.constant 0 : i32
    %c0_i32_1 = arith.constant 0 : i32
    return %c0_i32, %c0_i32_0 : i32, i32
  }
  func.func @transform_1(%arg0: i32) -> (i32, i32) {
    %c0_i32 = arith.constant 0 : i32
    %c0_i32_0 = arith.constant 0 : i32
    %c0_i32_1 = arith.constant 0 : i32
    return %c0_i32, %c0_i32_0 : i32, i32
  }
  func.func @transform_2(%arg0: i32) -> (i32, i32) {
    %c0_i32 = arith.constant 0 : i32
    %c0_i32_0 = arith.constant 0 : i32
    %c0_i32_1 = arith.constant 0 : i32
    return %c0_i32, %c0_i32_0 : i32, i32
  }
  func.func @transform_3(%arg0: i32) -> (i32, i32, i32) {
    %c0_i32 = arith.constant 0 : i32
    %c0_i32_0 = arith.constant 0 : i32
    %c0_i32_1 = arith.constant 0 : i32
    %c0_i32_2 = arith.constant 0 : i32
    return %c0_i32, %c0_i32_0, %c0_i32_1 : i32, i32, i32
  }
  func.func @transform_4(%arg0: i32) -> (i32, i32) {
    %c0_i32 = arith.constant 0 : i32
    %c0_i32_0 = arith.constant 0 : i32
    %c0_i32_1 = arith.constant 0 : i32
    return %c0_i32, %c0_i32_0 : i32, i32
  }
  func.func @transform_5(%arg0: i32) -> (i32, i32) {
    %c0_i32 = arith.constant 0 : i32
    %c0_i32_0 = arith.constant 0 : i32
    %c0_i32_1 = arith.constant 0 : i32
    return %c0_i32, %c0_i32_0 : i32, i32
  }
  func.func @transform_6(%arg0: i32) -> (i32, i32) {
    %c0_i32 = arith.constant 0 : i32
    %c0_i32_0 = arith.constant 0 : i32
    %c0_i32_1 = arith.constant 0 : i32
    return %c0_i32, %c0_i32_0 : i32, i32
  }
  func.func @transform_7(%arg0: i32) -> (i32, i32) {
    %c0_i32 = arith.constant 0 : i32
    %c0_i32_0 = arith.constant 0 : i32
    %c0_i32_1 = arith.constant 0 : i32
    return %c0_i32, %c0_i32_0 : i32, i32
  }
  func.func @transform_8(%arg0: i32) -> (i32, i32) {
    %c0_i32 = arith.constant 0 : i32
    %c0_i32_0 = arith.constant 0 : i32
    %c0_i32_1 = arith.constant 0 : i32
    return %c0_i32, %c0_i32_0 : i32, i32
  }
  func.func @transform_9(%arg0: i32) -> (i32, i32) {
    %c0_i32 = arith.constant 0 : i32
    %c0_i32_0 = arith.constant 0 : i32
    %c0_i32_1 = arith.constant 0 : i32
    return %c0_i32, %c0_i32_0 : i32, i32
  }
}

</mosaic_0001>

<bundles_post_ra>
// kernel: inception_aux_forward.1
= control target key start
LH: loop header
LB: loop body
LE: loop exit
PB: predicated region body
PF: predicated region fallthrough
CT: control target
= control target key end

     0   :  { %v15806_v0 = vmov 0.0|0.0   ;;  %vm108_vm0 = vcmask 130048   ;;  %vm11298_vm1 = vcmask 1043456   ;;  %vm15809_vm2 = vmmov 0   ;;  %s20762_s1 = inlined_call_operand.vmem [shape: f32[144,128], index: 1, kind: input, shape index: {}]   ;;  %s20763_s0 = inlined_call_operand.vmem [shape: f32[200,144], index: 0, kind: input, shape index: {}]   ;;  %s20764_s3 = inlined_call_operand.vmem [shape: bf16[25,128,768], index: 3, kind: input, shape index: {}]   ;;  %s20765_s2 = inlined_call_operand.vmem [shape: f32[1,128], index: 2, kind: input, shape index: {}]   ;;  %s20766_s5 = inlined_call_operand.vmem [shape: f32[768,14], index: 5, kind: input, shape index: {}]   ;;  %s20767_s4 = inlined_call_operand.vmem [shape: f32[1,768], index: 4, kind: input, shape index: {}]   ;;  %s20768_s7 = inlined_call_operand.vmem [shape: f32[4,14], index: 7, kind: input, shape index: {}]   ;;  %s20769_s6 = inlined_call_operand.vmem [shape: f32[1,14], index: 6, kind: input, shape index: {}]   ;;  %s20770_s8 = inlined_call_operand.vmem [shape: f32[1,14], index: 8, kind: input, shape index: {}]   ;;  %s20771_s9 = inlined_call_operand.vmem [shape: f32[2,14], index: 9, kind: output, shape index: {}]  }
   0x1   :  { %13873 = vmatprep.subr.bf16.mxu0 %v15806_v0  ;;  %v83_v1 = vld [vmem:[%s20762_s1] sm:$0xff]  ;;  %v84_v2 = vld [vmem:[%s20762_s1 + $0x8] sm:$0xff]  ;;  %v85_v3 = vld [vmem:[%s20762_s1 + $0x10] sm:$0xff]  ;;  %vm11295_vm3 = vcmask 31744   ;;  %vm11373_vm4 = vcmask 107520  }
   0x2   :  { %v13874_v4 = vpack.c.bf16 %v84_v2, %v83_v1  ;;  %v86_v5 = vld [vmem:[%s20762_s1 + $0x18] sm:$0xff]  ;;  %v87_v7 = vld [vmem:[%s20762_s1 + $0x20] sm:$0xff]  ;;  %v88_v8 = vld [vmem:[%s20762_s1 + $0x28] sm:$0xff] }
   0x3   :  { %v13877_v6 = vpack.c.bf16 %v86_v5, %v85_v3  ;;  %v34_v9 = vld [vmem:[%s20763_s0 + $0x8] sm:$0xff]  ;;  %v13880_v10 = vpack.c.bf16 %v88_v8, %v87_v7  ;;  %v89_v11 = vld [vmem:[%s20762_s1 + $0x30] sm:$0xff]  ;;  %v90_v12 = vld [vmem:[%s20762_s1 + $0x38] sm:$0xff] }
   0x4   :  { %13875 = vmatpush1.bf16.msra.mxu0 %v13874_v4  ;;  %11380 = vmatprep.mubr.msk.f32.mxu0 %vm108_vm0, %v34_v9  ;;  %v13883_v13 = vpack.c.bf16 %v90_v12, %v89_v11  ;;  %v91_v14 = vld [vmem:[%s20762_s1 + $0x40] sm:$0xff]  ;;  %v92_v15 = vld [vmem:[%s20762_s1 + $0x48] sm:$0xff]  ;;  %v93_v17 = vld [vmem:[%s20762_s1 + $0x50] sm:$0xff] }
   0x5   :  { %13876 = vmatprep.subr.bf16.mxu0 %v15806_v0  ;;  %v13886_v16 = vpack.c.bf16 %v92_v15, %v91_v14  ;;  %v94_v18 = vld [vmem:[%s20762_s1 + $0x58] sm:$0xff]  ;;  %v95_v20 = vld [vmem:[%s20762_s1 + $0x60] sm:$0xff]  ;;  %v96_v21 = vld [vmem:[%s20762_s1 + $0x68] sm:$0xff] }
   0x6   :  { %v13889_v19 = vpack.c.bf16 %v94_v18, %v93_v17  ;;  %v14004_v22 = vld [vmem:[%s20764_s3 + $0x184] ss:$24 sps:$4 sm:$0xff]   ;;  %v97_v23 = vld [vmem:[%s20762_s1 + $0x70] sm:$0xff]  ;;  %v14009_v24 = vld [vmem:[%s20764_s3 + $0x180] ss:$24 sps:$4 sm:$0xff]   ;;  %v13892_v25 = vpack.c.bf16 %v96_v21, %v95_v20 }
   0x7   :  { %738 = vmatprep.subr.bf16.mxu1 %v14004_v22  ;;  %v14010_v26 = vld [vmem:[%s20764_s3 + $0x1b4] ss:$24 sps:$4 sm:$0xff]   ;;  %v98_v27 = vld [vmem:[%s20762_s1 + $0x78] sm:$0xff]  ;;  %v14015_v28 = vld [vmem:[%s20764_s3 + $0x1b0] ss:$24 sps:$4 sm:$0xff]  }
   0x8   :  { %13878 = vmatpush1.bf16.msra.mxu0 %v13877_v6  ;;  %739 = vmatpush1.bf16.msra.mxu1 %v14009_v24  ;;  %v13895_v29 = vpack.c.bf16 %v98_v27, %v97_v23  ;;  %v14016_v30 = vld [vmem:[%s20764_s3 + $0x1e4] ss:$24 sps:$4 sm:$0xff]   ;;  %v100_v32 = vld [vmem:[%s20762_s1 + $0x88] sm:$0xff]  ;;  %v14021_v33 = vld [vmem:[%s20764_s3 + $0x1e0] ss:$24 sps:$4 sm:$0xff]  }
   0x9   :  { %13879 = vmatprep.subr.bf16.mxu0 %v15806_v0  ;;  %740 = vmatprep.subr.bf16.mxu1 %v14010_v26  ;;  %v99_v31 = vld [vmem:[%s20762_s1 + $0x80] sm:$0xff]  ;;  %v14022_v34 = vld [vmem:[%s20764_s3 + $0x214] ss:$24 sps:$4 sm:$0xff]   ;;  %v14027_v37 = vld [vmem:[%s20764_s3 + $0x210] ss:$24 sps:$4 sm:$0xff]  }
   0xa   :  { %v13898_v35 = vpack.c.bf16 %v100_v32, %v99_v31  ;;  %v14003_v36 = vld [vmem:[%s20764_s3 + $0xc] ss:$24 sps:$4 sm:$0xff]   ;;  %v36_v40 = vld [vmem:[%s20763_s0 + $0x18] sm:$0xff]  ;;  %v14001_v41 = vld [vmem:[%s20764_s3 + $0x8] ss:$24 sps:$4 sm:$0xff]  }
   0xb   :  { %v14028_v38 = vld [vmem:[%s20764_s3 + $0x244] ss:$24 sps:$4 sm:$0xff]   ;;  %v14033_v43 = vld [vmem:[%s20764_s3 + $0x240] ss:$24 sps:$4 sm:$0xff]   ;;  %v14034_v44 = vld [vmem:[%s20764_s3 + $0x274] ss:$24 sps:$4 sm:$0xff]  }
   0xc   :  { %13881 = vmatpush1.bf16.msra.mxu0 %v13880_v10  ;;  %741 = vmatpush1.bf16.msra.mxu1 %v14015_v28  ;;  %v33_v39 = vld [vmem:[%s20763_s0] sm:$0xff]  ;;  %v14008_v42 = vld [vmem:[%s20764_s3 + $0x3c] ss:$24 sps:$4 sm:$0xff]   ;;  %v38_v46 = vld [vmem:[%s20763_s0 + $0x28] sm:$0xff] }
   0xd   :  { %13882 = vmatprep.subr.bf16.mxu0 %v15806_v0  ;;  %742 = vmatprep.subr.bf16.mxu1 %v14016_v30  ;;  %v35_v45 = vld [vmem:[%s20763_s0 + $0x10] sm:$0xff]  ;;  %v14014_v48 = vld [vmem:[%s20764_s3 + $0x6c] ss:$24 sps:$4 sm:$0xff]   ;;  %v14012_v51 = vld [vmem:[%s20764_s3 + $0x68] ss:$24 sps:$4 sm:$0xff]  }
   0xe   :  { %v14006_v47 = vld [vmem:[%s20764_s3 + $0x38] ss:$24 sps:$4 sm:$0xff]   ;;  %v37_v50 = vld [vmem:[%s20763_s0 + $0x20] sm:$0xff]  ;;  %v14020_v53 = vld [vmem:[%s20764_s3 + $0x9c] ss:$24 sps:$4 sm:$0xff]  }
   0xf   :  { %v14039_v49 = vld [vmem:[%s20764_s3 + $0x270] ss:$24 sps:$4 sm:$0xff]   ;;  %v40_v52 = vld [vmem:[%s20763_s0 + $0x38] sm:$0xff]  ;;  %v14026_v57 = vld [vmem:[%s20764_s3 + $0xcc] ss:$24 sps:$4 sm:$0xff]  }
  0x10   :  { %13884 = vmatpush1.bf16.msra.mxu0 %v13883_v13  ;;  %743 = vmatpush1.bf16.msra.mxu1 %v14021_v33  ;;  %v39_v54 = vld [vmem:[%s20763_s0 + $0x30] sm:$0xff]  ;;  %v42_v56 = vld [vmem:[%s20763_s0 + $0x48] sm:$0xff]  ;;  %v41_v58 = vld [vmem:[%s20763_s0 + $0x40] sm:$0xff] }
  0x11   :  { %13885 = vmatprep.subr.bf16.mxu0 %v15806_v0  ;;  %744 = vmatprep.subr.bf16.mxu1 %v14022_v34  ;;  %v14018_v55 = vld [vmem:[%s20764_s3 + $0x98] ss:$24 sps:$4 sm:$0xff]   ;;  %v14024_v59 = vld [vmem:[%s20764_s3 + $0xc8] ss:$24 sps:$4 sm:$0xff]   ;;  %v14032_v61 = vld [vmem:[%s20764_s3 + $0xfc] ss:$24 sps:$4 sm:$0xff]  }
  0x12   :  { %v44_v60 = vld [vmem:[%s20763_s0 + $0x58] sm:$0xff]  ;;  %v43_v62 = vld [vmem:[%s20763_s0 + $0x50] sm:$0xff]  ;;  %v14038_v1 = vld [vmem:[%s20764_s3 + $0x12c] ss:$24 sps:$4 sm:$0xff]  }
  0x13   :  { %v14030_v63 = vld [vmem:[%s20764_s3 + $0xf8] ss:$24 sps:$4 sm:$0xff]   ;;  %v45_v2 = vld [vmem:[%s20763_s0 + $0x60] sm:$0xff]  ;;  %v50_v6 = vld [vmem:[%s20763_s0 + $0x88] sm:$0xff] }
  0x14   :  { %13887 = vmatpush1.bf16.msra.mxu0 %v13886_v16  ;;  %745 = vmatpush1.bf16.msra.mxu1 %v14027_v37  ;;  %v14036_v3 = vld [vmem:[%s20764_s3 + $0x128] ss:$24 sps:$4 sm:$0xff]   ;;  %v48_v4 = vld [vmem:[%s20763_s0 + $0x78] sm:$0xff]  ;;  %v47_v5 = vld [vmem:[%s20763_s0 + $0x70] sm:$0xff] }
  0x15   :  { %13888 = vmatprep.subr.bf16.mxu0 %v15806_v0  ;;  %746 = vmatprep.subr.bf16.mxu1 %v14028_v38  ;;  %v49_v7 = vld [vmem:[%s20763_s0 + $0x80] sm:$0xff]  ;;  %v52_v8 = vld [vmem:[%s20763_s0 + $0x98] sm:$0xff]  ;;  %v51_v9 = vld [vmem:[%s20763_s0 + $0x90] sm:$0xff] }
  0x16   :  { %v54_v10 = vld [vmem:[%s20763_s0 + $0xa8] sm:$0xff]  ;;  %v53_v11 = vld [vmem:[%s20763_s0 + $0xa0] sm:$0xff]  ;;  %v56_v12 = vld [vmem:[%s20763_s0 + $0xb8] sm:$0xff] }
  0x17   :  { %v55_v13 = vld [vmem:[%s20763_s0 + $0xb0] sm:$0xff]  ;;  %v58_v14 = vld [vmem:[%s20763_s0 + $0xc8] sm:$0xff]  ;;  %v57_v15 = vld [vmem:[%s20763_s0 + $0xc0] sm:$0xff] }
  0x18   :  { %13890 = vmatpush1.bf16.msra.mxu0 %v13889_v19  ;;  %747 = vmatpush1.bf16.msra.mxu1 %v14033_v43  ;;  %v60_v16 = vld [vmem:[%s20763_s0 + $0xd8] sm:$0xff]  ;;  %v59_v17 = vld [vmem:[%s20763_s0 + $0xd0] sm:$0xff]  ;;  %v62_v18 = vld [vmem:[%s20763_s0 + $0xe8] sm:$0xff] }
  0x19   :  { %13891 = vmatprep.subr.bf16.mxu0 %v15806_v0  ;;  %748 = vmatprep.subr.bf16.mxu1 %v14034_v44  ;;  %v61_v19 = vld [vmem:[%s20763_s0 + $0xe0] sm:$0xff]  ;;  %v64_v20 = vld [vmem:[%s20763_s0 + $0xf8] sm:$0xff]  ;;  %v63_v21 = vld [vmem:[%s20763_s0 + $0xf0] sm:$0xff] }
  0x1a   :  { %v66_v22 = vld [vmem:[%s20763_s0 + $0x108] sm:$0xff]  ;;  %v65_v23 = vld [vmem:[%s20763_s0 + $0x100] sm:$0xff]  ;;  %v68_v24 = vld [vmem:[%s20763_s0 + $0x118] sm:$0xff] }
  0x1b   :  { %v70_v26 = vld [vmem:[%s20763_s0 + $0x128] sm:$0xff]  ;;  %v69_v27 = vld [vmem:[%s20763_s0 + $0x120] sm:$0xff]  ;;  %v72_v28 = vld [vmem:[%s20763_s0 + $0x138] sm:$0xff] }
  0x1c   :  { %13893 = vmatpush1.bf16.msra.mxu0 %v13892_v25  ;;  %749 = vmatpush1.bf16.msra.mxu1 %v14039_v49  ;;  %v67_v25 = vld [vmem:[%s20763_s0 + $0x110] sm:$0xff]  ;;  %v74_v30 = vld [vmem:[%s20763_s0 + $0x148] sm:$0xff]  ;;  %v73_v31 = vld [vmem:[%s20763_s0 + $0x140] sm:$0xff] }
  0x1d   :  { %13894 = vmatprep.subr.bf16.mxu0 %v15806_v0  ;;  %v76_v32 = vld [vmem:[%s20763_s0 + $0x158] sm:$0xff]  ;;  %v75_v33 = vld [vmem:[%s20763_s0 + $0x150] sm:$0xff]  ;;  %v78_v34 = vld [vmem:[%s20763_s0 + $0x168] sm:$0xff] }
  0x1e   :  { %v77_v37 = vld [vmem:[%s20763_s0 + $0x160] sm:$0xff]  ;;  %v14042_v38 = vld [vmem:[%s20764_s3 + $0x158] ss:$24 sps:$4 sm:$0xff]   ;;  %v82_v44 = vld [vmem:[%s20763_s0 + $0x188] sm:$0xff] }
  0x1f   :  { %v14050_v43 = vld [vmem:[%s20764_s3 + $0x304] ss:$24 sps:$4 sm:$0xff]   ;;  %v16197_v49 = vld [vmem:[%s20765_s2] ss:$0 sm:$0xff] }
  0x20   :  { %13896 = vmatpush1.bf16.msra.mxu0 %v13895_v29  ;;  %v71_v29 = vld [vmem:[%s20763_s0 + $0x130] sm:$0xff] }
  0x21   :  { %13897 = vmatprep.subr.bf16.mxu0 %v15806_v0  ;;  %v46_v0 = vld [vmem:[%s20763_s0 + $0x68] sm:$0xff] }
  0x24   :  { %13899 = vmatpush1.bf16.msra.mxu0 %v13898_v35  ;;  %v14040_v35 = vld [vmem:[%s20764_s3 + $0x2a4] ss:$24 sps:$4 sm:$0xff]  }
  0x25   :  { %1142 = vmatprep.subr.bf16.mxu0 %v14003_v36  ;;  %v14044_v36 = vld [vmem:[%s20764_s3 + $0x15c] ss:$24 sps:$4 sm:$0xff]   ;;  %750 = vmatprep.subr.bf16.mxu1 %v14040_v35  ;;  %v14094_v35 = vld [vmem:[%s20764_s3 + $0x2d8] ss:$24 sps:$4 sm:$0xff]  }
  0x27   :  { %249 = vmatmul.mubr.f32.vlgmr.msra.gmra.mrb[0].mxu0 %v33_v39  ;;  %v14045_v39 = vld [vmem:[%s20764_s3 + $0x2a0] ss:$24 sps:$4 sm:$0xff]  }
  0x28   :  { %11381 = vmatprep.mubr.msk.f32.mxu0 %vm108_vm0, %v36_v40  ;;  %1143 = vmatpush1.bf16.msra.mxu0 %v14001_v41  ;;  %v80_v40 = vld [vmem:[%s20763_s0 + $0x178] sm:$0xff]  ;;  %v79_v41 = vld [vmem:[%s20763_s0 + $0x170] sm:$0xff] }
  0x29   :  { %1144 = vmatprep.subr.bf16.mxu0 %v14008_v42  ;;  %751 = vmatpush1.bf16.msra.mxu1 %v14045_v39  ;;  %v14046_v42 = vld [vmem:[%s20764_s3 + $0x2d4] ss:$24 sps:$4 sm:$0xff]   ;;  %v14100_v39 = vld [vmem:[%s20764_s3 + $0x190] ss:$24 sps:$4 sm:$0xff]  }
  0x2a   :  { %752 = vmatprep.subr.bf16.mxu1 %v14046_v42  ;;  %v14111_v42 = vld [vmem:[%s20764_s3 + $0x374] ss:$24 sps:$4 sm:$0xff]  }
  0x2b   :  { %254 = vmatmul.mubr.f32.gmra.mrb[2].mxu0 %v35_v45  ;;  %v14051_v45 = vld [vmem:[%s20764_s3 + $0x2d0] ss:$24 sps:$4 sm:$0xff]  }
  0x2c   :  { %11382 = vmatprep.mubr.msk.f32.mxu0 %vm108_vm0, %v38_v46  ;;  %1145 = vmatpush1.bf16.msra.mxu0 %v14006_v47  ;;  %v15807_v46 = vmov 0   ;;  %v14054_v47 = vld [vmem:[%s20764_s3 + $0x18c] ss:$24 sps:$4 sm:$0xff]  }
  0x2d   :  { %1146 = vmatprep.subr.bf16.mxu0 %v14014_v48  ;;  %753 = vmatpush1.bf16.msra.mxu1 %v14051_v45  ;;  %v81_v48 = vld [vmem:[%s20763_s0 + $0x180] sm:$0xff]  ;;  %v14114_v45 = vld [vmem:[%s20764_s3 + $0x1f4] ss:$24 sps:$4 sm:$0xff]  }
  0x2e   :  { %770 = vmatprep.mubr.bf16.mxu1 %v15807_v46  ;;  %779 = vmatprep.subr.bf16.mxu1 %v14054_v47  ;;  %v14117_v47 = vld [vmem:[%s20764_s3 + $0x3a4] ss:$24 sps:$4 sm:$0xff]  }
  0x2f   :  { %259 = vmatmul.mubr.f32.gmra.mrb[4].mxu0 %v37_v50 }
  0x30   :  { %11383 = vmatprep.mubr.msk.f32.mxu0 %vm108_vm0, %v40_v52  ;;  %1147 = vmatpush1.bf16.msra.mxu0 %v14012_v51 }
  0x31   :  { %1148 = vmatprep.subr.bf16.mxu0 %v14020_v53 }
  0x33   :  { %264 = vmatmul.mubr.f32.gmra.mrb[6].mxu0 %v39_v54 }
  0x34   :  { %11384 = vmatprep.mubr.msk.f32.mxu0 %vm108_vm0, %v42_v56  ;;  %1149 = vmatpush1.bf16.msra.mxu0 %v14018_v55  ;;  %v14048_v55 = vld [vmem:[%s20764_s3 + $0x300] ss:$24 sps:$4 sm:$0xff]  }
  0x35   :  { %1150 = vmatprep.subr.bf16.mxu0 %v14026_v57 }
  0x37   :  { %269 = vmatmul.mubr.f32.gmra.mrb[8].mxu0 %v41_v58 }
  0x38   :  { %11385 = vmatprep.mubr.msk.f32.mxu0 %vm108_vm0, %v44_v60  ;;  %1151 = vmatpush1.bf16.msra.mxu0 %v14024_v59  ;;  %v14057_v59 = vld [vmem:[%s20764_s3 + $0x334] ss:$24 sps:$4 sm:$0xff]   ;;  %v14052_v60 = vld [vmem:[%s20764_s3 + $0x188] ss:$24 sps:$4 sm:$0xff]  }
  0x39   :  { %1152 = vmatprep.subr.bf16.mxu0 %v14032_v61  ;;  %v14055_v61 = vld [vmem:[%s20764_s3 + $0x330] ss:$24 sps:$4 sm:$0xff]  }
  0x3b   :  { %274 = vmatmul.mubr.f32.gmra.mrb[10].mxu0 %v43_v62 }
  0x3c   :  { %11386 = vmatprep.mubr.msk.f32.mxu0 %vm108_vm0, %v46_v0  ;;  %1153 = vmatpush1.bf16.msra.mxu0 %v14030_v63 }
  0x3d   :  { %1154 = vmatprep.subr.bf16.mxu0 %v14038_v1  ;;  %v14060_v1 = vld [vmem:[%s20764_s3 + $0x1bc] ss:$24 sps:$4 sm:$0xff]  }
  0x3f   :  { %279 = vmatmul.mubr.f32.gmra.mrb[12].mxu0 %v45_v2  ;;  %v14063_v2 = vld [vmem:[%s20764_s3 + $0x364] ss:$24 sps:$4 sm:$0xff]  }
  0x40   :  { %11387 = vmatprep.mubr.msk.f32.mxu0 %vm108_vm0, %v48_v4  ;;  %1155 = vmatpush1.bf16.msra.mxu0 %v14036_v3  ;;  %v14058_v4 = vld [vmem:[%s20764_s3 + $0x1b8] ss:$24 sps:$4 sm:$0xff]  }
  0x41   :  { %1156 = vmatprep.subr.bf16.mxu0 %v14044_v36  ;;  %v14097_v36 = vld [vmem:[%s20764_s3 + $0x310] ss:$24 sps:$4 sm:$0xff]  }
  0x43   :  { %284 = vmatmul.mubr.f32.gmra.mrb[14].mxu0 %v47_v5  ;;  %v14061_v5 = vld [vmem:[%s20764_s3 + $0x360] ss:$24 sps:$4 sm:$0xff]  }
  0x44   :  { %11388 = vmatprep.mubr.msk.f32.mxu0 %vm108_vm0, %v50_v6  ;;  %1157 = vmatpush1.bf16.msra.mxu0 %v14042_v38  ;;  %v14105_v38 = vld [vmem:[%s20764_s3 + $0x344] ss:$24 sps:$4 sm:$0xff]  }
  0x45   :  { %1514 = vmatprep.subr.bf16.mxu0 %v14050_v43  ;;  %v14106_v43 = vld [vmem:[%s20764_s3 + $0x1c0] ss:$24 sps:$4 sm:$0xff]  }
  0x47   :  { %289 = vmatmul.mubr.f32.gmra.mrb[16].mxu0 %v49_v7  ;;  %v14066_v7 = vld [vmem:[%s20764_s3 + $0x1ec] ss:$24 sps:$4 sm:$0xff]  }
  0x48   :  { %11389 = vmatprep.mubr.msk.f32.mxu0 %vm108_vm0, %v52_v8  ;;  %v14069_v8 = vld [vmem:[%s20764_s3 + $0x394] ss:$24 sps:$4 sm:$0xff]  }
  0x4b   :  { %294 = vmatmul.mubr.f32.gmra.mrb[18].mxu0 %v51_v9 }
  0x4c   :  { %11390 = vmatprep.mubr.msk.f32.mxu0 %vm108_vm0, %v54_v10  ;;  %v14064_v10 = vld [vmem:[%s20764_s3 + $0x1e8] ss:$24 sps:$4 sm:$0xff]  }
  0x4f   :  { %299 = vmatmul.mubr.f32.gmra.mrb[20].mxu0 %v53_v11  ;;  %v14067_v11 = vld [vmem:[%s20764_s3 + $0x390] ss:$24 sps:$4 sm:$0xff]  }
  0x50   :  { %11391 = vmatprep.mubr.msk.f32.mxu0 %vm108_vm0, %v56_v12 }
  0x53   :  { %304 = vmatmul.mubr.f32.gmra.mrb[22].mxu0 %v55_v13  ;;  %v14072_v13 = vld [vmem:[%s20764_s3 + $0x21c] ss:$24 sps:$4 sm:$0xff]  }
  0x54   :  { %11392 = vmatprep.mubr.msk.f32.mxu0 %vm108_vm0, %v58_v14  ;;  %v14075_v14 = vld [vmem:[%s20764_s3 + $0x3c4] ss:$24 sps:$4 sm:$0xff]  }
  0x57   :  { %309 = vmatmul.mubr.f32.gmra.mrb[24].mxu0 %v57_v15 }
  0x58   :  { %11393 = vmatprep.mubr.msk.f32.mxu0 %vm108_vm0, %v60_v16  ;;  %v14070_v16 = vld [vmem:[%s20764_s3 + $0x218] ss:$24 sps:$4 sm:$0xff]  }
  0x5b   :  { %314 = vmatmul.mubr.f32.gmra.mrb[26].mxu0 %v59_v17  ;;  %v14073_v17 = vld [vmem:[%s20764_s3 + $0x3c0] ss:$24 sps:$4 sm:$0xff]  }
  0x5c   :  { %11394 = vmatprep.mubr.msk.f32.mxu0 %vm108_vm0, %v62_v18  ;;  %v14078_v18 = vld [vmem:[%s20764_s3 + $0x24c] ss:$24 sps:$4 sm:$0xff]  }
  0x5f   :  { %319 = vmatmul.mubr.f32.gmra.mrb[28].mxu0 %v61_v19  ;;  %v14081_v19 = vld [vmem:[%s20764_s3 + $0x3f4] ss:$24 sps:$4 sm:$0xff]  }
  0x60   :  { %11395 = vmatprep.mubr.msk.f32.mxu0 %vm108_vm0, %v64_v20  ;;  %v14076_v20 = vld [vmem:[%s20764_s3 + $0x248] ss:$24 sps:$4 sm:$0xff]  }
  0x63   :  { %324 = vmatmul.mubr.f32.gmra.mrb[30].mxu0 %v63_v21  ;;  %v14079_v21 = vld [vmem:[%s20764_s3 + $0x3f0] ss:$24 sps:$4 sm:$0xff]  }
  0x64   :  { %11396 = vmatprep.mubr.msk.f32.mxu0 %vm108_vm0, %v66_v22  ;;  %v14084_v22 = vld [vmem:[%s20764_s3 + $0x27c] ss:$24 sps:$4 sm:$0xff]  }
  0x67   :  { %329 = vmatmul.mubr.f32.gmra.mrb[32].mxu0 %v65_v23  ;;  %v14087_v23 = vld [vmem:[%s20764_s3 + $0x424] ss:$24 sps:$4 sm:$0xff]  }
  0x68   :  { %11397 = vmatprep.mubr.msk.f32.mxu0 %vm108_vm0, %v68_v24 }
  0x6b   :  { %334 = vmatmul.mubr.f32.gmra.mrb[34].mxu0 %v67_v25  ;;  %v14082_v25 = vld [vmem:[%s20764_s3 + $0x278] ss:$24 sps:$4 sm:$0xff]  }
  0x6c   :  { %11398 = vmatprep.mubr.msk.f32.mxu0 %vm108_vm0, %v70_v26  ;;  %v14085_v26 = vld [vmem:[%s20764_s3 + $0x420] ss:$24 sps:$4 sm:$0xff]  }
  0x6f   :  { %339 = vmatmul.mubr.f32.gmra.mrb[36].mxu0 %v69_v27  ;;  %v14090_v27 = vld [vmem:[%s20764_s3 + $0x2ac] ss:$24 sps:$4 sm:$0xff]  }
  0x70   :  { %11399 = vmatprep.mubr.msk.f32.mxu0 %vm108_vm0, %v72_v28  ;;  %v14093_v28 = vld [vmem:[%s20764_s3 + $0x454] ss:$24 sps:$4 sm:$0xff]  }
  0x73   :  { %344 = vmatmul.mubr.f32.gmra.mrb[38].mxu0 %v71_v29 }
  0x74   :  { %11400 = vmatprep.mubr.msk.f32.mxu0 %vm108_vm0, %v74_v30  ;;  %v14088_v30 = vld [vmem:[%s20764_s3 + $0x2a8] ss:$24 sps:$4 sm:$0xff]  }
  0x77   :  { %349 = vmatmul.mubr.f32.gmra.mrb[40].mxu0 %v73_v31  ;;  %v14091_v31 = vld [vmem:[%s20764_s3 + $0x450] ss:$24 sps:$4 sm:$0xff]  }
  0x78   :  { %11401 = vmatprep.mubr.msk.f32.mxu0 %vm108_vm0, %v76_v32  ;;  %v14096_v32 = vld [vmem:[%s20764_s3 + $0x2dc] ss:$24 sps:$4 sm:$0xff]  }
  0x7b   :  { %354 = vmatmul.mubr.f32.gmra.mrb[42].mxu0 %v75_v33  ;;  %v14099_v33 = vld [vmem:[%s20764_s3 + $0x314] ss:$24 sps:$4 sm:$0xff]  }
  0x7c   :  { %11402 = vmatprep.mubr.msk.f32.mxu0 %vm108_vm0, %v78_v34 }
  0x7f   :  { %359 = vmatmul.mubr.f32.gmra.mrb[44].mxu0 %v77_v37  ;;  %v14102_v37 = vld [vmem:[%s20764_s3 + $0x194] ss:$24 sps:$4 sm:$0xff]  }
  0x80   :  { %11403 = vmatprep.mubr.msk.f32.mxu0 %vm108_vm0, %v80_v40  ;;  %v14103_v40 = vld [vmem:[%s20764_s3 + $0x340] ss:$24 sps:$4 sm:$0xff]  }
  0x83   :  { %364 = vmatmul.mubr.f32.gmra.mrb[46].mxu0 %v79_v41  ;;  %v14108_v41 = vld [vmem:[%s20764_s3 + $0x1c4] ss:$24 sps:$4 sm:$0xff]  }
  0x84   :  { %11404 = vmatprep.mubr.msk.f32.mxu0 %vm108_vm0, %v82_v44  ;;  %v14109_v44 = vld [vmem:[%s20764_s3 + $0x370] ss:$24 sps:$4 sm:$0xff]  }
  0x87   :  { %369 = vmatmul.mubr.f32.gmra.mrb[48].mxu0 %v81_v48  ;;  %v14112_v48 = vld [vmem:[%s20764_s3 + $0x1f0] ss:$24 sps:$4 sm:$0xff]  }
  0x88   :  { %1174 = vmatprep.mubr.bf16.mxu0 %v15807_v46 }
  0xfa   :  { %v250_v50 = vpop.f32.mrb[0].mxu0 }
  0xfb   :  { %v251_v51 = vadd.f32 %v16197_v49, %v250_v50  ;;  %v252_v52 = vpop.f32.mrb[1].mxu0  ;;  %v14115_v50 = vld [vmem:[%s20764_s3 + $0x3a0] ss:$24 sps:$4 sm:$0xff]  }
  0xfc   :  { %v14120_v52 = vld [vmem:[%s20764_s3 + $0x224] ss:$24 sps:$4 sm:$0xff]  }
  0xfd   :  { %v374_v53 = vmax.f32 %v251_v51, 0.0 }
  0xfe   :  { %v255_v54 = vpop.f32.mrb[2].mxu0 }
  0xff   :  { %v16203_v56 = vpack.c.bf16 %v374_v53, %v374_v53  ;;  %v256_v57 = vadd.f32 %v16197_v49, %v255_v54  ;;  %v257_v58 = vpop.f32.mrb[3].mxu0  ;;  %v14123_v53 = vld [vmem:[%s20764_s3 + $0x3d4] ss:$24 sps:$4 sm:$0xff]  }
 0x101   :  { %v375_v62 = vmax.f32 %v256_v57, 0.0  ;;  %1175 = vmatmul.mubr.bf16.vlgmr.msra.gmra.mrb[52].mxu0 %v16203_v56  ;;  %v14121_v57 = vld [vmem:[%s20764_s3 + $0x3d0] ss:$24 sps:$4 sm:$0xff]  }
 0x102   :  { %1515 = vmatpush1.bf16.msra.mxu0 %v14048_v55  ;;  %v260_v63 = vpop.f32.mrb[4].mxu0  ;;  %1546 = vmatprep.mubr.bf16.mxu0 %v15807_v46  ;;  %v14118_v55 = vld [vmem:[%s20764_s3 + $0x220] ss:$24 sps:$4 sm:$0xff]  }
 0x103   :  { %v16217_v0 = vpack.c.bf16 %v375_v62, %v375_v62  ;;  %1516 = vmatprep.subr.bf16.mxu0 %v14057_v59  ;;  %v262_v3 = vpop.f32.mrb[5].mxu0  ;;  %v261_v24 = vadd.f32 %v16197_v49, %v260_v63  ;;  %v14126_v59 = vld [vmem:[%s20764_s3 + $0x254] ss:$24 sps:$4 sm:$0xff]  }
 0x105   :  { %771 = vmatmul.mubr.bf16.vlgmr.msra.gmra.mrb[0].mxu1 %v16217_v0  ;;  %v376_v29 = vmax.f32 %v261_v24, 0.0 }
 0x106   :  { %780 = vmatpush1.bf16.msra.mxu1 %v14052_v60  ;;  %1517 = vmatpush1.bf16.msra.mxu0 %v14055_v61  ;;  %v16232_v6 = vpop.f32.mrb[6].mxu0  ;;  %v14129_v60 = vld [vmem:[%s20764_s3 + $0x404] ss:$24 sps:$4 sm:$0xff]  }
 0x107   :  { %781 = vmatprep.subr.bf16.mxu1 %v14060_v1  ;;  %1518 = vmatprep.subr.bf16.mxu0 %v14063_v2  ;;  %v267_v9 = vpop.f32.mrb[7].mxu0  ;;  %v16304_v34 = vpack.c.bf16 %v376_v29, %v376_v29  ;;  %v14124_v1 = vld [vmem:[%s20764_s3 + $0x250] ss:$24 sps:$4 sm:$0xff]   ;;  %v14127_v2 = vld [vmem:[%s20764_s3 + $0x400] ss:$24 sps:$4 sm:$0xff]  }
 0x108   :  { %811 = vmatprep.mubr.bf16.mxu1 %v15807_v46 }
 0x10a   :  { %782 = vmatpush1.bf16.msra.mxu1 %v14058_v4  ;;  %1519 = vmatpush1.bf16.msra.mxu0 %v14061_v5  ;;  %v16247_v12 = vpop.f32.mrb[8].mxu0  ;;  %v14132_v4 = vld [vmem:[%s20764_s3 + $0x284] ss:$24 sps:$4 sm:$0xff]   ;;  %v14135_v5 = vld [vmem:[%s20764_s3 + $0x434] ss:$24 sps:$4 sm:$0xff]  }
 0x10b   :  { %783 = vmatprep.subr.bf16.mxu1 %v14066_v7  ;;  %1520 = vmatprep.subr.bf16.mxu0 %v14069_v8  ;;  %v272_v15 = vpop.f32.mrb[9].mxu0 }
 0x10c   :  { %v14141_v15 = vld [vmem:[%s20764_s3 + $0x464] ss:$24 sps:$4 sm:$0xff]  }
 0x10e   :  { %784 = vmatpush1.bf16.msra.mxu1 %v14064_v10  ;;  %1521 = vmatpush1.bf16.msra.mxu0 %v14067_v11  ;;  %v16352_v51 = vpop.f32.mrb[10].mxu0  ;;  %v14130_v10 = vld [vmem:[%s20764_s3 + $0x280] ss:$24 sps:$4 sm:$0xff]   ;;  %v14133_v11 = vld [vmem:[%s20764_s3 + $0x430] ss:$24 sps:$4 sm:$0xff]  }
 0x10f   :  { %785 = vmatprep.subr.bf16.mxu1 %v14072_v13  ;;  %1522 = vmatprep.subr.bf16.mxu0 %v14075_v14  ;;  %v277_v54 = vpop.f32.mrb[11].mxu0  ;;  %v14138_v14 = vld [vmem:[%s20764_s3 + $0x2b4] ss:$24 sps:$4 sm:$0xff]  }
 0x110   :  { %v14160_v54 = vld [vmem:[%s20764_s3 + $0x60] ss:$24 sps:$4 sm:$0xff]  }
 0x112   :  { %786 = vmatpush1.bf16.msra.mxu1 %v14070_v16  ;;  %1523 = vmatpush1.bf16.msra.mxu0 %v14073_v17  ;;  %v16366_v58 = vpop.f32.mrb[12].mxu0 }
 0x113   :  { %787 = vmatprep.subr.bf16.mxu1 %v14078_v18  ;;  %1524 = vmatprep.subr.bf16.mxu0 %v14081_v19  ;;  %v282_v61 = vpop.f32.mrb[13].mxu0  ;;  %v14136_v19 = vld [vmem:[%s20764_s3 + $0x2b0] ss:$24 sps:$4 sm:$0xff]  }
 0x116   :  { %788 = vmatpush1.bf16.msra.mxu1 %v14076_v20  ;;  %1525 = vmatpush1.bf16.msra.mxu0 %v14079_v21  ;;  %v16374_v62 = vpop.f32.mrb[14].mxu0  ;;  %v14139_v20 = vld [vmem:[%s20764_s3 + $0x460] ss:$24 sps:$4 sm:$0xff]  }
 0x117   :  { %789 = vmatprep.subr.bf16.mxu1 %v14084_v22  ;;  %1526 = vmatprep.subr.bf16.mxu0 %v14087_v23  ;;  %v287_v63 = vpop.f32.mrb[15].mxu0  ;;  %v14144_v22 = vld [vmem:[%s20764_s3 + $0x2e4] ss:$24 sps:$4 sm:$0xff]  }
 0x118   :  { %v14147_v23 = vld [vmem:[%s20764_s3 + $0x48c] ss:$24 sps:$4 sm:$0xff]   ;;  %v14166_v63 = vld [vmem:[%s20764_s3 + $0x90] ss:$24 sps:$4 sm:$0xff]  }
 0x11a   :  { %790 = vmatpush1.bf16.msra.mxu1 %v14082_v25  ;;  %1527 = vmatpush1.bf16.msra.mxu0 %v14085_v26  ;;  %v16382_v3 = vpop.f32.mrb[16].mxu0 }
 0x11b   :  { %791 = vmatprep.subr.bf16.mxu1 %v14090_v27  ;;  %1528 = vmatprep.subr.bf16.mxu0 %v14093_v28  ;;  %v292_v7 = vpop.f32.mrb[17].mxu0  ;;  %v14142_v27 = vld [vmem:[%s20764_s3 + $0x2e0] ss:$24 sps:$4 sm:$0xff]  }
 0x11c   :  { %v14145_v28 = vld [vmem:[%s20764_s3 + $0x488] ss:$24 sps:$4 sm:$0xff]  }
 0x11e   :  { %792 = vmatpush1.bf16.msra.mxu1 %v14088_v30  ;;  %1529 = vmatpush1.bf16.msra.mxu0 %v14091_v31  ;;  %v16390_v8 = vpop.f32.mrb[18].mxu0  ;;  %v14150_v30 = vld [vmem:[%s20764_s3 + $0x4] ss:$24 sps:$4 sm:$0xff]  }
 0x11f   :  { %793 = vmatprep.subr.bf16.mxu1 %v14096_v32  ;;  %1596 = vmatprep.subr.bf16.mxu0 %v14099_v33  ;;  %v297_v9 = vpop.f32.mrb[19].mxu0  ;;  %v14153_v31 = vld [vmem:[%s20764_s3 + $0x4bc] ss:$24 sps:$4 sm:$0xff]   ;;  %v14148_v33 = vld [vmem:[%s20764_s3] ss:$24 sps:$4 sm:$0xff]  }
 0x120   :  { %v14172_v9 = vld [vmem:[%s20764_s3 + $0xc0] ss:$24 sps:$4 sm:$0xff]  }
 0x121   :  { %1547 = vmatmul.mubr.bf16.vlgmr.msra.gmra.mrb[56].mxu0 %v16304_v34 }
 0x122   :  { %794 = vmatpush1.bf16.msra.mxu1 %v14094_v35  ;;  %1597 = vmatpush1.bf16.msra.mxu0 %v14097_v36  ;;  %v16398_v13 = vpop.f32.mrb[20].mxu0  ;;  %v14151_v35 = vld [vmem:[%s20764_s3 + $0x4b8] ss:$24 sps:$4 sm:$0xff]  }
 0x123   :  { %820 = vmatprep.subr.bf16.mxu1 %v14102_v37  ;;  %1598 = vmatprep.subr.bf16.mxu0 %v14105_v38  ;;  %v302_v16 = vpop.f32.mrb[21].mxu0 }
 0x124   :  { %1628 = vmatprep.mubr.bf16.mxu0 %v15807_v46 }
 0x125   :  { %812 = vmatmul.mubr.bf16.vlgmr.msra.gmra.mrb[4].mxu1 %v16217_v0 }
 0x126   :  { %821 = vmatpush1.bf16.msra.mxu1 %v14100_v39  ;;  %1599 = vmatpush1.bf16.msra.mxu0 %v14103_v40  ;;  %v16406_v17 = vpop.f32.mrb[22].mxu0  ;;  %v14156_v39 = vld [vmem:[%s20764_s3 + $0x34] ss:$24 sps:$4 sm:$0xff]  }
 0x127   :  { %822 = vmatprep.subr.bf16.mxu1 %v14108_v41  ;;  %1600 = vmatprep.subr.bf16.mxu0 %v14111_v42  ;;  %v307_v18 = vpop.f32.mrb[23].mxu0  ;;  %v14159_v40 = vld [vmem:[%s20764_s3 + $0x4ec] ss:$24 sps:$4 sm:$0xff]  }
 0x128   :  { %852 = vmatprep.mubr.bf16.mxu1 %v15807_v46  ;;  %v14178_v18 = vld [vmem:[%s20764_s3 + $0xf0] ss:$24 sps:$4 sm:$0xff]  }
 0x12a   :  { %823 = vmatpush1.bf16.msra.mxu1 %v14106_v43  ;;  %1601 = vmatpush1.bf16.msra.mxu0 %v14109_v44  ;;  %v16414_v21 = vpop.f32.mrb[24].mxu0  ;;  %v14154_v44 = vld [vmem:[%s20764_s3 + $0x30] ss:$24 sps:$4 sm:$0xff]  }
 0x12b   :  { %824 = vmatprep.subr.bf16.mxu1 %v14114_v45  ;;  %1602 = vmatprep.subr.bf16.mxu0 %v14117_v47  ;;  %v312_v24 = vpop.f32.mrb[25].mxu0  ;;  %v14157_v45 = vld [vmem:[%s20764_s3 + $0x4e8] ss:$24 sps:$4 sm:$0xff]  }
 0x12c   :  { %v14189_v24 = vld [vmem:[%s20764_s3 + $0x5dc] ss:$24 sps:$4 sm:$0xff]  }
 0x12e   :  { %825 = vmatpush1.bf16.msra.mxu1 %v14112_v48  ;;  %1603 = vmatpush1.bf16.msra.mxu0 %v14115_v50  ;;  %v16422_v25 = vpop.f32.mrb[26].mxu0  ;;  %v14162_v48 = vld [vmem:[%s20764_s3 + $0x64] ss:$24 sps:$4 sm:$0xff]  }
 0x12f   :  { %826 = vmatprep.subr.bf16.mxu1 %v14120_v52  ;;  %1604 = vmatprep.subr.bf16.mxu0 %v14123_v53  ;;  %v317_v26 = vpop.f32.mrb[27].mxu0 }
 0x132   :  { %827 = vmatpush1.bf16.msra.mxu1 %v14118_v55  ;;  %1605 = vmatpush1.bf16.msra.mxu0 %v14121_v57  ;;  %v16430_v29 = vpop.f32.mrb[28].mxu0  ;;  %v14163_v55 = vld [vmem:[%s20764_s3 + $0x518] ss:$24 sps:$4 sm:$0xff]  }
 0x133   :  { %828 = vmatprep.subr.bf16.mxu1 %v14126_v59  ;;  %1606 = vmatprep.subr.bf16.mxu0 %v14129_v60  ;;  %v322_v32 = vpop.f32.mrb[29].mxu0  ;;  %v14168_v59 = vld [vmem:[%s20764_s3 + $0x94] ss:$24 sps:$4 sm:$0xff]  }
 0x134   :  { %v14171_v60 = vld [vmem:[%s20764_s3 + $0x54c] ss:$24 sps:$4 sm:$0xff]  }
 0x136   :  { %829 = vmatpush1.bf16.msra.mxu1 %v14124_v1  ;;  %1607 = vmatpush1.bf16.msra.mxu0 %v14127_v2  ;;  %v16444_v36 = vpop.f32.mrb[30].mxu0  ;;  %v14169_v1 = vld [vmem:[%s20764_s3 + $0x548] ss:$24 sps:$4 sm:$0xff]  }
 0x137   :  { %830 = vmatprep.subr.bf16.mxu1 %v14132_v4  ;;  %1608 = vmatprep.subr.bf16.mxu0 %v14135_v5  ;;  %v327_v37 = vpop.f32.mrb[31].mxu0  ;;  %v14174_v4 = vld [vmem:[%s20764_s3 + $0xc4] ss:$24 sps:$4 sm:$0xff]  }
 0x138   :  { %v14177_v5 = vld [vmem:[%s20764_s3 + $0x57c] ss:$24 sps:$4 sm:$0xff]   ;;  %v14193_v37 = vld [vmem:[%s20764_s3 + $0x600] ss:$24 sps:$4 sm:$0xff]  }
 0x13a   :  { %831 = vmatpush1.bf16.msra.mxu1 %v14130_v10  ;;  %1609 = vmatpush1.bf16.msra.mxu0 %v14133_v11  ;;  %v16447_v38 = vpop.f32.mrb[32].mxu0  ;;  %v14175_v10 = vld [vmem:[%s20764_s3 + $0x578] ss:$24 sps:$4 sm:$0xff]  }
 0x13b   :  { %832 = vmatprep.subr.bf16.mxu1 %v14138_v14  ;;  %1610 = vmatprep.subr.bf16.mxu0 %v14141_v15  ;;  %v332_v41 = vpop.f32.mrb[33].mxu0  ;;  %v14180_v14 = vld [vmem:[%s20764_s3 + $0xf4] ss:$24 sps:$4 sm:$0xff]  }
 0x13c   :  { %v14183_v15 = vld [vmem:[%s20764_s3 + $0x5ac] ss:$24 sps:$4 sm:$0xff]   ;;  %v14196_v41 = vld [vmem:[%s20764_s3 + $0x10] ss:$24 sps:$4 sm:$0xff]  }
 0x13e   :  { %833 = vmatpush1.bf16.msra.mxu1 %v14136_v19  ;;  %1611 = vmatpush1.bf16.msra.mxu0 %v14139_v20  ;;  %v16456_v42 = vpop.f32.mrb[34].mxu0  ;;  %v14181_v19 = vld [vmem:[%s20764_s3 + $0x5a8] ss:$24 sps:$4 sm:$0xff]   ;;  %v266_v20 = vadd.f32 %v16197_v49, %v16232_v6  ;;  %v14187_v49 = vld [vmem:[%s20764_s3 + $0x5d8] ss:$24 sps:$4 sm:$0xff]  }
 0x13f   :  { %834 = vmatprep.subr.bf16.mxu1 %v14144_v22  ;;  %1974 = vmatprep.subr.bf16.mxu0 %v14147_v23  ;;  %v337_v43 = vpop.f32.mrb[35].mxu0  ;;  %v14186_v23 = vld [vmem:[%s20764_s3 + $0x124] ss:$24 sps:$4 sm:$0xff]  }
 0x140   :  { %v377_v6 = vmax.f32 %v266_v20, 0.0  ;;  %v14199_v43 = vld [vmem:[%s20764_s3 + $0x630] ss:$24 sps:$4 sm:$0xff]   ;;  %v14237_v20 = vld [vmem:[%s20764_s3 + $0x754] ss:$24 sps:$4 sm:$0xff]  }
 0x141   :  { %1629 = vmatmul.mubr.bf16.vlgmr.msra.gmra.mrb[60].mxu0 %v16304_v34 }
 0x142   :  { %835 = vmatpush1.bf16.msra.mxu1 %v14142_v27  ;;  %1975 = vmatpush1.bf16.msra.mxu0 %v14145_v28  ;;  %v16465_v47 = vpop.f32.mrb[36].mxu0  ;;  %v14184_v27 = vld [vmem:[%s20764_s3 + $0x120] ss:$24 sps:$4 sm:$0xff]  }
 0x143   :  { %1101 = vmatprep.subr.bf16.mxu1 %v14150_v30  ;;  %1976 = vmatprep.subr.bf16.mxu0 %v14153_v31  ;;  %v342_v50 = vpop.f32.mrb[37].mxu0  ;;  %v14192_v30 = vld [vmem:[%s20764_s3 + $0x154] ss:$24 sps:$4 sm:$0xff]   ;;  %v14195_v31 = vld [vmem:[%s20764_s3 + $0x604] ss:$24 sps:$4 sm:$0xff]  }
 0x144   :  { %2006 = vmatprep.mubr.bf16.mxu0 %v15807_v46  ;;  %v14210_v50 = vld [vmem:[%s20764_s3 + $0x74] ss:$24 sps:$4 sm:$0xff]  }
 0x145   :  { %853 = vmatmul.mubr.bf16.vlgmr.msra.gmra.mrb[8].mxu1 %v16217_v0  ;;  %v14165_v0 = vld [vmem:[%s20764_s3 + $0x51c] ss:$24 sps:$4 sm:$0xff]  }
 0x146   :  { %1102 = vmatpush1.bf16.msra.mxu1 %v14148_v33  ;;  %1977 = vmatpush1.bf16.msra.mxu0 %v14151_v35  ;;  %v16474_v52 = vpop.f32.mrb[38].mxu0  ;;  %v16548_v33 = vpack.c.bf16 %v377_v6, %v377_v6  ;;  %v14190_v35 = vld [vmem:[%s20764_s3 + $0x150] ss:$24 sps:$4 sm:$0xff]  }
 0x147   :  { %1103 = vmatprep.subr.bf16.mxu1 %v14156_v39  ;;  %1978 = vmatprep.subr.bf16.mxu0 %v14159_v40  ;;  %v347_v53 = vpop.f32.mrb[39].mxu0  ;;  %v14198_v39 = vld [vmem:[%s20764_s3 + $0x14] ss:$24 sps:$4 sm:$0xff]  }
 0x148   :  { %1133 = vmatprep.mubr.bf16.mxu1 %v15807_v46  ;;  %v14201_v40 = vld [vmem:[%s20764_s3 + $0x634] ss:$24 sps:$4 sm:$0xff]  }
 0x149   :  { %v14213_v53 = vld [vmem:[%s20764_s3 + $0x694] ss:$24 sps:$4 sm:$0xff]  }
 0x14a   :  { %1104 = vmatpush1.bf16.msra.mxu1 %v14154_v44  ;;  %1979 = vmatpush1.bf16.msra.mxu0 %v14157_v45  ;;  %v16482_v57 = vpop.f32.mrb[40].mxu0  ;;  %v14204_v44 = vld [vmem:[%s20764_s3 + $0x44] ss:$24 sps:$4 sm:$0xff]  }
 0x14b   :  { %1105 = vmatprep.subr.bf16.mxu1 %v14162_v48  ;;  %1980 = vmatprep.subr.bf16.mxu0 %v14165_v0  ;;  %v352_v61 = vpop.f32.mrb[41].mxu0  ;;  %v14207_v45 = vld [vmem:[%s20764_s3 + $0x664] ss:$24 sps:$4 sm:$0xff]   ;;  %v14202_v48 = vld [vmem:[%s20764_s3 + $0x40] ss:$24 sps:$4 sm:$0xff]  }
 0x14c   :  { %v14205_v0 = vld [vmem:[%s20764_s3 + $0x660] ss:$24 sps:$4 sm:$0xff]  }
 0x14d   :  { %v14214_v61 = vld [vmem:[%s20764_s3 + $0xa0] ss:$24 sps:$4 sm:$0xff]  }
 0x14e   :  { %1106 = vmatpush1.bf16.msra.mxu1 %v14160_v54  ;;  %1981 = vmatpush1.bf16.msra.mxu0 %v14163_v55  ;;  %v16496_v2 = vpop.f32.mrb[42].mxu0  ;;  %v14208_v54 = vld [vmem:[%s20764_s3 + $0x70] ss:$24 sps:$4 sm:$0xff]  }
 0x14f   :  { %1107 = vmatprep.subr.bf16.mxu1 %v14168_v59  ;;  %1982 = vmatprep.subr.bf16.mxu0 %v14171_v60  ;;  %v357_v7 = vpop.f32.mrb[43].mxu0  ;;  %v14211_v55 = vld [vmem:[%s20764_s3 + $0x690] ss:$24 sps:$4 sm:$0xff]   ;;  %v14216_v59 = vld [vmem:[%s20764_s3 + $0xa4] ss:$24 sps:$4 sm:$0xff]  }
 0x150   :  { %v14219_v60 = vld [vmem:[%s20764_s3 + $0x6c4] ss:$24 sps:$4 sm:$0xff]   ;;  %v14223_v7 = vld [vmem:[%s20764_s3 + $0x6f0] ss:$24 sps:$4 sm:$0xff]  }
 0x152   :  { %1108 = vmatpush1.bf16.msra.mxu1 %v14166_v63  ;;  %1983 = vmatpush1.bf16.msra.mxu0 %v14169_v1  ;;  %v16510_v11 = vpop.f32.mrb[44].mxu0  ;;  %v14217_v63 = vld [vmem:[%s20764_s3 + $0x6c0] ss:$24 sps:$4 sm:$0xff]   ;;  %v14222_v1 = vld [vmem:[%s20764_s3 + $0xd4] ss:$24 sps:$4 sm:$0xff]  }
 0x153   :  { %1109 = vmatprep.subr.bf16.mxu1 %v14174_v4  ;;  %1984 = vmatprep.subr.bf16.mxu0 %v14177_v5  ;;  %v362_v16 = vpop.f32.mrb[45].mxu0  ;;  %v14225_v4 = vld [vmem:[%s20764_s3 + $0x6f4] ss:$24 sps:$4 sm:$0xff]   ;;  %v14220_v5 = vld [vmem:[%s20764_s3 + $0xd0] ss:$24 sps:$4 sm:$0xff]  }
 0x154   :  { %v16635_v16 = vld [vmem:[%s20765_s2] ss:$0 sm:$0xff] }
 0x156   :  { %1110 = vmatpush1.bf16.msra.mxu1 %v14172_v9  ;;  %1985 = vmatpush1.bf16.msra.mxu0 %v14175_v10  ;;  %v16526_v22 = vpop.f32.mrb[46].mxu0  ;;  %v14228_v9 = vld [vmem:[%s20764_s3 + $0x104] ss:$24 sps:$4 sm:$0xff]  }
 0x157   :  { %1111 = vmatprep.subr.bf16.mxu1 %v14180_v14  ;;  %1986 = vmatprep.subr.bf16.mxu0 %v14183_v15  ;;  %v367_v26 = vpop.f32.mrb[47].mxu0  ;;  %v14231_v10 = vld [vmem:[%s20764_s3 + $0x724] ss:$24 sps:$4 sm:$0xff]   ;;  %v14226_v14 = vld [vmem:[%s20764_s3 + $0x100] ss:$24 sps:$4 sm:$0xff]  }
 0x158   :  { %v14229_v15 = vld [vmem:[%s20764_s3 + $0x720] ss:$24 sps:$4 sm:$0xff]   ;;  %v14240_v26 = vld [vmem:[%s20764_s3 + $0x164] ss:$24 sps:$4 sm:$0xff]  }
 0x15a   :  { %1112 = vmatpush1.bf16.msra.mxu1 %v14178_v18  ;;  %1987 = vmatpush1.bf16.msra.mxu0 %v14181_v19  ;;  %v16540_v28 = vpop.f32.mrb[48].mxu0  ;;  %v271_v18 = vadd.f32 %v16635_v16, %v16247_v12  ;;  %v14234_v19 = vld [vmem:[%s20764_s3 + $0x134] ss:$24 sps:$4 sm:$0xff]   ;;  %v14235_v12 = vld [vmem:[%s20764_s3 + $0x750] ss:$24 sps:$4 sm:$0xff]  }
 0x15b   :  { %1113 = vmatprep.subr.bf16.mxu1 %v14186_v23  ;;  %1988 = vmatprep.subr.bf16.mxu0 %v14189_v24  ;;  %v372_v32 = vpop.f32.mrb[49].mxu0  ;;  %v14232_v23 = vld [vmem:[%s20764_s3 + $0x130] ss:$24 sps:$4 sm:$0xff]  }
 0x15c   :  { %v378_v24 = vmax.f32 %v271_v18, 0.0  ;;  %v14249_v32 = vld [vmem:[%s20764_s3 + $0x644] ss:$24 sps:$4 sm:$0xff]  }
 0x15d   :  { %v14291_v18 = vld [vmem:[%s20764_s3 + $0x78c] ss:$24 sps:$4 sm:$0xff]  }
 0x15e   :  { %1114 = vmatpush1.bf16.msra.mxu1 %v14184_v27  ;;  %1989 = vmatpush1.bf16.msra.mxu0 %v14187_v49  ;;  %v14243_v27 = vld [vmem:[%s20764_s3 + $0x614] ss:$24 sps:$4 sm:$0xff]   ;;  %v14238_v49 = vld [vmem:[%s20764_s3 + $0x160] ss:$24 sps:$4 sm:$0xff]   ;;  %v16660_v6 = vpack.c.bf16 %v378_v24, %v378_v24 }
 0x15f   :  { %1115 = vmatprep.subr.bf16.mxu1 %v14192_v30  ;;  %2352 = vmatprep.subr.bf16.mxu0 %v14195_v31  ;;  %v14241_v30 = vld [vmem:[%s20764_s3 + $0x610] ss:$24 sps:$4 sm:$0xff]   ;;  %v14246_v31 = vld [vmem:[%s20764_s3 + $0x30c] ss:$24 sps:$4 sm:$0xff]   ;;  %v14292_v24 = vld [vmem:[%s20764_s3 + $0x480] ss:$24 sps:$4 sm:$0xff]  }
 0x161   :  { %2007 = vmatmul.mubr.bf16.vlgmr.msra.gmra.mrb[64].mxu0 %v16548_v33 }
 0x162   :  { %1116 = vmatpush1.bf16.msra.mxu1 %v14190_v35  ;;  %2353 = vmatpush1.bf16.msra.mxu0 %v14193_v37  ;;  %v14244_v35 = vld [vmem:[%s20764_s3 + $0x308] ss:$24 sps:$4 sm:$0xff]  }
 0x163   :  { %1183 = vmatprep.subr.bf16.mxu1 %v14198_v39  ;;  %2354 = vmatprep.subr.bf16.mxu0 %v14201_v40  ;;  %v14247_v37 = vld [vmem:[%s20764_s3 + $0x640] ss:$24 sps:$4 sm:$0xff]   ;;  %v14252_v39 = vld [vmem:[%s20764_s3 + $0x33c] ss:$24 sps:$4 sm:$0xff]  }
 0x164   :  { %2384 = vmatprep.mubr.bf16.mxu0 %v15807_v46  ;;  %v14255_v40 = vld [vmem:[%s20764_s3 + $0x674] ss:$24 sps:$4 sm:$0xff]  }
 0x165   :  { %1134 = vmatmul.mubr.bf16.vlgmr.msra.gmra.mrb[12].mxu1 %v16203_v56 }
 0x166   :  { %1184 = vmatpush1.bf16.msra.mxu1 %v14196_v41  ;;  %2355 = vmatpush1.bf16.msra.mxu0 %v14199_v43  ;;  %v14250_v41 = vld [vmem:[%s20764_s3 + $0x338] ss:$24 sps:$4 sm:$0xff]  }
 0x167   :  { %1185 = vmatprep.subr.bf16.mxu1 %v14204_v44  ;;  %2356 = vmatprep.subr.bf16.mxu0 %v14207_v45  ;;  %v14253_v43 = vld [vmem:[%s20764_s3 + $0x670] ss:$24 sps:$4 sm:$0xff]   ;;  %v14258_v44 = vld [vmem:[%s20764_s3 + $0x36c] ss:$24 sps:$4 sm:$0xff]  }
 0x168   :  { %1215 = vmatprep.mubr.bf16.mxu1 %v15807_v46  ;;  %v14256_v45 = vld [vmem:[%s20764_s3 + $0x368] ss:$24 sps:$4 sm:$0xff]  }
 0x16a   :  { %1186 = vmatpush1.bf16.msra.mxu1 %v14202_v48  ;;  %2357 = vmatpush1.bf16.msra.mxu0 %v14205_v0  ;;  %v14259_v48 = vld [vmem:[%s20764_s3 + $0x6a0] ss:$24 sps:$4 sm:$0xff]   ;;  %v14264_v0 = vld [vmem:[%s20764_s3 + $0x39c] ss:$24 sps:$4 sm:$0xff]  }
 0x16b   :  { %1187 = vmatprep.subr.bf16.mxu1 %v14210_v50  ;;  %2358 = vmatprep.subr.bf16.mxu0 %v14213_v53  ;;  %v14267_v50 = vld [vmem:[%s20764_s3 + $0x6d4] ss:$24 sps:$4 sm:$0xff]   ;;  %v14262_v53 = vld [vmem:[%s20764_s3 + $0x398] ss:$24 sps:$4 sm:$0xff]  }
 0x16e   :  { %1188 = vmatpush1.bf16.msra.mxu1 %v14208_v54  ;;  %2359 = vmatpush1.bf16.msra.mxu0 %v14211_v55  ;;  %v14265_v54 = vld [vmem:[%s20764_s3 + $0x6d0] ss:$24 sps:$4 sm:$0xff]   ;;  %v14270_v55 = vld [vmem:[%s20764_s3 + $0x3cc] ss:$24 sps:$4 sm:$0xff]  }
 0x16f   :  { %1189 = vmatprep.subr.bf16.mxu1 %v14216_v59  ;;  %2360 = vmatprep.subr.bf16.mxu0 %v14219_v60  ;;  %v14273_v59 = vld [vmem:[%s20764_s3 + $0x704] ss:$24 sps:$4 sm:$0xff]   ;;  %v14268_v60 = vld [vmem:[%s20764_s3 + $0x3c8] ss:$24 sps:$4 sm:$0xff]  }
 0x172   :  { %1190 = vmatpush1.bf16.msra.mxu1 %v14214_v61  ;;  %2361 = vmatpush1.bf16.msra.mxu0 %v14217_v63  ;;  %v14271_v61 = vld [vmem:[%s20764_s3 + $0x700] ss:$24 sps:$4 sm:$0xff]   ;;  %v14276_v63 = vld [vmem:[%s20764_s3 + $0x3fc] ss:$24 sps:$4 sm:$0xff]  }
 0x173   :  { %1191 = vmatprep.subr.bf16.mxu1 %v14222_v1  ;;  %2362 = vmatprep.subr.bf16.mxu0 %v14225_v4  ;;  %v14279_v1 = vld [vmem:[%s20764_s3 + $0x734] ss:$24 sps:$4 sm:$0xff]   ;;  %v14274_v4 = vld [vmem:[%s20764_s3 + $0x3f8] ss:$24 sps:$4 sm:$0xff]  }
 0x176   :  { %1192 = vmatpush1.bf16.msra.mxu1 %v14220_v5  ;;  %2363 = vmatpush1.bf16.msra.mxu0 %v14223_v7  ;;  %v14277_v5 = vld [vmem:[%s20764_s3 + $0x730] ss:$24 sps:$4 sm:$0xff]   ;;  %v14282_v7 = vld [vmem:[%s20764_s3 + $0x42c] ss:$24 sps:$4 sm:$0xff]  }
 0x177   :  { %1193 = vmatprep.subr.bf16.mxu1 %v14228_v9  ;;  %2364 = vmatprep.subr.bf16.mxu0 %v14231_v10  ;;  %v14285_v9 = vld [vmem:[%s20764_s3 + $0x764] ss:$24 sps:$4 sm:$0xff]   ;;  %v14280_v10 = vld [vmem:[%s20764_s3 + $0x428] ss:$24 sps:$4 sm:$0xff]  }
 0x17a   :  { %1194 = vmatpush1.bf16.msra.mxu1 %v14226_v14  ;;  %2365 = vmatpush1.bf16.msra.mxu0 %v14229_v15  ;;  %v14283_v14 = vld [vmem:[%s20764_s3 + $0x760] ss:$24 sps:$4 sm:$0xff]   ;;  %v14288_v15 = vld [vmem:[%s20764_s3 + $0x45c] ss:$24 sps:$4 sm:$0xff]  }
 0x17b   :  { %1195 = vmatprep.subr.bf16.mxu1 %v14234_v19  ;;  %2366 = vmatprep.subr.bf16.mxu0 %v14237_v20  ;;  %v14286_v19 = vld [vmem:[%s20764_s3 + $0x458] ss:$24 sps:$4 sm:$0xff]   ;;  %v14289_v20 = vld [vmem:[%s20764_s3 + $0x788] ss:$24 sps:$4 sm:$0xff]  }
 0x17e   :  { %1196 = vmatpush1.bf16.msra.mxu1 %v14232_v23  ;;  %2367 = vmatpush1.bf16.msra.mxu0 %v14235_v12  ;;  %v14294_v23 = vld [vmem:[%s20764_s3 + $0x484] ss:$24 sps:$4 sm:$0xff]  }
 0x17f   :  { %1197 = vmatprep.subr.bf16.mxu1 %v14240_v26  ;;  %2434 = vmatprep.subr.bf16.mxu0 %v14243_v27  ;;  %v14297_v12 = vld [vmem:[%s20764_s3 + $0x7bc] ss:$24 sps:$4 sm:$0xff]   ;;  %v14295_v26 = vld [vmem:[%s20764_s3 + $0x7b8] ss:$24 sps:$4 sm:$0xff]  }
 0x180   :  { %v14300_v27 = vld [vmem:[%s20764_s3 + $0x4b4] ss:$24 sps:$4 sm:$0xff]  }
 0x181   :  { %2385 = vmatmul.mubr.bf16.vlgmr.msra.gmra.mrb[68].mxu0 %v16660_v6 }
 0x182   :  { %1198 = vmatpush1.bf16.msra.mxu1 %v14238_v49  ;;  %2435 = vmatpush1.bf16.msra.mxu0 %v14241_v30  ;;  %v14303_v49 = vld [vmem:[%s20764_s3 + $0x7ec] ss:$24 sps:$4 sm:$0xff]   ;;  %v14298_v30 = vld [vmem:[%s20764_s3 + $0x4b0] ss:$24 sps:$4 sm:$0xff]  }
 0x183   :  { %1555 = vmatprep.subr.bf16.mxu1 %v14246_v31  ;;  %2436 = vmatprep.subr.bf16.mxu0 %v14249_v32  ;;  %v14301_v31 = vld [vmem:[%s20764_s3 + $0x7e8] ss:$24 sps:$4 sm:$0xff]   ;;  %v14306_v32 = vld [vmem:[%s20764_s3 + $0x4e4] ss:$24 sps:$4 sm:$0xff]  }
 0x184   :  { %2466 = vmatprep.mubr.bf16.mxu0 %v15807_v46 }
 0x185   :  { %1216 = vmatmul.mubr.bf16.vlgmr.msra.gmra.mrb[16].mxu1 %v16203_v56  ;;  %v14261_v56 = vld [vmem:[%s20764_s3 + $0x6a4] ss:$24 sps:$4 sm:$0xff]  }
 0x186   :  { %1556 = vmatpush1.bf16.msra.mxu1 %v14244_v35  ;;  %2437 = vmatpush1.bf16.msra.mxu0 %v14247_v37  ;;  %v14304_v35 = vld [vmem:[%s20764_s3 + $0x4e0] ss:$24 sps:$4 sm:$0xff]  }
 0x187   :  { %1557 = vmatprep.subr.bf16.mxu1 %v14252_v39  ;;  %2438 = vmatprep.subr.bf16.mxu0 %v14255_v40  ;;  %v14307_v37 = vld [vmem:[%s20764_s3 + $0x818] ss:$24 sps:$4 sm:$0xff]   ;;  %v14312_v39 = vld [vmem:[%s20764_s3 + $0x514] ss:$24 sps:$4 sm:$0xff]  }
 0x188   :  { %1587 = vmatprep.mubr.bf16.mxu1 %v15807_v46  ;;  %v14315_v40 = vld [vmem:[%s20764_s3 + $0x84c] ss:$24 sps:$4 sm:$0xff]  }
 0x18a   :  { %1558 = vmatpush1.bf16.msra.mxu1 %v14250_v41  ;;  %2439 = vmatpush1.bf16.msra.mxu0 %v14253_v43  ;;  %v14310_v41 = vld [vmem:[%s20764_s3 + $0x510] ss:$24 sps:$4 sm:$0xff]  }
 0x18b   :  { %1559 = vmatprep.subr.bf16.mxu1 %v14258_v44  ;;  %2440 = vmatprep.subr.bf16.mxu0 %v14261_v56  ;;  %v14313_v43 = vld [vmem:[%s20764_s3 + $0x848] ss:$24 sps:$4 sm:$0xff]   ;;  %v14318_v44 = vld [vmem:[%s20764_s3 + $0x544] ss:$24 sps:$4 sm:$0xff]  }
 0x18c   :  { %v14321_v56 = vld [vmem:[%s20764_s3 + $0x87c] ss:$24 sps:$4 sm:$0xff]  }
 0x18e   :  { %1560 = vmatpush1.bf16.msra.mxu1 %v14256_v45  ;;  %2441 = vmatpush1.bf16.msra.mxu0 %v14259_v48  ;;  %v14316_v45 = vld [vmem:[%s20764_s3 + $0x540] ss:$24 sps:$4 sm:$0xff]  }
 0x18f   :  { %1561 = vmatprep.subr.bf16.mxu1 %v14264_v0  ;;  %2442 = vmatprep.subr.bf16.mxu0 %v14267_v50  ;;  %v14319_v48 = vld [vmem:[%s20764_s3 + $0x878] ss:$24 sps:$4 sm:$0xff]   ;;  %v14324_v0 = vld [vmem:[%s20764_s3 + $0x574] ss:$24 sps:$4 sm:$0xff]  }
 0x190   :  { %v14327_v50 = vld [vmem:[%s20764_s3 + $0x8ac] ss:$24 sps:$4 sm:$0xff]  }
 0x192   :  { %1562 = vmatpush1.bf16.msra.mxu1 %v14262_v53  ;;  %2443 = vmatpush1.bf16.msra.mxu0 %v14265_v54  ;;  %v14322_v53 = vld [vmem:[%s20764_s3 + $0x570] ss:$24 sps:$4 sm:$0xff]  }
 0x193   :  { %1563 = vmatprep.subr.bf16.mxu1 %v14270_v55  ;;  %2444 = vmatprep.subr.bf16.mxu0 %v14273_v59  ;;  %v14325_v54 = vld [vmem:[%s20764_s3 + $0x8a8] ss:$24 sps:$4 sm:$0xff]   ;;  %v276_v55 = vadd.f32 %v16635_v16, %v16352_v51  ;;  %v14330_v59 = vld [vmem:[%s20764_s3 + $0x5a4] ss:$24 sps:$4 sm:$0xff]   ;;  %v14331_v51 = vld [vmem:[%s20764_s3 + $0x8d8] ss:$24 sps:$4 sm:$0xff]  }
 0x196   :  { %1564 = vmatpush1.bf16.msra.mxu1 %v14268_v60  ;;  %2445 = vmatpush1.bf16.msra.mxu0 %v14271_v61  ;;  %v14333_v60 = vld [vmem:[%s20764_s3 + $0x8dc] ss:$24 sps:$4 sm:$0xff]   ;;  %v14328_v61 = vld [vmem:[%s20764_s3 + $0x5a0] ss:$24 sps:$4 sm:$0xff]  }
 0x197   :  { %1565 = vmatprep.subr.bf16.mxu1 %v14276_v63  ;;  %2446 = vmatprep.subr.bf16.mxu0 %v14279_v1  ;;  %v379_v63 = vmax.f32 %v276_v55, 0.0  ;;  %v14336_v1 = vld [vmem:[%s20764_s3 + $0x5d4] ss:$24 sps:$4 sm:$0xff]  }
 0x198   :  { %v14381_v55 = vld [vmem:[%s20764_s3 + $0xa54] ss:$24 sps:$4 sm:$0xff]  }
 0x19a   :  { %1566 = vmatpush1.bf16.msra.mxu1 %v14274_v4  ;;  %2447 = vmatpush1.bf16.msra.mxu0 %v14277_v5  ;;  %v14339_v4 = vld [vmem:[%s20764_s3 + $0x904] ss:$24 sps:$4 sm:$0xff]   ;;  %v14334_v5 = vld [vmem:[%s20764_s3 + $0x5d0] ss:$24 sps:$4 sm:$0xff]  }
 0x19b   :  { %1567 = vmatprep.subr.bf16.mxu1 %v14282_v7  ;;  %2448 = vmatprep.subr.bf16.mxu0 %v14285_v9  ;;  %v16864_v7 = vpack.c.bf16 %v379_v63, %v379_v63  ;;  %v14337_v9 = vld [vmem:[%s20764_s3 + $0x900] ss:$24 sps:$4 sm:$0xff]  }
 0x19e   :  { %1568 = vmatpush1.bf16.msra.mxu1 %v14280_v10  ;;  %2449 = vmatpush1.bf16.msra.mxu0 %v14283_v14  ;;  %v14342_v10 = vld [vmem:[%s20764_s3 + $0x494] ss:$24 sps:$4 sm:$0xff]  }
 0x19f   :  { %1569 = vmatprep.subr.bf16.mxu1 %v14288_v15  ;;  %2812 = vmatprep.subr.bf16.mxu0 %v14291_v18  ;;  %v14345_v14 = vld [vmem:[%s20764_s3 + $0x934] ss:$24 sps:$4 sm:$0xff]   ;;  %v14340_v15 = vld [vmem:[%s20764_s3 + $0x490] ss:$24 sps:$4 sm:$0xff]  }
 0x1a0   :  { %v14343_v18 = vld [vmem:[%s20764_s3 + $0x930] ss:$24 sps:$4 sm:$0xff]  }
 0x1a1   :  { %2467 = vmatmul.mubr.bf16.vlgmr.msra.gmra.mrb[72].mxu0 %v16660_v6 }
 0x1a2   :  { %1570 = vmatpush1.bf16.msra.mxu1 %v14286_v19  ;;  %2813 = vmatpush1.bf16.msra.mxu0 %v14289_v20  ;;  %v14348_v19 = vld [vmem:[%s20764_s3 + $0x4c4] ss:$24 sps:$4 sm:$0xff]  }
 0x1a3   :  { %1933 = vmatprep.subr.bf16.mxu1 %v14294_v23  ;;  %2814 = vmatprep.subr.bf16.mxu0 %v14297_v12  ;;  %v14351_v20 = vld [vmem:[%s20764_s3 + $0x964] ss:$24 sps:$4 sm:$0xff]   ;;  %v14346_v23 = vld [vmem:[%s20764_s3 + $0x4c0] ss:$24 sps:$4 sm:$0xff]  }
 0x1a4   :  { %2844 = vmatprep.mubr.bf16.mxu0 %v15807_v46  ;;  %v14349_v12 = vld [vmem:[%s20764_s3 + $0x960] ss:$24 sps:$4 sm:$0xff]  }
 0x1a5   :  { %1588 = vmatmul.mubr.bf16.vlgmr.msra.gmra.mrb[20].mxu1 %v16304_v34  ;;  %v14309_v34 = vld [vmem:[%s20764_s3 + $0x81c] ss:$24 sps:$4 sm:$0xff]  }
 0x1a6   :  { %1934 = vmatpush1.bf16.msra.mxu1 %v14292_v24  ;;  %2815 = vmatpush1.bf16.msra.mxu0 %v14295_v26  ;;  %v14354_v24 = vld [vmem:[%s20764_s3 + $0x4f4] ss:$24 sps:$4 sm:$0xff]  }
 0x1a7   :  { %1935 = vmatprep.subr.bf16.mxu1 %v14300_v27  ;;  %2816 = vmatprep.subr.bf16.mxu0 %v14303_v49  ;;  %v14357_v26 = vld [vmem:[%s20764_s3 + $0x994] ss:$24 sps:$4 sm:$0xff]   ;;  %v14352_v27 = vld [vmem:[%s20764_s3 + $0x4f0] ss:$24 sps:$4 sm:$0xff]  }
 0x1a8   :  { %1965 = vmatprep.mubr.bf16.mxu1 %v15807_v46  ;;  %v14355_v49 = vld [vmem:[%s20764_s3 + $0x990] ss:$24 sps:$4 sm:$0xff]  }
 0x1aa   :  { %1936 = vmatpush1.bf16.msra.mxu1 %v14298_v30  ;;  %2817 = vmatpush1.bf16.msra.mxu0 %v14301_v31  ;;  %v14360_v30 = vld [vmem:[%s20764_s3 + $0x524] ss:$24 sps:$4 sm:$0xff]  }
 0x1ab   :  { %1937 = vmatprep.subr.bf16.mxu1 %v14306_v32  ;;  %2818 = vmatprep.subr.bf16.mxu0 %v14309_v34  ;;  %v14363_v31 = vld [vmem:[%s20764_s3 + $0x9c4] ss:$24 sps:$4 sm:$0xff]   ;;  %v14358_v32 = vld [vmem:[%s20764_s3 + $0x520] ss:$24 sps:$4 sm:$0xff]  }
 0x1ac   :  { %v14361_v34 = vld [vmem:[%s20764_s3 + $0x9c0] ss:$24 sps:$4 sm:$0xff]  }
 0x1ae   :  { %1938 = vmatpush1.bf16.msra.mxu1 %v14304_v35  ;;  %2819 = vmatpush1.bf16.msra.mxu0 %v14307_v37  ;;  %v14366_v35 = vld [vmem:[%s20764_s3 + $0x554] ss:$24 sps:$4 sm:$0xff]  }
 0x1af   :  { %1939 = vmatprep.subr.bf16.mxu1 %v14312_v39  ;;  %2820 = vmatprep.subr.bf16.mxu0 %v14315_v40  ;;  %v14369_v37 = vld [vmem:[%s20764_s3 + $0x9f4] ss:$24 sps:$4 sm:$0xff]   ;;  %v14364_v39 = vld [vmem:[%s20764_s3 + $0x550] ss:$24 sps:$4 sm:$0xff]  }
 0x1b0   :  { %v14367_v40 = vld [vmem:[%s20764_s3 + $0x9f0] ss:$24 sps:$4 sm:$0xff]  }
 0x1b2   :  { %1940 = vmatpush1.bf16.msra.mxu1 %v14310_v41  ;;  %2821 = vmatpush1.bf16.msra.mxu0 %v14313_v43  ;;  %v14372_v41 = vld [vmem:[%s20764_s3 + $0x584] ss:$24 sps:$4 sm:$0xff]  }
 0x1b3   :  { %1941 = vmatprep.subr.bf16.mxu1 %v14318_v44  ;;  %2822 = vmatprep.subr.bf16.mxu0 %v14321_v56  ;;  %v14375_v43 = vld [vmem:[%s20764_s3 + $0xa24] ss:$24 sps:$4 sm:$0xff]   ;;  %v14370_v56 = vld [vmem:[%s20764_s3 + $0x580] ss:$24 sps:$4 sm:$0xff]  }
 0x1b6   :  { %1942 = vmatpush1.bf16.msra.mxu1 %v14316_v45  ;;  %2823 = vmatpush1.bf16.msra.mxu0 %v14319_v48  ;;  %v14373_v45 = vld [vmem:[%s20764_s3 + $0xa20] ss:$24 sps:$4 sm:$0xff]   ;;  %v281_v48 = vadd.f32 %v16635_v16, %v16366_v58  ;;  %v14376_v58 = vld [vmem:[%s20764_s3 + $0x5b0] ss:$24 sps:$4 sm:$0xff]  }
 0x1b7   :  { %1943 = vmatprep.subr.bf16.mxu1 %v14324_v0  ;;  %2824 = vmatprep.subr.bf16.mxu0 %v14327_v50  ;;  %v14379_v16 = vld [vmem:[%s20764_s3 + $0xa50] ss:$24 sps:$4 sm:$0xff]  }
 0x1ba   :  { %1944 = vmatpush1.bf16.msra.mxu1 %v14322_v53  ;;  %2825 = vmatpush1.bf16.msra.mxu0 %v14325_v54  ;;  %v14378_v54 = vld [vmem:[%s20764_s3 + $0x5b4] ss:$24 sps:$4 sm:$0xff]  }
 0x1bb   :  { %1945 = vmatprep.subr.bf16.mxu1 %v14330_v59  ;;  %2826 = vmatprep.subr.bf16.mxu0 %v14333_v60  ;;  %v380_v60 = vmax.f32 %v281_v48, 0.0 }
 0x1be   :  { %1946 = vmatpush1.bf16.msra.mxu1 %v14328_v61  ;;  %2827 = vmatpush1.bf16.msra.mxu0 %v14331_v51 }
 0x1bf   :  { %1947 = vmatprep.subr.bf16.mxu1 %v14336_v1  ;;  %3190 = vmatprep.subr.bf16.mxu0 %v14339_v4  ;;  %v14384_v1 = vld [vmem:[%s20764_s3 + $0x5e4] ss:$24 sps:$4 sm:$0xff]   ;;  %v14387_v4 = vld [vmem:[%s20764_s3 + $0x914] ss:$24 sps:$4 sm:$0xff]  }
 0x1c1   :  { %2845 = vmatmul.mubr.bf16.vlgmr.msra.gmra.mrb[76].mxu0 %v16864_v7 }
 0x1c2   :  { %1948 = vmatpush1.bf16.msra.mxu1 %v14334_v5  ;;  %3191 = vmatpush1.bf16.msra.mxu0 %v14337_v9  ;;  %v14382_v5 = vld [vmem:[%s20764_s3 + $0x5e0] ss:$24 sps:$4 sm:$0xff]   ;;  %v16976_v9 = vpack.c.bf16 %v380_v60, %v380_v60 }
 0x1c3   :  { %2015 = vmatprep.subr.bf16.mxu1 %v14342_v10  ;;  %3192 = vmatprep.subr.bf16.mxu0 %v14345_v14  ;;  %v14385_v10 = vld [vmem:[%s20764_s3 + $0x910] ss:$24 sps:$4 sm:$0xff]   ;;  %v14390_v14 = vld [vmem:[%s20764_s3 + $0x60c] ss:$24 sps:$4 sm:$0xff]  }
 0x1c4   :  { %3222 = vmatprep.mubr.bf16.mxu0 %v15807_v46  ;;  %v14424_v60 = vld [vmem:[%s20764_s3 + $0x728] ss:$24 sps:$4 sm:$0xff]  }
 0x1c5   :  { %1966 = vmatmul.mubr.bf16.vlgmr.msra.gmra.mrb[24].mxu1 %v16548_v33 }
 0x1c6   :  { %2016 = vmatpush1.bf16.msra.mxu1 %v14340_v15  ;;  %3193 = vmatpush1.bf16.msra.mxu0 %v14343_v18  ;;  %v14393_v15 = vld [vmem:[%s20764_s3 + $0x944] ss:$24 sps:$4 sm:$0xff]   ;;  %v14388_v18 = vld [vmem:[%s20764_s3 + $0x608] ss:$24 sps:$4 sm:$0xff]  }
 0x1c7   :  { %2017 = vmatprep.subr.bf16.mxu1 %v14348_v19  ;;  %3194 = vmatprep.subr.bf16.mxu0 %v14351_v20  ;;  %v14391_v19 = vld [vmem:[%s20764_s3 + $0x940] ss:$24 sps:$4 sm:$0xff]   ;;  %v14396_v20 = vld [vmem:[%s20764_s3 + $0x63c] ss:$24 sps:$4 sm:$0xff]  }
 0x1c8   :  { %2047 = vmatprep.mubr.bf16.mxu1 %v15807_v46 }
 0x1ca   :  { %2018 = vmatpush1.bf16.msra.mxu1 %v14346_v23  ;;  %3195 = vmatpush1.bf16.msra.mxu0 %v14349_v12  ;;  %v14399_v23 = vld [vmem:[%s20764_s3 + $0x974] ss:$24 sps:$4 sm:$0xff]   ;;  %v14394_v12 = vld [vmem:[%s20764_s3 + $0x638] ss:$24 sps:$4 sm:$0xff]  }
 0x1cb   :  { %2019 = vmatprep.subr.bf16.mxu1 %v14354_v24  ;;  %3196 = vmatprep.subr.bf16.mxu0 %v14357_v26  ;;  %v14397_v24 = vld [vmem:[%s20764_s3 + $0x970] ss:$24 sps:$4 sm:$0xff]   ;;  %v14402_v26 = vld [vmem:[%s20764_s3 + $0x66c] ss:$24 sps:$4 sm:$0xff]  }
 0x1ce   :  { %2020 = vmatpush1.bf16.msra.mxu1 %v14352_v27  ;;  %3197 = vmatpush1.bf16.msra.mxu0 %v14355_v49  ;;  %v14400_v27 = vld [vmem:[%s20764_s3 + $0x668] ss:$24 sps:$4 sm:$0xff]  }
 0x1cf   :  { %2021 = vmatprep.subr.bf16.mxu1 %v14360_v30  ;;  %3198 = vmatprep.subr.bf16.mxu0 %v14363_v31  ;;  %v14403_v49 = vld [vmem:[%s20764_s3 + $0x9a0] ss:$24 sps:$4 sm:$0xff]   ;;  %v14408_v30 = vld [vmem:[%s20764_s3 + $0x69c] ss:$24 sps:$4 sm:$0xff]  }
 0x1d0   :  { %v14411_v31 = vld [vmem:[%s20764_s3 + $0x9d4] ss:$24 sps:$4 sm:$0xff]  }
 0x1d2   :  { %2022 = vmatpush1.bf16.msra.mxu1 %v14358_v32  ;;  %3199 = vmatpush1.bf16.msra.mxu0 %v14361_v34  ;;  %v14406_v32 = vld [vmem:[%s20764_s3 + $0x698] ss:$24 sps:$4 sm:$0xff]  }
 0x1d3   :  { %2023 = vmatprep.subr.bf16.mxu1 %v14366_v35  ;;  %3200 = vmatprep.subr.bf16.mxu0 %v14369_v37  ;;  %v14409_v34 = vld [vmem:[%s20764_s3 + $0x9d0] ss:$24 sps:$4 sm:$0xff]   ;;  %v14414_v35 = vld [vmem:[%s20764_s3 + $0x6cc] ss:$24 sps:$4 sm:$0xff]  }
 0x1d4   :  { %v16939_v44 = vpop.f32.mrb[52].mxu0  ;;  %v14417_v37 = vld [vmem:[%s20764_s3 + $0xa04] ss:$24 sps:$4 sm:$0xff]  }
 0x1d5   :  { %v16949_v0 = vpop.f32.mrb[53].mxu0 }
 0x1d6   :  { %2024 = vmatpush1.bf16.msra.mxu1 %v14364_v39  ;;  %3201 = vmatpush1.bf16.msra.mxu0 %v14367_v40  ;;  %v1180_v50 = vpop.f32.mrb[54].mxu0  ;;  %v14412_v39 = vld [vmem:[%s20764_s3 + $0x6c8] ss:$24 sps:$4 sm:$0xff]  }
 0x1d7   :  { %v1181_v53 = vpop.f32.mrb[55].mxu0  ;;  %2025 = vmatprep.subr.bf16.mxu1 %v14372_v41  ;;  %3202 = vmatprep.subr.bf16.mxu0 %v14375_v43  ;;  %v14415_v40 = vld [vmem:[%s20764_s3 + $0xa00] ss:$24 sps:$4 sm:$0xff]   ;;  %v14420_v41 = vld [vmem:[%s20764_s3 + $0x6fc] ss:$24 sps:$4 sm:$0xff]  }
 0x1d8   :  { %v16957_v59 = vpop.f32.mrb[0].mxu1  ;;  %v14423_v43 = vld [vmem:[%s20764_s3 + $0xa34] ss:$24 sps:$4 sm:$0xff]  }
 0x1d9   :  { %v16965_v61 = vpop.f32.mrb[1].mxu1 }
 0x1da   :  { %2026 = vmatpush1.bf16.msra.mxu1 %v14370_v56  ;;  %3203 = vmatpush1.bf16.msra.mxu0 %v14373_v45  ;;  %v776_v51 = vpop.f32.mrb[2].mxu1  ;;  %v14418_v56 = vld [vmem:[%s20764_s3 + $0x6f8] ss:$24 sps:$4 sm:$0xff]  }
 0x1db   :  { %v777_v63 = vpop.f32.mrb[3].mxu1  ;;  %2027 = vmatprep.subr.bf16.mxu1 %v14378_v54  ;;  %3204 = vmatprep.subr.bf16.mxu0 %v14381_v55  ;;  %v14421_v45 = vld [vmem:[%s20764_s3 + $0xa30] ss:$24 sps:$4 sm:$0xff]   ;;  %v14426_v54 = vld [vmem:[%s20764_s3 + $0x72c] ss:$24 sps:$4 sm:$0xff]  }
 0x1dc   :  { %v14429_v55 = vld [vmem:[%s20764_s3 + $0xa64] ss:$24 sps:$4 sm:$0xff]   ;;  %v14427_v51 = vld [vmem:[%s20764_s3 + $0xa60] ss:$24 sps:$4 sm:$0xff]  }
 0x1de   :  { %2028 = vmatpush1.bf16.msra.mxu1 %v14376_v58  ;;  %3205 = vmatpush1.bf16.msra.mxu0 %v14379_v16 }
 0x1df   :  { %2029 = vmatprep.subr.bf16.mxu1 %v14384_v1  ;;  %3272 = vmatprep.subr.bf16.mxu0 %v14387_v4 }
 0x1e1   :  { %3223 = vmatmul.mubr.bf16.vlgmr.msra.gmra.mrb[80].mxu0 %v16976_v9 }
 0x1e2   :  { %2030 = vmatpush1.bf16.msra.mxu1 %v14382_v5  ;;  %3273 = vmatpush1.bf16.msra.mxu0 %v14385_v10 }
 0x1e3   :  { %2393 = vmatprep.subr.bf16.mxu1 %v14390_v14  ;;  %3274 = vmatprep.subr.bf16.mxu0 %v14393_v15  ;;  %v14432_v14 = vld [vmem:[%s20764_s3 + $0x75c] ss:$24 sps:$4 sm:$0xff]   ;;  %v14435_v15 = vld [vmem:[%s20764_s3 + $0xa8c] ss:$24 sps:$4 sm:$0xff]  }
 0x1e4   :  { %3304 = vmatprep.mubr.bf16.mxu0 %v15807_v46 }
 0x1e5   :  { %2048 = vmatmul.mubr.bf16.vlgmr.msra.gmra.mrb[28].mxu1 %v16548_v33  ;;  %v14405_v33 = vld [vmem:[%s20764_s3 + $0x9a4] ss:$24 sps:$4 sm:$0xff]  }
 0x1e6   :  { %2394 = vmatpush1.bf16.msra.mxu1 %v14388_v18  ;;  %3275 = vmatpush1.bf16.msra.mxu0 %v14391_v19  ;;  %v14438_v18 = vld [vmem:[%s20764_s3 + $0x784] ss:$24 sps:$4 sm:$0xff]  }
 0x1e7   :  { %2395 = vmatprep.subr.bf16.mxu1 %v14396_v20  ;;  %3276 = vmatprep.subr.bf16.mxu0 %v14399_v23  ;;  %v14441_v19 = vld [vmem:[%s20764_s3 + $0xabc] ss:$24 sps:$4 sm:$0xff]   ;;  %v14436_v20 = vld [vmem:[%s20764_s3 + $0x780] ss:$24 sps:$4 sm:$0xff]  }
 0x1e8   :  { %2425 = vmatprep.mubr.bf16.mxu1 %v15807_v46  ;;  %v14439_v23 = vld [vmem:[%s20764_s3 + $0xab8] ss:$24 sps:$4 sm:$0xff]  }
 0x1ea   :  { %2396 = vmatpush1.bf16.msra.mxu1 %v14394_v12  ;;  %3277 = vmatpush1.bf16.msra.mxu0 %v14397_v24  ;;  %v14444_v12 = vld [vmem:[%s20764_s3 + $0x7b4] ss:$24 sps:$4 sm:$0xff]  }
 0x1eb   :  { %2397 = vmatprep.subr.bf16.mxu1 %v14402_v26  ;;  %3278 = vmatprep.subr.bf16.mxu0 %v14405_v33  ;;  %v14447_v24 = vld [vmem:[%s20764_s3 + $0xaec] ss:$24 sps:$4 sm:$0xff]   ;;  %v14442_v26 = vld [vmem:[%s20764_s3 + $0x7b0] ss:$24 sps:$4 sm:$0xff]  }
 0x1ec   :  { %v14445_v33 = vld [vmem:[%s20764_s3 + $0xae8] ss:$24 sps:$4 sm:$0xff]  }
 0x1ee   :  { %2398 = vmatpush1.bf16.msra.mxu1 %v14400_v27  ;;  %3279 = vmatpush1.bf16.msra.mxu0 %v14403_v49  ;;  %v14450_v27 = vld [vmem:[%s20764_s3 + $0x7e4] ss:$24 sps:$4 sm:$0xff]   ;;  %v14448_v49 = vld [vmem:[%s20764_s3 + $0x7e0] ss:$24 sps:$4 sm:$0xff]  }
 0x1ef   :  { %2399 = vmatprep.subr.bf16.mxu1 %v14408_v30  ;;  %3280 = vmatprep.subr.bf16.mxu0 %v14411_v31  ;;  %v14451_v30 = vld [vmem:[%s20764_s3 + $0xb18] ss:$24 sps:$4 sm:$0xff]   ;;  %v14456_v31 = vld [vmem:[%s20764_s3 + $0x814] ss:$24 sps:$4 sm:$0xff]  }
 0x1f2   :  { %2400 = vmatpush1.bf16.msra.mxu1 %v14406_v32  ;;  %3281 = vmatpush1.bf16.msra.mxu0 %v14409_v34  ;;  %v14459_v32 = vld [vmem:[%s20764_s3 + $0xb4c] ss:$24 sps:$4 sm:$0xff]   ;;  %v14454_v34 = vld [vmem:[%s20764_s3 + $0x810] ss:$24 sps:$4 sm:$0xff]  }
 0x1f3   :  { %2401 = vmatprep.subr.bf16.mxu1 %v14414_v35  ;;  %3282 = vmatprep.subr.bf16.mxu0 %v14417_v37  ;;  %v14457_v35 = vld [vmem:[%s20764_s3 + $0xb48] ss:$24 sps:$4 sm:$0xff]   ;;  %v14462_v37 = vld [vmem:[%s20764_s3 + $0x844] ss:$24 sps:$4 sm:$0xff]  }
 0x1f4   :  { %v17057_v48 = vpop.f32.mrb[56].mxu0 }
 0x1f5   :  { %v17059_v50 = vpop.f32.mrb[57].mxu0 }
 0x1f6   :  { %2402 = vmatpush1.bf16.msra.mxu1 %v14412_v39  ;;  %3283 = vmatpush1.bf16.msra.mxu0 %v14415_v40  ;;  %v1552_v53 = vpop.f32.mrb[58].mxu0  ;;  %v14465_v39 = vld [vmem:[%s20764_s3 + $0xb7c] ss:$24 sps:$4 sm:$0xff]   ;;  %v14460_v40 = vld [vmem:[%s20764_s3 + $0x840] ss:$24 sps:$4 sm:$0xff]  }
 0x1f7   :  { %2403 = vmatprep.subr.bf16.mxu1 %v14420_v41  ;;  %3284 = vmatprep.subr.bf16.mxu0 %v14423_v43  ;;  %v1553_v58 = vpop.f32.mrb[59].mxu0  ;;  %v14463_v41 = vld [vmem:[%s20764_s3 + $0xb78] ss:$24 sps:$4 sm:$0xff]   ;;  %v14468_v43 = vld [vmem:[%s20764_s3 + $0x874] ss:$24 sps:$4 sm:$0xff]  }
 0x1f8   :  { %v813_v16 = vpop.f32.mrb[4].mxu1  ;;  %v14469_v53 = vld [vmem:[%s20764_s3 + $0xba8] ss:$24 sps:$4 sm:$0xff]  }
 0x1f9   :  { %v17074_v63 = vadd.f32 %v16939_v44, %v813_v16  ;;  %v815_v1 = vpop.f32.mrb[5].mxu1  ;;  %v14430_v44 = vld [vmem:[%s20764_s3 + $0x758] ss:$24 sps:$4 sm:$0xff]   ;;  %v17174_v58 = vld [vmem:[%s20765_s2] ss:$0 sm:$0xff] }
 0x1fa   :  { %v17077_v4 = vadd.f32 %v16949_v0, %v815_v1  ;;  %v817_v5 = vpop.f32.mrb[6].mxu1  ;;  %2404 = vmatpush1.bf16.msra.mxu1 %v14418_v56  ;;  %3285 = vmatpush1.bf16.msra.mxu0 %v14421_v45  ;;  %v14433_v0 = vld [vmem:[%s20764_s3 + $0xa88] ss:$24 sps:$4 sm:$0xff]   ;;  %v14471_v56 = vld [vmem:[%s20764_s3 + $0xbac] ss:$24 sps:$4 sm:$0xff]   ;;  %v286_v16 = vadd.f32 %v17174_v58, %v16374_v62 }
 0x1fb   :  { %v818_v10 = vpop.f32.mrb[7].mxu1  ;;  %2405 = vmatprep.subr.bf16.mxu1 %v14426_v54  ;;  %3286 = vmatprep.subr.bf16.mxu0 %v14429_v55  ;;  %v14466_v45 = vld [vmem:[%s20764_s3 + $0x870] ss:$24 sps:$4 sm:$0xff]   ;;  %v14477_v1 = vld [vmem:[%s20764_s3 + $0xbdc] ss:$24 sps:$4 sm:$0xff]  }
 0x1fc   :  { %v14472_v62 = vld [vmem:[%s20764_s3 + $0x8a0] ss:$24 sps:$4 sm:$0xff]  }
 0x1fe   :  { %2406 = vmatpush1.bf16.msra.mxu1 %v14424_v60  ;;  %3287 = vmatpush1.bf16.msra.mxu0 %v14427_v51  ;;  %v14474_v51 = vld [vmem:[%s20764_s3 + $0x8a4] ss:$24 sps:$4 sm:$0xff]  }
 0x1ff   :  { %2407 = vmatprep.subr.bf16.mxu1 %v14432_v14  ;;  %3650 = vmatprep.subr.bf16.mxu0 %v14435_v15  ;;  %v14475_v14 = vld [vmem:[%s20764_s3 + $0xbd8] ss:$24 sps:$4 sm:$0xff]  }
 0x201   :  { %3305 = vmatmul.mubr.bf16.vlgmr.msra.gmra.mrb[84].mxu0 %v16976_v9 }
 0x202   :  { %2408 = vmatpush1.bf16.msra.mxu1 %v14430_v44  ;;  %3651 = vmatpush1.bf16.msra.mxu0 %v14433_v0  ;;  %v381_v44 = vmax.f32 %v286_v16, 0.0  ;;  %v14508_v16 = vld [vmem:[%s20764_s3 + $0x850] ss:$24 sps:$4 sm:$0xff]  }
 0x203   :  { %2771 = vmatprep.subr.bf16.mxu1 %v14438_v18  ;;  %3652 = vmatprep.subr.bf16.mxu0 %v14441_v19  ;;  %v14480_v19 = vld [vmem:[%s20764_s3 + $0x8d4] ss:$24 sps:$4 sm:$0xff]  }
 0x204   :  { %3682 = vmatprep.mubr.bf16.mxu0 %v15807_v46 }
 0x205   :  { %2426 = vmatmul.mubr.bf16.vlgmr.msra.gmra.mrb[32].mxu1 %v16660_v6  ;;  %v14453_v6 = vld [vmem:[%s20764_s3 + $0xb1c] ss:$24 sps:$4 sm:$0xff]  }
 0x206   :  { %2772 = vmatpush1.bf16.msra.mxu1 %v14436_v20  ;;  %3653 = vmatpush1.bf16.msra.mxu0 %v14439_v23  ;;  %v14483_v20 = vld [vmem:[%s20764_s3 + $0xc04] ss:$24 sps:$4 sm:$0xff]   ;;  %v14478_v23 = vld [vmem:[%s20764_s3 + $0x8d0] ss:$24 sps:$4 sm:$0xff]  }
 0x207   :  { %2773 = vmatprep.subr.bf16.mxu1 %v14444_v12  ;;  %3654 = vmatprep.subr.bf16.mxu0 %v14447_v24  ;;  %v14481_v12 = vld [vmem:[%s20764_s3 + $0xc00] ss:$24 sps:$4 sm:$0xff]   ;;  %v14486_v24 = vld [vmem:[%s20764_s3 + $0x794] ss:$24 sps:$4 sm:$0xff]  }
 0x208   :  { %2803 = vmatprep.mubr.bf16.mxu1 %v15807_v46 }
 0x20a   :  { %2774 = vmatpush1.bf16.msra.mxu1 %v14442_v26  ;;  %3655 = vmatpush1.bf16.msra.mxu0 %v14445_v33  ;;  %v17209_v26 = vpack.c.bf16 %v381_v44, %v381_v44  ;;  %v14489_v33 = vld [vmem:[%s20764_s3 + $0xc34] ss:$24 sps:$4 sm:$0xff]  }
 0x20b   :  { %2775 = vmatprep.subr.bf16.mxu1 %v14450_v27  ;;  %3656 = vmatprep.subr.bf16.mxu0 %v14453_v6  ;;  %v14484_v27 = vld [vmem:[%s20764_s3 + $0x790] ss:$24 sps:$4 sm:$0xff]  }
 0x20c   :  { %v14487_v6 = vld [vmem:[%s20764_s3 + $0xc30] ss:$24 sps:$4 sm:$0xff]  }
 0x20e   :  { %2776 = vmatpush1.bf16.msra.mxu1 %v14448_v49  ;;  %3657 = vmatpush1.bf16.msra.mxu0 %v14451_v30  ;;  %v14492_v49 = vld [vmem:[%s20764_s3 + $0x7c4] ss:$24 sps:$4 sm:$0xff]  }
 0x20f   :  { %2777 = vmatprep.subr.bf16.mxu1 %v14456_v31  ;;  %3658 = vmatprep.subr.bf16.mxu0 %v14459_v32  ;;  %v14495_v30 = vld [vmem:[%s20764_s3 + $0xc64] ss:$24 sps:$4 sm:$0xff]   ;;  %v14490_v31 = vld [vmem:[%s20764_s3 + $0x7c0] ss:$24 sps:$4 sm:$0xff]  }
 0x210   :  { %v14493_v32 = vld [vmem:[%s20764_s3 + $0xc60] ss:$24 sps:$4 sm:$0xff]  }
 0x212   :  { %2778 = vmatpush1.bf16.msra.mxu1 %v14454_v34  ;;  %3659 = vmatpush1.bf16.msra.mxu0 %v14457_v35  ;;  %v14498_v34 = vld [vmem:[%s20764_s3 + $0x7f4] ss:$24 sps:$4 sm:$0xff]  }
 0x213   :  { %2779 = vmatprep.subr.bf16.mxu1 %v14462_v37  ;;  %3660 = vmatprep.subr.bf16.mxu0 %v14465_v39  ;;  %v14501_v35 = vld [vmem:[%s20764_s3 + $0xc94] ss:$24 sps:$4 sm:$0xff]   ;;  %v14496_v37 = vld [vmem:[%s20764_s3 + $0x7f0] ss:$24 sps:$4 sm:$0xff]  }
 0x214   :  { %v17167_v54 = vpop.f32.mrb[60].mxu0  ;;  %v14499_v39 = vld [vmem:[%s20764_s3 + $0xc90] ss:$24 sps:$4 sm:$0xff]  }
 0x215   :  { %v17169_v55 = vpop.f32.mrb[61].mxu0 }
 0x216   :  { %2780 = vmatpush1.bf16.msra.mxu1 %v14460_v40  ;;  %3661 = vmatpush1.bf16.msra.mxu0 %v14463_v41  ;;  %v1634_v60 = vpop.f32.mrb[62].mxu0  ;;  %v14504_v40 = vld [vmem:[%s20764_s3 + $0x824] ss:$24 sps:$4 sm:$0xff]  }
 0x217   :  { %2781 = vmatprep.subr.bf16.mxu1 %v14468_v43  ;;  %3662 = vmatprep.subr.bf16.mxu0 %v14471_v56  ;;  %v1635_v5 = vpop.f32.mrb[63].mxu0  ;;  %v14507_v41 = vld [vmem:[%s20764_s3 + $0xcc4] ss:$24 sps:$4 sm:$0xff]   ;;  %v14502_v43 = vld [vmem:[%s20764_s3 + $0x820] ss:$24 sps:$4 sm:$0xff]  }
 0x218   :  { %v17184_v10 = vpop.f32.mrb[8].mxu1  ;;  %v14505_v56 = vld [vmem:[%s20764_s3 + $0xcc0] ss:$24 sps:$4 sm:$0xff]   ;;  %v14511_v60 = vld [vmem:[%s20764_s3 + $0xcf0] ss:$24 sps:$4 sm:$0xff]  }
 0x219   :  { %v17192_v15 = vpop.f32.mrb[9].mxu1  ;;  %v14514_v5 = vld [vmem:[%s20764_s3 + $0x880] ss:$24 sps:$4 sm:$0xff]  }
 0x21a   :  { %v858_v0 = vpop.f32.mrb[10].mxu1  ;;  %2782 = vmatpush1.bf16.msra.mxu1 %v14466_v45  ;;  %3663 = vmatpush1.bf16.msra.mxu0 %v14469_v53  ;;  %v14510_v45 = vld [vmem:[%s20764_s3 + $0x854] ss:$24 sps:$4 sm:$0xff]  }
 0x21b   :  { %v859_v18 = vpop.f32.mrb[11].mxu1  ;;  %2783 = vmatprep.subr.bf16.mxu1 %v14474_v51  ;;  %3664 = vmatprep.subr.bf16.mxu0 %v14477_v1  ;;  %v14513_v53 = vld [vmem:[%s20764_s3 + $0xcf4] ss:$24 sps:$4 sm:$0xff]   ;;  %v14516_v51 = vld [vmem:[%s20764_s3 + $0x884] ss:$24 sps:$4 sm:$0xff]   ;;  %v291_v0 = vadd.f32 %v17174_v58, %v16382_v3 }
 0x21c   :  { %v14519_v1 = vld [vmem:[%s20764_s3 + $0xd24] ss:$24 sps:$4 sm:$0xff]   ;;  %v14523_v3 = vld [vmem:[%s20764_s3 + $0xd50] ss:$24 sps:$4 sm:$0xff]  }
 0x21e   :  { %2784 = vmatpush1.bf16.msra.mxu1 %v14472_v62  ;;  %3665 = vmatpush1.bf16.msra.mxu0 %v14475_v14  ;;  %v14517_v62 = vld [vmem:[%s20764_s3 + $0xd20] ss:$24 sps:$4 sm:$0xff]  }
 0x21f   :  { %2785 = vmatprep.subr.bf16.mxu1 %v14480_v19  ;;  %4028 = vmatprep.subr.bf16.mxu0 %v14483_v20  ;;  %v14522_v19 = vld [vmem:[%s20764_s3 + $0x8b4] ss:$24 sps:$4 sm:$0xff]  }
 0x220   :  { %v14525_v20 = vld [vmem:[%s20764_s3 + $0xd54] ss:$24 sps:$4 sm:$0xff]  }
 0x221   :  { %3683 = vmatmul.mubr.bf16.vlgmr.msra.gmra.mrb[88].mxu0 %v17209_v26 }
 0x222   :  { %2786 = vmatpush1.bf16.msra.mxu1 %v14478_v23  ;;  %4029 = vmatpush1.bf16.msra.mxu0 %v14481_v12 }
 0x223   :  { %2853 = vmatprep.subr.bf16.mxu1 %v14486_v24  ;;  %4030 = vmatprep.subr.bf16.mxu0 %v14489_v33  ;;  %v14520_v24 = vld [vmem:[%s20764_s3 + $0x8b0] ss:$24 sps:$4 sm:$0xff]  }
 0x224   :  { %4060 = vmatprep.mubr.bf16.mxu0 %v15807_v46 }
 0x225   :  { %2804 = vmatmul.mubr.bf16.vlgmr.msra.gmra.mrb[36].mxu1 %v16864_v7 }
 0x226   :  { %2854 = vmatpush1.bf16.msra.mxu1 %v14484_v27  ;;  %4031 = vmatpush1.bf16.msra.mxu0 %v14487_v6  ;;  %v382_v6 = vmax.f32 %v291_v0, 0.0  ;;  %v14553_v0 = vld [vmem:[%s20764_s3 + $0xcd0] ss:$24 sps:$4 sm:$0xff]  }
 0x227   :  { %2855 = vmatprep.subr.bf16.mxu1 %v14492_v49  ;;  %4032 = vmatprep.subr.bf16.mxu0 %v14495_v30 }
 0x228   :  { %2885 = vmatprep.mubr.bf16.mxu1 %v15807_v46 }
 0x22a   :  { %2856 = vmatpush1.bf16.msra.mxu1 %v14490_v31  ;;  %4033 = vmatpush1.bf16.msra.mxu0 %v14493_v32 }
 0x22b   :  { %2857 = vmatprep.subr.bf16.mxu1 %v14498_v34  ;;  %4034 = vmatprep.subr.bf16.mxu0 %v14501_v35  ;;  %v14528_v34 = vld [vmem:[%s20764_s3 + $0x8e4] ss:$24 sps:$4 sm:$0xff]  }
 0x22e   :  { %2858 = vmatpush1.bf16.msra.mxu1 %v14496_v37  ;;  %4035 = vmatpush1.bf16.msra.mxu0 %v14499_v39  ;;  %v14534_v37 = vld [vmem:[%s20764_s3 + $0x90c] ss:$24 sps:$4 sm:$0xff]   ;;  %v17325_v39 = vpack.c.bf16 %v382_v6, %v382_v6  ;;  %v14565_v6 = vld [vmem:[%s20764_s3 + $0xd30] ss:$24 sps:$4 sm:$0xff]  }
 0x22f   :  { %2859 = vmatprep.subr.bf16.mxu1 %v14504_v40  ;;  %4036 = vmatprep.subr.bf16.mxu0 %v14507_v41  ;;  %v14532_v40 = vld [vmem:[%s20764_s3 + $0x908] ss:$24 sps:$4 sm:$0xff]  }
 0x230   :  { %v14535_v41 = vld [vmem:[%s20764_s3 + $0xc40] ss:$24 sps:$4 sm:$0xff]  }
 0x232   :  { %2860 = vmatpush1.bf16.msra.mxu1 %v14502_v43  ;;  %4037 = vmatpush1.bf16.msra.mxu0 %v14505_v56  ;;  %v14540_v43 = vld [vmem:[%s20764_s3 + $0x93c] ss:$24 sps:$4 sm:$0xff]  }
 0x233   :  { %2861 = vmatprep.subr.bf16.mxu1 %v14510_v45  ;;  %4038 = vmatprep.subr.bf16.mxu0 %v14513_v53  ;;  %v14543_v56 = vld [vmem:[%s20764_s3 + $0xc74] ss:$24 sps:$4 sm:$0xff]   ;;  %v14538_v45 = vld [vmem:[%s20764_s3 + $0x938] ss:$24 sps:$4 sm:$0xff]  }
 0x234   :  { %v17284_v14 = vpop.f32.mrb[64].mxu0  ;;  %v14541_v53 = vld [vmem:[%s20764_s3 + $0xc70] ss:$24 sps:$4 sm:$0xff]  }
 0x235   :  { %v17286_v44 = vpop.f32.mrb[65].mxu0 }
 0x236   :  { %2862 = vmatpush1.bf16.msra.mxu1 %v14508_v16  ;;  %4039 = vmatpush1.bf16.msra.mxu0 %v14511_v60  ;;  %v2012_v18 = vpop.f32.mrb[66].mxu0  ;;  %v14546_v16 = vld [vmem:[%s20764_s3 + $0x96c] ss:$24 sps:$4 sm:$0xff]   ;;  %v14544_v60 = vld [vmem:[%s20764_s3 + $0x968] ss:$24 sps:$4 sm:$0xff]  }
 0x237   :  { %2863 = vmatprep.subr.bf16.mxu1 %v14516_v51  ;;  %4040 = vmatprep.subr.bf16.mxu0 %v14519_v1  ;;  %v2013_v23 = vpop.f32.mrb[67].mxu0  ;;  %v14547_v51 = vld [vmem:[%s20764_s3 + $0xca0] ss:$24 sps:$4 sm:$0xff]   ;;  %v14552_v1 = vld [vmem:[%s20764_s3 + $0x99c] ss:$24 sps:$4 sm:$0xff]  }
 0x238   :  { %v1135_v12 = vpop.f32.mrb[12].mxu1  ;;  %v14558_v18 = vld [vmem:[%s20764_s3 + $0x9cc] ss:$24 sps:$4 sm:$0xff]   ;;  %v14559_v23 = vld [vmem:[%s20764_s3 + $0xd00] ss:$24 sps:$4 sm:$0xff]  }
 0x239   :  { %v1136_v33 = vadd.f32 %v1135_v12, %v16957_v59  ;;  %v1137_v27 = vpop.f32.mrb[13].mxu1  ;;  %v14531_v59 = vld [vmem:[%s20764_s3 + $0xc14] ss:$24 sps:$4 sm:$0xff]  }
 0x23a   :  { %v1138_v49 = vadd.f32 %v1137_v27, %v16965_v61  ;;  %v1139_v30 = vpop.f32.mrb[14].mxu1  ;;  %2864 = vmatpush1.bf16.msra.mxu1 %v14514_v5  ;;  %4041 = vmatpush1.bf16.msra.mxu0 %v14517_v62  ;;  %v14526_v61 = vld [vmem:[%s20764_s3 + $0x8e0] ss:$24 sps:$4 sm:$0xff]   ;;  %v14555_v5 = vld [vmem:[%s20764_s3 + $0xcd4] ss:$24 sps:$4 sm:$0xff]  }
 0x23b   :  { %v17305_v31 = vadd.f32 %v17057_v48, %v1136_v33  ;;  %v1140_v32 = vpop.f32.mrb[15].mxu1  ;;  %2865 = vmatprep.subr.bf16.mxu1 %v14522_v19  ;;  %4042 = vmatprep.subr.bf16.mxu0 %v14525_v20  ;;  %v14529_v48 = vld [vmem:[%s20764_s3 + $0xc10] ss:$24 sps:$4 sm:$0xff]   ;;  %v14561_v19 = vld [vmem:[%s20764_s3 + $0xd04] ss:$24 sps:$4 sm:$0xff]  }
 0x23c   :  { %v17314_v35 = vadd.f32 %v17059_v50, %v1138_v49  ;;  %v14537_v50 = vld [vmem:[%s20764_s3 + $0xc44] ss:$24 sps:$4 sm:$0xff]   ;;  %v14550_v62 = vld [vmem:[%s20764_s3 + $0x998] ss:$24 sps:$4 sm:$0xff]   ;;  %v14556_v20 = vld [vmem:[%s20764_s3 + $0x9c8] ss:$24 sps:$4 sm:$0xff]  }
 0x23d   :  { %v14564_v12 = vld [vmem:[%s20764_s3 + $0x9fc] ss:$24 sps:$4 sm:$0xff]   ;;  %v14562_v27 = vld [vmem:[%s20764_s3 + $0x9f8] ss:$24 sps:$4 sm:$0xff]   ;;  %v14570_v30 = vld [vmem:[%s20764_s3 + $0xa2c] ss:$24 sps:$4 sm:$0xff]  }
 0x23e   :  { %2866 = vmatpush1.bf16.msra.mxu1 %v14520_v24  ;;  %4043 = vmatpush1.bf16.msra.mxu0 %v14523_v3  ;;  %v14567_v24 = vld [vmem:[%s20764_s3 + $0xd34] ss:$24 sps:$4 sm:$0xff]   ;;  %v14573_v32 = vld [vmem:[%s20764_s3 + $0xd64] ss:$24 sps:$4 sm:$0xff]  }
 0x23f   :  { %2867 = vmatprep.subr.bf16.mxu1 %v14528_v34  ;;  %4110 = vmatprep.subr.bf16.mxu0 %v14531_v59 }
 0x241   :  { %4061 = vmatmul.mubr.bf16.vlgmr.msra.gmra.mrb[92].mxu0 %v17325_v39 }
 0x242   :  { %2868 = vmatpush1.bf16.msra.mxu1 %v14526_v61  ;;  %4111 = vmatpush1.bf16.msra.mxu0 %v14529_v48 }
 0x243   :  { %3231 = vmatprep.subr.bf16.mxu1 %v14534_v37  ;;  %4112 = vmatprep.subr.bf16.mxu0 %v14537_v50 }
 0x244   :  { %4142 = vmatprep.mubr.bf16.mxu0 %v15807_v46 }
 0x245   :  { %2886 = vmatmul.mubr.bf16.vlgmr.msra.gmra.mrb[40].mxu1 %v16864_v7  ;;  %v14549_v7 = vld [vmem:[%s20764_s3 + $0xca4] ss:$24 sps:$4 sm:$0xff]  }
 0x246   :  { %3232 = vmatpush1.bf16.msra.mxu1 %v14532_v40  ;;  %4113 = vmatpush1.bf16.msra.mxu0 %v14535_v41  ;;  %v14568_v40 = vld [vmem:[%s20764_s3 + $0xa28] ss:$24 sps:$4 sm:$0xff]  }
 0x247   :  { %3233 = vmatprep.subr.bf16.mxu1 %v14540_v43  ;;  %4114 = vmatprep.subr.bf16.mxu0 %v14543_v56  ;;  %v14571_v41 = vld [vmem:[%s20764_s3 + $0xd60] ss:$24 sps:$4 sm:$0xff]  }
 0x248   :  { %3263 = vmatprep.mubr.bf16.mxu1 %v15807_v46 }
 0x24a   :  { %3234 = vmatpush1.bf16.msra.mxu1 %v14538_v45  ;;  %4115 = vmatpush1.bf16.msra.mxu0 %v14541_v53  ;;  %v14577_v53 = vld [vmem:[%s20764_s3 + $0xd88] ss:$24 sps:$4 sm:$0xff]  }
 0x24b   :  { %3235 = vmatprep.subr.bf16.mxu1 %v14546_v16  ;;  %4116 = vmatprep.subr.bf16.mxu0 %v14549_v7  ;;  %v14582_v16 = vld [vmem:[%s20764_s3 + $0xa84] ss:$24 sps:$4 sm:$0xff]   ;;  %v14580_v7 = vld [vmem:[%s20764_s3 + $0xa80] ss:$24 sps:$4 sm:$0xff]  }
 0x24e   :  { %3236 = vmatpush1.bf16.msra.mxu1 %v14544_v60  ;;  %4117 = vmatpush1.bf16.msra.mxu0 %v14547_v51  ;;  %v14583_v60 = vld [vmem:[%s20764_s3 + $0xdb8] ss:$24 sps:$4 sm:$0xff]   ;;  %v14588_v51 = vld [vmem:[%s20764_s3 + $0xab4] ss:$24 sps:$4 sm:$0xff]  }
 0x24f   :  { %3237 = vmatprep.subr.bf16.mxu1 %v14552_v1  ;;  %4118 = vmatprep.subr.bf16.mxu0 %v14555_v5  ;;  %v14591_v1 = vld [vmem:[%s20764_s3 + $0xdec] ss:$24 sps:$4 sm:$0xff]   ;;  %v14586_v5 = vld [vmem:[%s20764_s3 + $0xab0] ss:$24 sps:$4 sm:$0xff]  }
 0x252   :  { %3238 = vmatpush1.bf16.msra.mxu1 %v14550_v62  ;;  %4119 = vmatpush1.bf16.msra.mxu0 %v14553_v0  ;;  %v14589_v62 = vld [vmem:[%s20764_s3 + $0xde8] ss:$24 sps:$4 sm:$0xff]   ;;  %v14594_v0 = vld [vmem:[%s20764_s3 + $0xae4] ss:$24 sps:$4 sm:$0xff]  }
 0x253   :  { %3239 = vmatprep.subr.bf16.mxu1 %v14558_v18  ;;  %4120 = vmatprep.subr.bf16.mxu0 %v14561_v19  ;;  %v14592_v18 = vld [vmem:[%s20764_s3 + $0xae0] ss:$24 sps:$4 sm:$0xff]  }
 0x254   :  { %v17394_v3 = vpop.f32.mrb[68].mxu0  ;;  %v14595_v19 = vld [vmem:[%s20764_s3 + $0xe18] ss:$24 sps:$4 sm:$0xff]  }
 0x255   :  { %v17396_v33 = vpop.f32.mrb[69].mxu0 }
 0x256   :  { %3240 = vmatpush1.bf16.msra.mxu1 %v14556_v20  ;;  %4121 = vmatpush1.bf16.msra.mxu0 %v14559_v23  ;;  %v2390_v49 = vpop.f32.mrb[70].mxu0  ;;  %v14600_v20 = vld [vmem:[%s20764_s3 + $0xb14] ss:$24 sps:$4 sm:$0xff]  }
 0x257   :  { %3241 = vmatprep.subr.bf16.mxu1 %v14564_v12  ;;  %4122 = vmatprep.subr.bf16.mxu0 %v14567_v24  ;;  %v2391_v34 = vpop.f32.mrb[71].mxu0  ;;  %v14603_v23 = vld [vmem:[%s20764_s3 + $0xe4c] ss:$24 sps:$4 sm:$0xff]   ;;  %v14598_v12 = vld [vmem:[%s20764_s3 + $0xb10] ss:$24 sps:$4 sm:$0xff]  }
 0x258   :  { %v1217_v59 = vpop.f32.mrb[16].mxu1  ;;  %v14601_v24 = vld [vmem:[%s20764_s3 + $0xe48] ss:$24 sps:$4 sm:$0xff]   ;;  %v14615_v34 = vld [vmem:[%s20764_s3 + $0xeac] ss:$24 sps:$4 sm:$0xff]  }
 0x259   :  { %v1218_v61 = vadd.f32 %v1217_v59, %v17184_v10  ;;  %v1219_v48 = vpop.f32.mrb[17].mxu1  ;;  %v14576_v10 = vld [vmem:[%s20764_s3 + $0xa5c] ss:$24 sps:$4 sm:$0xff]   ;;  %v14604_v49 = vld [vmem:[%s20764_s3 + $0xb40] ss:$24 sps:$4 sm:$0xff]  }
 0x25a   :  { %v1220_v37 = vadd.f32 %v1219_v48, %v17192_v15  ;;  %v1221_v50 = vpop.f32.mrb[18].mxu1  ;;  %3242 = vmatpush1.bf16.msra.mxu1 %v14562_v27  ;;  %4123 = vmatpush1.bf16.msra.mxu0 %v14565_v6  ;;  %v14579_v15 = vld [vmem:[%s20764_s3 + $0xd8c] ss:$24 sps:$4 sm:$0xff]   ;;  %v14609_v6 = vld [vmem:[%s20764_s3 + $0xe7c] ss:$24 sps:$4 sm:$0xff]  }
 0x25b   :  { %v17419_v43 = vadd.f32 %v17167_v54, %v1218_v61  ;;  %v1222_v56 = vpop.f32.mrb[19].mxu1  ;;  %3243 = vmatprep.subr.bf16.mxu1 %v14570_v30  ;;  %4124 = vmatprep.subr.bf16.mxu0 %v14573_v32  ;;  %v14574_v54 = vld [vmem:[%s20764_s3 + $0xa58] ss:$24 sps:$4 sm:$0xff]   ;;  %v14606_v27 = vld [vmem:[%s20764_s3 + $0xb44] ss:$24 sps:$4 sm:$0xff]  }
 0x25c   :  { %v17428_v45 = vadd.f32 %v17169_v55, %v1220_v37  ;;  %v14585_v55 = vld [vmem:[%s20764_s3 + $0xdbc] ss:$24 sps:$4 sm:$0xff]   ;;  %v14607_v30 = vld [vmem:[%s20764_s3 + $0xe78] ss:$24 sps:$4 sm:$0xff]   ;;  %v14613_v37 = vld [vmem:[%s20764_s3 + $0xea8] ss:$24 sps:$4 sm:$0xff]  }
 0x25d   :  { %v14612_v32 = vld [vmem:[%s20764_s3 + $0xb74] ss:$24 sps:$4 sm:$0xff]   ;;  %v14610_v48 = vld [vmem:[%s20764_s3 + $0xb70] ss:$24 sps:$4 sm:$0xff]  }
 0x25e   :  { %3244 = vmatpush1.bf16.msra.mxu1 %v14568_v40  ;;  %4125 = vmatpush1.bf16.msra.mxu0 %v14571_v41  ;;  %v296_v40 = vadd.f32 %v17174_v58, %v16390_v8  ;;  %v14618_v41 = vld [vmem:[%s20764_s3 + $0xba4] ss:$24 sps:$4 sm:$0xff]   ;;  %v14616_v8 = vld [vmem:[%s20764_s3 + $0xba0] ss:$24 sps:$4 sm:$0xff]  }
 0x25f   :  { %3245 = vmatprep.subr.bf16.mxu1 %v14576_v10  ;;  %4488 = vmatprep.subr.bf16.mxu0 %v14579_v15  ;;  %v14621_v56 = vld [vmem:[%s20764_s3 + $0xedc] ss:$24 sps:$4 sm:$0xff]  }
 0x261   :  { %4143 = vmatmul.mubr.bf16.vlgmr.msra.gmra.mrb[96].mxu0 %v17325_v39 }
 0x262   :  { %3246 = vmatpush1.bf16.msra.mxu1 %v14574_v54  ;;  %4489 = vmatpush1.bf16.msra.mxu0 %v14577_v53 }
 0x263   :  { %3609 = vmatprep.subr.bf16.mxu1 %v14582_v16  ;;  %4490 = vmatprep.subr.bf16.mxu0 %v14585_v55 }
 0x264   :  { %4520 = vmatprep.mubr.bf16.mxu0 %v15807_v46 }
 0x265   :  { %3264 = vmatmul.mubr.bf16.vlgmr.msra.gmra.mrb[44].mxu1 %v16976_v9  ;;  %v14597_v9 = vld [vmem:[%s20764_s3 + $0xe1c] ss:$24 sps:$4 sm:$0xff]  }
 0x266   :  { %3610 = vmatpush1.bf16.msra.mxu1 %v14580_v7  ;;  %4491 = vmatpush1.bf16.msra.mxu0 %v14583_v60  ;;  %v14619_v7 = vld [vmem:[%s20764_s3 + $0xed8] ss:$24 sps:$4 sm:$0xff]   ;;  %v383_v60 = vmax.f32 %v296_v40, 0.0  ;;  %v14657_v40 = vld [vmem:[%s20764_s3 + $0xff4] ss:$24 sps:$4 sm:$0xff]  }
 0x267   :  { %3611 = vmatprep.subr.bf16.mxu1 %v14588_v51  ;;  %4492 = vmatprep.subr.bf16.mxu0 %v14591_v1 }
 0x268   :  { %3641 = vmatprep.mubr.bf16.mxu1 %v15807_v46 }
 0x26a   :  { %3612 = vmatpush1.bf16.msra.mxu1 %v14586_v5  ;;  %4493 = vmatpush1.bf16.msra.mxu0 %v14589_v62  ;;  %v14625_v62 = vld [vmem:[%s20764_s3 + $0xf00] ss:$24 sps:$4 sm:$0xff]  }
 0x26b   :  { %3613 = vmatprep.subr.bf16.mxu1 %v14594_v0  ;;  %4494 = vmatprep.subr.bf16.mxu0 %v14597_v9  ;;  %v17550_v0 = vpack.c.bf16 %v383_v60, %v383_v60  ;;  %v14630_v9 = vld [vmem:[%s20764_s3 + $0xa94] ss:$24 sps:$4 sm:$0xff]  }
 0x26c   :  { %v14666_v60 = vld [vmem:[%s20764_s3 + $0xbb4] ss:$24 sps:$4 sm:$0xff]  }
 0x26e   :  { %3614 = vmatpush1.bf16.msra.mxu1 %v14592_v18  ;;  %4495 = vmatpush1.bf16.msra.mxu0 %v14595_v19  ;;  %v14628_v18 = vld [vmem:[%s20764_s3 + $0xa90] ss:$24 sps:$4 sm:$0xff]  }
 0x26f   :  { %3615 = vmatprep.subr.bf16.mxu1 %v14600_v20  ;;  %4496 = vmatprep.subr.bf16.mxu0 %v14603_v23  ;;  %v14631_v19 = vld [vmem:[%s20764_s3 + $0xf30] ss:$24 sps:$4 sm:$0xff]   ;;  %v14636_v20 = vld [vmem:[%s20764_s3 + $0xac4] ss:$24 sps:$4 sm:$0xff]  }
 0x270   :  { %v14639_v23 = vld [vmem:[%s20764_s3 + $0xf64] ss:$24 sps:$4 sm:$0xff]  }
 0x272   :  { %3616 = vmatpush1.bf16.msra.mxu1 %v14598_v12  ;;  %4497 = vmatpush1.bf16.msra.mxu0 %v14601_v24  ;;  %v14634_v12 = vld [vmem:[%s20764_s3 + $0xac0] ss:$24 sps:$4 sm:$0xff]  }
 0x273   :  { %3617 = vmatprep.subr.bf16.mxu1 %v14606_v27  ;;  %4498 = vmatprep.subr.bf16.mxu0 %v14609_v6  ;;  %v14637_v24 = vld [vmem:[%s20764_s3 + $0xf60] ss:$24 sps:$4 sm:$0xff]   ;;  %v14642_v27 = vld [vmem:[%s20764_s3 + $0xaf4] ss:$24 sps:$4 sm:$0xff]  }
 0x274   :  { %v17506_v59 = vpop.f32.mrb[72].mxu0  ;;  %v14645_v6 = vld [vmem:[%s20764_s3 + $0xf94] ss:$24 sps:$4 sm:$0xff]  }
 0x275   :  { %v17508_v61 = vpop.f32.mrb[73].mxu0 }
 0x276   :  { %3618 = vmatpush1.bf16.msra.mxu1 %v14604_v49  ;;  %4499 = vmatpush1.bf16.msra.mxu0 %v14607_v30  ;;  %v2472_v50 = vpop.f32.mrb[74].mxu0  ;;  %v14640_v49 = vld [vmem:[%s20764_s3 + $0xaf0] ss:$24 sps:$4 sm:$0xff]  }
 0x277   :  { %3619 = vmatprep.subr.bf16.mxu1 %v14612_v32  ;;  %4500 = vmatprep.subr.bf16.mxu0 %v14615_v34  ;;  %v2473_v10 = vpop.f32.mrb[75].mxu0  ;;  %v14643_v30 = vld [vmem:[%s20764_s3 + $0xf90] ss:$24 sps:$4 sm:$0xff]   ;;  %v14648_v32 = vld [vmem:[%s20764_s3 + $0xb24] ss:$24 sps:$4 sm:$0xff]  }
 0x278   :  { %v1589_v15 = vpop.f32.mrb[20].mxu1  ;;  %v14651_v34 = vld [vmem:[%s20764_s3 + $0xfc4] ss:$24 sps:$4 sm:$0xff]   ;;  %v14654_v50 = vld [vmem:[%s20764_s3 + $0xb54] ss:$24 sps:$4 sm:$0xff]  }
 0x279   :  { %v1639_v54 = vadd.f32 %v1589_v15, %v17074_v63  ;;  %v1591_v53 = vpop.f32.mrb[21].mxu1  ;;  %v14624_v63 = vld [vmem:[%s20764_s3 + $0xbd4] ss:$24 sps:$4 sm:$0xff]   ;;  %v14660_v10 = vld [vmem:[%s20764_s3 + $0xb84] ss:$24 sps:$4 sm:$0xff]  }
 0x27a   :  { %v1640_v16 = vadd.f32 %v1591_v53, %v17077_v4  ;;  %v1593_v55 = vpop.f32.mrb[22].mxu1  ;;  %3620 = vmatpush1.bf16.msra.mxu1 %v14610_v48  ;;  %4501 = vmatpush1.bf16.msra.mxu0 %v14613_v37  ;;  %v14627_v4 = vld [vmem:[%s20764_s3 + $0xf04] ss:$24 sps:$4 sm:$0xff]   ;;  %v14646_v48 = vld [vmem:[%s20764_s3 + $0xb20] ss:$24 sps:$4 sm:$0xff]  }
 0x27b   :  { %v17533_v51 = vadd.f32 %v17284_v14, %v1639_v54  ;;  %v1594_v1 = vpop.f32.mrb[23].mxu1  ;;  %3621 = vmatprep.subr.bf16.mxu1 %v14618_v41  ;;  %4502 = vmatprep.subr.bf16.mxu0 %v14621_v56  ;;  %v14622_v14 = vld [vmem:[%s20764_s3 + $0xbd0] ss:$24 sps:$4 sm:$0xff]   ;;  %v14649_v37 = vld [vmem:[%s20764_s3 + $0xfc0] ss:$24 sps:$4 sm:$0xff]  }
 0x27c   :  { %v17542_v5 = vadd.f32 %v17286_v44, %v1640_v16  ;;  %v14633_v44 = vld [vmem:[%s20764_s3 + $0xf34] ss:$24 sps:$4 sm:$0xff]   ;;  %v14652_v41 = vld [vmem:[%s20764_s3 + $0xb50] ss:$24 sps:$4 sm:$0xff]   ;;  %v14663_v15 = vld [vmem:[%s20764_s3 + $0x1024] ss:$24 sps:$4 sm:$0xff]  }
 0x27d   :  { %v14655_v56 = vld [vmem:[%s20764_s3 + $0xff0] ss:$24 sps:$4 sm:$0xff]   ;;  %v14658_v16 = vld [vmem:[%s20764_s3 + $0xb80] ss:$24 sps:$4 sm:$0xff]   ;;  %v14669_v1 = vld [vmem:[%s20764_s3 + $0x1054] ss:$24 sps:$4 sm:$0xff]  }
 0x27e   :  { %3622 = vmatpush1.bf16.msra.mxu1 %v14616_v8  ;;  %4503 = vmatpush1.bf16.msra.mxu0 %v14619_v7  ;;  %v14661_v55 = vld [vmem:[%s20764_s3 + $0x1020] ss:$24 sps:$4 sm:$0xff]   ;;  %v301_v7 = vadd.f32 %v17174_v58, %v16398_v13  ;;  %v14664_v13 = vld [vmem:[%s20764_s3 + $0xbb0] ss:$24 sps:$4 sm:$0xff]  }
 0x27f   :  { %3623 = vmatprep.subr.bf16.mxu1 %v14624_v63  ;;  %4866 = vmatprep.subr.bf16.mxu0 %v14627_v4  ;;  %v14667_v58 = vld [vmem:[%s20764_s3 + $0x1050] ss:$24 sps:$4 sm:$0xff]  }
 0x281   :  { %4521 = vmatmul.mubr.bf16.vlgmr.msra.gmra.mrb[100].mxu0 %v17550_v0 }
 0x282   :  { %3624 = vmatpush1.bf16.msra.mxu1 %v14622_v14  ;;  %4867 = vmatpush1.bf16.msra.mxu0 %v14625_v62 }
 0x283   :  { %3691 = vmatprep.subr.bf16.mxu1 %v14630_v9  ;;  %4868 = vmatprep.subr.bf16.mxu0 %v14633_v44 }
 0x284   :  { %4898 = vmatprep.mubr.bf16.mxu0 %v15807_v46 }
 0x285   :  { %3642 = vmatmul.mubr.bf16.vlgmr.msra.gmra.mrb[48].mxu1 %v17209_v26 }
 0x286   :  { %3692 = vmatpush1.bf16.msra.mxu1 %v14628_v18  ;;  %4869 = vmatpush1.bf16.msra.mxu0 %v14631_v19  ;;  %v384_v18 = vmax.f32 %v301_v7, 0.0  ;;  %v14703_v7 = vld [vmem:[%s20764_s3 + $0x1000] ss:$24 sps:$4 sm:$0xff]  }
 0x287   :  { %3693 = vmatprep.subr.bf16.mxu1 %v14636_v20  ;;  %4870 = vmatprep.subr.bf16.mxu0 %v14639_v23 }
 0x288   :  { %3723 = vmatprep.mubr.bf16.mxu1 %v15807_v46 }
 0x28a   :  { %3694 = vmatpush1.bf16.msra.mxu1 %v14634_v12  ;;  %4871 = vmatpush1.bf16.msra.mxu0 %v14637_v24  ;;  %v14673_v12 = vld [vmem:[%s20764_s3 + $0xf10] ss:$24 sps:$4 sm:$0xff]   ;;  %v17666_v24 = vpack.c.bf16 %v384_v18, %v384_v18 }
 0x28b   :  { %3695 = vmatprep.subr.bf16.mxu1 %v14642_v27  ;;  %4872 = vmatprep.subr.bf16.mxu0 %v14645_v6  ;;  %v14678_v27 = vld [vmem:[%s20764_s3 + $0xc0c] ss:$24 sps:$4 sm:$0xff]   ;;  %v14676_v6 = vld [vmem:[%s20764_s3 + $0xc08] ss:$24 sps:$4 sm:$0xff]  }
 0x28e   :  { %3696 = vmatpush1.bf16.msra.mxu1 %v14640_v49  ;;  %4873 = vmatpush1.bf16.msra.mxu0 %v14643_v30  ;;  %v14679_v49 = vld [vmem:[%s20764_s3 + $0xf40] ss:$24 sps:$4 sm:$0xff]   ;;  %v14684_v30 = vld [vmem:[%s20764_s3 + $0xc3c] ss:$24 sps:$4 sm:$0xff]  }
 0x28f   :  { %3697 = vmatprep.subr.bf16.mxu1 %v14648_v32  ;;  %4874 = vmatprep.subr.bf16.mxu0 %v14651_v34  ;;  %v14687_v32 = vld [vmem:[%s20764_s3 + $0xf74] ss:$24 sps:$4 sm:$0xff]   ;;  %v14682_v34 = vld [vmem:[%s20764_s3 + $0xc38] ss:$24 sps:$4 sm:$0xff]  }
 0x292   :  { %3698 = vmatpush1.bf16.msra.mxu1 %v14646_v48  ;;  %4875 = vmatpush1.bf16.msra.mxu0 %v14649_v37  ;;  %v14685_v48 = vld [vmem:[%s20764_s3 + $0xf70] ss:$24 sps:$4 sm:$0xff]   ;;  %v14690_v37 = vld [vmem:[%s20764_s3 + $0xc6c] ss:$24 sps:$4 sm:$0xff]  }
 0x293   :  { %3699 = vmatprep.subr.bf16.mxu1 %v14654_v50  ;;  %4876 = vmatprep.subr.bf16.mxu0 %v14657_v40  ;;  %v14688_v50 = vld [vmem:[%s20764_s3 + $0xc68] ss:$24 sps:$4 sm:$0xff]  }
 0x294   :  { %v17622_v54 = vpop.f32.mrb[76].mxu0  ;;  %v14691_v40 = vld [vmem:[%s20764_s3 + $0xfa0] ss:$24 sps:$4 sm:$0xff]  }
 0x295   :  { %v17624_v53 = vpop.f32.mrb[77].mxu0 }
 0x296   :  { %3700 = vmatpush1.bf16.msra.mxu1 %v14652_v41  ;;  %4877 = vmatpush1.bf16.msra.mxu0 %v14655_v56  ;;  %v2850_v8 = vpop.f32.mrb[78].mxu0  ;;  %v14696_v41 = vld [vmem:[%s20764_s3 + $0xc9c] ss:$24 sps:$4 sm:$0xff]  }
 0x297   :  { %3701 = vmatprep.subr.bf16.mxu1 %v14660_v10  ;;  %4878 = vmatprep.subr.bf16.mxu0 %v14663_v15  ;;  %v2851_v63 = vpop.f32.mrb[79].mxu0  ;;  %v14699_v56 = vld [vmem:[%s20764_s3 + $0xfd4] ss:$24 sps:$4 sm:$0xff]   ;;  %v14694_v10 = vld [vmem:[%s20764_s3 + $0xc98] ss:$24 sps:$4 sm:$0xff]  }
 0x298   :  { %v1967_v4 = vpop.f32.mrb[24].mxu1  ;;  %v14697_v15 = vld [vmem:[%s20764_s3 + $0xfd0] ss:$24 sps:$4 sm:$0xff]  }
 0x299   :  { %v2056_v14 = vadd.f32 %v1967_v4, %v17305_v31  ;;  %v1969_v62 = vpop.f32.mrb[25].mxu1  ;;  %v14672_v31 = vld [vmem:[%s20764_s3 + $0xbe4] ss:$24 sps:$4 sm:$0xff]   ;;  %v14700_v8 = vld [vmem:[%s20764_s3 + $0xcc8] ss:$24 sps:$4 sm:$0xff]  }
 0x29a   :  { %v2057_v9 = vadd.f32 %v1969_v62, %v17314_v35  ;;  %v1971_v44 = vpop.f32.mrb[26].mxu1  ;;  %3702 = vmatpush1.bf16.msra.mxu1 %v14658_v16  ;;  %4879 = vmatpush1.bf16.msra.mxu0 %v14661_v55  ;;  %v14675_v35 = vld [vmem:[%s20764_s3 + $0xf14] ss:$24 sps:$4 sm:$0xff]   ;;  %v14705_v55 = vld [vmem:[%s20764_s3 + $0x1004] ss:$24 sps:$4 sm:$0xff]  }
 0x29b   :  { %v17649_v19 = vadd.f32 %v17394_v3, %v2056_v14  ;;  %v1972_v20 = vpop.f32.mrb[27].mxu1  ;;  %3703 = vmatprep.subr.bf16.mxu1 %v14666_v60  ;;  %4880 = vmatprep.subr.bf16.mxu0 %v14669_v1  ;;  %v14670_v3 = vld [vmem:[%s20764_s3 + $0xbe0] ss:$24 sps:$4 sm:$0xff]   ;;  %v14702_v16 = vld [vmem:[%s20764_s3 + $0xccc] ss:$24 sps:$4 sm:$0xff]  }
 0x29c   :  { %v17658_v23 = vadd.f32 %v17396_v33, %v2057_v9  ;;  %v14681_v33 = vld [vmem:[%s20764_s3 + $0xf44] ss:$24 sps:$4 sm:$0xff]   ;;  %v14711_v1 = vld [vmem:[%s20764_s3 + $0x1034] ss:$24 sps:$4 sm:$0xff]   ;;  %v14706_v14 = vld [vmem:[%s20764_s3 + $0xcf8] ss:$24 sps:$4 sm:$0xff]  }
 0x29d   :  { %v14708_v60 = vld [vmem:[%s20764_s3 + $0xcfc] ss:$24 sps:$4 sm:$0xff]   ;;  %v14709_v62 = vld [vmem:[%s20764_s3 + $0x1030] ss:$24 sps:$4 sm:$0xff]   ;;  %v14714_v44 = vld [vmem:[%s20764_s3 + $0xd2c] ss:$24 sps:$4 sm:$0xff]  }
 0x29e   :  { %3704 = vmatpush1.bf16.msra.mxu1 %v14664_v13  ;;  %4881 = vmatpush1.bf16.msra.mxu0 %v14667_v58  ;;  %v14717_v13 = vld [vmem:[%s20764_s3 + $0x1064] ss:$24 sps:$4 sm:$0xff]  }
 0x29f   :  { %3705 = vmatprep.subr.bf16.mxu1 %v14672_v31  ;;  %4948 = vmatprep.subr.bf16.mxu0 %v14675_v35 }
 0x2a1   :  { %4899 = vmatmul.mubr.bf16.vlgmr.msra.gmra.mrb[104].mxu0 %v17666_v24 }
 0x2a2   :  { %3706 = vmatpush1.bf16.msra.mxu1 %v14670_v3  ;;  %4949 = vmatpush1.bf16.msra.mxu0 %v14673_v12  ;;  %v14712_v12 = vld [vmem:[%s20764_s3 + $0xd28] ss:$24 sps:$4 sm:$0xff]  }
 0x2a3   :  { %4069 = vmatprep.subr.bf16.mxu1 %v14678_v27  ;;  %4950 = vmatprep.subr.bf16.mxu0 %v14681_v33  ;;  %v14715_v27 = vld [vmem:[%s20764_s3 + $0x1060] ss:$24 sps:$4 sm:$0xff]  }
 0x2a4   :  { %4980 = vmatprep.mubr.bf16.mxu0 %v15807_v46 }
 0x2a5   :  { %3724 = vmatmul.mubr.bf16.vlgmr.msra.gmra.mrb[52].mxu1 %v17209_v26  ;;  %v14693_v26 = vld [vmem:[%s20764_s3 + $0xfa4] ss:$24 sps:$4 sm:$0xff]  }
 0x2a6   :  { %4070 = vmatpush1.bf16.msra.mxu1 %v14676_v6  ;;  %4951 = vmatpush1.bf16.msra.mxu0 %v14679_v49 }
 0x2a7   :  { %4071 = vmatprep.subr.bf16.mxu1 %v14684_v30  ;;  %4952 = vmatprep.subr.bf16.mxu0 %v14687_v32  ;;  %v14721_v30 = vld [vmem:[%s20764_s3 + $0x1088] ss:$24 sps:$4 sm:$0xff]   ;;  %v14726_v32 = vld [vmem:[%s20764_s3 + $0xd84] ss:$24 sps:$4 sm:$0xff]  }
 0x2a8   :  { %4101 = vmatprep.mubr.bf16.mxu1 %v15807_v46 }
 0x2aa   :  { %4072 = vmatpush1.bf16.msra.mxu1 %v14682_v34  ;;  %4953 = vmatpush1.bf16.msra.mxu0 %v14685_v48  ;;  %v14724_v34 = vld [vmem:[%s20764_s3 + $0xd80] ss:$24 sps:$4 sm:$0xff]  }
 0x2ab   :  { %4073 = vmatprep.subr.bf16.mxu1 %v14690_v37  ;;  %4954 = vmatprep.subr.bf16.mxu0 %v14693_v26  ;;  %v14727_v48 = vld [vmem:[%s20764_s3 + $0x10b8] ss:$24 sps:$4 sm:$0xff]   ;;  %v14732_v37 = vld [vmem:[%s20764_s3 + $0xdb4] ss:$24 sps:$4 sm:$0xff]  }
 0x2ac   :  { %v14735_v26 = vld [vmem:[%s20764_s3 + $0x10ec] ss:$24 sps:$4 sm:$0xff]  }
 0x2ae   :  { %4074 = vmatpush1.bf16.msra.mxu1 %v14688_v50  ;;  %4955 = vmatpush1.bf16.msra.mxu0 %v14691_v40  ;;  %v14730_v50 = vld [vmem:[%s20764_s3 + $0xdb0] ss:$24 sps:$4 sm:$0xff]  }
 0x2af   :  { %4075 = vmatprep.subr.bf16.mxu1 %v14696_v41  ;;  %4956 = vmatprep.subr.bf16.mxu0 %v14699_v56  ;;  %v14733_v40 = vld [vmem:[%s20764_s3 + $0x10e8] ss:$24 sps:$4 sm:$0xff]   ;;  %v14738_v41 = vld [vmem:[%s20764_s3 + $0xde4] ss:$24 sps:$4 sm:$0xff]  }
 0x2b0   :  { %v14736_v56 = vld [vmem:[%s20764_s3 + $0xde0] ss:$24 sps:$4 sm:$0xff]  }
 0x2b2   :  { %4076 = vmatpush1.bf16.msra.mxu1 %v14694_v10  ;;  %4957 = vmatpush1.bf16.msra.mxu0 %v14697_v15  ;;  %v14739_v10 = vld [vmem:[%s20764_s3 + $0x1118] ss:$24 sps:$4 sm:$0xff]   ;;  %v14744_v15 = vld [vmem:[%s20764_s3 + $0xe14] ss:$24 sps:$4 sm:$0xff]  }
 0x2b3   :  { %4077 = vmatprep.subr.bf16.mxu1 %v14702_v16  ;;  %4958 = vmatprep.subr.bf16.mxu0 %v14705_v55  ;;  %v14747_v16 = vld [vmem:[%s20764_s3 + $0x114c] ss:$24 sps:$4 sm:$0xff]   ;;  %v14742_v55 = vld [vmem:[%s20764_s3 + $0xe10] ss:$24 sps:$4 sm:$0xff]  }
 0x2b4   :  { %v17738_v63 = vpop.f32.mrb[80].mxu0 }
 0x2b5   :  { %v17740_v4 = vpop.f32.mrb[81].mxu0 }
 0x2b6   :  { %4078 = vmatpush1.bf16.msra.mxu1 %v14700_v8  ;;  %4959 = vmatpush1.bf16.msra.mxu0 %v14703_v7  ;;  %v3228_v9 = vpop.f32.mrb[82].mxu0  ;;  %v14745_v8 = vld [vmem:[%s20764_s3 + $0x1148] ss:$24 sps:$4 sm:$0xff]   ;;  %v14750_v7 = vld [vmem:[%s20764_s3 + $0xe44] ss:$24 sps:$4 sm:$0xff]  }
 0x2b7   :  { %4079 = vmatprep.subr.bf16.mxu1 %v14708_v60  ;;  %4960 = vmatprep.subr.bf16.mxu0 %v14711_v1  ;;  %v3229_v58 = vpop.f32.mrb[83].mxu0  ;;  %v14753_v60 = vld [vmem:[%s20764_s3 + $0x117c] ss:$24 sps:$4 sm:$0xff]   ;;  %v14748_v1 = vld [vmem:[%s20764_s3 + $0xe40] ss:$24 sps:$4 sm:$0xff]  }
 0x2b8   :  { %v2049_v18 = vpop.f32.mrb[28].mxu1  ;;  %v14759_v9 = vld [vmem:[%s20764_s3 + $0x11ac] ss:$24 sps:$4 sm:$0xff]  }
 0x2b9   :  { %v2060_v20 = vadd.f32 %v2049_v18, %v17419_v43  ;;  %v2051_v31 = vpop.f32.mrb[29].mxu1  ;;  %v14720_v43 = vld [vmem:[%s20764_s3 + $0xd5c] ss:$24 sps:$4 sm:$0xff]   ;;  %v14754_v18 = vld [vmem:[%s20764_s3 + $0xe70] ss:$24 sps:$4 sm:$0xff]  }
 0x2ba   :  { %v2061_v35 = vadd.f32 %v2051_v31, %v17428_v45  ;;  %v2053_v3 = vpop.f32.mrb[30].mxu1  ;;  %4080 = vmatpush1.bf16.msra.mxu1 %v14706_v14  ;;  %4961 = vmatpush1.bf16.msra.mxu0 %v14709_v62  ;;  %v14723_v45 = vld [vmem:[%s20764_s3 + $0x108c] ss:$24 sps:$4 sm:$0xff]   ;;  %v14751_v14 = vld [vmem:[%s20764_s3 + $0x1178] ss:$24 sps:$4 sm:$0xff]  }
 0x2bb   :  { %v17763_v33 = vadd.f32 %v17506_v59, %v2060_v20  ;;  %v2054_v6 = vpop.f32.mrb[31].mxu1  ;;  %4081 = vmatprep.subr.bf16.mxu1 %v14714_v44  ;;  %4962 = vmatprep.subr.bf16.mxu0 %v14717_v13  ;;  %v14718_v59 = vld [vmem:[%s20764_s3 + $0xd58] ss:$24 sps:$4 sm:$0xff]   ;;  %v14756_v62 = vld [vmem:[%s20764_s3 + $0xe74] ss:$24 sps:$4 sm:$0xff]  }
 0x2bc   :  { %v17772_v49 = vadd.f32 %v17508_v61, %v2061_v35  ;;  %v14729_v61 = vld [vmem:[%s20764_s3 + $0x10bc] ss:$24 sps:$4 sm:$0xff]   ;;  %v14757_v20 = vld [vmem:[%s20764_s3 + $0x11a8] ss:$24 sps:$4 sm:$0xff]  }
 0x2bd   :  { %v17863_v31 = vld [vmem:[%s20765_s2] ss:$0 sm:$0xff] }
 0x2be   :  { %4082 = vmatpush1.bf16.msra.mxu1 %v14712_v12  ;;  %4963 = vmatpush1.bf16.msra.mxu0 %v14715_v27  ;;  %v306_v35 = vadd.f32 %v17863_v31, %v16406_v17  ;;  %v14762_v12 = vld [vmem:[%s20764_s3 + $0xea4] ss:$24 sps:$4 sm:$0xff]   ;;  %v14760_v17 = vld [vmem:[%s20764_s3 + $0xea0] ss:$24 sps:$4 sm:$0xff]  }
 0x2bf   :  { %4083 = vmatprep.subr.bf16.mxu1 %v14720_v43  ;;  %5326 = vmatprep.subr.bf16.mxu0 %v14723_v45  ;;  %v14765_v27 = vld [vmem:[%s20764_s3 + $0x11dc] ss:$24 sps:$4 sm:$0xff]  }
 0x2c1   :  { %4981 = vmatmul.mubr.bf16.vlgmr.msra.gmra.mrb[108].mxu0 %v17666_v24 }
 0x2c2   :  { %4084 = vmatpush1.bf16.msra.mxu1 %v14718_v59  ;;  %5327 = vmatpush1.bf16.msra.mxu0 %v14721_v30 }
 0x2c3   :  { %4447 = vmatprep.subr.bf16.mxu1 %v14726_v32  ;;  %5328 = vmatprep.subr.bf16.mxu0 %v14729_v61  ;;  %v14763_v32 = vld [vmem:[%s20764_s3 + $0x11d8] ss:$24 sps:$4 sm:$0xff]   ;;  %v385_v61 = vmax.f32 %v306_v35, 0.0 }
 0x2c4   :  { %5358 = vmatprep.mubr.bf16.mxu0 %v15807_v46  ;;  %v14799_v35 = vld [vmem:[%s20764_s3 + $0x12f0] ss:$24 sps:$4 sm:$0xff]  }
 0x2c5   :  { %4102 = vmatmul.mubr.bf16.vlgmr.msra.gmra.mrb[56].mxu1 %v17325_v39  ;;  %v14741_v39 = vld [vmem:[%s20764_s3 + $0x111c] ss:$24 sps:$4 sm:$0xff]  }
 0x2c6   :  { %4448 = vmatpush1.bf16.msra.mxu1 %v14724_v34  ;;  %5329 = vmatpush1.bf16.msra.mxu0 %v14727_v48 }
 0x2c7   :  { %4449 = vmatprep.subr.bf16.mxu1 %v14732_v37  ;;  %5330 = vmatprep.subr.bf16.mxu0 %v14735_v26  ;;  %v14766_v26 = vld [vmem:[%s20764_s3 + $0xed0] ss:$24 sps:$4 sm:$0xff]  }
 0x2c8   :  { %4479 = vmatprep.mubr.bf16.mxu1 %v15807_v46 }
 0x2ca   :  { %4450 = vmatpush1.bf16.msra.mxu1 %v14730_v50  ;;  %5331 = vmatpush1.bf16.msra.mxu0 %v14733_v40  ;;  %v14769_v50 = vld [vmem:[%s20764_s3 + $0x1200] ss:$24 sps:$4 sm:$0xff]   ;;  %v17899_v40 = vpack.c.bf16 %v385_v61, %v385_v61  ;;  %v14813_v61 = vld [vmem:[%s20764_s3 + $0x1354] ss:$24 sps:$4 sm:$0xff]  }
 0x2cb   :  { %4451 = vmatprep.subr.bf16.mxu1 %v14738_v41  ;;  %5332 = vmatprep.subr.bf16.mxu0 %v14741_v39  ;;  %v14772_v41 = vld [vmem:[%s20764_s3 + $0xd90] ss:$24 sps:$4 sm:$0xff]  }
 0x2cc   :  { %v14775_v39 = vld [vmem:[%s20764_s3 + $0x1230] ss:$24 sps:$4 sm:$0xff]  }
 0x2ce   :  { %4452 = vmatpush1.bf16.msra.mxu1 %v14736_v56  ;;  %5333 = vmatpush1.bf16.msra.mxu0 %v14739_v10  ;;  %v14780_v56 = vld [vmem:[%s20764_s3 + $0xdc4] ss:$24 sps:$4 sm:$0xff]  }
 0x2cf   :  { %4453 = vmatprep.subr.bf16.mxu1 %v14744_v15  ;;  %5334 = vmatprep.subr.bf16.mxu0 %v14747_v16  ;;  %v14783_v10 = vld [vmem:[%s20764_s3 + $0x1264] ss:$24 sps:$4 sm:$0xff]   ;;  %v14778_v15 = vld [vmem:[%s20764_s3 + $0xdc0] ss:$24 sps:$4 sm:$0xff]  }
 0x2d0   :  { %v14781_v16 = vld [vmem:[%s20764_s3 + $0x1260] ss:$24 sps:$4 sm:$0xff]  }
 0x2d2   :  { %4454 = vmatpush1.bf16.msra.mxu1 %v14742_v55  ;;  %5335 = vmatpush1.bf16.msra.mxu0 %v14745_v8  ;;  %v14786_v55 = vld [vmem:[%s20764_s3 + $0xdf4] ss:$24 sps:$4 sm:$0xff]  }
 0x2d3   :  { %4455 = vmatprep.subr.bf16.mxu1 %v14750_v7  ;;  %5336 = vmatprep.subr.bf16.mxu0 %v14753_v60  ;;  %v14789_v8 = vld [vmem:[%s20764_s3 + $0x1294] ss:$24 sps:$4 sm:$0xff]   ;;  %v14784_v7 = vld [vmem:[%s20764_s3 + $0xdf0] ss:$24 sps:$4 sm:$0xff]  }
 0x2d4   :  { %v17850_v44 = vpop.f32.mrb[84].mxu0  ;;  %v14787_v60 = vld [vmem:[%s20764_s3 + $0x1290] ss:$24 sps:$4 sm:$0xff]  }
 0x2d5   :  { %v17852_v13 = vpop.f32.mrb[85].mxu0 }
 0x2d6   :  { %v3310_v58 = vpop.f32.mrb[86].mxu0  ;;  %4456 = vmatpush1.bf16.msra.mxu1 %v14748_v1  ;;  %5337 = vmatpush1.bf16.msra.mxu0 %v14751_v14  ;;  %v14792_v1 = vld [vmem:[%s20764_s3 + $0xe24] ss:$24 sps:$4 sm:$0xff]  }
 0x2d7   :  { %v3311_v3 = vpop.f32.mrb[87].mxu0  ;;  %4457 = vmatprep.subr.bf16.mxu1 %v14756_v62  ;;  %5338 = vmatprep.subr.bf16.mxu0 %v14759_v9  ;;  %v14795_v14 = vld [vmem:[%s20764_s3 + $0x12c4] ss:$24 sps:$4 sm:$0xff]   ;;  %v14790_v62 = vld [vmem:[%s20764_s3 + $0xe20] ss:$24 sps:$4 sm:$0xff]  }
 0x2d8   :  { %v2427_v6 = vpop.f32.mrb[32].mxu1  ;;  %v14793_v9 = vld [vmem:[%s20764_s3 + $0x12c0] ss:$24 sps:$4 sm:$0xff]   ;;  %v14798_v58 = vld [vmem:[%s20764_s3 + $0xe54] ss:$24 sps:$4 sm:$0xff]  }
 0x2d9   :  { %v2477_v43 = vadd.f32 %v2427_v6, %v17533_v51  ;;  %v2429_v45 = vpop.f32.mrb[33].mxu1  ;;  %v14768_v51 = vld [vmem:[%s20764_s3 + $0xed4] ss:$24 sps:$4 sm:$0xff]   ;;  %v14804_v3 = vld [vmem:[%s20764_s3 + $0xe84] ss:$24 sps:$4 sm:$0xff]  }
 0x2da   :  { %v2478_v59 = vadd.f32 %v2429_v45, %v17542_v5  ;;  %v2431_v30 = vpop.f32.mrb[34].mxu1  ;;  %4458 = vmatpush1.bf16.msra.mxu1 %v14754_v18  ;;  %5339 = vmatpush1.bf16.msra.mxu0 %v14757_v20  ;;  %v14771_v5 = vld [vmem:[%s20764_s3 + $0x1204] ss:$24 sps:$4 sm:$0xff]   ;;  %v14801_v18 = vld [vmem:[%s20764_s3 + $0x12f4] ss:$24 sps:$4 sm:$0xff]  }
 0x2db   :  { %v2432_v34 = vpop.f32.mrb[35].mxu1  ;;  %4459 = vmatprep.subr.bf16.mxu1 %v14762_v12  ;;  %5340 = vmatprep.subr.bf16.mxu0 %v14765_v27  ;;  %v17888_v48 = vadd.f32 %v17622_v54, %v2477_v43  ;;  %v14774_v54 = vld [vmem:[%s20764_s3 + $0xd94] ss:$24 sps:$4 sm:$0xff]   ;;  %v14796_v20 = vld [vmem:[%s20764_s3 + $0xe50] ss:$24 sps:$4 sm:$0xff]   ;;  %v311_v30 = vadd.f32 %v17863_v31, %v16414_v21 }
 0x2dc   :  { %v17891_v37 = vadd.f32 %v17624_v53, %v2478_v59  ;;  %v14777_v53 = vld [vmem:[%s20764_s3 + $0x1234] ss:$24 sps:$4 sm:$0xff]   ;;  %v14807_v12 = vld [vmem:[%s20764_s3 + $0x1324] ss:$24 sps:$4 sm:$0xff]   ;;  %v14802_v45 = vld [vmem:[%s20764_s3 + $0xe80] ss:$24 sps:$4 sm:$0xff]  }
 0x2dd   :  { %v14805_v59 = vld [vmem:[%s20764_s3 + $0x1320] ss:$24 sps:$4 sm:$0xff]   ;;  %v14808_v21 = vld [vmem:[%s20764_s3 + $0xeb0] ss:$24 sps:$4 sm:$0xff]  }
 0x2de   :  { %4460 = vmatpush1.bf16.msra.mxu1 %v14760_v17  ;;  %5341 = vmatpush1.bf16.msra.mxu0 %v14763_v32  ;;  %v14810_v32 = vld [vmem:[%s20764_s3 + $0xeb4] ss:$24 sps:$4 sm:$0xff]  }
 0x2df   :  { %4461 = vmatprep.subr.bf16.mxu1 %v14768_v51  ;;  %5704 = vmatprep.subr.bf16.mxu0 %v14771_v5 }
 0x2e1   :  { %5359 = vmatmul.mubr.bf16.vlgmr.msra.gmra.mrb[112].mxu0 %v17899_v40 }
 0x2e2   :  { %4462 = vmatpush1.bf16.msra.mxu1 %v14766_v26  ;;  %5705 = vmatpush1.bf16.msra.mxu0 %v14769_v50 }
 0x2e3   :  { %4529 = vmatprep.subr.bf16.mxu1 %v14774_v54  ;;  %5706 = vmatprep.subr.bf16.mxu0 %v14777_v53  ;;  %v14811_v54 = vld [vmem:[%s20764_s3 + $0x1350] ss:$24 sps:$4 sm:$0xff]   ;;  %v386_v53 = vmax.f32 %v311_v30, 0.0  ;;  %v14852_v30 = vld [vmem:[%s20764_s3 + $0xffc] ss:$24 sps:$4 sm:$0xff]  }
 0x2e4   :  { %5736 = vmatprep.mubr.bf16.mxu0 %v15807_v46 }
 0x2e5   :  { %4480 = vmatmul.mubr.bf16.vlgmr.msra.gmra.mrb[60].mxu1 %v17550_v0 }
 0x2e6   :  { %4530 = vmatpush1.bf16.msra.mxu1 %v14772_v41  ;;  %5707 = vmatpush1.bf16.msra.mxu0 %v14775_v39 }
 0x2e7   :  { %4531 = vmatprep.subr.bf16.mxu1 %v14780_v56  ;;  %5708 = vmatprep.subr.bf16.mxu0 %v14783_v10  ;;  %v14814_v10 = vld [vmem:[%s20764_s3 + $0xee0] ss:$24 sps:$4 sm:$0xff]  }
 0x2e8   :  { %4561 = vmatprep.mubr.bf16.mxu1 %v15807_v46 }
 0x2ea   :  { %4532 = vmatpush1.bf16.msra.mxu1 %v14778_v15  ;;  %5709 = vmatpush1.bf16.msra.mxu0 %v14781_v16  ;;  %v14817_v15 = vld [vmem:[%s20764_s3 + $0x1210] ss:$24 sps:$4 sm:$0xff]   ;;  %v18015_v16 = vpack.c.bf16 %v386_v53, %v386_v53 }
 0x2eb   :  { %4533 = vmatprep.subr.bf16.mxu1 %v14786_v55  ;;  %5710 = vmatprep.subr.bf16.mxu0 %v14789_v8  ;;  %v14820_v55 = vld [vmem:[%s20764_s3 + $0xf08] ss:$24 sps:$4 sm:$0xff]  }
 0x2ec   :  { %v14823_v8 = vld [vmem:[%s20764_s3 + $0x1240] ss:$24 sps:$4 sm:$0xff]  }
 0x2ee   :  { %4534 = vmatpush1.bf16.msra.mxu1 %v14784_v7  ;;  %5711 = vmatpush1.bf16.msra.mxu0 %v14787_v60  ;;  %v14828_v7 = vld [vmem:[%s20764_s3 + $0xf3c] ss:$24 sps:$4 sm:$0xff]  }
 0x2ef   :  { %4535 = vmatprep.subr.bf16.mxu1 %v14792_v1  ;;  %5712 = vmatprep.subr.bf16.mxu0 %v14795_v14  ;;  %v14831_v60 = vld [vmem:[%s20764_s3 + $0x1274] ss:$24 sps:$4 sm:$0xff]   ;;  %v14826_v1 = vld [vmem:[%s20764_s3 + $0xf38] ss:$24 sps:$4 sm:$0xff]  }
 0x2f0   :  { %v14829_v14 = vld [vmem:[%s20764_s3 + $0x1270] ss:$24 sps:$4 sm:$0xff]  }
 0x2f2   :  { %4536 = vmatpush1.bf16.msra.mxu1 %v14790_v62  ;;  %5713 = vmatpush1.bf16.msra.mxu0 %v14793_v9  ;;  %v14834_v62 = vld [vmem:[%s20764_s3 + $0xf6c] ss:$24 sps:$4 sm:$0xff]   ;;  %v14832_v9 = vld [vmem:[%s20764_s3 + $0xf68] ss:$24 sps:$4 sm:$0xff]  }
 0x2f3   :  { %4537 = vmatprep.subr.bf16.mxu1 %v14798_v58  ;;  %5714 = vmatprep.subr.bf16.mxu0 %v14801_v18  ;;  %v14835_v58 = vld [vmem:[%s20764_s3 + $0x12a0] ss:$24 sps:$4 sm:$0xff]   ;;  %v14840_v18 = vld [vmem:[%s20764_s3 + $0xf9c] ss:$24 sps:$4 sm:$0xff]  }
 0x2f4   :  { %v17971_v27 = vpop.f32.mrb[88].mxu0 }
 0x2f5   :  { %v17973_v6 = vpop.f32.mrb[89].mxu0 }
 0x2f6   :  { %v3688_v43 = vpop.f32.mrb[90].mxu0  ;;  %4538 = vmatpush1.bf16.msra.mxu1 %v14796_v20  ;;  %5715 = vmatpush1.bf16.msra.mxu0 %v14799_v35  ;;  %v14843_v20 = vld [vmem:[%s20764_s3 + $0x12d4] ss:$24 sps:$4 sm:$0xff]   ;;  %v14838_v35 = vld [vmem:[%s20764_s3 + $0xf98] ss:$24 sps:$4 sm:$0xff]  }
 0x2f7   :  { %v3689_v17 = vpop.f32.mrb[91].mxu0  ;;  %4539 = vmatprep.subr.bf16.mxu1 %v14804_v3  ;;  %5716 = vmatprep.subr.bf16.mxu0 %v14807_v12  ;;  %v14841_v3 = vld [vmem:[%s20764_s3 + $0x12d0] ss:$24 sps:$4 sm:$0xff]   ;;  %v14846_v12 = vld [vmem:[%s20764_s3 + $0xfcc] ss:$24 sps:$4 sm:$0xff]  }
 0x2f8   :  { %v2805_v34 = vpop.f32.mrb[36].mxu1  ;;  %v14849_v43 = vld [vmem:[%s20764_s3 + $0x1304] ss:$24 sps:$4 sm:$0xff]   ;;  %v14855_v17 = vld [vmem:[%s20764_s3 + $0x1334] ss:$24 sps:$4 sm:$0xff]  }
 0x2f9   :  { %v2894_v51 = vadd.f32 %v2805_v34, %v17649_v19  ;;  %v2807_v5 = vpop.f32.mrb[37].mxu1  ;;  %v14816_v19 = vld [vmem:[%s20764_s3 + $0xee4] ss:$24 sps:$4 sm:$0xff]  }
 0x2fa   :  { %v2895_v26 = vadd.f32 %v2807_v5, %v17658_v23  ;;  %v2809_v50 = vpop.f32.mrb[38].mxu1  ;;  %4540 = vmatpush1.bf16.msra.mxu1 %v14802_v45  ;;  %5717 = vmatpush1.bf16.msra.mxu0 %v14805_v59  ;;  %v14819_v23 = vld [vmem:[%s20764_s3 + $0x1214] ss:$24 sps:$4 sm:$0xff]   ;;  %v14844_v45 = vld [vmem:[%s20764_s3 + $0xfc8] ss:$24 sps:$4 sm:$0xff]  }
 0x2fb   :  { %v2810_v41 = vpop.f32.mrb[39].mxu1  ;;  %4541 = vmatprep.subr.bf16.mxu1 %v14810_v32  ;;  %5718 = vmatprep.subr.bf16.mxu0 %v14813_v61  ;;  %v18004_v39 = vadd.f32 %v17738_v63, %v2894_v51  ;;  %v14822_v63 = vld [vmem:[%s20764_s3 + $0xf0c] ss:$24 sps:$4 sm:$0xff]   ;;  %v14847_v59 = vld [vmem:[%s20764_s3 + $0x1300] ss:$24 sps:$4 sm:$0xff]  }
 0x2fc   :  { %v18007_v56 = vadd.f32 %v17740_v4, %v2895_v26  ;;  %v14825_v4 = vld [vmem:[%s20764_s3 + $0x1244] ss:$24 sps:$4 sm:$0xff]   ;;  %v14850_v51 = vld [vmem:[%s20764_s3 + $0xff8] ss:$24 sps:$4 sm:$0xff]  }
 0x2fd   :  { %v14853_v5 = vld [vmem:[%s20764_s3 + $0x1330] ss:$24 sps:$4 sm:$0xff]   ;;  %v14858_v50 = vld [vmem:[%s20764_s3 + $0x102c] ss:$24 sps:$4 sm:$0xff]  }
 0x2fe   :  { %4542 = vmatpush1.bf16.msra.mxu1 %v14808_v21  ;;  %5719 = vmatpush1.bf16.msra.mxu0 %v14811_v54  ;;  %v14861_v21 = vld [vmem:[%s20764_s3 + $0x1364] ss:$24 sps:$4 sm:$0xff]  }
 0x2ff   :  { %4543 = vmatprep.subr.bf16.mxu1 %v14816_v19  ;;  %5786 = vmatprep.subr.bf16.mxu0 %v14819_v23 }
 0x301   :  { %5737 = vmatmul.mubr.bf16.vlgmr.msra.gmra.mrb[116].mxu0 %v18015_v16 }
 0x302   :  { %4544 = vmatpush1.bf16.msra.mxu1 %v14814_v10  ;;  %5787 = vmatpush1.bf16.msra.mxu0 %v14817_v15  ;;  %v14856_v10 = vld [vmem:[%s20764_s3 + $0x1028] ss:$24 sps:$4 sm:$0xff]  }
 0x303   :  { %4907 = vmatprep.subr.bf16.mxu1 %v14822_v63  ;;  %5788 = vmatprep.subr.bf16.mxu0 %v14825_v4  ;;  %v14859_v15 = vld [vmem:[%s20764_s3 + $0x1360] ss:$24 sps:$4 sm:$0xff]  }
 0x304   :  { %5818 = vmatprep.mubr.bf16.mxu0 %v15807_v46 }
 0x305   :  { %4562 = vmatmul.mubr.bf16.vlgmr.msra.gmra.mrb[64].mxu1 %v17550_v0  ;;  %v14837_v0 = vld [vmem:[%s20764_s3 + $0x12a4] ss:$24 sps:$4 sm:$0xff]  }
 0x306   :  { %4908 = vmatpush1.bf16.msra.mxu1 %v14820_v55  ;;  %5789 = vmatpush1.bf16.msra.mxu0 %v14823_v8  ;;  %v14862_v8 = vld [vmem:[%s20764_s3 + $0x1058] ss:$24 sps:$4 sm:$0xff]  }
 0x307   :  { %4909 = vmatprep.subr.bf16.mxu1 %v14828_v7  ;;  %5790 = vmatprep.subr.bf16.mxu0 %v14831_v60  ;;  %v14865_v7 = vld [vmem:[%s20764_s3 + $0x1388] ss:$24 sps:$4 sm:$0xff]  }
 0x308   :  { %4939 = vmatprep.mubr.bf16.mxu1 %v15807_v46  ;;  %v14868_v60 = vld [vmem:[%s20764_s3 + $0x1080] ss:$24 sps:$4 sm:$0xff]  }
 0x30a   :  { %4910 = vmatpush1.bf16.msra.mxu1 %v14826_v1  ;;  %5791 = vmatpush1.bf16.msra.mxu0 %v14829_v14  ;;  %v14871_v1 = vld [vmem:[%s20764_s3 + $0x13b8] ss:$24 sps:$4 sm:$0xff]   ;;  %v14876_v14 = vld [vmem:[%s20764_s3 + $0x10b4] ss:$24 sps:$4 sm:$0xff]  }
 0x30b   :  { %4911 = vmatprep.subr.bf16.mxu1 %v14834_v62  ;;  %5792 = vmatprep.subr.bf16.mxu0 %v14837_v0  ;;  %v14879_v62 = vld [vmem:[%s20764_s3 + $0x13ec] ss:$24 sps:$4 sm:$0xff]   ;;  %v14874_v0 = vld [vmem:[%s20764_s3 + $0x10b0] ss:$24 sps:$4 sm:$0xff]  }
 0x30e   :  { %4912 = vmatpush1.bf16.msra.mxu1 %v14832_v9  ;;  %5793 = vmatpush1.bf16.msra.mxu0 %v14835_v58  ;;  %v14877_v9 = vld [vmem:[%s20764_s3 + $0x13e8] ss:$24 sps:$4 sm:$0xff]   ;;  %v14882_v58 = vld [vmem:[%s20764_s3 + $0x10e4] ss:$24 sps:$4 sm:$0xff]  }
 0x30f   :  { %4913 = vmatprep.subr.bf16.mxu1 %v14840_v18  ;;  %5794 = vmatprep.subr.bf16.mxu0 %v14843_v20  ;;  %v14880_v18 = vld [vmem:[%s20764_s3 + $0x10e0] ss:$24 sps:$4 sm:$0xff]  }
 0x310   :  { %v14883_v20 = vld [vmem:[%s20764_s3 + $0x1418] ss:$24 sps:$4 sm:$0xff]  }
 0x312   :  { %4914 = vmatpush1.bf16.msra.mxu1 %v14838_v35  ;;  %5795 = vmatpush1.bf16.msra.mxu0 %v14841_v3  ;;  %v14888_v35 = vld [vmem:[%s20764_s3 + $0x1114] ss:$24 sps:$4 sm:$0xff]  }
 0x313   :  { %4915 = vmatprep.subr.bf16.mxu1 %v14846_v12  ;;  %5796 = vmatprep.subr.bf16.mxu0 %v14849_v43  ;;  %v14891_v3 = vld [vmem:[%s20764_s3 + $0x144c] ss:$24 sps:$4 sm:$0xff]   ;;  %v14886_v12 = vld [vmem:[%s20764_s3 + $0x1110] ss:$24 sps:$4 sm:$0xff]  }
 0x314   :  { %v18087_v32 = vpop.f32.mrb[92].mxu0  ;;  %v14889_v43 = vld [vmem:[%s20764_s3 + $0x1448] ss:$24 sps:$4 sm:$0xff]  }
 0x315   :  { %v18089_v61 = vpop.f32.mrb[93].mxu0 }
 0x316   :  { %v4066_v34 = vpop.f32.mrb[94].mxu0  ;;  %4916 = vmatpush1.bf16.msra.mxu1 %v14844_v45  ;;  %5797 = vmatpush1.bf16.msra.mxu0 %v14847_v59  ;;  %v14894_v45 = vld [vmem:[%s20764_s3 + $0x1144] ss:$24 sps:$4 sm:$0xff]  }
 0x317   :  { %v4067_v26 = vpop.f32.mrb[95].mxu0  ;;  %4917 = vmatprep.subr.bf16.mxu1 %v14852_v30  ;;  %5798 = vmatprep.subr.bf16.mxu0 %v14855_v17  ;;  %v14897_v59 = vld [vmem:[%s20764_s3 + $0x147c] ss:$24 sps:$4 sm:$0xff]   ;;  %v14892_v30 = vld [vmem:[%s20764_s3 + $0x1140] ss:$24 sps:$4 sm:$0xff]  }
 0x318   :  { %v2887_v54 = vpop.f32.mrb[40].mxu1  ;;  %v14895_v17 = vld [vmem:[%s20764_s3 + $0x1478] ss:$24 sps:$4 sm:$0xff]   ;;  %v14900_v34 = vld [vmem:[%s20764_s3 + $0x1174] ss:$24 sps:$4 sm:$0xff]  }
 0x319   :  { %v2898_v53 = vadd.f32 %v2887_v54, %v17763_v33  ;;  %v2889_v41 = vpop.f32.mrb[41].mxu1  ;;  %v14864_v33 = vld [vmem:[%s20764_s3 + $0x105c] ss:$24 sps:$4 sm:$0xff]   ;;  %v14901_v54 = vld [vmem:[%s20764_s3 + $0x14a8] ss:$24 sps:$4 sm:$0xff]  }
 0x31a   :  { %v2899_v19 = vadd.f32 %v2889_v41, %v17772_v49  ;;  %v2891_v23 = vpop.f32.mrb[42].mxu1  ;;  %4918 = vmatpush1.bf16.msra.mxu1 %v14850_v51  ;;  %5799 = vmatpush1.bf16.msra.mxu0 %v14853_v5  ;;  %v14867_v49 = vld [vmem:[%s20764_s3 + $0x138c] ss:$24 sps:$4 sm:$0xff]  }
 0x31b   :  { %v2892_v63 = vpop.f32.mrb[43].mxu1  ;;  %4919 = vmatprep.subr.bf16.mxu1 %v14858_v50  ;;  %5800 = vmatprep.subr.bf16.mxu0 %v14861_v21  ;;  %v18118_v4 = vadd.f32 %v17850_v44, %v2898_v53  ;;  %v14870_v44 = vld [vmem:[%s20764_s3 + $0x1084] ss:$24 sps:$4 sm:$0xff]   ;;  %v14898_v21 = vld [vmem:[%s20764_s3 + $0x1170] ss:$24 sps:$4 sm:$0xff]   ;;  %v316_v53 = vadd.f32 %v17863_v31, %v16422_v25 }
 0x31c   :  { %v18121_v55 = vadd.f32 %v17852_v13, %v2899_v19  ;;  %v14873_v13 = vld [vmem:[%s20764_s3 + $0x13bc] ss:$24 sps:$4 sm:$0xff]   ;;  %v14903_v51 = vld [vmem:[%s20764_s3 + $0x14ac] ss:$24 sps:$4 sm:$0xff]   ;;  %v14904_v25 = vld [vmem:[%s20764_s3 + $0x11a0] ss:$24 sps:$4 sm:$0xff]  }
 0x31d   :  { %v14906_v19 = vld [vmem:[%s20764_s3 + $0x11a4] ss:$24 sps:$4 sm:$0xff]  }
 0x31e   :  { %4920 = vmatpush1.bf16.msra.mxu1 %v14856_v10  ;;  %5801 = vmatpush1.bf16.msra.mxu0 %v14859_v15  ;;  %v14909_v23 = vld [vmem:[%s20764_s3 + $0x14dc] ss:$24 sps:$4 sm:$0xff]  }
 0x31f   :  { %4921 = vmatprep.subr.bf16.mxu1 %v14864_v33  ;;  %6164 = vmatprep.subr.bf16.mxu0 %v14867_v49 }
 0x321   :  { %5819 = vmatmul.mubr.bf16.vlgmr.msra.gmra.mrb[120].mxu0 %v18015_v16 }
 0x322   :  { %4922 = vmatpush1.bf16.msra.mxu1 %v14862_v8  ;;  %6165 = vmatpush1.bf16.msra.mxu0 %v14865_v7  ;;  %v14907_v8 = vld [vmem:[%s20764_s3 + $0x14d8] ss:$24 sps:$4 sm:$0xff]   ;;  %v387_v7 = vmax.f32 %v316_v53, 0.0  ;;  %v14951_v53 = vld [vmem:[%s20764_s3 + $0x1624] ss:$24 sps:$4 sm:$0xff]  }
 0x323   :  { %5285 = vmatprep.subr.bf16.mxu1 %v14870_v44  ;;  %6166 = vmatprep.subr.bf16.mxu0 %v14873_v13 }
 0x324   :  { %6196 = vmatprep.mubr.bf16.mxu0 %v15807_v46 }
 0x325   :  { %4940 = vmatmul.mubr.bf16.vlgmr.msra.gmra.mrb[68].mxu1 %v17666_v24  ;;  %v14885_v24 = vld [vmem:[%s20764_s3 + $0x141c] ss:$24 sps:$4 sm:$0xff]  }
 0x326   :  { %5286 = vmatpush1.bf16.msra.mxu1 %v14868_v60  ;;  %6167 = vmatpush1.bf16.msra.mxu0 %v14871_v1  ;;  %v14910_v1 = vld [vmem:[%s20764_s3 + $0x11d0] ss:$24 sps:$4 sm:$0xff]  }
 0x327   :  { %5287 = vmatprep.subr.bf16.mxu1 %v14876_v14  ;;  %6168 = vmatprep.subr.bf16.mxu0 %v14879_v62  ;;  %v14913_v14 = vld [vmem:[%s20764_s3 + $0x1500] ss:$24 sps:$4 sm:$0xff]   ;;  %v18243_v62 = vpack.c.bf16 %v387_v7, %v387_v7 }
 0x328   :  { %5317 = vmatprep.mubr.bf16.mxu1 %v15807_v46 }
 0x32a   :  { %5288 = vmatpush1.bf16.msra.mxu1 %v14874_v0  ;;  %6169 = vmatpush1.bf16.msra.mxu0 %v14877_v9  ;;  %v14916_v0 = vld [vmem:[%s20764_s3 + $0x1090] ss:$24 sps:$4 sm:$0xff]  }
 0x32b   :  { %5289 = vmatprep.subr.bf16.mxu1 %v14882_v58  ;;  %6170 = vmatprep.subr.bf16.mxu0 %v14885_v24  ;;  %v14919_v9 = vld [vmem:[%s20764_s3 + $0x1530] ss:$24 sps:$4 sm:$0xff]   ;;  %v14924_v58 = vld [vmem:[%s20764_s3 + $0x10c4] ss:$24 sps:$4 sm:$0xff]  }
 0x32c   :  { %v14927_v24 = vld [vmem:[%s20764_s3 + $0x1564] ss:$24 sps:$4 sm:$0xff]  }
 0x32e   :  { %5290 = vmatpush1.bf16.msra.mxu1 %v14880_v18  ;;  %6171 = vmatpush1.bf16.msra.mxu0 %v14883_v20  ;;  %v14922_v18 = vld [vmem:[%s20764_s3 + $0x10c0] ss:$24 sps:$4 sm:$0xff]  }
 0x32f   :  { %5291 = vmatprep.subr.bf16.mxu1 %v14888_v35  ;;  %6172 = vmatprep.subr.bf16.mxu0 %v14891_v3  ;;  %v14925_v20 = vld [vmem:[%s20764_s3 + $0x1560] ss:$24 sps:$4 sm:$0xff]   ;;  %v14930_v35 = vld [vmem:[%s20764_s3 + $0x10f4] ss:$24 sps:$4 sm:$0xff]  }
 0x330   :  { %v14933_v3 = vld [vmem:[%s20764_s3 + $0x1594] ss:$24 sps:$4 sm:$0xff]  }
 0x332   :  { %5292 = vmatpush1.bf16.msra.mxu1 %v14886_v12  ;;  %6173 = vmatpush1.bf16.msra.mxu0 %v14889_v43  ;;  %v14928_v12 = vld [vmem:[%s20764_s3 + $0x10f0] ss:$24 sps:$4 sm:$0xff]  }
 0x333   :  { %5293 = vmatprep.subr.bf16.mxu1 %v14894_v45  ;;  %6174 = vmatprep.subr.bf16.mxu0 %v14897_v59  ;;  %v14931_v43 = vld [vmem:[%s20764_s3 + $0x1590] ss:$24 sps:$4 sm:$0xff]   ;;  %v14936_v45 = vld [vmem:[%s20764_s3 + $0x1124] ss:$24 sps:$4 sm:$0xff]  }
 0x334   :  { %v18199_v5 = vpop.f32.mrb[96].mxu0  ;;  %v14939_v59 = vld [vmem:[%s20764_s3 + $0x15c4] ss:$24 sps:$4 sm:$0xff]  }
 0x335   :  { %v18201_v26 = vpop.f32.mrb[97].mxu0 }
 0x336   :  { %v4148_v50 = vpop.f32.mrb[98].mxu0  ;;  %5294 = vmatpush1.bf16.msra.mxu1 %v14892_v30  ;;  %6175 = vmatpush1.bf16.msra.mxu0 %v14895_v17  ;;  %v14934_v30 = vld [vmem:[%s20764_s3 + $0x1120] ss:$24 sps:$4 sm:$0xff]  }
 0x337   :  { %v4149_v41 = vpop.f32.mrb[99].mxu0  ;;  %5295 = vmatprep.subr.bf16.mxu1 %v14900_v34  ;;  %6176 = vmatprep.subr.bf16.mxu0 %v14903_v51  ;;  %v14937_v17 = vld [vmem:[%s20764_s3 + $0x15c0] ss:$24 sps:$4 sm:$0xff]   ;;  %v14942_v34 = vld [vmem:[%s20764_s3 + $0x1154] ss:$24 sps:$4 sm:$0xff]  }
 0x338   :  { %v3265_v10 = vpop.f32.mrb[44].mxu1  ;;  %v14945_v51 = vld [vmem:[%s20764_s3 + $0x15f4] ss:$24 sps:$4 sm:$0xff]   ;;  %v14940_v50 = vld [vmem:[%s20764_s3 + $0x1150] ss:$24 sps:$4 sm:$0xff]  }
 0x339   :  { %v3315_v15 = vadd.f32 %v3265_v10, %v17888_v48  ;;  %v3267_v63 = vpop.f32.mrb[45].mxu1  ;;  %v14912_v48 = vld [vmem:[%s20764_s3 + $0x11d4] ss:$24 sps:$4 sm:$0xff]   ;;  %v14946_v10 = vld [vmem:[%s20764_s3 + $0x1180] ss:$24 sps:$4 sm:$0xff]  }
 0x33a   :  { %v3316_v33 = vadd.f32 %v3267_v63, %v17891_v37  ;;  %v3269_v49 = vpop.f32.mrb[46].mxu1  ;;  %5296 = vmatpush1.bf16.msra.mxu1 %v14898_v21  ;;  %6177 = vmatpush1.bf16.msra.mxu0 %v14901_v54  ;;  %v14915_v37 = vld [vmem:[%s20764_s3 + $0x1504] ss:$24 sps:$4 sm:$0xff]   ;;  %v14943_v21 = vld [vmem:[%s20764_s3 + $0x15f0] ss:$24 sps:$4 sm:$0xff]   ;;  %v321_v63 = vadd.f32 %v17863_v31, %v16430_v29 }
 0x33b   :  { %v3270_v44 = vpop.f32.mrb[47].mxu1  ;;  %5297 = vmatprep.subr.bf16.mxu1 %v14906_v19  ;;  %6178 = vmatprep.subr.bf16.mxu0 %v14909_v23  ;;  %v18232_v13 = vadd.f32 %v17971_v27, %v3315_v15  ;;  %v14918_v27 = vld [vmem:[%s20764_s3 + $0x1094] ss:$24 sps:$4 sm:$0xff]   ;;  %v14948_v54 = vld [vmem:[%s20764_s3 + $0x1184] ss:$24 sps:$4 sm:$0xff]  }
 0x33c   :  { %v18235_v60 = vadd.f32 %v17973_v6, %v3316_v33  ;;  %v14921_v6 = vld [vmem:[%s20764_s3 + $0x1534] ss:$24 sps:$4 sm:$0xff]   ;;  %v14949_v15 = vld [vmem:[%s20764_s3 + $0x1620] ss:$24 sps:$4 sm:$0xff]   ;;  %v14952_v29 = vld [vmem:[%s20764_s3 + $0x11b0] ss:$24 sps:$4 sm:$0xff]  }
 0x33d   :  { %v14954_v49 = vld [vmem:[%s20764_s3 + $0x11b4] ss:$24 sps:$4 sm:$0xff]  }
 0x33e   :  { %5298 = vmatpush1.bf16.msra.mxu1 %v14904_v25  ;;  %6179 = vmatpush1.bf16.msra.mxu0 %v14907_v8  ;;  %v14957_v25 = vld [vmem:[%s20764_s3 + $0x1654] ss:$24 sps:$4 sm:$0xff]  }
 0x33f   :  { %5299 = vmatprep.subr.bf16.mxu1 %v14912_v48  ;;  %6542 = vmatprep.subr.bf16.mxu0 %v14915_v37 }
 0x341   :  { %6197 = vmatmul.mubr.bf16.vlgmr.msra.gmra.mrb[124].mxu0 %v18243_v62 }
 0x342   :  { %5300 = vmatpush1.bf16.msra.mxu1 %v14910_v1  ;;  %6543 = vmatpush1.bf16.msra.mxu0 %v14913_v14  ;;  %v14955_v1 = vld [vmem:[%s20764_s3 + $0x1650] ss:$24 sps:$4 sm:$0xff]   ;;  %v388_v14 = vmax.f32 %v321_v63, 0.0 }
 0x343   :  { %5367 = vmatprep.subr.bf16.mxu1 %v14918_v27  ;;  %6544 = vmatprep.subr.bf16.mxu0 %v14921_v6 }
 0x344   :  { %6574 = vmatprep.mubr.bf16.mxu0 %v15807_v46 }
 0x345   :  { %5318 = vmatmul.mubr.bf16.vlgmr.msra.gmra.mrb[72].mxu1 %v17899_v40 }
 0x346   :  { %5368 = vmatpush1.bf16.msra.mxu1 %v14916_v0  ;;  %6545 = vmatpush1.bf16.msra.mxu0 %v14919_v9  ;;  %v14958_v9 = vld [vmem:[%s20764_s3 + $0x11e0] ss:$24 sps:$4 sm:$0xff]  }
 0x347   :  { %5369 = vmatprep.subr.bf16.mxu1 %v14924_v58  ;;  %6546 = vmatprep.subr.bf16.mxu0 %v14927_v24  ;;  %v14961_v58 = vld [vmem:[%s20764_s3 + $0x1510] ss:$24 sps:$4 sm:$0xff]   ;;  %v18359_v24 = vpack.c.bf16 %v388_v14, %v388_v14 }
 0x348   :  { %5399 = vmatprep.mubr.bf16.mxu1 %v15807_v46 }
 0x34a   :  { %5370 = vmatpush1.bf16.msra.mxu1 %v14922_v18  ;;  %6547 = vmatpush1.bf16.msra.mxu0 %v14925_v20  ;;  %v14964_v18 = vld [vmem:[%s20764_s3 + $0x1208] ss:$24 sps:$4 sm:$0xff]  }
 0x34b   :  { %5371 = vmatprep.subr.bf16.mxu1 %v14930_v35  ;;  %6548 = vmatprep.subr.bf16.mxu0 %v14933_v3  ;;  %v14967_v20 = vld [vmem:[%s20764_s3 + $0x1540] ss:$24 sps:$4 sm:$0xff]   ;;  %v14972_v35 = vld [vmem:[%s20764_s3 + $0x123c] ss:$24 sps:$4 sm:$0xff]  }
 0x34c   :  { %v14975_v3 = vld [vmem:[%s20764_s3 + $0x1574] ss:$24 sps:$4 sm:$0xff]  }
 0x34e   :  { %5372 = vmatpush1.bf16.msra.mxu1 %v14928_v12  ;;  %6549 = vmatpush1.bf16.msra.mxu0 %v14931_v43  ;;  %v14970_v12 = vld [vmem:[%s20764_s3 + $0x1238] ss:$24 sps:$4 sm:$0xff]  }
 0x34f   :  { %5373 = vmatprep.subr.bf16.mxu1 %v14936_v45  ;;  %6550 = vmatprep.subr.bf16.mxu0 %v14939_v59  ;;  %v14973_v43 = vld [vmem:[%s20764_s3 + $0x1570] ss:$24 sps:$4 sm:$0xff]   ;;  %v14978_v45 = vld [vmem:[%s20764_s3 + $0x126c] ss:$24 sps:$4 sm:$0xff]  }
 0x350   :  { %v14976_v59 = vld [vmem:[%s20764_s3 + $0x1268] ss:$24 sps:$4 sm:$0xff]  }
 0x352   :  { %5374 = vmatpush1.bf16.msra.mxu1 %v14934_v30  ;;  %6551 = vmatpush1.bf16.msra.mxu0 %v14937_v17  ;;  %v14979_v30 = vld [vmem:[%s20764_s3 + $0x15a0] ss:$24 sps:$4 sm:$0xff]   ;;  %v14984_v17 = vld [vmem:[%s20764_s3 + $0x129c] ss:$24 sps:$4 sm:$0xff]  }
 0x353   :  { %5375 = vmatprep.subr.bf16.mxu1 %v14942_v34  ;;  %6552 = vmatprep.subr.bf16.mxu0 %v14945_v51  ;;  %v14987_v34 = vld [vmem:[%s20764_s3 + $0x15d4] ss:$24 sps:$4 sm:$0xff]   ;;  %v14982_v51 = vld [vmem:[%s20764_s3 + $0x1298] ss:$24 sps:$4 sm:$0xff]  }
 0x354   :  { %v18315_v41 = vpop.f32.mrb[100].mxu0 }
 0x355   :  { %v18317_v19 = vpop.f32.mrb[101].mxu0 }
 0x356   :  { %v4526_v23 = vpop.f32.mrb[102].mxu0  ;;  %5376 = vmatpush1.bf16.msra.mxu1 %v14940_v50  ;;  %6553 = vmatpush1.bf16.msra.mxu0 %v14943_v21  ;;  %v14985_v50 = vld [vmem:[%s20764_s3 + $0x15d0] ss:$24 sps:$4 sm:$0xff]   ;;  %v14990_v21 = vld [vmem:[%s20764_s3 + $0x12cc] ss:$24 sps:$4 sm:$0xff]  }
 0x357   :  { %v4527_v33 = vpop.f32.mrb[103].mxu0  ;;  %5377 = vmatprep.subr.bf16.mxu1 %v14948_v54  ;;  %6554 = vmatprep.subr.bf16.mxu0 %v14951_v53  ;;  %v14993_v54 = vld [vmem:[%s20764_s3 + $0x1604] ss:$24 sps:$4 sm:$0xff]   ;;  %v14988_v53 = vld [vmem:[%s20764_s3 + $0x12c8] ss:$24 sps:$4 sm:$0xff]  }
 0x358   :  { %v3643_v8 = vpop.f32.mrb[48].mxu1  ;;  %v14991_v23 = vld [vmem:[%s20764_s3 + $0x1600] ss:$24 sps:$4 sm:$0xff]  }
 0x359   :  { %v3732_v7 = vadd.f32 %v3643_v8, %v18004_v39  ;;  %v3645_v44 = vpop.f32.mrb[49].mxu1  ;;  %v14960_v39 = vld [vmem:[%s20764_s3 + $0x11e4] ss:$24 sps:$4 sm:$0xff]   ;;  %v14997_v8 = vld [vmem:[%s20764_s3 + $0x1630] ss:$24 sps:$4 sm:$0xff]  }
 0x35a   :  { %v3733_v48 = vadd.f32 %v3645_v44, %v18007_v56  ;;  %v3647_v37 = vpop.f32.mrb[50].mxu1  ;;  %5378 = vmatpush1.bf16.msra.mxu1 %v14946_v10  ;;  %6555 = vmatpush1.bf16.msra.mxu0 %v14949_v15  ;;  %v14963_v56 = vld [vmem:[%s20764_s3 + $0x1514] ss:$24 sps:$4 sm:$0xff]  }
 0x35b   :  { %v3648_v27 = vpop.f32.mrb[51].mxu1  ;;  %5379 = vmatprep.subr.bf16.mxu1 %v14954_v49  ;;  %6556 = vmatprep.subr.bf16.mxu0 %v14957_v25  ;;  %v18348_v6 = vadd.f32 %v18087_v32, %v3732_v7  ;;  %v14966_v32 = vld [vmem:[%s20764_s3 + $0x120c] ss:$24 sps:$4 sm:$0xff]   ;;  %v14996_v10 = vld [vmem:[%s20764_s3 + $0x12fc] ss:$24 sps:$4 sm:$0xff]  }
 0x35c   :  { %v18351_v0 = vadd.f32 %v18089_v61, %v3733_v48  ;;  %v14969_v61 = vld [vmem:[%s20764_s3 + $0x1544] ss:$24 sps:$4 sm:$0xff]   ;;  %v14999_v15 = vld [vmem:[%s20764_s3 + $0x1634] ss:$24 sps:$4 sm:$0xff]   ;;  %v14994_v25 = vld [vmem:[%s20764_s3 + $0x12f8] ss:$24 sps:$4 sm:$0xff]  }
 0x35d   :  { %v15002_v44 = vld [vmem:[%s20764_s3 + $0x132c] ss:$24 sps:$4 sm:$0xff]  }
 0x35e   :  { %5380 = vmatpush1.bf16.msra.mxu1 %v14952_v29  ;;  %6557 = vmatpush1.bf16.msra.mxu0 %v14955_v1  ;;  %v15005_v48 = vld [vmem:[%s20764_s3 + $0x1664] ss:$24 sps:$4 sm:$0xff]  }
 0x35f   :  { %5381 = vmatprep.subr.bf16.mxu1 %v14960_v39  ;;  %6624 = vmatprep.subr.bf16.mxu0 %v14963_v56  ;;  %v15000_v39 = vld [vmem:[%s20764_s3 + $0x1328] ss:$24 sps:$4 sm:$0xff]  }
 0x360   :  { %v15003_v56 = vld [vmem:[%s20764_s3 + $0x1660] ss:$24 sps:$4 sm:$0xff]  }
 0x361   :  { %6575 = vmatmul.mubr.bf16.vlgmr.msra.gmra.mrb[128].mxu0 %v18359_v24 }
 0x362   :  { %5382 = vmatpush1.bf16.msra.mxu1 %v14958_v9  ;;  %6625 = vmatpush1.bf16.msra.mxu0 %v14961_v58 }
 0x363   :  { %5745 = vmatprep.subr.bf16.mxu1 %v14966_v32  ;;  %6626 = vmatprep.subr.bf16.mxu0 %v14969_v61  ;;  %v15006_v61 = vld [vmem:[%s20764_s3 + $0x1358] ss:$24 sps:$4 sm:$0xff]  }
 0x364   :  { %6656 = vmatprep.mubr.bf16.mxu0 %v15807_v46 }
 0x365   :  { %5400 = vmatmul.mubr.bf16.vlgmr.msra.gmra.mrb[76].mxu1 %v17899_v40  ;;  %v14981_v40 = vld [vmem:[%s20764_s3 + $0x15a4] ss:$24 sps:$4 sm:$0xff]  }
 0x366   :  { %5746 = vmatpush1.bf16.msra.mxu1 %v14964_v18  ;;  %6627 = vmatpush1.bf16.msra.mxu0 %v14967_v20  ;;  %v15009_v18 = vld [vmem:[%s20764_s3 + $0x1688] ss:$24 sps:$4 sm:$0xff]  }
 0x367   :  { %5747 = vmatprep.subr.bf16.mxu1 %v14972_v35  ;;  %6628 = vmatprep.subr.bf16.mxu0 %v14975_v3  ;;  %v15012_v20 = vld [vmem:[%s20764_s3 + $0x1380] ss:$24 sps:$4 sm:$0xff]   ;;  %v15020_v3 = vld [vmem:[%s20764_s3 + $0x13b4] ss:$24 sps:$4 sm:$0xff]  }
 0x368   :  { %5777 = vmatprep.mubr.bf16.mxu1 %v15807_v46  ;;  %v15015_v35 = vld [vmem:[%s20764_s3 + $0x16b8] ss:$24 sps:$4 sm:$0xff]  }
 0x36a   :  { %5748 = vmatpush1.bf16.msra.mxu1 %v14970_v12  ;;  %6629 = vmatpush1.bf16.msra.mxu0 %v14973_v43  ;;  %v15023_v12 = vld [vmem:[%s20764_s3 + $0x16ec] ss:$24 sps:$4 sm:$0xff]   ;;  %v15018_v43 = vld [vmem:[%s20764_s3 + $0x13b0] ss:$24 sps:$4 sm:$0xff]  }
 0x36b   :  { %5749 = vmatprep.subr.bf16.mxu1 %v14978_v45  ;;  %6630 = vmatprep.subr.bf16.mxu0 %v14981_v40  ;;  %v15021_v45 = vld [vmem:[%s20764_s3 + $0x16e8] ss:$24 sps:$4 sm:$0xff]   ;;  %v15026_v40 = vld [vmem:[%s20764_s3 + $0x13e4] ss:$24 sps:$4 sm:$0xff]  }
 0x36e   :  { %5750 = vmatpush1.bf16.msra.mxu1 %v14976_v59  ;;  %6631 = vmatpush1.bf16.msra.mxu0 %v14979_v30  ;;  %v15024_v59 = vld [vmem:[%s20764_s3 + $0x13e0] ss:$24 sps:$4 sm:$0xff]  }
 0x36f   :  { %5751 = vmatprep.subr.bf16.mxu1 %v14984_v17  ;;  %6632 = vmatprep.subr.bf16.mxu0 %v14987_v34  ;;  %v15027_v30 = vld [vmem:[%s20764_s3 + $0x1718] ss:$24 sps:$4 sm:$0xff]   ;;  %v15032_v17 = vld [vmem:[%s20764_s3 + $0x1414] ss:$24 sps:$4 sm:$0xff]  }
 0x370   :  { %v15035_v34 = vld [vmem:[%s20764_s3 + $0x174c] ss:$24 sps:$4 sm:$0xff]  }
 0x372   :  { %5752 = vmatpush1.bf16.msra.mxu1 %v14982_v51  ;;  %6633 = vmatpush1.bf16.msra.mxu0 %v14985_v50  ;;  %v15030_v51 = vld [vmem:[%s20764_s3 + $0x1410] ss:$24 sps:$4 sm:$0xff]  }
 0x373   :  { %5753 = vmatprep.subr.bf16.mxu1 %v14990_v21  ;;  %6634 = vmatprep.subr.bf16.mxu0 %v14993_v54  ;;  %v15033_v50 = vld [vmem:[%s20764_s3 + $0x1748] ss:$24 sps:$4 sm:$0xff]   ;;  %v15038_v21 = vld [vmem:[%s20764_s3 + $0x1444] ss:$24 sps:$4 sm:$0xff]  }
 0x374   :  { %v18431_v63 = vpop.f32.mrb[104].mxu0  ;;  %v15041_v54 = vld [vmem:[%s20764_s3 + $0x177c] ss:$24 sps:$4 sm:$0xff]  }
 0x375   :  { %v18433_v33 = vpop.f32.mrb[105].mxu0 }
 0x376   :  { %v4904_v49 = vpop.f32.mrb[106].mxu0  ;;  %5754 = vmatpush1.bf16.msra.mxu1 %v14988_v53  ;;  %6635 = vmatpush1.bf16.msra.mxu0 %v14991_v23  ;;  %v15036_v53 = vld [vmem:[%s20764_s3 + $0x1440] ss:$24 sps:$4 sm:$0xff]  }
 0x377   :  { %v4905_v7 = vpop.f32.mrb[107].mxu0  ;;  %5755 = vmatprep.subr.bf16.mxu1 %v14996_v10  ;;  %6636 = vmatprep.subr.bf16.mxu0 %v14999_v15  ;;  %v15039_v23 = vld [vmem:[%s20764_s3 + $0x1778] ss:$24 sps:$4 sm:$0xff]   ;;  %v15044_v10 = vld [vmem:[%s20764_s3 + $0x1474] ss:$24 sps:$4 sm:$0xff]  }
 0x378   :  { %v3725_v37 = vpop.f32.mrb[52].mxu1  ;;  %v15047_v15 = vld [vmem:[%s20764_s3 + $0x17ac] ss:$24 sps:$4 sm:$0xff]   ;;  %v15042_v7 = vld [vmem:[%s20764_s3 + $0x1470] ss:$24 sps:$4 sm:$0xff]  }
 0x379   :  { %v3736_v29 = vadd.f32 %v3725_v37, %v18118_v4  ;;  %v3727_v1 = vpop.f32.mrb[53].mxu1  ;;  %v15008_v4 = vld [vmem:[%s20764_s3 + $0x135c] ss:$24 sps:$4 sm:$0xff]  }
 0x37a   :  { %v3737_v14 = vadd.f32 %v3727_v1, %v18121_v55  ;;  %v3729_v27 = vpop.f32.mrb[54].mxu1  ;;  %5756 = vmatpush1.bf16.msra.mxu1 %v14994_v25  ;;  %6637 = vmatpush1.bf16.msra.mxu0 %v14997_v8  ;;  %v15011_v55 = vld [vmem:[%s20764_s3 + $0x168c] ss:$24 sps:$4 sm:$0xff]   ;;  %v15053_v1 = vld [vmem:[%s20764_s3 + $0x17dc] ss:$24 sps:$4 sm:$0xff]  }
 0x37b   :  { %v3730_v9 = vpop.f32.mrb[55].mxu1  ;;  %5757 = vmatprep.subr.bf16.mxu1 %v15002_v44  ;;  %6638 = vmatprep.subr.bf16.mxu0 %v15005_v48  ;;  %v18462_v58 = vadd.f32 %v18199_v5, %v3736_v29  ;;  %v15014_v5 = vld [vmem:[%s20764_s3 + $0x1384] ss:$24 sps:$4 sm:$0xff]   ;;  %v15045_v44 = vld [vmem:[%s20764_s3 + $0x17a8] ss:$24 sps:$4 sm:$0xff]   ;;  %v326_v48 = vadd.f32 %v17863_v31, %v16444_v36 }
 0x37c   :  { %v18465_v32 = vadd.f32 %v18201_v26, %v3737_v14  ;;  %v15017_v26 = vld [vmem:[%s20764_s3 + $0x16bc] ss:$24 sps:$4 sm:$0xff]   ;;  %v15048_v36 = vld [vmem:[%s20764_s3 + $0x14a0] ss:$24 sps:$4 sm:$0xff]  }
 0x37d   :  { %v15050_v29 = vld [vmem:[%s20764_s3 + $0x14a4] ss:$24 sps:$4 sm:$0xff]   ;;  %v15051_v31 = vld [vmem:[%s20764_s3 + $0x17d8] ss:$24 sps:$4 sm:$0xff]  }
 0x37e   :  { %5758 = vmatpush1.bf16.msra.mxu1 %v15000_v39  ;;  %6639 = vmatpush1.bf16.msra.mxu0 %v15003_v56 }
 0x37f   :  { %5759 = vmatprep.subr.bf16.mxu1 %v15008_v4  ;;  %7002 = vmatprep.subr.bf16.mxu0 %v15011_v55  ;;  %v389_v4 = vmax.f32 %v326_v48, 0.0 }
 0x381   :  { %6657 = vmatmul.mubr.bf16.vlgmr.msra.gmra.mrb[132].mxu0 %v18359_v24 }
 0x382   :  { %5760 = vmatpush1.bf16.msra.mxu1 %v15006_v61  ;;  %7003 = vmatpush1.bf16.msra.mxu0 %v15009_v18 }
 0x383   :  { %6123 = vmatprep.subr.bf16.mxu1 %v15014_v5  ;;  %7004 = vmatprep.subr.bf16.mxu0 %v15017_v26  ;;  %v15054_v5 = vld [vmem:[%s20764_s3 + $0x14d0] ss:$24 sps:$4 sm:$0xff]   ;;  %v15057_v26 = vld [vmem:[%s20764_s3 + $0x1800] ss:$24 sps:$4 sm:$0xff]  }
 0x384   :  { %7034 = vmatprep.mubr.bf16.mxu0 %v15807_v46 }
 0x385   :  { %5778 = vmatmul.mubr.bf16.vlgmr.msra.gmra.mrb[80].mxu1 %v18015_v16  ;;  %v15029_v16 = vld [vmem:[%s20764_s3 + $0x171c] ss:$24 sps:$4 sm:$0xff]  }
 0x386   :  { %6124 = vmatpush1.bf16.msra.mxu1 %v15012_v20  ;;  %7005 = vmatpush1.bf16.msra.mxu0 %v15015_v35  ;;  %v18587_v20 = vpack.c.bf16 %v389_v4, %v389_v4  ;;  %v15060_v35 = vld [vmem:[%s20764_s3 + $0x1390] ss:$24 sps:$4 sm:$0xff]  }
 0x387   :  { %6125 = vmatprep.subr.bf16.mxu1 %v15020_v3  ;;  %7006 = vmatprep.subr.bf16.mxu0 %v15023_v12  ;;  %v15063_v3 = vld [vmem:[%s20764_s3 + $0x1830] ss:$24 sps:$4 sm:$0xff]   ;;  %v15068_v12 = vld [vmem:[%s20764_s3 + $0x13c4] ss:$24 sps:$4 sm:$0xff]  }
 0x388   :  { %6155 = vmatprep.mubr.bf16.mxu1 %v15807_v46 }
 0x38a   :  { %6126 = vmatpush1.bf16.msra.mxu1 %v15018_v43  ;;  %7007 = vmatpush1.bf16.msra.mxu0 %v15021_v45  ;;  %v15071_v43 = vld [vmem:[%s20764_s3 + $0x1864] ss:$24 sps:$4 sm:$0xff]   ;;  %v15066_v45 = vld [vmem:[%s20764_s3 + $0x13c0] ss:$24 sps:$4 sm:$0xff]  }
 0x38b   :  { %6127 = vmatprep.subr.bf16.mxu1 %v15026_v40  ;;  %7008 = vmatprep.subr.bf16.mxu0 %v15029_v16  ;;  %v15069_v40 = vld [vmem:[%s20764_s3 + $0x1860] ss:$24 sps:$4 sm:$0xff]   ;;  %v15074_v16 = vld [vmem:[%s20764_s3 + $0x13f4] ss:$24 sps:$4 sm:$0xff]  }
 0x38e   :  { %6128 = vmatpush1.bf16.msra.mxu1 %v15024_v59  ;;  %7009 = vmatpush1.bf16.msra.mxu0 %v15027_v30  ;;  %v15077_v59 = vld [vmem:[%s20764_s3 + $0x1894] ss:$24 sps:$4 sm:$0xff]   ;;  %v15072_v30 = vld [vmem:[%s20764_s3 + $0x13f0] ss:$24 sps:$4 sm:$0xff]  }
 0x38f   :  { %6129 = vmatprep.subr.bf16.mxu1 %v15032_v17  ;;  %7010 = vmatprep.subr.bf16.mxu0 %v15035_v34  ;;  %v15075_v17 = vld [vmem:[%s20764_s3 + $0x1890] ss:$24 sps:$4 sm:$0xff]   ;;  %v15080_v34 = vld [vmem:[%s20764_s3 + $0x1424] ss:$24 sps:$4 sm:$0xff]  }
 0x392   :  { %6130 = vmatpush1.bf16.msra.mxu1 %v15030_v51  ;;  %7011 = vmatpush1.bf16.msra.mxu0 %v15033_v50  ;;  %v15083_v51 = vld [vmem:[%s20764_s3 + $0x18c4] ss:$24 sps:$4 sm:$0xff]   ;;  %v15078_v50 = vld [vmem:[%s20764_s3 + $0x1420] ss:$24 sps:$4 sm:$0xff]  }
 0x393   :  { %6131 = vmatprep.subr.bf16.mxu1 %v15038_v21  ;;  %7012 = vmatprep.subr.bf16.mxu0 %v15041_v54  ;;  %v15081_v21 = vld [vmem:[%s20764_s3 + $0x18c0] ss:$24 sps:$4 sm:$0xff]   ;;  %v15086_v54 = vld [vmem:[%s20764_s3 + $0x1454] ss:$24 sps:$4 sm:$0xff]  }
 0x394   :  { %v18543_v49 = vpop.f32.mrb[108].mxu0 }
 0x395   :  { %v18545_v25 = vpop.f32.mrb[109].mxu0 }
 0x396   :  { %v4986_v8 = vpop.f32.mrb[110].mxu0  ;;  %6132 = vmatpush1.bf16.msra.mxu1 %v15036_v53  ;;  %7013 = vmatpush1.bf16.msra.mxu0 %v15039_v23  ;;  %v15089_v53 = vld [vmem:[%s20764_s3 + $0x18f4] ss:$24 sps:$4 sm:$0xff]   ;;  %v15084_v23 = vld [vmem:[%s20764_s3 + $0x1450] ss:$24 sps:$4 sm:$0xff]  }
 0x397   :  { %v4987_v37 = vpop.f32.mrb[111].mxu0  ;;  %6133 = vmatprep.subr.bf16.mxu1 %v15044_v10  ;;  %7014 = vmatprep.subr.bf16.mxu0 %v15047_v15  ;;  %v15087_v10 = vld [vmem:[%s20764_s3 + $0x18f0] ss:$24 sps:$4 sm:$0xff]   ;;  %v15092_v15 = vld [vmem:[%s20764_s3 + $0x1484] ss:$24 sps:$4 sm:$0xff]  }
 0x398   :  { %v4103_v14 = vpop.f32.mrb[56].mxu1  ;;  %v15095_v8 = vld [vmem:[%s20764_s3 + $0x1924] ss:$24 sps:$4 sm:$0xff]   ;;  %v15090_v37 = vld [vmem:[%s20764_s3 + $0x1480] ss:$24 sps:$4 sm:$0xff]  }
 0x399   :  { %v4153_v27 = vadd.f32 %v4103_v14, %v18232_v13  ;;  %v4105_v39 = vpop.f32.mrb[57].mxu1  ;;  %v15056_v13 = vld [vmem:[%s20764_s3 + $0x14d4] ss:$24 sps:$4 sm:$0xff]  }
 0x39a   :  { %v4154_v56 = vadd.f32 %v4105_v39, %v18235_v60  ;;  %v4107_v9 = vpop.f32.mrb[58].mxu1  ;;  %6134 = vmatpush1.bf16.msra.mxu1 %v15042_v7  ;;  %7015 = vmatpush1.bf16.msra.mxu0 %v15045_v44  ;;  %v15059_v60 = vld [vmem:[%s20764_s3 + $0x1804] ss:$24 sps:$4 sm:$0xff]   ;;  %v15098_v39 = vld [vmem:[%s20764_s3 + $0x14b4] ss:$24 sps:$4 sm:$0xff]  }
 0x39b   :  { %v4108_v55 = vpop.f32.mrb[59].mxu1  ;;  %6135 = vmatprep.subr.bf16.mxu1 %v15050_v29  ;;  %7016 = vmatprep.subr.bf16.mxu0 %v15053_v1  ;;  %v18576_v61 = vadd.f32 %v18315_v41, %v4153_v27  ;;  %v15062_v41 = vld [vmem:[%s20764_s3 + $0x1394] ss:$24 sps:$4 sm:$0xff]   ;;  %v15093_v29 = vld [vmem:[%s20764_s3 + $0x1920] ss:$24 sps:$4 sm:$0xff]  }
 0x39c   :  { %v18579_v18 = vadd.f32 %v18317_v19, %v4154_v56  ;;  %v15065_v19 = vld [vmem:[%s20764_s3 + $0x1834] ss:$24 sps:$4 sm:$0xff]   ;;  %v18672_v1 = vld [vmem:[%s20765_s2] ss:$0 sm:$0xff] }
 0x39d   :  { %v331_v14 = vadd.f32 %v18672_v1, %v16447_v38  ;;  %v15101_v56 = vld [vmem:[%s20764_s3 + $0x1954] ss:$24 sps:$4 sm:$0xff]   ;;  %v15096_v38 = vld [vmem:[%s20764_s3 + $0x14b0] ss:$24 sps:$4 sm:$0xff]  }
 0x39e   :  { %6136 = vmatpush1.bf16.msra.mxu1 %v15048_v36  ;;  %7017 = vmatpush1.bf16.msra.mxu0 %v15051_v31 }
 0x39f   :  { %6137 = vmatprep.subr.bf16.mxu1 %v15056_v13  ;;  %7380 = vmatprep.subr.bf16.mxu0 %v15059_v60  ;;  %v15099_v13 = vld [vmem:[%s20764_s3 + $0x1950] ss:$24 sps:$4 sm:$0xff]   ;;  %v390_v60 = vmax.f32 %v331_v14, 0.0 }
 0x3a1   :  { %7035 = vmatmul.mubr.bf16.vlgmr.msra.gmra.mrb[136].mxu0 %v18587_v20 }
 0x3a2   :  { %6138 = vmatpush1.bf16.msra.mxu1 %v15054_v5  ;;  %7381 = vmatpush1.bf16.msra.mxu0 %v15057_v26 }
 0x3a3   :  { %6205 = vmatprep.subr.bf16.mxu1 %v15062_v41  ;;  %7382 = vmatprep.subr.bf16.mxu0 %v15065_v19  ;;  %v15102_v19 = vld [vmem:[%s20764_s3 + $0x14e0] ss:$24 sps:$4 sm:$0xff]  }
 0x3a4   :  { %7412 = vmatprep.mubr.bf16.mxu0 %v15807_v46 }
 0x3a5   :  { %6156 = vmatmul.mubr.bf16.vlgmr.msra.gmra.mrb[84].mxu1 %v18243_v62 }
 0x3a6   :  { %6206 = vmatpush1.bf16.msra.mxu1 %v15060_v35  ;;  %7383 = vmatpush1.bf16.msra.mxu0 %v15063_v3  ;;  %v15105_v35 = vld [vmem:[%s20764_s3 + $0x1810] ss:$24 sps:$4 sm:$0xff]   ;;  %v18708_v3 = vpack.c.bf16 %v390_v60, %v390_v60 }
 0x3a7   :  { %6207 = vmatprep.subr.bf16.mxu1 %v15068_v12  ;;  %7384 = vmatprep.subr.bf16.mxu0 %v15071_v43  ;;  %v15108_v12 = vld [vmem:[%s20764_s3 + $0x1508] ss:$24 sps:$4 sm:$0xff]  }
 0x3a8   :  { %6237 = vmatprep.mubr.bf16.mxu1 %v15807_v46  ;;  %v15111_v43 = vld [vmem:[%s20764_s3 + $0x1840] ss:$24 sps:$4 sm:$0xff]  }
 0x3a9   :  { %v15144_v60 = vld [vmem:[%s20764_s3 + $0x1628] ss:$24 sps:$4 sm:$0xff]  }
 0x3aa   :  { %6208 = vmatpush1.bf16.msra.mxu1 %v15066_v45  ;;  %7385 = vmatpush1.bf16.msra.mxu0 %v15069_v40  ;;  %v15116_v45 = vld [vmem:[%s20764_s3 + $0x153c] ss:$24 sps:$4 sm:$0xff]  }
 0x3ab   :  { %6209 = vmatprep.subr.bf16.mxu1 %v15074_v16  ;;  %7386 = vmatprep.subr.bf16.mxu0 %v15077_v59  ;;  %v15119_v40 = vld [vmem:[%s20764_s3 + $0x1874] ss:$24 sps:$4 sm:$0xff]   ;;  %v15114_v16 = vld [vmem:[%s20764_s3 + $0x1538] ss:$24 sps:$4 sm:$0xff]  }
 0x3ac   :  { %v15117_v59 = vld [vmem:[%s20764_s3 + $0x1870] ss:$24 sps:$4 sm:$0xff]  }
 0x3ae   :  { %6210 = vmatpush1.bf16.msra.mxu1 %v15072_v30  ;;  %7387 = vmatpush1.bf16.msra.mxu0 %v15075_v17  ;;  %v15122_v30 = vld [vmem:[%s20764_s3 + $0x156c] ss:$24 sps:$4 sm:$0xff]   ;;  %v15120_v17 = vld [vmem:[%s20764_s3 + $0x1568] ss:$24 sps:$4 sm:$0xff]  }
 0x3af   :  { %6211 = vmatprep.subr.bf16.mxu1 %v15080_v34  ;;  %7388 = vmatprep.subr.bf16.mxu0 %v15083_v51  ;;  %v15123_v34 = vld [vmem:[%s20764_s3 + $0x18a0] ss:$24 sps:$4 sm:$0xff]   ;;  %v15128_v51 = vld [vmem:[%s20764_s3 + $0x159c] ss:$24 sps:$4 sm:$0xff]  }
 0x3b2   :  { %6212 = vmatpush1.bf16.msra.mxu1 %v15078_v50  ;;  %7389 = vmatpush1.bf16.msra.mxu0 %v15081_v21  ;;  %v15131_v50 = vld [vmem:[%s20764_s3 + $0x18d4] ss:$24 sps:$4 sm:$0xff]   ;;  %v15126_v21 = vld [vmem:[%s20764_s3 + $0x1598] ss:$24 sps:$4 sm:$0xff]  }
 0x3b3   :  { %6213 = vmatprep.subr.bf16.mxu1 %v15086_v54  ;;  %7390 = vmatprep.subr.bf16.mxu0 %v15089_v53  ;;  %v15129_v54 = vld [vmem:[%s20764_s3 + $0x18d0] ss:$24 sps:$4 sm:$0xff]   ;;  %v15134_v53 = vld [vmem:[%s20764_s3 + $0x15cc] ss:$24 sps:$4 sm:$0xff]  }
 0x3b4   :  { %v18659_v7 = vpop.f32.mrb[112].mxu0 }
 0x3b5   :  { %v18661_v44 = vpop.f32.mrb[113].mxu0 }
 0x3b6   :  { %v5364_v48 = vpop.f32.mrb[114].mxu0  ;;  %6214 = vmatpush1.bf16.msra.mxu1 %v15084_v23  ;;  %7391 = vmatpush1.bf16.msra.mxu0 %v15087_v10  ;;  %v15137_v23 = vld [vmem:[%s20764_s3 + $0x1904] ss:$24 sps:$4 sm:$0xff]   ;;  %v15132_v10 = vld [vmem:[%s20764_s3 + $0x15c8] ss:$24 sps:$4 sm:$0xff]  }
 0x3b7   :  { %v5365_v27 = vpop.f32.mrb[115].mxu0  ;;  %6215 = vmatprep.subr.bf16.mxu1 %v15092_v15  ;;  %7392 = vmatprep.subr.bf16.mxu0 %v15095_v8  ;;  %v15135_v15 = vld [vmem:[%s20764_s3 + $0x1900] ss:$24 sps:$4 sm:$0xff]   ;;  %v15140_v8 = vld [vmem:[%s20764_s3 + $0x15fc] ss:$24 sps:$4 sm:$0xff]  }
 0x3b8   :  { %v4481_v9 = vpop.f32.mrb[60].mxu1  ;;  %v15143_v48 = vld [vmem:[%s20764_s3 + $0x1934] ss:$24 sps:$4 sm:$0xff]   ;;  %v15138_v27 = vld [vmem:[%s20764_s3 + $0x15f8] ss:$24 sps:$4 sm:$0xff]  }
 0x3b9   :  { %v4570_v36 = vadd.f32 %v4481_v9, %v18348_v6  ;;  %v4483_v31 = vpop.f32.mrb[61].mxu1  ;;  %v15104_v6 = vld [vmem:[%s20764_s3 + $0x14e4] ss:$24 sps:$4 sm:$0xff]  }
 0x3ba   :  { %v4571_v4 = vadd.f32 %v4483_v31, %v18351_v0  ;;  %v4485_v55 = vpop.f32.mrb[62].mxu1  ;;  %6216 = vmatpush1.bf16.msra.mxu1 %v15090_v37  ;;  %7393 = vmatpush1.bf16.msra.mxu0 %v15093_v29  ;;  %v15107_v0 = vld [vmem:[%s20764_s3 + $0x1814] ss:$24 sps:$4 sm:$0xff]  }
 0x3bb   :  { %v4486_v5 = vpop.f32.mrb[63].mxu1  ;;  %6217 = vmatprep.subr.bf16.mxu1 %v15098_v39  ;;  %7394 = vmatprep.subr.bf16.mxu0 %v15101_v56  ;;  %v18697_v26 = vadd.f32 %v18431_v63, %v4570_v36  ;;  %v15110_v63 = vld [vmem:[%s20764_s3 + $0x150c] ss:$24 sps:$4 sm:$0xff]   ;;  %v15141_v39 = vld [vmem:[%s20764_s3 + $0x1930] ss:$24 sps:$4 sm:$0xff]  }
 0x3bc   :  { %v18700_v41 = vadd.f32 %v18433_v33, %v4571_v4  ;;  %v15113_v33 = vld [vmem:[%s20764_s3 + $0x1844] ss:$24 sps:$4 sm:$0xff]   ;;  %v15147_v5 = vld [vmem:[%s20764_s3 + $0x1960] ss:$24 sps:$4 sm:$0xff]  }
 0x3bd   :  { %v15146_v9 = vld [vmem:[%s20764_s3 + $0x162c] ss:$24 sps:$4 sm:$0xff]  }
 0x3be   :  { %6218 = vmatpush1.bf16.msra.mxu1 %v15096_v38  ;;  %7395 = vmatpush1.bf16.msra.mxu0 %v15099_v13  ;;  %v15149_v36 = vld [vmem:[%s20764_s3 + $0x1964] ss:$24 sps:$4 sm:$0xff]  }
 0x3bf   :  { %6219 = vmatprep.subr.bf16.mxu1 %v15104_v6  ;;  %7462 = vmatprep.subr.bf16.mxu0 %v15107_v0 }
 0x3c1   :  { %7413 = vmatmul.mubr.bf16.vlgmr.msra.gmra.mrb[140].mxu0 %v18708_v3 }
 0x3c2   :  { %6220 = vmatpush1.bf16.msra.mxu1 %v15102_v19  ;;  %7463 = vmatpush1.bf16.msra.mxu0 %v15105_v35  ;;  %v15150_v35 = vld [vmem:[%s20764_s3 + $0x1658] ss:$24 sps:$4 sm:$0xff]  }
 0x3c3   :  { %6583 = vmatprep.subr.bf16.mxu1 %v15110_v63  ;;  %7464 = vmatprep.subr.bf16.mxu0 %v15113_v33  ;;  %v15153_v63 = vld [vmem:[%s20764_s3 + $0x1988] ss:$24 sps:$4 sm:$0xff]  }
 0x3c4   :  { %7494 = vmatprep.mubr.bf16.mxu0 %v15807_v46  ;;  %v15156_v33 = vld [vmem:[%s20764_s3 + $0x1680] ss:$24 sps:$4 sm:$0xff]  }
 0x3c5   :  { %6238 = vmatmul.mubr.bf16.vlgmr.msra.gmra.mrb[88].mxu1 %v18243_v62  ;;  %v15125_v62 = vld [vmem:[%s20764_s3 + $0x18a4] ss:$24 sps:$4 sm:$0xff]  }
 0x3c6   :  { %6584 = vmatpush1.bf16.msra.mxu1 %v15108_v12  ;;  %7465 = vmatpush1.bf16.msra.mxu0 %v15111_v43  ;;  %v15159_v12 = vld [vmem:[%s20764_s3 + $0x19b8] ss:$24 sps:$4 sm:$0xff]   ;;  %v15164_v43 = vld [vmem:[%s20764_s3 + $0x16b4] ss:$24 sps:$4 sm:$0xff]  }
 0x3c7   :  { %6585 = vmatprep.subr.bf16.mxu1 %v15116_v45  ;;  %7466 = vmatprep.subr.bf16.mxu0 %v15119_v40  ;;  %v15167_v45 = vld [vmem:[%s20764_s3 + $0x19ec] ss:$24 sps:$4 sm:$0xff]   ;;  %v15162_v40 = vld [vmem:[%s20764_s3 + $0x16b0] ss:$24 sps:$4 sm:$0xff]  }
 0x3c8   :  { %6615 = vmatprep.mubr.bf16.mxu1 %v15807_v46 }
 0x3ca   :  { %6586 = vmatpush1.bf16.msra.mxu1 %v15114_v16  ;;  %7467 = vmatpush1.bf16.msra.mxu0 %v15117_v59  ;;  %v15165_v16 = vld [vmem:[%s20764_s3 + $0x19e8] ss:$24 sps:$4 sm:$0xff]   ;;  %v15170_v59 = vld [vmem:[%s20764_s3 + $0x16e4] ss:$24 sps:$4 sm:$0xff]  }
 0x3cb   :  { %6587 = vmatprep.subr.bf16.mxu1 %v15122_v30  ;;  %7468 = vmatprep.subr.bf16.mxu0 %v15125_v62  ;;  %v15168_v30 = vld [vmem:[%s20764_s3 + $0x16e0] ss:$24 sps:$4 sm:$0xff]  }
 0x3cc   :  { %v15171_v62 = vld [vmem:[%s20764_s3 + $0x1a18] ss:$24 sps:$4 sm:$0xff]  }
 0x3ce   :  { %6588 = vmatpush1.bf16.msra.mxu1 %v15120_v17  ;;  %7469 = vmatpush1.bf16.msra.mxu0 %v15123_v34  ;;  %v15176_v17 = vld [vmem:[%s20764_s3 + $0x1714] ss:$24 sps:$4 sm:$0xff]  }
 0x3cf   :  { %6589 = vmatprep.subr.bf16.mxu1 %v15128_v51  ;;  %7470 = vmatprep.subr.bf16.mxu0 %v15131_v50  ;;  %v15179_v34 = vld [vmem:[%s20764_s3 + $0x1a4c] ss:$24 sps:$4 sm:$0xff]   ;;  %v15174_v51 = vld [vmem:[%s20764_s3 + $0x1710] ss:$24 sps:$4 sm:$0xff]  }
 0x3d0   :  { %v15177_v50 = vld [vmem:[%s20764_s3 + $0x1a48] ss:$24 sps:$4 sm:$0xff]  }
 0x3d2   :  { %6590 = vmatpush1.bf16.msra.mxu1 %v15126_v21  ;;  %7471 = vmatpush1.bf16.msra.mxu0 %v15129_v54  ;;  %v15182_v21 = vld [vmem:[%s20764_s3 + $0x1744] ss:$24 sps:$4 sm:$0xff]  }
 0x3d3   :  { %6591 = vmatprep.subr.bf16.mxu1 %v15134_v53  ;;  %7472 = vmatprep.subr.bf16.mxu0 %v15137_v23  ;;  %v15185_v54 = vld [vmem:[%s20764_s3 + $0x1a7c] ss:$24 sps:$4 sm:$0xff]   ;;  %v15180_v53 = vld [vmem:[%s20764_s3 + $0x1740] ss:$24 sps:$4 sm:$0xff]  }
 0x3d4   :  { %v18780_v37 = vpop.f32.mrb[116].mxu0  ;;  %v15183_v23 = vld [vmem:[%s20764_s3 + $0x1a78] ss:$24 sps:$4 sm:$0xff]  }
 0x3d5   :  { %v18782_v29 = vpop.f32.mrb[117].mxu0 }
 0x3d6   :  { %v5742_v14 = vpop.f32.mrb[118].mxu0  ;;  %6592 = vmatpush1.bf16.msra.mxu1 %v15132_v10  ;;  %7473 = vmatpush1.bf16.msra.mxu0 %v15135_v15  ;;  %v15188_v10 = vld [vmem:[%s20764_s3 + $0x1774] ss:$24 sps:$4 sm:$0xff]  }
 0x3d7   :  { %v5743_v56 = vpop.f32.mrb[119].mxu0  ;;  %6593 = vmatprep.subr.bf16.mxu1 %v15140_v8  ;;  %7474 = vmatprep.subr.bf16.mxu0 %v15143_v48  ;;  %v15191_v15 = vld [vmem:[%s20764_s3 + $0x1aac] ss:$24 sps:$4 sm:$0xff]  }
 0x3d8   :  { %v4563_v31 = vpop.f32.mrb[64].mxu1  ;;  %v336_v56 = vadd.f32 %v18672_v1, %v16456_v42  ;;  %v15192_v42 = vld [vmem:[%s20764_s3 + $0x17a0] ss:$24 sps:$4 sm:$0xff]  }
 0x3d9   :  { %v4574_v4 = vadd.f32 %v4563_v31, %v18462_v58  ;;  %v4565_v55 = vpop.f32.mrb[65].mxu1  ;;  %v15152_v58 = vld [vmem:[%s20764_s3 + $0x165c] ss:$24 sps:$4 sm:$0xff]  }
 0x3da   :  { %v4575_v38 = vadd.f32 %v4565_v55, %v18465_v32  ;;  %v4567_v13 = vpop.f32.mrb[66].mxu1  ;;  %6594 = vmatpush1.bf16.msra.mxu1 %v15138_v27  ;;  %7475 = vmatpush1.bf16.msra.mxu0 %v15141_v39  ;;  %v15155_v32 = vld [vmem:[%s20764_s3 + $0x198c] ss:$24 sps:$4 sm:$0xff]   ;;  %v15186_v27 = vld [vmem:[%s20764_s3 + $0x1770] ss:$24 sps:$4 sm:$0xff]  }
 0x3db   :  { %v4568_v6 = vpop.f32.mrb[67].mxu1  ;;  %6595 = vmatprep.subr.bf16.mxu1 %v15146_v9  ;;  %7476 = vmatprep.subr.bf16.mxu0 %v15149_v36  ;;  %v18811_v0 = vadd.f32 %v18543_v49, %v4574_v4  ;;  %v15158_v49 = vld [vmem:[%s20764_s3 + $0x1684] ss:$24 sps:$4 sm:$0xff]   ;;  %v15189_v39 = vld [vmem:[%s20764_s3 + $0x1aa8] ss:$24 sps:$4 sm:$0xff]  }
 0x3dc   :  { %v18814_v19 = vadd.f32 %v18545_v25, %v4575_v38  ;;  %v15161_v25 = vld [vmem:[%s20764_s3 + $0x19bc] ss:$24 sps:$4 sm:$0xff]   ;;  %v391_v6 = vmax.f32 %v336_v56, 0.0  ;;  %v15234_v56 = vld [vmem:[%s20764_s3 + $0x1780] ss:$24 sps:$4 sm:$0xff]  }
 0x3dd   :  { %v15194_v36 = vld [vmem:[%s20764_s3 + $0x17a4] ss:$24 sps:$4 sm:$0xff]  }
 0x3de   :  { %6596 = vmatpush1.bf16.msra.mxu1 %v15144_v60  ;;  %7477 = vmatpush1.bf16.msra.mxu0 %v15147_v5  ;;  %v15197_v31 = vld [vmem:[%s20764_s3 + $0x1adc] ss:$24 sps:$4 sm:$0xff]   ;;  %v15195_v5 = vld [vmem:[%s20764_s3 + $0x1ad8] ss:$24 sps:$4 sm:$0xff]  }
 0x3df   :  { %6597 = vmatprep.subr.bf16.mxu1 %v15152_v58  ;;  %7840 = vmatprep.subr.bf16.mxu0 %v15155_v32 }
 0x3e1   :  { %7495 = vmatmul.mubr.bf16.vlgmr.msra.gmra.mrb[144].mxu0 %v18708_v3 }
 0x3e2   :  { %6598 = vmatpush1.bf16.msra.mxu1 %v15150_v35  ;;  %7841 = vmatpush1.bf16.msra.mxu0 %v15153_v63  ;;  %v15198_v63 = vld [vmem:[%s20764_s3 + $0x17d0] ss:$24 sps:$4 sm:$0xff]  }
 0x3e3   :  { %6961 = vmatprep.subr.bf16.mxu1 %v15158_v49  ;;  %7842 = vmatprep.subr.bf16.mxu0 %v15161_v25  ;;  %v15201_v49 = vld [vmem:[%s20764_s3 + $0x1b00] ss:$24 sps:$4 sm:$0xff]   ;;  %v18936_v25 = vpack.c.bf16 %v391_v6, %v391_v6  ;;  %v15243_v6 = vld [vmem:[%s20764_s3 + $0x1c50] ss:$24 sps:$4 sm:$0xff]  }
 0x3e4   :  { %7872 = vmatprep.mubr.bf16.mxu0 %v15807_v46 }
 0x3e5   :  { %6616 = vmatmul.mubr.bf16.vlgmr.msra.gmra.mrb[92].mxu1 %v18359_v24  ;;  %v15173_v24 = vld [vmem:[%s20764_s3 + $0x1a1c] ss:$24 sps:$4 sm:$0xff]  }
 0x3e6   :  { %6962 = vmatpush1.bf16.msra.mxu1 %v15156_v33  ;;  %7843 = vmatpush1.bf16.msra.mxu0 %v15159_v12  ;;  %v15204_v33 = vld [vmem:[%s20764_s3 + $0x1690] ss:$24 sps:$4 sm:$0xff]  }
 0x3e7   :  { %6963 = vmatprep.subr.bf16.mxu1 %v15164_v43  ;;  %7844 = vmatprep.subr.bf16.mxu0 %v15167_v45  ;;  %v15207_v12 = vld [vmem:[%s20764_s3 + $0x1b30] ss:$24 sps:$4 sm:$0xff]   ;;  %v15212_v43 = vld [vmem:[%s20764_s3 + $0x16c4] ss:$24 sps:$4 sm:$0xff]  }
 0x3e8   :  { %6993 = vmatprep.mubr.bf16.mxu1 %v15807_v46  ;;  %v15215_v45 = vld [vmem:[%s20764_s3 + $0x1b64] ss:$24 sps:$4 sm:$0xff]  }
 0x3ea   :  { %6964 = vmatpush1.bf16.msra.mxu1 %v15162_v40  ;;  %7845 = vmatpush1.bf16.msra.mxu0 %v15165_v16  ;;  %v15210_v40 = vld [vmem:[%s20764_s3 + $0x16c0] ss:$24 sps:$4 sm:$0xff]  }
 0x3eb   :  { %6965 = vmatprep.subr.bf16.mxu1 %v15170_v59  ;;  %7846 = vmatprep.subr.bf16.mxu0 %v15173_v24  ;;  %v15213_v16 = vld [vmem:[%s20764_s3 + $0x1b60] ss:$24 sps:$4 sm:$0xff]   ;;  %v15218_v59 = vld [vmem:[%s20764_s3 + $0x16f4] ss:$24 sps:$4 sm:$0xff]  }
 0x3ec   :  { %v15221_v24 = vld [vmem:[%s20764_s3 + $0x1b94] ss:$24 sps:$4 sm:$0xff]  }
 0x3ee   :  { %6966 = vmatpush1.bf16.msra.mxu1 %v15168_v30  ;;  %7847 = vmatpush1.bf16.msra.mxu0 %v15171_v62  ;;  %v15216_v30 = vld [vmem:[%s20764_s3 + $0x16f0] ss:$24 sps:$4 sm:$0xff]  }
 0x3ef   :  { %6967 = vmatprep.subr.bf16.mxu1 %v15176_v17  ;;  %7848 = vmatprep.subr.bf16.mxu0 %v15179_v34  ;;  %v15219_v62 = vld [vmem:[%s20764_s3 + $0x1b90] ss:$24 sps:$4 sm:$0xff]   ;;  %v15224_v17 = vld [vmem:[%s20764_s3 + $0x1724] ss:$24 sps:$4 sm:$0xff]  }
 0x3f0   :  { %v15227_v34 = vld [vmem:[%s20764_s3 + $0x1bc4] ss:$24 sps:$4 sm:$0xff]  }
 0x3f2   :  { %6968 = vmatpush1.bf16.msra.mxu1 %v15174_v51  ;;  %7849 = vmatpush1.bf16.msra.mxu0 %v15177_v50  ;;  %v15222_v51 = vld [vmem:[%s20764_s3 + $0x1720] ss:$24 sps:$4 sm:$0xff]  }
 0x3f3   :  { %6969 = vmatprep.subr.bf16.mxu1 %v15182_v21  ;;  %7850 = vmatprep.subr.bf16.mxu0 %v15185_v54  ;;  %v15225_v50 = vld [vmem:[%s20764_s3 + $0x1bc0] ss:$24 sps:$4 sm:$0xff]   ;;  %v15230_v21 = vld [vmem:[%s20764_s3 + $0x1754] ss:$24 sps:$4 sm:$0xff]  }
 0x3f4   :  { %v18892_v8 = vpop.f32.mrb[120].mxu0  ;;  %v15233_v54 = vld [vmem:[%s20764_s3 + $0x1bf4] ss:$24 sps:$4 sm:$0xff]  }
 0x3f5   :  { %v18894_v48 = vpop.f32.mrb[121].mxu0 }
 0x3f6   :  { %v5824_v14 = vpop.f32.mrb[122].mxu0  ;;  %6970 = vmatpush1.bf16.msra.mxu1 %v15180_v53  ;;  %7851 = vmatpush1.bf16.msra.mxu0 %v15183_v23  ;;  %v15228_v53 = vld [vmem:[%s20764_s3 + $0x1750] ss:$24 sps:$4 sm:$0xff]  }
 0x3f7   :  { %v5825_v9 = vpop.f32.mrb[123].mxu0  ;;  %6971 = vmatprep.subr.bf16.mxu1 %v15188_v10  ;;  %7852 = vmatprep.subr.bf16.mxu0 %v15191_v15  ;;  %v15231_v23 = vld [vmem:[%s20764_s3 + $0x1bf0] ss:$24 sps:$4 sm:$0xff]   ;;  %v15236_v10 = vld [vmem:[%s20764_s3 + $0x1784] ss:$24 sps:$4 sm:$0xff]  }
 0x3f8   :  { %v4941_v4 = vpop.f32.mrb[68].mxu1  ;;  %v15239_v15 = vld [vmem:[%s20764_s3 + $0x1c24] ss:$24 sps:$4 sm:$0xff]   ;;  %v15237_v9 = vld [vmem:[%s20764_s3 + $0x1c20] ss:$24 sps:$4 sm:$0xff]  }
 0x3f9   :  { %v4991_v55 = vadd.f32 %v4941_v4, %v18576_v61  ;;  %v4943_v38 = vpop.f32.mrb[69].mxu1  ;;  %v15200_v61 = vld [vmem:[%s20764_s3 + $0x17d4] ss:$24 sps:$4 sm:$0xff]  }
 0x3fa   :  { %v4992_v13 = vadd.f32 %v4943_v38, %v18579_v18  ;;  %v4945_v60 = vpop.f32.mrb[70].mxu1  ;;  %6972 = vmatpush1.bf16.msra.mxu1 %v15186_v27  ;;  %7853 = vmatpush1.bf16.msra.mxu0 %v15189_v39  ;;  %v15203_v18 = vld [vmem:[%s20764_s3 + $0x1b04] ss:$24 sps:$4 sm:$0xff]   ;;  %v15242_v4 = vld [vmem:[%s20764_s3 + $0x17b4] ss:$24 sps:$4 sm:$0xff]  }
 0x3fb   :  { %v4946_v58 = vpop.f32.mrb[71].mxu1  ;;  %6973 = vmatprep.subr.bf16.mxu1 %v15194_v36  ;;  %7854 = vmatprep.subr.bf16.mxu0 %v15197_v31  ;;  %v18925_v32 = vadd.f32 %v18659_v7, %v4991_v55  ;;  %v15206_v7 = vld [vmem:[%s20764_s3 + $0x1694] ss:$24 sps:$4 sm:$0xff]   ;;  %v341_v36 = vadd.f32 %v18672_v1, %v16465_v47  ;;  %v15240_v47 = vld [vmem:[%s20764_s3 + $0x17b0] ss:$24 sps:$4 sm:$0xff]  }
 0x3fc   :  { %v18928_v35 = vadd.f32 %v18661_v44, %v4992_v13  ;;  %v15209_v44 = vld [vmem:[%s20764_s3 + $0x1b34] ss:$24 sps:$4 sm:$0xff]  }
 0x3fd   :  { %v15245_v55 = vld [vmem:[%s20764_s3 + $0x1c54] ss:$24 sps:$4 sm:$0xff]   ;;  %v392_v58 = vmax.f32 %v341_v36, 0.0  ;;  %v15285_v36 = vld [vmem:[%s20764_s3 + $0x1c30] ss:$24 sps:$4 sm:$0xff]  }
 0x3fe   :  { %6974 = vmatpush1.bf16.msra.mxu1 %v15192_v42  ;;  %7855 = vmatpush1.bf16.msra.mxu0 %v15195_v5 }
 0x3ff   :  { %6975 = vmatprep.subr.bf16.mxu1 %v15200_v61  ;;  %8218 = vmatprep.subr.bf16.mxu0 %v15203_v18 }
 0x401   :  { %7873 = vmatmul.mubr.bf16.vlgmr.msra.gmra.mrb[148].mxu0 %v18936_v25 }
 0x402   :  { %6976 = vmatpush1.bf16.msra.mxu1 %v15198_v63  ;;  %8219 = vmatpush1.bf16.msra.mxu0 %v15201_v49  ;;  %v15246_v49 = vld [vmem:[%s20764_s3 + $0x17e0] ss:$24 sps:$4 sm:$0xff]  }
 0x403   :  { %7043 = vmatprep.subr.bf16.mxu1 %v15206_v7  ;;  %8220 = vmatprep.subr.bf16.mxu0 %v15209_v44  ;;  %v15249_v7 = vld [vmem:[%s20764_s3 + $0x1b10] ss:$24 sps:$4 sm:$0xff]   ;;  %v19052_v44 = vpack.c.bf16 %v392_v58, %v392_v58 }
 0x404   :  { %8250 = vmatprep.mubr.bf16.mxu0 %v15807_v46 }
 0x405   :  { %6994 = vmatmul.mubr.bf16.vlgmr.msra.gmra.mrb[96].mxu1 %v18587_v20 }
 0x406   :  { %7044 = vmatpush1.bf16.msra.mxu1 %v15204_v33  ;;  %8221 = vmatpush1.bf16.msra.mxu0 %v15207_v12  ;;  %v15252_v33 = vld [vmem:[%s20764_s3 + $0x1808] ss:$24 sps:$4 sm:$0xff]  }
 0x407   :  { %7045 = vmatprep.subr.bf16.mxu1 %v15212_v43  ;;  %8222 = vmatprep.subr.bf16.mxu0 %v15215_v45  ;;  %v15255_v12 = vld [vmem:[%s20764_s3 + $0x1b40] ss:$24 sps:$4 sm:$0xff]   ;;  %v15260_v43 = vld [vmem:[%s20764_s3 + $0x183c] ss:$24 sps:$4 sm:$0xff]  }
 0x408   :  { %7075 = vmatprep.mubr.bf16.mxu1 %v15807_v46  ;;  %v15263_v45 = vld [vmem:[%s20764_s3 + $0x1b74] ss:$24 sps:$4 sm:$0xff]  }
 0x40a   :  { %7046 = vmatpush1.bf16.msra.mxu1 %v15210_v40  ;;  %8223 = vmatpush1.bf16.msra.mxu0 %v15213_v16  ;;  %v15258_v40 = vld [vmem:[%s20764_s3 + $0x1838] ss:$24 sps:$4 sm:$0xff]  }
 0x40b   :  { %7047 = vmatprep.subr.bf16.mxu1 %v15218_v59  ;;  %8224 = vmatprep.subr.bf16.mxu0 %v15221_v24  ;;  %v15261_v16 = vld [vmem:[%s20764_s3 + $0x1b70] ss:$24 sps:$4 sm:$0xff]   ;;  %v15266_v59 = vld [vmem:[%s20764_s3 + $0x186c] ss:$24 sps:$4 sm:$0xff]  }
 0x40c   :  { %v15264_v24 = vld [vmem:[%s20764_s3 + $0x1868] ss:$24 sps:$4 sm:$0xff]  }
 0x40e   :  { %7048 = vmatpush1.bf16.msra.mxu1 %v15216_v30  ;;  %8225 = vmatpush1.bf16.msra.mxu0 %v15219_v62  ;;  %v15267_v30 = vld [vmem:[%s20764_s3 + $0x1ba0] ss:$24 sps:$4 sm:$0xff]   ;;  %v15272_v62 = vld [vmem:[%s20764_s3 + $0x189c] ss:$24 sps:$4 sm:$0xff]  }
 0x40f   :  { %7049 = vmatprep.subr.bf16.mxu1 %v15224_v17  ;;  %8226 = vmatprep.subr.bf16.mxu0 %v15227_v34  ;;  %v15275_v17 = vld [vmem:[%s20764_s3 + $0x1bd4] ss:$24 sps:$4 sm:$0xff]   ;;  %v15270_v34 = vld [vmem:[%s20764_s3 + $0x1898] ss:$24 sps:$4 sm:$0xff]  }
 0x412   :  { %7050 = vmatpush1.bf16.msra.mxu1 %v15222_v51  ;;  %8227 = vmatpush1.bf16.msra.mxu0 %v15225_v50  ;;  %v15273_v51 = vld [vmem:[%s20764_s3 + $0x1bd0] ss:$24 sps:$4 sm:$0xff]   ;;  %v15278_v50 = vld [vmem:[%s20764_s3 + $0x18cc] ss:$24 sps:$4 sm:$0xff]  }
 0x413   :  { %7051 = vmatprep.subr.bf16.mxu1 %v15230_v21  ;;  %8228 = vmatprep.subr.bf16.mxu0 %v15233_v54  ;;  %v15281_v21 = vld [vmem:[%s20764_s3 + $0x1c04] ss:$24 sps:$4 sm:$0xff]   ;;  %v15276_v54 = vld [vmem:[%s20764_s3 + $0x18c8] ss:$24 sps:$4 sm:$0xff]  }
 0x414   :  { %v19008_v14 = vpop.f32.mrb[124].mxu0 }
 0x415   :  { %v19010_v27 = vpop.f32.mrb[125].mxu0 }
 0x416   :  { %v6202_v39 = vpop.f32.mrb[126].mxu0  ;;  %7052 = vmatpush1.bf16.msra.mxu1 %v15228_v53  ;;  %8229 = vmatpush1.bf16.msra.mxu0 %v15231_v23  ;;  %v15279_v53 = vld [vmem:[%s20764_s3 + $0x1c00] ss:$24 sps:$4 sm:$0xff]   ;;  %v15284_v23 = vld [vmem:[%s20764_s3 + $0x18fc] ss:$24 sps:$4 sm:$0xff]  }
 0x417   :  { %v6203_v31 = vpop.f32.mrb[127].mxu0  ;;  %7053 = vmatprep.subr.bf16.mxu1 %v15236_v10  ;;  %8230 = vmatprep.subr.bf16.mxu0 %v15239_v15  ;;  %v15287_v10 = vld [vmem:[%s20764_s3 + $0x1c34] ss:$24 sps:$4 sm:$0xff]  }
 0x418   :  { %v5319_v38 = vpop.f32.mrb[72].mxu1 }
 0x419   :  { %v5408_v13 = vadd.f32 %v5319_v38, %v18697_v26  ;;  %v5321_v60 = vpop.f32.mrb[73].mxu1  ;;  %v15248_v26 = vld [vmem:[%s20764_s3 + $0x17e4] ss:$24 sps:$4 sm:$0xff]  }
 0x41a   :  { %v5409_v42 = vadd.f32 %v5321_v60, %v18700_v41  ;;  %v5323_v5 = vpop.f32.mrb[74].mxu1  ;;  %7054 = vmatpush1.bf16.msra.mxu1 %v15234_v56  ;;  %8231 = vmatpush1.bf16.msra.mxu0 %v15237_v9  ;;  %v15251_v41 = vld [vmem:[%s20764_s3 + $0x1b14] ss:$24 sps:$4 sm:$0xff]   ;;  %v15282_v9 = vld [vmem:[%s20764_s3 + $0x18f8] ss:$24 sps:$4 sm:$0xff]  }
 0x41b   :  { %v5324_v61 = vpop.f32.mrb[75].mxu1  ;;  %7055 = vmatprep.subr.bf16.mxu1 %v15242_v4  ;;  %8232 = vmatprep.subr.bf16.mxu0 %v15245_v55  ;;  %v19041_v18 = vadd.f32 %v18780_v37, %v5408_v13  ;;  %v15254_v37 = vld [vmem:[%s20764_s3 + $0x180c] ss:$24 sps:$4 sm:$0xff]  }
 0x41c   :  { %v19044_v63 = vadd.f32 %v18782_v29, %v5409_v42  ;;  %v15257_v29 = vld [vmem:[%s20764_s3 + $0x1b44] ss:$24 sps:$4 sm:$0xff]  }
 0x41d   :  { %v15290_v4 = vld [vmem:[%s20764_s3 + $0x192c] ss:$24 sps:$4 sm:$0xff]  }
 0x41e   :  { %7056 = vmatpush1.bf16.msra.mxu1 %v15240_v47  ;;  %8233 = vmatpush1.bf16.msra.mxu0 %v15243_v6  ;;  %v15293_v55 = vld [vmem:[%s20764_s3 + $0x1c64] ss:$24 sps:$4 sm:$0xff]   ;;  %v15288_v47 = vld [vmem:[%s20764_s3 + $0x1928] ss:$24 sps:$4 sm:$0xff]  }
 0x41f   :  { %7057 = vmatprep.subr.bf16.mxu1 %v15248_v26  ;;  %8300 = vmatprep.subr.bf16.mxu0 %v15251_v41  ;;  %v15291_v6 = vld [vmem:[%s20764_s3 + $0x1c60] ss:$24 sps:$4 sm:$0xff]  }
 0x420   :  { %v15294_v41 = vld [vmem:[%s20764_s3 + $0x1958] ss:$24 sps:$4 sm:$0xff]  }
 0x421   :  { %8251 = vmatmul.mubr.bf16.vlgmr.msra.gmra.mrb[152].mxu0 %v19052_v44 }
 0x422   :  { %7058 = vmatpush1.bf16.msra.mxu1 %v15246_v49  ;;  %8301 = vmatpush1.bf16.msra.mxu0 %v15249_v7  ;;  %v15297_v49 = vld [vmem:[%s20764_s3 + $0x1c88] ss:$24 sps:$4 sm:$0xff]  }
 0x423   :  { %7421 = vmatprep.subr.bf16.mxu1 %v15254_v37  ;;  %8302 = vmatprep.subr.bf16.mxu0 %v15257_v29  ;;  %v15300_v7 = vld [vmem:[%s20764_s3 + $0x1980] ss:$24 sps:$4 sm:$0xff]   ;;  %v15308_v29 = vld [vmem:[%s20764_s3 + $0x19b4] ss:$24 sps:$4 sm:$0xff]  }
 0x424   :  { %8332 = vmatprep.mubr.bf16.mxu0 %v15807_v46  ;;  %v15303_v37 = vld [vmem:[%s20764_s3 + $0x1cb8] ss:$24 sps:$4 sm:$0xff]  }
 0x425   :  { %7076 = vmatmul.mubr.bf16.vlgmr.msra.gmra.mrb[100].mxu1 %v18587_v20  ;;  %v15269_v20 = vld [vmem:[%s20764_s3 + $0x1ba4] ss:$24 sps:$4 sm:$0xff]  }
 0x426   :  { %7422 = vmatpush1.bf16.msra.mxu1 %v15252_v33  ;;  %8303 = vmatpush1.bf16.msra.mxu0 %v15255_v12  ;;  %v15311_v33 = vld [vmem:[%s20764_s3 + $0x1cec] ss:$24 sps:$4 sm:$0xff]   ;;  %v15306_v12 = vld [vmem:[%s20764_s3 + $0x19b0] ss:$24 sps:$4 sm:$0xff]  }
 0x427   :  { %7423 = vmatprep.subr.bf16.mxu1 %v15260_v43  ;;  %8304 = vmatprep.subr.bf16.mxu0 %v15263_v45  ;;  %v15309_v43 = vld [vmem:[%s20764_s3 + $0x1ce8] ss:$24 sps:$4 sm:$0xff]   ;;  %v15314_v45 = vld [vmem:[%s20764_s3 + $0x19e4] ss:$24 sps:$4 sm:$0xff]  }
 0x428   :  { %7453 = vmatprep.mubr.bf16.mxu1 %v15807_v46 }
 0x42a   :  { %7424 = vmatpush1.bf16.msra.mxu1 %v15258_v40  ;;  %8305 = vmatpush1.bf16.msra.mxu0 %v15261_v16  ;;  %v15312_v40 = vld [vmem:[%s20764_s3 + $0x19e0] ss:$24 sps:$4 sm:$0xff]  }
 0x42b   :  { %7425 = vmatprep.subr.bf16.mxu1 %v15266_v59  ;;  %8306 = vmatprep.subr.bf16.mxu0 %v15269_v20  ;;  %v15315_v16 = vld [vmem:[%s20764_s3 + $0x1d18] ss:$24 sps:$4 sm:$0xff]   ;;  %v15320_v59 = vld [vmem:[%s20764_s3 + $0x1a14] ss:$24 sps:$4 sm:$0xff]  }
 0x42c   :  { %v15323_v20 = vld [vmem:[%s20764_s3 + $0x1d4c] ss:$24 sps:$4 sm:$0xff]  }
 0x42e   :  { %7426 = vmatpush1.bf16.msra.mxu1 %v15264_v24  ;;  %8307 = vmatpush1.bf16.msra.mxu0 %v15267_v30  ;;  %v15318_v24 = vld [vmem:[%s20764_s3 + $0x1a10] ss:$24 sps:$4 sm:$0xff]  }
 0x42f   :  { %7427 = vmatprep.subr.bf16.mxu1 %v15272_v62  ;;  %8308 = vmatprep.subr.bf16.mxu0 %v15275_v17  ;;  %v15321_v30 = vld [vmem:[%s20764_s3 + $0x1d48] ss:$24 sps:$4 sm:$0xff]   ;;  %v15326_v62 = vld [vmem:[%s20764_s3 + $0x1a44] ss:$24 sps:$4 sm:$0xff]  }
 0x430   :  { %v15329_v17 = vld [vmem:[%s20764_s3 + $0x1d7c] ss:$24 sps:$4 sm:$0xff]  }
 0x432   :  { %7428 = vmatpush1.bf16.msra.mxu1 %v15270_v34  ;;  %8309 = vmatpush1.bf16.msra.mxu0 %v15273_v51  ;;  %v15324_v34 = vld [vmem:[%s20764_s3 + $0x1a40] ss:$24 sps:$4 sm:$0xff]  }
 0x433   :  { %7429 = vmatprep.subr.bf16.mxu1 %v15278_v50  ;;  %8310 = vmatprep.subr.bf16.mxu0 %v15281_v21  ;;  %v15327_v51 = vld [vmem:[%s20764_s3 + $0x1d78] ss:$24 sps:$4 sm:$0xff]   ;;  %v15332_v50 = vld [vmem:[%s20764_s3 + $0x1a74] ss:$24 sps:$4 sm:$0xff]  }
 0x434   :  { %v19124_v15 = vpop.f32.mrb[128].mxu0  ;;  %v15335_v21 = vld [vmem:[%s20764_s3 + $0x1dac] ss:$24 sps:$4 sm:$0xff]  }
 0x435   :  { %v19126_v39 = vpop.f32.mrb[129].mxu0 }
 0x436   :  { %v6580_v56 = vpop.f32.mrb[130].mxu0  ;;  %7430 = vmatpush1.bf16.msra.mxu1 %v15276_v54  ;;  %8311 = vmatpush1.bf16.msra.mxu0 %v15279_v53 }
 0x437   :  { %v6581_v31 = vpop.f32.mrb[131].mxu0  ;;  %7431 = vmatprep.subr.bf16.mxu1 %v15284_v23  ;;  %8312 = vmatprep.subr.bf16.mxu0 %v15287_v10  ;;  %v15330_v10 = vld [vmem:[%s20764_s3 + $0x1a70] ss:$24 sps:$4 sm:$0xff]  }
 0x438   :  { %v5401_v38 = vpop.f32.mrb[76].mxu1  ;;  %v15333_v56 = vld [vmem:[%s20764_s3 + $0x1da8] ss:$24 sps:$4 sm:$0xff]   ;;  %v15338_v31 = vld [vmem:[%s20764_s3 + $0x1aa4] ss:$24 sps:$4 sm:$0xff]  }
 0x439   :  { %v5412_v13 = vadd.f32 %v5401_v38, %v18811_v0  ;;  %v5403_v60 = vpop.f32.mrb[77].mxu1  ;;  %v15296_v0 = vld [vmem:[%s20764_s3 + $0x195c] ss:$24 sps:$4 sm:$0xff]  }
 0x43a   :  { %v5413_v42 = vadd.f32 %v5403_v60, %v18814_v19  ;;  %v5405_v5 = vpop.f32.mrb[78].mxu1  ;;  %7432 = vmatpush1.bf16.msra.mxu1 %v15282_v9  ;;  %8313 = vmatpush1.bf16.msra.mxu0 %v15285_v36  ;;  %v15299_v19 = vld [vmem:[%s20764_s3 + $0x1c8c] ss:$24 sps:$4 sm:$0xff]   ;;  %v346_v9 = vadd.f32 %v18672_v1, %v16474_v52  ;;  %v15336_v52 = vld [vmem:[%s20764_s3 + $0x1aa0] ss:$24 sps:$4 sm:$0xff]  }
 0x43b   :  { %v5406_v58 = vpop.f32.mrb[79].mxu1  ;;  %7433 = vmatprep.subr.bf16.mxu1 %v15290_v4  ;;  %8314 = vmatprep.subr.bf16.mxu0 %v15293_v55  ;;  %v19155_v61 = vadd.f32 %v18892_v8, %v5412_v13  ;;  %v15302_v8 = vld [vmem:[%s20764_s3 + $0x1984] ss:$24 sps:$4 sm:$0xff]   ;;  %v15339_v5 = vld [vmem:[%s20764_s3 + $0x1dd8] ss:$24 sps:$4 sm:$0xff]  }
 0x43c   :  { %v19158_v26 = vadd.f32 %v18894_v48, %v5413_v42  ;;  %v15305_v48 = vld [vmem:[%s20764_s3 + $0x1cbc] ss:$24 sps:$4 sm:$0xff]  }
 0x43d   :  { %v15341_v4 = vld [vmem:[%s20764_s3 + $0x1ddc] ss:$24 sps:$4 sm:$0xff]  }
 0x43e   :  { %7434 = vmatpush1.bf16.msra.mxu1 %v15288_v47  ;;  %8315 = vmatpush1.bf16.msra.mxu0 %v15291_v6  ;;  %v393_v47 = vmax.f32 %v346_v9, 0.0  ;;  %v351_v9 = vadd.f32 %v18672_v1, %v16482_v57  ;;  %v15384_v57 = vld [vmem:[%s20764_s3 + $0x1ab0] ss:$24 sps:$4 sm:$0xff]  }
 0x43f   :  { %7435 = vmatprep.subr.bf16.mxu1 %v15296_v0  ;;  %8678 = vmatprep.subr.bf16.mxu0 %v15299_v19  ;;  %v15342_v19 = vld [vmem:[%s20764_s3 + $0x1ad0] ss:$24 sps:$4 sm:$0xff]  }
 0x440   :  { %v15387_v1 = vld [vmem:[%s20764_s3 + $0x1f50] ss:$24 sps:$4 sm:$0xff]  }
 0x441   :  { %8333 = vmatmul.mubr.bf16.vlgmr.msra.gmra.mrb[156].mxu0 %v19052_v44 }
 0x442   :  { %7436 = vmatpush1.bf16.msra.mxu1 %v15294_v41  ;;  %8679 = vmatpush1.bf16.msra.mxu0 %v15297_v49  ;;  %v15345_v41 = vld [vmem:[%s20764_s3 + $0x1e00] ss:$24 sps:$4 sm:$0xff]   ;;  %v19280_v49 = vpack.c.bf16 %v393_v47, %v393_v47 }
 0x443   :  { %7799 = vmatprep.subr.bf16.mxu1 %v15302_v8  ;;  %8680 = vmatprep.subr.bf16.mxu0 %v15305_v48  ;;  %v15348_v8 = vld [vmem:[%s20764_s3 + $0x1990] ss:$24 sps:$4 sm:$0xff]  }
 0x444   :  { %8710 = vmatprep.mubr.bf16.mxu0 %v15807_v46  ;;  %v15351_v48 = vld [vmem:[%s20764_s3 + $0x1e30] ss:$24 sps:$4 sm:$0xff]  }
 0x445   :  { %7454 = vmatmul.mubr.bf16.vlgmr.msra.gmra.mrb[104].mxu1 %v18708_v3  ;;  %v15317_v3 = vld [vmem:[%s20764_s3 + $0x1d1c] ss:$24 sps:$4 sm:$0xff]  }
 0x446   :  { %7800 = vmatpush1.bf16.msra.mxu1 %v15300_v7  ;;  %8681 = vmatpush1.bf16.msra.mxu0 %v15303_v37  ;;  %v15356_v7 = vld [vmem:[%s20764_s3 + $0x19c4] ss:$24 sps:$4 sm:$0xff]  }
 0x447   :  { %7801 = vmatprep.subr.bf16.mxu1 %v15308_v29  ;;  %8682 = vmatprep.subr.bf16.mxu0 %v15311_v33  ;;  %v15359_v37 = vld [vmem:[%s20764_s3 + $0x1e64] ss:$24 sps:$4 sm:$0xff]   ;;  %v15354_v29 = vld [vmem:[%s20764_s3 + $0x19c0] ss:$24 sps:$4 sm:$0xff]  }
 0x448   :  { %7831 = vmatprep.mubr.bf16.mxu1 %v15807_v46  ;;  %v15357_v33 = vld [vmem:[%s20764_s3 + $0x1e60] ss:$24 sps:$4 sm:$0xff]  }
 0x44a   :  { %7802 = vmatpush1.bf16.msra.mxu1 %v15306_v12  ;;  %8683 = vmatpush1.bf16.msra.mxu0 %v15309_v43  ;;  %v15362_v12 = vld [vmem:[%s20764_s3 + $0x19f4] ss:$24 sps:$4 sm:$0xff]  }
 0x44b   :  { %7803 = vmatprep.subr.bf16.mxu1 %v15314_v45  ;;  %8684 = vmatprep.subr.bf16.mxu0 %v15317_v3  ;;  %v15365_v43 = vld [vmem:[%s20764_s3 + $0x1e94] ss:$24 sps:$4 sm:$0xff]   ;;  %v15360_v45 = vld [vmem:[%s20764_s3 + $0x19f0] ss:$24 sps:$4 sm:$0xff]  }
 0x44c   :  { %v15363_v3 = vld [vmem:[%s20764_s3 + $0x1e90] ss:$24 sps:$4 sm:$0xff]  }
 0x44e   :  { %7804 = vmatpush1.bf16.msra.mxu1 %v15312_v40  ;;  %8685 = vmatpush1.bf16.msra.mxu0 %v15315_v16  ;;  %v15368_v40 = vld [vmem:[%s20764_s3 + $0x1a24] ss:$24 sps:$4 sm:$0xff]  }
 0x44f   :  { %7805 = vmatprep.subr.bf16.mxu1 %v15320_v59  ;;  %8686 = vmatprep.subr.bf16.mxu0 %v15323_v20  ;;  %v15371_v16 = vld [vmem:[%s20764_s3 + $0x1ec4] ss:$24 sps:$4 sm:$0xff]   ;;  %v15366_v59 = vld [vmem:[%s20764_s3 + $0x1a20] ss:$24 sps:$4 sm:$0xff]  }
 0x450   :  { %v15369_v20 = vld [vmem:[%s20764_s3 + $0x1ec0] ss:$24 sps:$4 sm:$0xff]  }
 0x452   :  { %7806 = vmatpush1.bf16.msra.mxu1 %v15318_v24  ;;  %8687 = vmatpush1.bf16.msra.mxu0 %v15321_v30  ;;  %v15374_v24 = vld [vmem:[%s20764_s3 + $0x1a54] ss:$24 sps:$4 sm:$0xff]  }
 0x453   :  { %7807 = vmatprep.subr.bf16.mxu1 %v15326_v62  ;;  %8688 = vmatprep.subr.bf16.mxu0 %v15329_v17  ;;  %v15377_v30 = vld [vmem:[%s20764_s3 + $0x1ef4] ss:$24 sps:$4 sm:$0xff]   ;;  %v15372_v62 = vld [vmem:[%s20764_s3 + $0x1a50] ss:$24 sps:$4 sm:$0xff]  }
 0x454   :  { %v19236_v54 = vpop.f32.mrb[132].mxu0  ;;  %v15375_v17 = vld [vmem:[%s20764_s3 + $0x1ef0] ss:$24 sps:$4 sm:$0xff]  }
 0x455   :  { %v19238_v53 = vpop.f32.mrb[133].mxu0 }
 0x456   :  { %v6662_v23 = vpop.f32.mrb[134].mxu0  ;;  %7808 = vmatpush1.bf16.msra.mxu1 %v15324_v34  ;;  %8689 = vmatpush1.bf16.msra.mxu0 %v15327_v51  ;;  %v15380_v34 = vld [vmem:[%s20764_s3 + $0x1a84] ss:$24 sps:$4 sm:$0xff]  }
 0x457   :  { %v6663_v36 = vpop.f32.mrb[135].mxu0  ;;  %7809 = vmatprep.subr.bf16.mxu1 %v15332_v50  ;;  %8690 = vmatprep.subr.bf16.mxu0 %v15335_v21  ;;  %v15383_v51 = vld [vmem:[%s20764_s3 + $0x1f24] ss:$24 sps:$4 sm:$0xff]  }
 0x458   :  { %v5779_v55 = vpop.f32.mrb[80].mxu1 }
 0x459   :  { %v5829_v38 = vadd.f32 %v5779_v55, %v18925_v32  ;;  %v5781_v13 = vpop.f32.mrb[81].mxu1  ;;  %v15344_v32 = vld [vmem:[%s20764_s3 + $0x1ad4] ss:$24 sps:$4 sm:$0xff]  }
 0x45a   :  { %v5830_v60 = vadd.f32 %v5781_v13, %v18928_v35  ;;  %v5783_v42 = vpop.f32.mrb[82].mxu1  ;;  %7810 = vmatpush1.bf16.msra.mxu1 %v15330_v10  ;;  %8691 = vmatpush1.bf16.msra.mxu0 %v15333_v56  ;;  %v15347_v35 = vld [vmem:[%s20764_s3 + $0x1e04] ss:$24 sps:$4 sm:$0xff]   ;;  %v15378_v10 = vld [vmem:[%s20764_s3 + $0x1a80] ss:$24 sps:$4 sm:$0xff]  }
 0x45b   :  { %v5784_v6 = vpop.f32.mrb[83].mxu1  ;;  %7811 = vmatprep.subr.bf16.mxu1 %v15338_v31  ;;  %8692 = vmatprep.subr.bf16.mxu0 %v15341_v4  ;;  %v19269_v58 = vadd.f32 %v19008_v14, %v5829_v38  ;;  %v15350_v14 = vld [vmem:[%s20764_s3 + $0x1994] ss:$24 sps:$4 sm:$0xff]   ;;  %v15381_v56 = vld [vmem:[%s20764_s3 + $0x1f20] ss:$24 sps:$4 sm:$0xff]  }
 0x45c   :  { %v19272_v0 = vadd.f32 %v19010_v27, %v5830_v60  ;;  %v15353_v27 = vld [vmem:[%s20764_s3 + $0x1e34] ss:$24 sps:$4 sm:$0xff]  }
 0x45d   :  { %v15386_v31 = vld [vmem:[%s20764_s3 + $0x1ab4] ss:$24 sps:$4 sm:$0xff]  }
 0x45e   :  { %7812 = vmatpush1.bf16.msra.mxu1 %v15336_v52  ;;  %8693 = vmatpush1.bf16.msra.mxu0 %v15339_v5  ;;  %v15389_v4 = vld [vmem:[%s20764_s3 + $0x1f54] ss:$24 sps:$4 sm:$0xff]   ;;  %v394_v52 = vmax.f32 %v351_v9, 0.0  ;;  %v15437_v9 = vld [vmem:[%s20764_s3 + $0x1f64] ss:$24 sps:$4 sm:$0xff]  }
 0x45f   :  { %7813 = vmatprep.subr.bf16.mxu1 %v15344_v32  ;;  %9056 = vmatprep.subr.bf16.mxu0 %v15347_v35  ;;  %v15390_v32 = vld [vmem:[%s20764_s3 + $0x1ae0] ss:$24 sps:$4 sm:$0xff]   ;;  %v15393_v35 = vld [vmem:[%s20764_s3 + $0x1e10] ss:$24 sps:$4 sm:$0xff]  }
 0x461   :  { %8711 = vmatmul.mubr.bf16.vlgmr.msra.gmra.mrb[160].mxu0 %v19280_v49 }
 0x462   :  { %7814 = vmatpush1.bf16.msra.mxu1 %v15342_v19  ;;  %9057 = vmatpush1.bf16.msra.mxu0 %v15345_v41  ;;  %v19396_v19 = vpack.c.bf16 %v394_v52, %v394_v52  ;;  %v15396_v41 = vld [vmem:[%s20764_s3 + $0x1b08] ss:$24 sps:$4 sm:$0xff]   ;;  %v15438_v52 = vld [vmem:[%s20764_s3 + $0x1c58] ss:$24 sps:$4 sm:$0xff]  }
 0x463   :  { %7881 = vmatprep.subr.bf16.mxu1 %v15350_v14  ;;  %9058 = vmatprep.subr.bf16.mxu0 %v15353_v27  ;;  %v15399_v14 = vld [vmem:[%s20764_s3 + $0x1e40] ss:$24 sps:$4 sm:$0xff]   ;;  %v15404_v27 = vld [vmem:[%s20764_s3 + $0x1b3c] ss:$24 sps:$4 sm:$0xff]  }
 0x464   :  { %9088 = vmatprep.mubr.bf16.mxu0 %v15807_v46 }
 0x465   :  { %7832 = vmatmul.mubr.bf16.vlgmr.msra.gmra.mrb[108].mxu1 %v18936_v25 }
 0x466   :  { %7882 = vmatpush1.bf16.msra.mxu1 %v15348_v8  ;;  %9059 = vmatpush1.bf16.msra.mxu0 %v15351_v48  ;;  %v15407_v8 = vld [vmem:[%s20764_s3 + $0x1e74] ss:$24 sps:$4 sm:$0xff]   ;;  %v15402_v48 = vld [vmem:[%s20764_s3 + $0x1b38] ss:$24 sps:$4 sm:$0xff]  }
 0x467   :  { %7883 = vmatprep.subr.bf16.mxu1 %v15356_v7  ;;  %9060 = vmatprep.subr.bf16.mxu0 %v15359_v37  ;;  %v15405_v7 = vld [vmem:[%s20764_s3 + $0x1e70] ss:$24 sps:$4 sm:$0xff]   ;;  %v15410_v37 = vld [vmem:[%s20764_s3 + $0x1b6c] ss:$24 sps:$4 sm:$0xff]  }
 0x468   :  { %7913 = vmatprep.mubr.bf16.mxu1 %v15807_v46 }
 0x46a   :  { %7884 = vmatpush1.bf16.msra.mxu1 %v15354_v29  ;;  %9061 = vmatpush1.bf16.msra.mxu0 %v15357_v33  ;;  %v15408_v29 = vld [vmem:[%s20764_s3 + $0x1b68] ss:$24 sps:$4 sm:$0xff]  }
 0x46b   :  { %7885 = vmatprep.subr.bf16.mxu1 %v15362_v12  ;;  %9062 = vmatprep.subr.bf16.mxu0 %v15365_v43  ;;  %v15411_v33 = vld [vmem:[%s20764_s3 + $0x1ea0] ss:$24 sps:$4 sm:$0xff]   ;;  %v15416_v12 = vld [vmem:[%s20764_s3 + $0x1b9c] ss:$24 sps:$4 sm:$0xff]  }
 0x46c   :  { %v15419_v43 = vld [vmem:[%s20764_s3 + $0x1ed4] ss:$24 sps:$4 sm:$0xff]  }
 0x46e   :  { %7886 = vmatpush1.bf16.msra.mxu1 %v15360_v45  ;;  %9063 = vmatpush1.bf16.msra.mxu0 %v15363_v3  ;;  %v15414_v45 = vld [vmem:[%s20764_s3 + $0x1b98] ss:$24 sps:$4 sm:$0xff]  }
 0x46f   :  { %7887 = vmatprep.subr.bf16.mxu1 %v15368_v40  ;;  %9064 = vmatprep.subr.bf16.mxu0 %v15371_v16  ;;  %v15417_v3 = vld [vmem:[%s20764_s3 + $0x1ed0] ss:$24 sps:$4 sm:$0xff]   ;;  %v15422_v40 = vld [vmem:[%s20764_s3 + $0x1bcc] ss:$24 sps:$4 sm:$0xff]  }
 0x470   :  { %v15425_v16 = vld [vmem:[%s20764_s3 + $0x1f04] ss:$24 sps:$4 sm:$0xff]  }
 0x472   :  { %7888 = vmatpush1.bf16.msra.mxu1 %v15366_v59  ;;  %9065 = vmatpush1.bf16.msra.mxu0 %v15369_v20  ;;  %v15420_v59 = vld [vmem:[%s20764_s3 + $0x1bc8] ss:$24 sps:$4 sm:$0xff]  }
 0x473   :  { %7889 = vmatprep.subr.bf16.mxu1 %v15374_v24  ;;  %9066 = vmatprep.subr.bf16.mxu0 %v15377_v30  ;;  %v15423_v20 = vld [vmem:[%s20764_s3 + $0x1f00] ss:$24 sps:$4 sm:$0xff]   ;;  %v15428_v24 = vld [vmem:[%s20764_s3 + $0x1bfc] ss:$24 sps:$4 sm:$0xff]  }
 0x474   :  { %v19352_v50 = vpop.f32.mrb[136].mxu0  ;;  %v15431_v30 = vld [vmem:[%s20764_s3 + $0x1f34] ss:$24 sps:$4 sm:$0xff]  }
 0x475   :  { %v19354_v21 = vpop.f32.mrb[137].mxu0 }
 0x476   :  { %v7040_v23 = vpop.f32.mrb[138].mxu0  ;;  %7890 = vmatpush1.bf16.msra.mxu1 %v15372_v62  ;;  %9067 = vmatpush1.bf16.msra.mxu0 %v15375_v17 }
 0x477   :  { %v7041_v36 = vpop.f32.mrb[139].mxu0  ;;  %7891 = vmatprep.subr.bf16.mxu1 %v15380_v34  ;;  %9068 = vmatprep.subr.bf16.mxu0 %v15383_v51  ;;  %v15426_v51 = vld [vmem:[%s20764_s3 + $0x1bf8] ss:$24 sps:$4 sm:$0xff]  }
 0x478   :  { %v6157_v55 = vpop.f32.mrb[84].mxu1  ;;  %v15429_v23 = vld [vmem:[%s20764_s3 + $0x1f30] ss:$24 sps:$4 sm:$0xff]  }
 0x479   :  { %v6246_v38 = vadd.f32 %v6157_v55, %v19041_v18  ;;  %v6159_v13 = vpop.f32.mrb[85].mxu1  ;;  %v15392_v18 = vld [vmem:[%s20764_s3 + $0x1ae4] ss:$24 sps:$4 sm:$0xff]  }
 0x47a   :  { %v6247_v60 = vadd.f32 %v6159_v13, %v19044_v63  ;;  %v6161_v42 = vpop.f32.mrb[86].mxu1  ;;  %7892 = vmatpush1.bf16.msra.mxu1 %v15378_v10  ;;  %9069 = vmatpush1.bf16.msra.mxu0 %v15381_v56  ;;  %v15395_v63 = vld [vmem:[%s20764_s3 + $0x1e14] ss:$24 sps:$4 sm:$0xff]   ;;  %v15432_v13 = vld [vmem:[%s20764_s3 + $0x1c28] ss:$24 sps:$4 sm:$0xff]  }
 0x47b   :  { %v6162_v5 = vpop.f32.mrb[87].mxu1  ;;  %7893 = vmatprep.subr.bf16.mxu1 %v15386_v31  ;;  %9070 = vmatprep.subr.bf16.mxu0 %v15389_v4  ;;  %v19385_v47 = vadd.f32 %v19124_v15, %v6246_v38  ;;  %v15398_v15 = vld [vmem:[%s20764_s3 + $0x1b0c] ss:$24 sps:$4 sm:$0xff]  }
 0x47c   :  { %v19388_v6 = vadd.f32 %v19126_v39, %v6247_v60  ;;  %v15401_v39 = vld [vmem:[%s20764_s3 + $0x1e44] ss:$24 sps:$4 sm:$0xff]   ;;  %v15435_v60 = vld [vmem:[%s20764_s3 + $0x1f60] ss:$24 sps:$4 sm:$0xff]  }
 0x47d   :  { %v15434_v56 = vld [vmem:[%s20764_s3 + $0x1c2c] ss:$24 sps:$4 sm:$0xff]   ;;  %v15441_v5 = vld [vmem:[%s20764_s3 + $0x1f88] ss:$24 sps:$4 sm:$0xff]  }
 0x47e   :  { %7894 = vmatpush1.bf16.msra.mxu1 %v15384_v57  ;;  %9071 = vmatpush1.bf16.msra.mxu0 %v15387_v1 }
 0x47f   :  { %7895 = vmatprep.subr.bf16.mxu1 %v15392_v18  ;;  %9138 = vmatprep.subr.bf16.mxu0 %v15395_v63  ;;  %v15444_v18 = vld [vmem:[%s20764_s3 + $0x1c80] ss:$24 sps:$4 sm:$0xff]  }
 0x480   :  { %v15447_v63 = vld [vmem:[%s20764_s3 + $0x1fb8] ss:$24 sps:$4 sm:$0xff]  }
 0x481   :  { %9089 = vmatmul.mubr.bf16.vlgmr.msra.gmra.mrb[164].mxu0 %v19396_v19 }
 0x482   :  { %7896 = vmatpush1.bf16.msra.mxu1 %v15390_v32  ;;  %9139 = vmatpush1.bf16.msra.mxu0 %v15393_v35  ;;  %v15452_v32 = vld [vmem:[%s20764_s3 + $0x1cb4] ss:$24 sps:$4 sm:$0xff]  }
 0x483   :  { %8259 = vmatprep.subr.bf16.mxu1 %v15398_v15  ;;  %9140 = vmatprep.subr.bf16.mxu0 %v15401_v39  ;;  %v15455_v35 = vld [vmem:[%s20764_s3 + $0x1fec] ss:$24 sps:$4 sm:$0xff]   ;;  %v15450_v15 = vld [vmem:[%s20764_s3 + $0x1cb0] ss:$24 sps:$4 sm:$0xff]  }
 0x484   :  { %9170 = vmatprep.mubr.bf16.mxu0 %v15807_v46  ;;  %v15453_v39 = vld [vmem:[%s20764_s3 + $0x1fe8] ss:$24 sps:$4 sm:$0xff]  }
 0x485   :  { %7914 = vmatmul.mubr.bf16.vlgmr.msra.gmra.mrb[112].mxu1 %v18936_v25  ;;  %v15413_v25 = vld [vmem:[%s20764_s3 + $0x1ea4] ss:$24 sps:$4 sm:$0xff]  }
 0x486   :  { %8260 = vmatpush1.bf16.msra.mxu1 %v15396_v41  ;;  %9141 = vmatpush1.bf16.msra.mxu0 %v15399_v14  ;;  %v15458_v41 = vld [vmem:[%s20764_s3 + $0x1ce4] ss:$24 sps:$4 sm:$0xff]   ;;  %v15456_v14 = vld [vmem:[%s20764_s3 + $0x1ce0] ss:$24 sps:$4 sm:$0xff]  }
 0x487   :  { %8261 = vmatprep.subr.bf16.mxu1 %v15404_v27  ;;  %9142 = vmatprep.subr.bf16.mxu0 %v15407_v8  ;;  %v15459_v27 = vld [vmem:[%s20764_s3 + $0x2018] ss:$24 sps:$4 sm:$0xff]   ;;  %v15464_v8 = vld [vmem:[%s20764_s3 + $0x1d14] ss:$24 sps:$4 sm:$0xff]  }
 0x488   :  { %8291 = vmatprep.mubr.bf16.mxu1 %v15807_v46 }
 0x48a   :  { %8262 = vmatpush1.bf16.msra.mxu1 %v15402_v48  ;;  %9143 = vmatpush1.bf16.msra.mxu0 %v15405_v7  ;;  %v15467_v48 = vld [vmem:[%s20764_s3 + $0x204c] ss:$24 sps:$4 sm:$0xff]   ;;  %v15462_v7 = vld [vmem:[%s20764_s3 + $0x1d10] ss:$24 sps:$4 sm:$0xff]  }
 0x48b   :  { %8263 = vmatprep.subr.bf16.mxu1 %v15410_v37  ;;  %9144 = vmatprep.subr.bf16.mxu0 %v15413_v25  ;;  %v15465_v37 = vld [vmem:[%s20764_s3 + $0x2048] ss:$24 sps:$4 sm:$0xff]   ;;  %v15470_v25 = vld [vmem:[%s20764_s3 + $0x1d44] ss:$24 sps:$4 sm:$0xff]  }
 0x48e   :  { %8264 = vmatpush1.bf16.msra.mxu1 %v15408_v29  ;;  %9145 = vmatpush1.bf16.msra.mxu0 %v15411_v33  ;;  %v15473_v29 = vld [vmem:[%s20764_s3 + $0x207c] ss:$24 sps:$4 sm:$0xff]   ;;  %v15468_v33 = vld [vmem:[%s20764_s3 + $0x1d40] ss:$24 sps:$4 sm:$0xff]  }
 0x48f   :  { %8265 = vmatprep.subr.bf16.mxu1 %v15416_v12  ;;  %9146 = vmatprep.subr.bf16.mxu0 %v15419_v43  ;;  %v15471_v12 = vld [vmem:[%s20764_s3 + $0x2078] ss:$24 sps:$4 sm:$0xff]   ;;  %v15476_v43 = vld [vmem:[%s20764_s3 + $0x1d74] ss:$24 sps:$4 sm:$0xff]  }
 0x492   :  { %8266 = vmatpush1.bf16.msra.mxu1 %v15414_v45  ;;  %9147 = vmatpush1.bf16.msra.mxu0 %v15417_v3  ;;  %v15479_v45 = vld [vmem:[%s20764_s3 + $0x20ac] ss:$24 sps:$4 sm:$0xff]  }
 0x493   :  { %8267 = vmatprep.subr.bf16.mxu1 %v15422_v40  ;;  %9148 = vmatprep.subr.bf16.mxu0 %v15425_v16 }
 0x494   :  { %v19468_v62 = vpop.f32.mrb[140].mxu0 }
 0x495   :  { %v19470_v17 = vpop.f32.mrb[141].mxu0 }
 0x496   :  { %v7418_v34 = vpop.f32.mrb[142].mxu0  ;;  %8268 = vmatpush1.bf16.msra.mxu1 %v15420_v59  ;;  %9149 = vmatpush1.bf16.msra.mxu0 %v15423_v20  ;;  %v15474_v59 = vld [vmem:[%s20764_s3 + $0x1d70] ss:$24 sps:$4 sm:$0xff]  }
 0x497   :  { %v7419_v10 = vpop.f32.mrb[143].mxu0  ;;  %8269 = vmatprep.subr.bf16.mxu1 %v15428_v24  ;;  %9150 = vmatprep.subr.bf16.mxu0 %v15431_v30  ;;  %v15477_v20 = vld [vmem:[%s20764_s3 + $0x20a8] ss:$24 sps:$4 sm:$0xff]  }
 0x498   :  { %v6239_v36 = vpop.f32.mrb[88].mxu1  ;;  %v19593_v24 = vld [vmem:[%s20765_s2] ss:$0 sm:$0xff] }
 0x499   :  { %v6250_v31 = vadd.f32 %v6239_v36, %v19155_v61  ;;  %v6241_v4 = vpop.f32.mrb[89].mxu1  ;;  %v15440_v61 = vld [vmem:[%s20764_s3 + $0x1c5c] ss:$24 sps:$4 sm:$0xff]   ;;  %v356_v30 = vadd.f32 %v19593_v24, %v16496_v2  ;;  %v15480_v2 = vld [vmem:[%s20764_s3 + $0x1da0] ss:$24 sps:$4 sm:$0xff]  }
 0x49a   :  { %v6251_v55 = vadd.f32 %v6241_v4, %v19158_v26  ;;  %v6243_v38 = vpop.f32.mrb[90].mxu1  ;;  %8270 = vmatpush1.bf16.msra.mxu1 %v15426_v51  ;;  %9151 = vmatpush1.bf16.msra.mxu0 %v15429_v23  ;;  %v15443_v26 = vld [vmem:[%s20764_s3 + $0x1f8c] ss:$24 sps:$4 sm:$0xff]   ;;  %v15485_v23 = vld [vmem:[%s20764_s3 + $0x20dc] ss:$24 sps:$4 sm:$0xff]  }
 0x49b   :  { %v6244_v42 = vpop.f32.mrb[91].mxu1  ;;  %8271 = vmatprep.subr.bf16.mxu1 %v15434_v56  ;;  %9152 = vmatprep.subr.bf16.mxu0 %v15437_v9  ;;  %v19499_v57 = vadd.f32 %v19236_v54, %v6250_v31  ;;  %v15446_v54 = vld [vmem:[%s20764_s3 + $0x1c84] ss:$24 sps:$4 sm:$0xff]   ;;  %v15483_v4 = vld [vmem:[%s20764_s3 + $0x20d8] ss:$24 sps:$4 sm:$0xff]  }
 0x49c   :  { %v19502_v1 = vadd.f32 %v19238_v53, %v6251_v55  ;;  %v15449_v53 = vld [vmem:[%s20764_s3 + $0x1fbc] ss:$24 sps:$4 sm:$0xff]   ;;  %v395_v55 = vmax.f32 %v356_v30, 0.0  ;;  %v15486_v42 = vld [vmem:[%s20764_s3 + $0x1dd0] ss:$24 sps:$4 sm:$0xff]  }
 0x49d   :  { %v15482_v51 = vld [vmem:[%s20764_s3 + $0x1da4] ss:$24 sps:$4 sm:$0xff]   ;;  %v15530_v30 = vld [vmem:[%s20764_s3 + $0x1db4] ss:$24 sps:$4 sm:$0xff]  }
 0x49e   :  { %8272 = vmatpush1.bf16.msra.mxu1 %v15432_v13  ;;  %9153 = vmatpush1.bf16.msra.mxu0 %v15435_v60 }
 0x49f   :  { %8273 = vmatprep.subr.bf16.mxu1 %v15440_v61  ;;  %9516 = vmatprep.subr.bf16.mxu0 %v15443_v26  ;;  %v15489_v61 = vld [vmem:[%s20764_s3 + $0x2100] ss:$24 sps:$4 sm:$0xff]   ;;  %v19629_v26 = vpack.c.bf16 %v395_v55, %v395_v55 }
 0x4a1   :  { %9171 = vmatmul.mubr.bf16.vlgmr.msra.gmra.mrb[168].mxu0 %v19396_v19 }
 0x4a2   :  { %8274 = vmatpush1.bf16.msra.mxu1 %v15438_v52  ;;  %9517 = vmatpush1.bf16.msra.mxu0 %v15441_v5  ;;  %v15492_v52 = vld [vmem:[%s20764_s3 + $0x1c90] ss:$24 sps:$4 sm:$0xff]  }
 0x4a3   :  { %8637 = vmatprep.subr.bf16.mxu1 %v15446_v54  ;;  %9518 = vmatprep.subr.bf16.mxu0 %v15449_v53  ;;  %v15495_v5 = vld [vmem:[%s20764_s3 + $0x2130] ss:$24 sps:$4 sm:$0xff]   ;;  %v15500_v54 = vld [vmem:[%s20764_s3 + $0x1cc4] ss:$24 sps:$4 sm:$0xff]  }
 0x4a4   :  { %9548 = vmatprep.mubr.bf16.mxu0 %v15807_v46  ;;  %v15503_v53 = vld [vmem:[%s20764_s3 + $0x2164] ss:$24 sps:$4 sm:$0xff]  }
 0x4a5   :  { %8292 = vmatmul.mubr.bf16.vlgmr.msra.gmra.mrb[116].mxu1 %v19052_v44  ;;  %v15461_v44 = vld [vmem:[%s20764_s3 + $0x201c] ss:$24 sps:$4 sm:$0xff]  }
 0x4a6   :  { %8638 = vmatpush1.bf16.msra.mxu1 %v15444_v18  ;;  %9519 = vmatpush1.bf16.msra.mxu0 %v15447_v63  ;;  %v15498_v18 = vld [vmem:[%s20764_s3 + $0x1cc0] ss:$24 sps:$4 sm:$0xff]  }
 0x4a7   :  { %8639 = vmatprep.subr.bf16.mxu1 %v15452_v32  ;;  %9520 = vmatprep.subr.bf16.mxu0 %v15455_v35  ;;  %v15501_v63 = vld [vmem:[%s20764_s3 + $0x2160] ss:$24 sps:$4 sm:$0xff]   ;;  %v15506_v32 = vld [vmem:[%s20764_s3 + $0x1cf4] ss:$24 sps:$4 sm:$0xff]  }
 0x4a8   :  { %8669 = vmatprep.mubr.bf16.mxu1 %v15807_v46  ;;  %v15509_v35 = vld [vmem:[%s20764_s3 + $0x2194] ss:$24 sps:$4 sm:$0xff]  }
 0x4aa   :  { %8640 = vmatpush1.bf16.msra.mxu1 %v15450_v15  ;;  %9521 = vmatpush1.bf16.msra.mxu0 %v15453_v39  ;;  %v15504_v15 = vld [vmem:[%s20764_s3 + $0x1cf0] ss:$24 sps:$4 sm:$0xff]  }
 0x4ab   :  { %8641 = vmatprep.subr.bf16.mxu1 %v15458_v41  ;;  %9522 = vmatprep.subr.bf16.mxu0 %v15461_v44  ;;  %v15507_v39 = vld [vmem:[%s20764_s3 + $0x2190] ss:$24 sps:$4 sm:$0xff]   ;;  %v15512_v41 = vld [vmem:[%s20764_s3 + $0x1d24] ss:$24 sps:$4 sm:$0xff]  }
 0x4ac   :  { %v15515_v44 = vld [vmem:[%s20764_s3 + $0x21c4] ss:$24 sps:$4 sm:$0xff]  }
 0x4ae   :  { %8642 = vmatpush1.bf16.msra.mxu1 %v15456_v14  ;;  %9523 = vmatpush1.bf16.msra.mxu0 %v15459_v27  ;;  %v15510_v14 = vld [vmem:[%s20764_s3 + $0x1d20] ss:$24 sps:$4 sm:$0xff]  }
 0x4af   :  { %8643 = vmatprep.subr.bf16.mxu1 %v15464_v8  ;;  %9524 = vmatprep.subr.bf16.mxu0 %v15467_v48  ;;  %v15513_v27 = vld [vmem:[%s20764_s3 + $0x21c0] ss:$24 sps:$4 sm:$0xff]   ;;  %v15518_v8 = vld [vmem:[%s20764_s3 + $0x1d54] ss:$24 sps:$4 sm:$0xff]  }
 0x4b0   :  { %v15521_v48 = vld [vmem:[%s20764_s3 + $0x21f4] ss:$24 sps:$4 sm:$0xff]  }
 0x4b2   :  { %8644 = vmatpush1.bf16.msra.mxu1 %v15462_v7  ;;  %9525 = vmatpush1.bf16.msra.mxu0 %v15465_v37  ;;  %v15516_v7 = vld [vmem:[%s20764_s3 + $0x1d50] ss:$24 sps:$4 sm:$0xff]  }
 0x4b3   :  { %8645 = vmatprep.subr.bf16.mxu1 %v15470_v25  ;;  %9526 = vmatprep.subr.bf16.mxu0 %v15473_v29  ;;  %v15519_v37 = vld [vmem:[%s20764_s3 + $0x21f0] ss:$24 sps:$4 sm:$0xff]   ;;  %v15524_v25 = vld [vmem:[%s20764_s3 + $0x1d84] ss:$24 sps:$4 sm:$0xff]  }
 0x4b4   :  { %v19580_v3 = vpop.f32.mrb[144].mxu0  ;;  %v15527_v29 = vld [vmem:[%s20764_s3 + $0x2224] ss:$24 sps:$4 sm:$0xff]  }
 0x4b5   :  { %v19582_v40 = vpop.f32.mrb[145].mxu0 }
 0x4b6   :  { %v7500_v16 = vpop.f32.mrb[146].mxu0  ;;  %8646 = vmatpush1.bf16.msra.mxu1 %v15468_v33  ;;  %9527 = vmatpush1.bf16.msra.mxu0 %v15471_v12 }
 0x4b7   :  { %v7501_v34 = vpop.f32.mrb[147].mxu0  ;;  %8647 = vmatprep.subr.bf16.mxu1 %v15476_v43  ;;  %9528 = vmatprep.subr.bf16.mxu0 %v15479_v45  ;;  %v15522_v45 = vld [vmem:[%s20764_s3 + $0x1d80] ss:$24 sps:$4 sm:$0xff]  }
 0x4b8   :  { %v6617_v10 = vpop.f32.mrb[92].mxu1  ;;  %v15525_v16 = vld [vmem:[%s20764_s3 + $0x2220] ss:$24 sps:$4 sm:$0xff]   ;;  %v15533_v34 = vld [vmem:[%s20764_s3 + $0x2254] ss:$24 sps:$4 sm:$0xff]  }
 0x4b9   :  { %v6667_v56 = vadd.f32 %v6617_v10, %v19269_v58  ;;  %v6619_v9 = vpop.f32.mrb[93].mxu1  ;;  %v15488_v58 = vld [vmem:[%s20764_s3 + $0x1dd4] ss:$24 sps:$4 sm:$0xff]  }
 0x4ba   :  { %v6668_v36 = vadd.f32 %v6619_v9, %v19272_v0  ;;  %v6621_v31 = vpop.f32.mrb[94].mxu1  ;;  %8648 = vmatpush1.bf16.msra.mxu1 %v15474_v59  ;;  %9529 = vmatpush1.bf16.msra.mxu0 %v15477_v20  ;;  %v15491_v0 = vld [vmem:[%s20764_s3 + $0x2104] ss:$24 sps:$4 sm:$0xff]   ;;  %v361_v59 = vadd.f32 %v19593_v24, %v16510_v11  ;;  %v15528_v11 = vld [vmem:[%s20764_s3 + $0x1db0] ss:$24 sps:$4 sm:$0xff]  }
 0x4bb   :  { %v6622_v38 = vpop.f32.mrb[95].mxu1  ;;  %8649 = vmatprep.subr.bf16.mxu1 %v15482_v51  ;;  %9530 = vmatprep.subr.bf16.mxu0 %v15485_v23  ;;  %v19618_v13 = vadd.f32 %v19352_v50, %v6667_v56  ;;  %v15494_v50 = vld [vmem:[%s20764_s3 + $0x1c94] ss:$24 sps:$4 sm:$0xff]  }
 0x4bc   :  { %v19621_v60 = vadd.f32 %v19354_v21, %v6668_v36  ;;  %v15497_v21 = vld [vmem:[%s20764_s3 + $0x2134] ss:$24 sps:$4 sm:$0xff]   ;;  %v15531_v36 = vld [vmem:[%s20764_s3 + $0x2250] ss:$24 sps:$4 sm:$0xff]   ;;  %v396_v31 = vmax.f32 %v361_v59, 0.0 }
 0x4bd   :  { %v15534_v38 = vld [vmem:[%s20764_s3 + $0x1de0] ss:$24 sps:$4 sm:$0xff]  }
 0x4be   :  { %8650 = vmatpush1.bf16.msra.mxu1 %v15480_v2  ;;  %9531 = vmatpush1.bf16.msra.mxu0 %v15483_v4 }
 0x4bf   :  { %8651 = vmatprep.subr.bf16.mxu1 %v15488_v58  ;;  %9894 = vmatprep.subr.bf16.mxu0 %v15491_v0  ;;  %v15537_v58 = vld [vmem:[%s20764_s3 + $0x2110] ss:$24 sps:$4 sm:$0xff]   ;;  %v19745_v0 = vpack.c.bf16 %v396_v31, %v396_v31 }
 0x4c0   :  { %v15585_v31 = vld [vmem:[%s20764_s3 + $0x2288] ss:$24 sps:$4 sm:$0xff]  }
 0x4c1   :  { %9549 = vmatmul.mubr.bf16.vlgmr.msra.gmra.mrb[172].mxu0 %v19629_v26 }
 0x4c2   :  { %8652 = vmatpush1.bf16.msra.mxu1 %v15486_v42  ;;  %9895 = vmatpush1.bf16.msra.mxu0 %v15489_v61  ;;  %v15540_v42 = vld [vmem:[%s20764_s3 + $0x1e08] ss:$24 sps:$4 sm:$0xff]  }
 0x4c3   :  { %8719 = vmatprep.subr.bf16.mxu1 %v15494_v50  ;;  %9896 = vmatprep.subr.bf16.mxu0 %v15497_v21  ;;  %v15543_v61 = vld [vmem:[%s20764_s3 + $0x2140] ss:$24 sps:$4 sm:$0xff]   ;;  %v15548_v50 = vld [vmem:[%s20764_s3 + $0x1e3c] ss:$24 sps:$4 sm:$0xff]  }
 0x4c4   :  { %9926 = vmatprep.mubr.bf16.mxu0 %v15807_v46  ;;  %v15551_v21 = vld [vmem:[%s20764_s3 + $0x2174] ss:$24 sps:$4 sm:$0xff]  }
 0x4c5   :  { %8670 = vmatmul.mubr.bf16.vlgmr.msra.gmra.mrb[120].mxu1 %v19280_v49 }
 0x4c6   :  { %8720 = vmatpush1.bf16.msra.mxu1 %v15492_v52  ;;  %9897 = vmatpush1.bf16.msra.mxu0 %v15495_v5  ;;  %v15546_v52 = vld [vmem:[%s20764_s3 + $0x1e38] ss:$24 sps:$4 sm:$0xff]  }
 0x4c7   :  { %8721 = vmatprep.subr.bf16.mxu1 %v15500_v54  ;;  %9898 = vmatprep.subr.bf16.mxu0 %v15503_v53  ;;  %v15549_v5 = vld [vmem:[%s20764_s3 + $0x2170] ss:$24 sps:$4 sm:$0xff]   ;;  %v15554_v54 = vld [vmem:[%s20764_s3 + $0x1e6c] ss:$24 sps:$4 sm:$0xff]  }
 0x4c8   :  { %8751 = vmatprep.mubr.bf16.mxu1 %v15807_v46  ;;  %v15552_v53 = vld [vmem:[%s20764_s3 + $0x1e68] ss:$24 sps:$4 sm:$0xff]  }
 0x4ca   :  { %8722 = vmatpush1.bf16.msra.mxu1 %v15498_v18  ;;  %9899 = vmatpush1.bf16.msra.mxu0 %v15501_v63  ;;  %v15555_v18 = vld [vmem:[%s20764_s3 + $0x21a0] ss:$24 sps:$4 sm:$0xff]   ;;  %v15560_v63 = vld [vmem:[%s20764_s3 + $0x1e9c] ss:$24 sps:$4 sm:$0xff]  }
 0x4cb   :  { %8723 = vmatprep.subr.bf16.mxu1 %v15506_v32  ;;  %9900 = vmatprep.subr.bf16.mxu0 %v15509_v35  ;;  %v15563_v32 = vld [vmem:[%s20764_s3 + $0x21d4] ss:$24 sps:$4 sm:$0xff]   ;;  %v15558_v35 = vld [vmem:[%s20764_s3 + $0x1e98] ss:$24 sps:$4 sm:$0xff]  }
 0x4ce   :  { %8724 = vmatpush1.bf16.msra.mxu1 %v15504_v15  ;;  %9901 = vmatpush1.bf16.msra.mxu0 %v15507_v39  ;;  %v15561_v15 = vld [vmem:[%s20764_s3 + $0x21d0] ss:$24 sps:$4 sm:$0xff]   ;;  %v15566_v39 = vld [vmem:[%s20764_s3 + $0x1ecc] ss:$24 sps:$4 sm:$0xff]  }
 0x4cf   :  { %8725 = vmatprep.subr.bf16.mxu1 %v15512_v41  ;;  %9902 = vmatprep.subr.bf16.mxu0 %v15515_v44  ;;  %v15569_v41 = vld [vmem:[%s20764_s3 + $0x2204] ss:$24 sps:$4 sm:$0xff]   ;;  %v15564_v44 = vld [vmem:[%s20764_s3 + $0x1ec8] ss:$24 sps:$4 sm:$0xff]  }
 0x4d2   :  { %8726 = vmatpush1.bf16.msra.mxu1 %v15510_v14  ;;  %9903 = vmatpush1.bf16.msra.mxu0 %v15513_v27  ;;  %v15567_v14 = vld [vmem:[%s20764_s3 + $0x2200] ss:$24 sps:$4 sm:$0xff]   ;;  %v15572_v27 = vld [vmem:[%s20764_s3 + $0x1efc] ss:$24 sps:$4 sm:$0xff]  }
 0x4d3   :  { %8727 = vmatprep.subr.bf16.mxu1 %v15518_v8  ;;  %9904 = vmatprep.subr.bf16.mxu0 %v15521_v48  ;;  %v15575_v8 = vld [vmem:[%s20764_s3 + $0x2234] ss:$24 sps:$4 sm:$0xff]  }
 0x4d4   :  { %v19701_v33 = vpop.f32.mrb[148].mxu0 }
 0x4d5   :  { %v19703_v12 = vpop.f32.mrb[149].mxu0 }
 0x4d6   :  { %v7878_v43 = vpop.f32.mrb[150].mxu0  ;;  %8728 = vmatpush1.bf16.msra.mxu1 %v15516_v7  ;;  %9905 = vmatpush1.bf16.msra.mxu0 %v15519_v37 }
 0x4d7   :  { %v7879_v20 = vpop.f32.mrb[151].mxu0  ;;  %8729 = vmatprep.subr.bf16.mxu1 %v15524_v25  ;;  %9906 = vmatprep.subr.bf16.mxu0 %v15527_v29  ;;  %v15570_v25 = vld [vmem:[%s20764_s3 + $0x1ef8] ss:$24 sps:$4 sm:$0xff]  }
 0x4d8   :  { %v6995_v51 = vpop.f32.mrb[96].mxu1  ;;  %v15573_v29 = vld [vmem:[%s20764_s3 + $0x2230] ss:$24 sps:$4 sm:$0xff]  }
 0x4d9   :  { %v7084_v23 = vadd.f32 %v6995_v51, %v19385_v47  ;;  %v6997_v10 = vpop.f32.mrb[97].mxu1  ;;  %v15536_v47 = vld [vmem:[%s20764_s3 + $0x1de4] ss:$24 sps:$4 sm:$0xff]  }
 0x4da   :  { %v7085_v56 = vadd.f32 %v6997_v10, %v19388_v6  ;;  %v6999_v9 = vpop.f32.mrb[98].mxu1  ;;  %8730 = vmatpush1.bf16.msra.mxu1 %v15522_v45  ;;  %9907 = vmatpush1.bf16.msra.mxu0 %v15525_v16  ;;  %v15539_v6 = vld [vmem:[%s20764_s3 + $0x2114] ss:$24 sps:$4 sm:$0xff]   ;;  %v15581_v16 = vld [vmem:[%s20764_s3 + $0x2264] ss:$24 sps:$4 sm:$0xff]  }
 0x4db   :  { %v7000_v2 = vpop.f32.mrb[99].mxu1  ;;  %8731 = vmatprep.subr.bf16.mxu1 %v15530_v30  ;;  %9908 = vmatprep.subr.bf16.mxu0 %v15533_v34  ;;  %v19734_v4 = vadd.f32 %v19468_v62, %v7084_v23  ;;  %v15542_v62 = vld [vmem:[%s20764_s3 + $0x1e0c] ss:$24 sps:$4 sm:$0xff]   ;;  %v15576_v23 = vld [vmem:[%s20764_s3 + $0x1f28] ss:$24 sps:$4 sm:$0xff]  }
 0x4dc   :  { %v19737_v55 = vadd.f32 %v19470_v17, %v7085_v56  ;;  %v15545_v17 = vld [vmem:[%s20764_s3 + $0x2144] ss:$24 sps:$4 sm:$0xff]   ;;  %v15579_v10 = vld [vmem:[%s20764_s3 + $0x2260] ss:$24 sps:$4 sm:$0xff]  }
 0x4dd   :  { %v15578_v45 = vld [vmem:[%s20764_s3 + $0x1f2c] ss:$24 sps:$4 sm:$0xff]   ;;  %v15588_v2 = vld [vmem:[%s20764_s3 + $0x1f80] ss:$24 sps:$4 sm:$0xff]  }
 0x4de   :  { %8732 = vmatpush1.bf16.msra.mxu1 %v15528_v11  ;;  %9909 = vmatpush1.bf16.msra.mxu0 %v15531_v36  ;;  %v15582_v36 = vld [vmem:[%s20764_s3 + $0x1f58] ss:$24 sps:$4 sm:$0xff]  }
 0x4df   :  { %8733 = vmatprep.subr.bf16.mxu1 %v15536_v47  ;;  %9976 = vmatprep.subr.bf16.mxu0 %v15539_v6  ;;  %v15591_v47 = vld [vmem:[%s20764_s3 + $0x22b8] ss:$24 sps:$4 sm:$0xff]   ;;  %v15596_v6 = vld [vmem:[%s20764_s3 + $0x1fb4] ss:$24 sps:$4 sm:$0xff]  }
 0x4e1   :  { %9927 = vmatmul.mubr.bf16.vlgmr.msra.gmra.mrb[176].mxu0 %v19745_v0 }
 0x4e2   :  { %8734 = vmatpush1.bf16.msra.mxu1 %v15534_v38  ;;  %9977 = vmatpush1.bf16.msra.mxu0 %v15537_v58  ;;  %v15599_v38 = vld [vmem:[%s20764_s3 + $0x22ec] ss:$24 sps:$4 sm:$0xff]   ;;  %v15594_v58 = vld [vmem:[%s20764_s3 + $0x1fb0] ss:$24 sps:$4 sm:$0xff]  }
 0x4e3   :  { %9097 = vmatprep.subr.bf16.mxu1 %v15542_v62  ;;  %9978 = vmatprep.subr.bf16.mxu0 %v15545_v17  ;;  %v15597_v62 = vld [vmem:[%s20764_s3 + $0x22e8] ss:$24 sps:$4 sm:$0xff]   ;;  %v15602_v17 = vld [vmem:[%s20764_s3 + $0x1fe4] ss:$24 sps:$4 sm:$0xff]  }
 0x4e4   :  { %10008 = vmatprep.mubr.bf16.mxu0 %v15807_v46 }
 0x4e5   :  { %8752 = vmatmul.mubr.bf16.vlgmr.msra.gmra.mrb[124].mxu1 %v19280_v49  ;;  %v15557_v49 = vld [vmem:[%s20764_s3 + $0x21a4] ss:$24 sps:$4 sm:$0xff]  }
 0x4e6   :  { %9098 = vmatpush1.bf16.msra.mxu1 %v15540_v42  ;;  %9979 = vmatpush1.bf16.msra.mxu0 %v15543_v61  ;;  %v15600_v42 = vld [vmem:[%s20764_s3 + $0x1fe0] ss:$24 sps:$4 sm:$0xff]  }
 0x4e7   :  { %9099 = vmatprep.subr.bf16.mxu1 %v15548_v50  ;;  %9980 = vmatprep.subr.bf16.mxu0 %v15551_v21  ;;  %v15603_v61 = vld [vmem:[%s20764_s3 + $0x2318] ss:$24 sps:$4 sm:$0xff]   ;;  %v15608_v50 = vld [vmem:[%s20764_s3 + $0x2014] ss:$24 sps:$4 sm:$0xff]  }
 0x4e8   :  { %9129 = vmatprep.mubr.bf16.mxu1 %v15807_v46  ;;  %v15611_v21 = vld [vmem:[%s20764_s3 + $0x234c] ss:$24 sps:$4 sm:$0xff]  }
 0x4ea   :  { %9100 = vmatpush1.bf16.msra.mxu1 %v15546_v52  ;;  %9981 = vmatpush1.bf16.msra.mxu0 %v15549_v5  ;;  %v15606_v52 = vld [vmem:[%s20764_s3 + $0x2010] ss:$24 sps:$4 sm:$0xff]  }
 0x4eb   :  { %9101 = vmatprep.subr.bf16.mxu1 %v15554_v54  ;;  %9982 = vmatprep.subr.bf16.mxu0 %v15557_v49  ;;  %v15609_v5 = vld [vmem:[%s20764_s3 + $0x2348] ss:$24 sps:$4 sm:$0xff]   ;;  %v15614_v54 = vld [vmem:[%s20764_s3 + $0x2044] ss:$24 sps:$4 sm:$0xff]  }
 0x4ec   :  { %v15617_v49 = vld [vmem:[%s20764_s3 + $0x237c] ss:$24 sps:$4 sm:$0xff]  }
 0x4ee   :  { %9102 = vmatpush1.bf16.msra.mxu1 %v15552_v53  ;;  %9983 = vmatpush1.bf16.msra.mxu0 %v15555_v18  ;;  %v15612_v53 = vld [vmem:[%s20764_s3 + $0x2040] ss:$24 sps:$4 sm:$0xff]  }
 0x4ef   :  { %9103 = vmatprep.subr.bf16.mxu1 %v15560_v63  ;;  %9984 = vmatprep.subr.bf16.mxu0 %v15563_v32  ;;  %v15615_v18 = vld [vmem:[%s20764_s3 + $0x2378] ss:$24 sps:$4 sm:$0xff]   ;;  %v15620_v63 = vld [vmem:[%s20764_s3 + $0x2074] ss:$24 sps:$4 sm:$0xff]  }
 0x4f0   :  { %v15623_v32 = vld [vmem:[%s20764_s3 + $0x23ac] ss:$24 sps:$4 sm:$0xff]  }
 0x4f2   :  { %9104 = vmatpush1.bf16.msra.mxu1 %v15558_v35  ;;  %9985 = vmatpush1.bf16.msra.mxu0 %v15561_v15 }
 0x4f3   :  { %9105 = vmatprep.subr.bf16.mxu1 %v15566_v39  ;;  %9986 = vmatprep.subr.bf16.mxu0 %v15569_v41  ;;  %v15618_v41 = vld [vmem:[%s20764_s3 + $0x2070] ss:$24 sps:$4 sm:$0xff]  }
 0x4f4   :  { %v19817_v48 = vpop.f32.mrb[152].mxu0 }
 0x4f5   :  { %v19819_v7 = vpop.f32.mrb[153].mxu0 }
 0x4f6   :  { %v8256_v37 = vpop.f32.mrb[154].mxu0  ;;  %9106 = vmatpush1.bf16.msra.mxu1 %v15564_v44  ;;  %9987 = vmatpush1.bf16.msra.mxu0 %v15567_v14  ;;  %v15621_v44 = vld [vmem:[%s20764_s3 + $0x23a8] ss:$24 sps:$4 sm:$0xff]   ;;  %v366_v14 = vadd.f32 %v19593_v24, %v16526_v22 }
 0x4f7   :  { %v8257_v43 = vpop.f32.mrb[155].mxu0  ;;  %9107 = vmatprep.subr.bf16.mxu1 %v15572_v27  ;;  %9988 = vmatprep.subr.bf16.mxu0 %v15575_v8  ;;  %v15626_v8 = vld [vmem:[%s20764_s3 + $0x20a4] ss:$24 sps:$4 sm:$0xff]   ;;  %v15624_v22 = vld [vmem:[%s20764_s3 + $0x20a0] ss:$24 sps:$4 sm:$0xff]  }
 0x4f8   :  { %v7077_v59 = vpop.f32.mrb[100].mxu1  ;;  %v15629_v37 = vld [vmem:[%s20764_s3 + $0x23dc] ss:$24 sps:$4 sm:$0xff]  }
 0x4f9   :  { %v7088_v20 = vadd.f32 %v7077_v59, %v19499_v57  ;;  %v7079_v30 = vpop.f32.mrb[101].mxu1  ;;  %v15584_v57 = vld [vmem:[%s20764_s3 + $0x1f5c] ss:$24 sps:$4 sm:$0xff]   ;;  %v15627_v59 = vld [vmem:[%s20764_s3 + $0x23d8] ss:$24 sps:$4 sm:$0xff]  }
 0x4fa   :  { %v7089_v34 = vadd.f32 %v7079_v30, %v19502_v1  ;;  %v7081_v51 = vpop.f32.mrb[102].mxu1  ;;  %9108 = vmatpush1.bf16.msra.mxu1 %v15570_v25  ;;  %9989 = vmatpush1.bf16.msra.mxu0 %v15573_v29  ;;  %v15587_v1 = vld [vmem:[%s20764_s3 + $0x228c] ss:$24 sps:$4 sm:$0xff]  }
 0x4fb   :  { %v7082_v56 = vpop.f32.mrb[103].mxu1  ;;  %9109 = vmatprep.subr.bf16.mxu1 %v15578_v45  ;;  %9990 = vmatprep.subr.bf16.mxu0 %v15581_v16  ;;  %v19848_v9 = vadd.f32 %v19580_v3, %v7088_v20  ;;  %v15590_v3 = vld [vmem:[%s20764_s3 + $0x1f84] ss:$24 sps:$4 sm:$0xff]   ;;  %v397_v20 = vmax.f32 %v366_v14, 0.0 }
 0x4fc   :  { %v19851_v11 = vadd.f32 %v19582_v40, %v7089_v34  ;;  %v15593_v40 = vld [vmem:[%s20764_s3 + $0x22bc] ss:$24 sps:$4 sm:$0xff]  }
 0x4fd   :  { %v19973_v56 = vpack.c.bf16 %v397_v20, %v397_v20 }
 0x4fe   :  { %9110 = vmatpush1.bf16.msra.mxu1 %v15576_v23  ;;  %9991 = vmatpush1.bf16.msra.mxu0 %v15579_v10  ;;  %v15630_v23 = vld [vmem:[%s20764_s3 + $0x20d0] ss:$24 sps:$4 sm:$0xff]   ;;  %v15633_v10 = vld [vmem:[%s20764_s3 + $0x2400] ss:$24 sps:$4 sm:$0xff]  }
 0x4ff   :  { %9111 = vmatprep.subr.bf16.mxu1 %v15584_v57  ;;  %10354 = vmatprep.subr.bf16.mxu0 %v15587_v1  ;;  %v15636_v57 = vld [vmem:[%s20764_s3 + $0x1f90] ss:$24 sps:$4 sm:$0xff]  }
 0x500   :  { %v15639_v1 = vld [vmem:[%s20764_s3 + $0x2430] ss:$24 sps:$4 sm:$0xff]  }
 0x501   :  { %10009 = vmatmul.mubr.bf16.vlgmr.msra.gmra.mrb[180].mxu0 %v19745_v0 }
 0x502   :  { %9112 = vmatpush1.bf16.msra.mxu1 %v15582_v36  ;;  %10355 = vmatpush1.bf16.msra.mxu0 %v15585_v31  ;;  %v15644_v36 = vld [vmem:[%s20764_s3 + $0x1fc4] ss:$24 sps:$4 sm:$0xff]  }
 0x503   :  { %9475 = vmatprep.subr.bf16.mxu1 %v15590_v3  ;;  %10356 = vmatprep.subr.bf16.mxu0 %v15593_v40  ;;  %v15647_v31 = vld [vmem:[%s20764_s3 + $0x2464] ss:$24 sps:$4 sm:$0xff]   ;;  %v15642_v3 = vld [vmem:[%s20764_s3 + $0x1fc0] ss:$24 sps:$4 sm:$0xff]  }
 0x504   :  { %10386 = vmatprep.mubr.bf16.mxu0 %v15807_v46  ;;  %v15645_v40 = vld [vmem:[%s20764_s3 + $0x2460] ss:$24 sps:$4 sm:$0xff]  }
 0x505   :  { %9130 = vmatmul.mubr.bf16.vlgmr.msra.gmra.mrb[128].mxu1 %v19396_v19  ;;  %v15605_v19 = vld [vmem:[%s20764_s3 + $0x231c] ss:$24 sps:$4 sm:$0xff]  }
 0x506   :  { %9476 = vmatpush1.bf16.msra.mxu1 %v15588_v2  ;;  %10357 = vmatpush1.bf16.msra.mxu0 %v15591_v47  ;;  %v15650_v2 = vld [vmem:[%s20764_s3 + $0x1ff4] ss:$24 sps:$4 sm:$0xff]  }
 0x507   :  { %9477 = vmatprep.subr.bf16.mxu1 %v15596_v6  ;;  %10358 = vmatprep.subr.bf16.mxu0 %v15599_v38  ;;  %v15653_v47 = vld [vmem:[%s20764_s3 + $0x2494] ss:$24 sps:$4 sm:$0xff]   ;;  %v15648_v6 = vld [vmem:[%s20764_s3 + $0x1ff0] ss:$24 sps:$4 sm:$0xff]  }
 0x508   :  { %9507 = vmatprep.mubr.bf16.mxu1 %v15807_v46  ;;  %v15651_v38 = vld [vmem:[%s20764_s3 + $0x2490] ss:$24 sps:$4 sm:$0xff]  }
 0x50a   :  { %9478 = vmatpush1.bf16.msra.mxu1 %v15594_v58  ;;  %10359 = vmatpush1.bf16.msra.mxu0 %v15597_v62  ;;  %v15656_v58 = vld [vmem:[%s20764_s3 + $0x2024] ss:$24 sps:$4 sm:$0xff]  }
 0x50b   :  { %9479 = vmatprep.subr.bf16.mxu1 %v15602_v17  ;;  %10360 = vmatprep.subr.bf16.mxu0 %v15605_v19  ;;  %v15659_v62 = vld [vmem:[%s20764_s3 + $0x24c4] ss:$24 sps:$4 sm:$0xff]   ;;  %v15654_v17 = vld [vmem:[%s20764_s3 + $0x2020] ss:$24 sps:$4 sm:$0xff]  }
 0x50c   :  { %v15657_v19 = vld [vmem:[%s20764_s3 + $0x24c0] ss:$24 sps:$4 sm:$0xff]  }
 0x50e   :  { %9480 = vmatpush1.bf16.msra.mxu1 %v15600_v42  ;;  %10361 = vmatpush1.bf16.msra.mxu0 %v15603_v61  ;;  %v15662_v42 = vld [vmem:[%s20764_s3 + $0x2054] ss:$24 sps:$4 sm:$0xff]  }
 0x50f   :  { %9481 = vmatprep.subr.bf16.mxu1 %v15608_v50  ;;  %10362 = vmatprep.subr.bf16.mxu0 %v15611_v21  ;;  %v15665_v61 = vld [vmem:[%s20764_s3 + $0x24f4] ss:$24 sps:$4 sm:$0xff]   ;;  %v15660_v50 = vld [vmem:[%s20764_s3 + $0x2050] ss:$24 sps:$4 sm:$0xff]  }
 0x510   :  { %v15663_v21 = vld [vmem:[%s20764_s3 + $0x24f0] ss:$24 sps:$4 sm:$0xff]  }
 0x512   :  { %9482 = vmatpush1.bf16.msra.mxu1 %v15606_v52  ;;  %10363 = vmatpush1.bf16.msra.mxu0 %v15609_v5  ;;  %v15668_v52 = vld [vmem:[%s20764_s3 + $0x2084] ss:$24 sps:$4 sm:$0xff]  }
 0x513   :  { %9483 = vmatprep.subr.bf16.mxu1 %v15614_v54  ;;  %10364 = vmatprep.subr.bf16.mxu0 %v15617_v49  ;;  %v15671_v5 = vld [vmem:[%s20764_s3 + $0x2524] ss:$24 sps:$4 sm:$0xff]  }
 0x514   :  { %v19929_v35 = vpop.f32.mrb[156].mxu0 }
 0x515   :  { %v19931_v15 = vpop.f32.mrb[157].mxu0 }
 0x516   :  { %v8338_v39 = vpop.f32.mrb[158].mxu0  ;;  %9484 = vmatpush1.bf16.msra.mxu1 %v15612_v53  ;;  %10365 = vmatpush1.bf16.msra.mxu0 %v15615_v18  ;;  %v15666_v18 = vld [vmem:[%s20764_s3 + $0x2080] ss:$24 sps:$4 sm:$0xff]  }
 0x517   :  { %v8339_v27 = vpop.f32.mrb[159].mxu0  ;;  %9485 = vmatprep.subr.bf16.mxu1 %v15620_v63  ;;  %10366 = vmatprep.subr.bf16.mxu0 %v15623_v32  ;;  %v15669_v63 = vld [vmem:[%s20764_s3 + $0x2520] ss:$24 sps:$4 sm:$0xff]   ;;  %v371_v32 = vadd.f32 %v19593_v24, %v16540_v28  ;;  %v15672_v28 = vld [vmem:[%s20764_s3 + $0x20b0] ss:$24 sps:$4 sm:$0xff]  }
 0x518   :  { %v7455_v25 = vpop.f32.mrb[104].mxu1  ;;  %v15675_v24 = vld [vmem:[%s20764_s3 + $0x2550] ss:$24 sps:$4 sm:$0xff]  }
 0x519   :  { %v7505_v29 = vadd.f32 %v7455_v25, %v19618_v13  ;;  %v7457_v43 = vpop.f32.mrb[105].mxu1  ;;  %v15632_v13 = vld [vmem:[%s20764_s3 + $0x20d4] ss:$24 sps:$4 sm:$0xff]  }
 0x51a   :  { %v7506_v45 = vadd.f32 %v7457_v43, %v19621_v60  ;;  %v7459_v16 = vpop.f32.mrb[106].mxu1  ;;  %9486 = vmatpush1.bf16.msra.mxu1 %v15618_v41  ;;  %10367 = vmatpush1.bf16.msra.mxu0 %v15621_v44  ;;  %v15635_v60 = vld [vmem:[%s20764_s3 + $0x2404] ss:$24 sps:$4 sm:$0xff]   ;;  %v15674_v41 = vld [vmem:[%s20764_s3 + $0x20b4] ss:$24 sps:$4 sm:$0xff]  }
 0x51b   :  { %v7460_v30 = vpop.f32.mrb[107].mxu1  ;;  %9487 = vmatprep.subr.bf16.mxu1 %v15626_v8  ;;  %10368 = vmatprep.subr.bf16.mxu0 %v15629_v37  ;;  %v19962_v34 = vadd.f32 %v19701_v33, %v7505_v29  ;;  %v15638_v33 = vld [vmem:[%s20764_s3 + $0x1f94] ss:$24 sps:$4 sm:$0xff]   ;;  %v398_v29 = vmax.f32 %v371_v32, 0.0 }
 0x51c   :  { %v19965_v51 = vadd.f32 %v19703_v12, %v7506_v45  ;;  %v15641_v12 = vld [vmem:[%s20764_s3 + $0x2434] ss:$24 sps:$4 sm:$0xff]   ;;  %v15684_v30 = vld [vmem:[%s20764_s3 + $0x2108] ss:$24 sps:$4 sm:$0xff]  }
 0x51d   :  { %v15677_v44 = vld [vmem:[%s20764_s3 + $0x2554] ss:$24 sps:$4 sm:$0xff]   ;;  %v20089_v20 = vpack.c.bf16 %v398_v29, %v398_v29  ;;  %v15738_v29 = vld [vmem:[%s20764_s3 + $0x2310] ss:$24 sps:$4 sm:$0xff]  }
 0x51e   :  { %9488 = vmatpush1.bf16.msra.mxu1 %v15624_v22  ;;  %10369 = vmatpush1.bf16.msra.mxu0 %v15627_v59  ;;  %v15678_v22 = vld [vmem:[%s20764_s3 + $0x20e0] ss:$24 sps:$4 sm:$0xff]   ;;  %v15681_v59 = vld [vmem:[%s20764_s3 + $0x2410] ss:$24 sps:$4 sm:$0xff]  }
 0x51f   :  { %9489 = vmatprep.subr.bf16.mxu1 %v15632_v13  ;;  %10732 = vmatprep.subr.bf16.mxu0 %v15635_v60  ;;  %v15687_v13 = vld [vmem:[%s20764_s3 + $0x2440] ss:$24 sps:$4 sm:$0xff]   ;;  %v15692_v60 = vld [vmem:[%s20764_s3 + $0x213c] ss:$24 sps:$4 sm:$0xff]  }
 0x521   :  { %10387 = vmatmul.mubr.bf16.vlgmr.msra.gmra.mrb[184].mxu0 %v19973_v56 }
 0x522   :  { %9490 = vmatpush1.bf16.msra.mxu1 %v15630_v23  ;;  %10733 = vmatpush1.bf16.msra.mxu0 %v15633_v10  ;;  %v15695_v23 = vld [vmem:[%s20764_s3 + $0x2474] ss:$24 sps:$4 sm:$0xff]   ;;  %v15690_v10 = vld [vmem:[%s20764_s3 + $0x2138] ss:$24 sps:$4 sm:$0xff]  }
 0x523   :  { %9557 = vmatprep.subr.bf16.mxu1 %v15638_v33  ;;  %10734 = vmatprep.subr.bf16.mxu0 %v15641_v12  ;;  %v15693_v33 = vld [vmem:[%s20764_s3 + $0x2470] ss:$24 sps:$4 sm:$0xff]   ;;  %v15698_v12 = vld [vmem:[%s20764_s3 + $0x216c] ss:$24 sps:$4 sm:$0xff]  }
 0x524   :  { %10764 = vmatprep.mubr.bf16.mxu0 %v15807_v46 }
 0x525   :  { %9508 = vmatmul.mubr.bf16.vlgmr.msra.gmra.mrb[132].mxu1 %v19629_v26 }
 0x526   :  { %9558 = vmatpush1.bf16.msra.mxu1 %v15636_v57  ;;  %10735 = vmatpush1.bf16.msra.mxu0 %v15639_v1  ;;  %v15696_v57 = vld [vmem:[%s20764_s3 + $0x2168] ss:$24 sps:$4 sm:$0xff]  }
 0x527   :  { %9559 = vmatprep.subr.bf16.mxu1 %v15644_v36  ;;  %10736 = vmatprep.subr.bf16.mxu0 %v15647_v31  ;;  %v15699_v1 = vld [vmem:[%s20764_s3 + $0x24a0] ss:$24 sps:$4 sm:$0xff]   ;;  %v15704_v36 = vld [vmem:[%s20764_s3 + $0x219c] ss:$24 sps:$4 sm:$0xff]  }
 0x528   :  { %9589 = vmatprep.mubr.bf16.mxu1 %v15807_v46  ;;  %v15707_v31 = vld [vmem:[%s20764_s3 + $0x24d4] ss:$24 sps:$4 sm:$0xff]  }
 0x52a   :  { %9560 = vmatpush1.bf16.msra.mxu1 %v15642_v3  ;;  %10737 = vmatpush1.bf16.msra.mxu0 %v15645_v40  ;;  %v15702_v3 = vld [vmem:[%s20764_s3 + $0x2198] ss:$24 sps:$4 sm:$0xff]  }
 0x52b   :  { %9561 = vmatprep.subr.bf16.mxu1 %v15650_v2  ;;  %10738 = vmatprep.subr.bf16.mxu0 %v15653_v47  ;;  %v15705_v40 = vld [vmem:[%s20764_s3 + $0x24d0] ss:$24 sps:$4 sm:$0xff]   ;;  %v15710_v2 = vld [vmem:[%s20764_s3 + $0x21cc] ss:$24 sps:$4 sm:$0xff]  }
 0x52c   :  { %v15713_v47 = vld [vmem:[%s20764_s3 + $0x2504] ss:$24 sps:$4 sm:$0xff]  }
 0x52e   :  { %9562 = vmatpush1.bf16.msra.mxu1 %v15648_v6  ;;  %10739 = vmatpush1.bf16.msra.mxu0 %v15651_v38  ;;  %v15708_v6 = vld [vmem:[%s20764_s3 + $0x21c8] ss:$24 sps:$4 sm:$0xff]  }
 0x52f   :  { %9563 = vmatprep.subr.bf16.mxu1 %v15656_v58  ;;  %10740 = vmatprep.subr.bf16.mxu0 %v15659_v62  ;;  %v15711_v38 = vld [vmem:[%s20764_s3 + $0x2500] ss:$24 sps:$4 sm:$0xff]   ;;  %v15716_v58 = vld [vmem:[%s20764_s3 + $0x21fc] ss:$24 sps:$4 sm:$0xff]  }
 0x530   :  { %v15719_v62 = vld [vmem:[%s20764_s3 + $0x2534] ss:$24 sps:$4 sm:$0xff]  }
 0x532   :  { %9564 = vmatpush1.bf16.msra.mxu1 %v15654_v17  ;;  %10741 = vmatpush1.bf16.msra.mxu0 %v15657_v19 }
 0x533   :  { %9565 = vmatprep.subr.bf16.mxu1 %v15662_v42  ;;  %10742 = vmatprep.subr.bf16.mxu0 %v15665_v61  ;;  %v15714_v61 = vld [vmem:[%s20764_s3 + $0x21f8] ss:$24 sps:$4 sm:$0xff]  }
 0x534   :  { %v20045_v54 = vpop.f32.mrb[160].mxu0 }
 0x535   :  { %v20047_v49 = vpop.f32.mrb[161].mxu0 }
 0x536   :  { %v8716_v53 = vpop.f32.mrb[162].mxu0  ;;  %9566 = vmatpush1.bf16.msra.mxu1 %v15660_v50  ;;  %10743 = vmatpush1.bf16.msra.mxu0 %v15663_v21  ;;  %v15717_v50 = vld [vmem:[%s20764_s3 + $0x2530] ss:$24 sps:$4 sm:$0xff]  }
 0x537   :  { %v8717_v39 = vpop.f32.mrb[163].mxu0  ;;  %9567 = vmatprep.subr.bf16.mxu1 %v15668_v52  ;;  %10744 = vmatprep.subr.bf16.mxu0 %v15671_v5  ;;  %v15722_v52 = vld [vmem:[%s20764_s3 + $0x222c] ss:$24 sps:$4 sm:$0xff]  }
 0x538   :  { %v7833_v14 = vpop.f32.mrb[108].mxu1  ;;  %v15725_v5 = vld [vmem:[%s20764_s3 + $0x2564] ss:$24 sps:$4 sm:$0xff]  }
 0x539   :  { %v7922_v27 = vadd.f32 %v7833_v14, %v19734_v4  ;;  %v7835_v8 = vpop.f32.mrb[109].mxu1  ;;  %v15680_v4 = vld [vmem:[%s20764_s3 + $0x20e4] ss:$24 sps:$4 sm:$0xff]  }
 0x53a   :  { %v7923_v37 = vadd.f32 %v7835_v8, %v19737_v55  ;;  %v7837_v25 = vpop.f32.mrb[110].mxu1  ;;  %9568 = vmatpush1.bf16.msra.mxu1 %v15666_v18  ;;  %10745 = vmatpush1.bf16.msra.mxu0 %v15669_v63  ;;  %v15683_v55 = vld [vmem:[%s20764_s3 + $0x2414] ss:$24 sps:$4 sm:$0xff]   ;;  %v15726_v8 = vld [vmem:[%s20764_s3 + $0x2258] ss:$24 sps:$4 sm:$0xff]  }
 0x53b   :  { %v7838_v43 = vpop.f32.mrb[111].mxu1  ;;  %9569 = vmatprep.subr.bf16.mxu1 %v15674_v41  ;;  %10746 = vmatprep.subr.bf16.mxu0 %v15677_v44  ;;  %v20078_v45 = vadd.f32 %v19817_v48, %v7922_v27  ;;  %v15686_v48 = vld [vmem:[%s20764_s3 + $0x210c] ss:$24 sps:$4 sm:$0xff]   ;;  %v15720_v41 = vld [vmem:[%s20764_s3 + $0x2228] ss:$24 sps:$4 sm:$0xff]  }
 0x53c   :  { %v20081_v16 = vadd.f32 %v19819_v7, %v7923_v37  ;;  %v15689_v7 = vld [vmem:[%s20764_s3 + $0x2444] ss:$24 sps:$4 sm:$0xff]   ;;  %v15723_v44 = vld [vmem:[%s20764_s3 + $0x2560] ss:$24 sps:$4 sm:$0xff]   ;;  %v15732_v25 = vld [vmem:[%s20764_s3 + $0x22b0] ss:$24 sps:$4 sm:$0xff]  }
 0x53d   :  { %v15731_v37 = vld [vmem:[%s20764_s3 + $0x2284] ss:$24 sps:$4 sm:$0xff]  }
 0x53e   :  { %9570 = vmatpush1.bf16.msra.mxu1 %v15672_v28  ;;  %10747 = vmatpush1.bf16.msra.mxu0 %v15675_v24  ;;  %v15737_v28 = vld [vmem:[%s20764_s3 + $0x22e4] ss:$24 sps:$4 sm:$0xff]   ;;  %v15735_v24 = vld [vmem:[%s20764_s3 + $0x22e0] ss:$24 sps:$4 sm:$0xff]  }
 0x53f   :  { %9571 = vmatprep.subr.bf16.mxu1 %v15680_v4  ;;  %10814 = vmatprep.subr.bf16.mxu0 %v15683_v55  ;;  %v15743_v43 = vld [vmem:[%s20764_s3 + $0x2344] ss:$24 sps:$4 sm:$0xff]   ;;  %v15741_v4 = vld [vmem:[%s20764_s3 + $0x2340] ss:$24 sps:$4 sm:$0xff]   ;;  %v15746_v55 = vld [vmem:[%s20764_s3 + $0x2374] ss:$24 sps:$4 sm:$0xff]  }
 0x541   :  { %10765 = vmatmul.mubr.bf16.vlgmr.msra.gmra.mrb[188].mxu0 %v20089_v20 }
 0x542   :  { %9572 = vmatpush1.bf16.msra.mxu1 %v15678_v22  ;;  %10815 = vmatpush1.bf16.msra.mxu0 %v15681_v59 }
 0x543   :  { %9935 = vmatprep.subr.bf16.mxu1 %v15686_v48  ;;  %10816 = vmatprep.subr.bf16.mxu0 %v15689_v7  ;;  %v15744_v7 = vld [vmem:[%s20764_s3 + $0x2370] ss:$24 sps:$4 sm:$0xff]  }
 0x544   :  { %10846 = vmatprep.mubr.bf16.mxu0 %v15807_v46 }
 0x545   :  { %9590 = vmatmul.mubr.bf16.vlgmr.msra.gmra.mrb[136].mxu1 %v19629_v26  ;;  %v15701_v26 = vld [vmem:[%s20764_s3 + $0x24a4] ss:$24 sps:$4 sm:$0xff]  }
 0x546   :  { %9936 = vmatpush1.bf16.msra.mxu1 %v15684_v30  ;;  %10817 = vmatpush1.bf16.msra.mxu0 %v15687_v13  ;;  %v15749_v13 = vld [vmem:[%s20764_s3 + $0x23a4] ss:$24 sps:$4 sm:$0xff]  }
 0x547   :  { %9937 = vmatprep.subr.bf16.mxu1 %v15692_v60  ;;  %10818 = vmatprep.subr.bf16.mxu0 %v15695_v23 }
 0x548   :  { %9967 = vmatprep.mubr.bf16.mxu1 %v15807_v46 }
 0x54a   :  { %9938 = vmatpush1.bf16.msra.mxu1 %v15690_v10  ;;  %10819 = vmatpush1.bf16.msra.mxu0 %v15693_v33 }
 0x54b   :  { %9939 = vmatprep.subr.bf16.mxu1 %v15698_v12  ;;  %10820 = vmatprep.subr.bf16.mxu0 %v15701_v26  ;;  %v15747_v26 = vld [vmem:[%s20764_s3 + $0x23a0] ss:$24 sps:$4 sm:$0xff]  }
 0x54e   :  { %9940 = vmatpush1.bf16.msra.mxu1 %v15696_v57  ;;  %10821 = vmatpush1.bf16.msra.mxu0 %v15699_v1  ;;  %v15752_v1 = vld [vmem:[%s20764_s3 + $0x23d4] ss:$24 sps:$4 sm:$0xff]  }
 0x54f   :  { %9941 = vmatprep.subr.bf16.mxu1 %v15704_v36  ;;  %10822 = vmatprep.subr.bf16.mxu0 %v15707_v31  ;;  %v15755_v31 = vld [vmem:[%s20764_s3 + $0x2294] ss:$24 sps:$4 sm:$0xff]  }
 0x552   :  { %9942 = vmatpush1.bf16.msra.mxu1 %v15702_v3  ;;  %10823 = vmatpush1.bf16.msra.mxu0 %v15705_v40  ;;  %v15753_v3 = vld [vmem:[%s20764_s3 + $0x2290] ss:$24 sps:$4 sm:$0xff]   ;;  %v15761_v40 = vld [vmem:[%s20764_s3 + $0x22f4] ss:$24 sps:$4 sm:$0xff]  }
 0x553   :  { %9943 = vmatprep.subr.bf16.mxu1 %v15710_v2  ;;  %10824 = vmatprep.subr.bf16.mxu0 %v15713_v47  ;;  %v15759_v2 = vld [vmem:[%s20764_s3 + $0x22f0] ss:$24 sps:$4 sm:$0xff]   ;;  %v15764_v47 = vld [vmem:[%s20764_s3 + $0x2324] ss:$24 sps:$4 sm:$0xff]  }
 0x554   :  { %v20161_v17 = vpop.f32.mrb[164].mxu0 }
 0x555   :  { %v20163_v19 = vpop.f32.mrb[165].mxu0 }
 0x556   :  { %v9094_v42 = vpop.f32.mrb[166].mxu0  ;;  %9944 = vmatpush1.bf16.msra.mxu1 %v15708_v6  ;;  %10825 = vmatpush1.bf16.msra.mxu0 %v15711_v38  ;;  %v15762_v6 = vld [vmem:[%s20764_s3 + $0x2320] ss:$24 sps:$4 sm:$0xff]   ;;  %v15767_v38 = vld [vmem:[%s20764_s3 + $0x2354] ss:$24 sps:$4 sm:$0xff]  }
 0x557   :  { %v9095_v21 = vpop.f32.mrb[167].mxu0  ;;  %9945 = vmatprep.subr.bf16.mxu1 %v15716_v58  ;;  %10826 = vmatprep.subr.bf16.mxu0 %v15719_v62  ;;  %v15765_v58 = vld [vmem:[%s20764_s3 + $0x2350] ss:$24 sps:$4 sm:$0xff]   ;;  %v15770_v62 = vld [vmem:[%s20764_s3 + $0x2384] ss:$24 sps:$4 sm:$0xff]  }
 0x558   :  { %v7915_v53 = vpop.f32.mrb[112].mxu1  ;;  %v15768_v21 = vld [vmem:[%s20764_s3 + $0x2380] ss:$24 sps:$4 sm:$0xff]  }
 0x559   :  { %v7926_v18 = vadd.f32 %v7915_v53, %v19848_v9  ;;  %v7917_v63 = vpop.f32.mrb[113].mxu1  ;;  %v15728_v9 = vld [vmem:[%s20764_s3 + $0x225c] ss:$24 sps:$4 sm:$0xff]  }
 0x55a   :  { %v7927_v32 = vadd.f32 %v7917_v63, %v19851_v11  ;;  %v7919_v39 = vpop.f32.mrb[114].mxu1  ;;  %9946 = vmatpush1.bf16.msra.mxu1 %v15714_v61  ;;  %10827 = vmatpush1.bf16.msra.mxu0 %v15717_v50 }
 0x55b   :  { %v7920_v14 = vpop.f32.mrb[115].mxu1  ;;  %9947 = vmatprep.subr.bf16.mxu1 %v15722_v52  ;;  %10828 = vmatprep.subr.bf16.mxu0 %v15725_v5  ;;  %v20189_v11 = vadd.f32 %v19929_v35, %v7926_v18  ;;  %v15729_v35 = vld [vmem:[%s20764_s3 + $0x2280] ss:$24 sps:$4 sm:$0xff]   ;;  %v15773_v5 = vld [vmem:[%s20764_s3 + $0x23b4] ss:$24 sps:$4 sm:$0xff]  }
 0x55c   :  { %v20192_v27 = vadd.f32 %v19931_v15, %v7927_v32  ;;  %v15734_v15 = vld [vmem:[%s20764_s3 + $0x22b4] ss:$24 sps:$4 sm:$0xff]   ;;  %v15776_v14 = vld [vmem:[%s20764_s3 + $0x23e4] ss:$24 sps:$4 sm:$0xff]  }
 0x55e   :  { %9948 = vmatpush1.bf16.msra.mxu1 %v15720_v41  ;;  %10829 = vmatpush1.bf16.msra.mxu0 %v15723_v44  ;;  %v15771_v41 = vld [vmem:[%s20764_s3 + $0x23b0] ss:$24 sps:$4 sm:$0xff]  }
 0x55f   :  { %9949 = vmatprep.subr.bf16.mxu1 %v15728_v9 }
 0x561   :  { %10847 = vmatmul.mubr.bf16.vlgmr.msra.gmra.mrb[192].mxu0 %v20089_v20 }
 0x562   :  { %9950 = vmatpush1.bf16.msra.mxu1 %v15726_v8  ;;  %v15779_v8 = vld [vmem:[%s20764_s3 + $0x240c] ss:$24 sps:$4 sm:$0xff]  }
 0x563   :  { %10313 = vmatprep.subr.bf16.mxu1 %v15731_v37  ;;  %v15777_v37 = vld [vmem:[%s20764_s3 + $0x2408] ss:$24 sps:$4 sm:$0xff]  }
 0x565   :  { %9968 = vmatmul.mubr.bf16.vlgmr.msra.gmra.mrb[140].mxu1 %v19745_v0  ;;  %v15740_v0 = vld [vmem:[%s20764_s3 + $0x2314] ss:$24 sps:$4 sm:$0xff]  }
 0x566   :  { %10314 = vmatpush1.bf16.msra.mxu1 %v15729_v35  ;;  %10345 = vmatprep.mubr.bf16.mxu1 %v15807_v46  ;;  %v15785_v35 = vld [vmem:[%s20764_s3 + $0x246c] ss:$24 sps:$4 sm:$0xff]  }
 0x567   :  { %10315 = vmatprep.subr.bf16.mxu1 %v15734_v15  ;;  %v15783_v15 = vld [vmem:[%s20764_s3 + $0x2468] ss:$24 sps:$4 sm:$0xff]  }
 0x56a   :  { %10316 = vmatpush1.bf16.msra.mxu1 %v15732_v25  ;;  %v15791_v25 = vld [vmem:[%s20764_s3 + $0x24cc] ss:$24 sps:$4 sm:$0xff]  }
 0x56b   :  { %10317 = vmatprep.subr.bf16.mxu1 %v15737_v28  ;;  %v15789_v28 = vld [vmem:[%s20764_s3 + $0x24c8] ss:$24 sps:$4 sm:$0xff]  }
 0x56e   :  { %10318 = vmatpush1.bf16.msra.mxu1 %v15735_v24  ;;  %v15794_v24 = vld [vmem:[%s20764_s3 + $0x24fc] ss:$24 sps:$4 sm:$0xff]  }
 0x56f   :  { %10319 = vmatprep.subr.bf16.mxu1 %v15740_v0 }
 0x572   :  { %10320 = vmatpush1.bf16.msra.mxu1 %v15738_v29 }
 0x573   :  { %10321 = vmatprep.subr.bf16.mxu1 %v15743_v43 }
 0x574   :  { %v20233_v22 = vpop.f32.mrb[168].mxu0 }
 0x575   :  { %v20235_v59 = vpop.f32.mrb[169].mxu0 }
 0x576   :  { %v9176_v48 = vpop.f32.mrb[170].mxu0  ;;  %10322 = vmatpush1.bf16.msra.mxu1 %v15741_v4  ;;  %v15792_v4 = vld [vmem:[%s20764_s3 + $0x24f8] ss:$24 sps:$4 sm:$0xff]  }
 0x577   :  { %v9177_v30 = vpop.f32.mrb[171].mxu0  ;;  %10323 = vmatprep.subr.bf16.mxu1 %v15746_v55  ;;  %v15797_v48 = vld [vmem:[%s20764_s3 + $0x252c] ss:$24 sps:$4 sm:$0xff]  }
 0x578   :  { %v8293_v60 = vpop.f32.mrb[116].mxu1 }
 0x579   :  { %v8343_v23 = vadd.f32 %v8293_v60, %v19962_v34  ;;  %v8295_v10 = vpop.f32.mrb[117].mxu1 }
 0x57a   :  { %v8344_v33 = vadd.f32 %v8295_v10, %v19965_v51  ;;  %v8297_v12 = vpop.f32.mrb[118].mxu1  ;;  %10324 = vmatpush1.bf16.msra.mxu1 %v15744_v7  ;;  %v15750_v51 = vld [vmem:[%s20764_s3 + $0x23d0] ss:$24 sps:$4 sm:$0xff]  }
 0x57b   :  { %v8298_v57 = vpop.f32.mrb[119].mxu1  ;;  %10325 = vmatprep.subr.bf16.mxu1 %v15749_v13  ;;  %v20252_v36 = vadd.f32 %v20045_v54, %v8343_v23  ;;  %v15758_v54 = vld [vmem:[%s20764_s3 + $0x22c4] ss:$24 sps:$4 sm:$0xff]   ;;  %v15795_v10 = vld [vmem:[%s20764_s3 + $0x2528] ss:$24 sps:$4 sm:$0xff]  }
 0x57c   :  { %v20255_v34 = vadd.f32 %v20047_v49, %v8344_v33  ;;  %v15756_v49 = vld [vmem:[%s20764_s3 + $0x22c0] ss:$24 sps:$4 sm:$0xff]   ;;  %v15800_v12 = vld [vmem:[%s20764_s3 + $0x255c] ss:$24 sps:$4 sm:$0xff]   ;;  %v10988_v57 = vld [vmem:[%s20766_s5 + $0x88] sm:$0xff] }
 0x57e   :  { %10326 = vmatpush1.bf16.msra.mxu1 %v15747_v26 }
 0x57f   :  { %10327 = vmatprep.subr.bf16.mxu1 %v15752_v1  ;;  %v15798_v1 = vld [vmem:[%s20764_s3 + $0x2558] ss:$24 sps:$4 sm:$0xff]  }
 0x582   :  { %10328 = vmatpush1.bf16.msra.mxu1 %v15750_v51 }
 0x583   :  { %10395 = vmatprep.subr.bf16.mxu1 %v15755_v31  ;;  %v10989_v31 = vld [vmem:[%s20766_s5 + $0x90] sm:$0xff] }
 0x585   :  { %10346 = vmatmul.mubr.bf16.vlgmr.msra.gmra.mrb[144].mxu1 %v19973_v56 }
 0x586   :  { %10396 = vmatpush1.bf16.msra.mxu1 %v15753_v3  ;;  %10427 = vmatprep.mubr.bf16.mxu1 %v15807_v46  ;;  %v10990_v3 = vld [vmem:[%s20766_s5 + $0x98] sm:$0xff] }
 0x587   :  { %10397 = vmatprep.subr.bf16.mxu1 %v15758_v54 }
 0x58a   :  { %10398 = vmatpush1.bf16.msra.mxu1 %v15756_v49  ;;  %v13904_v49 = vpack.c.bf16 %v10990_v3, %v10989_v31 }
 0x58b   :  { %10399 = vmatprep.subr.bf16.mxu1 %v15761_v40  ;;  %v10973_v40 = vld [vmem:[%s20766_s5 + $0x10] sm:$0xff] }
 0x58e   :  { %10400 = vmatpush1.bf16.msra.mxu1 %v15759_v2  ;;  %v10974_v2 = vld [vmem:[%s20766_s5 + $0x18] sm:$0xff] }
 0x58f   :  { %10401 = vmatprep.subr.bf16.mxu1 %v15764_v47  ;;  %v10991_v47 = vld [vmem:[%s20766_s5 + $0xa0] sm:$0xff] }
 0x592   :  { %10402 = vmatpush1.bf16.msra.mxu1 %v15762_v6  ;;  %v10992_v6 = vld [vmem:[%s20766_s5 + $0xa8] sm:$0xff] }
 0x593   :  { %10403 = vmatprep.subr.bf16.mxu1 %v15767_v38  ;;  %v13906_v38 = vpack.c.bf16 %v10974_v2, %v10973_v40 }
 0x594   :  { %v20295_v42 = vpop.f32.mrb[172].mxu0 }
 0x595   :  { %v20297_v61 = vpop.f32.mrb[173].mxu0 }
 0x596   :  { %v9554_v50 = vpop.f32.mrb[174].mxu0  ;;  %10404 = vmatpush1.bf16.msra.mxu1 %v15765_v58  ;;  %v13908_v58 = vpack.c.bf16 %v10992_v6, %v10991_v47 }
 0x597   :  { %v9555_v52 = vpop.f32.mrb[175].mxu0  ;;  %10405 = vmatprep.subr.bf16.mxu1 %v15770_v62  ;;  %v10975_v62 = vld [vmem:[%s20766_s5 + $0x20] sm:$0xff]  ;;  %v10976_v50 = vld [vmem:[%s20766_s5 + $0x28] sm:$0xff] }
 0x598   :  { %v8671_v53 = vpop.f32.mrb[120].mxu1 }
 0x599   :  { %v8760_v18 = vadd.f32 %v8671_v53, %v20078_v45  ;;  %v8673_v63 = vpop.f32.mrb[121].mxu1  ;;  %v10993_v53 = vld [vmem:[%s20766_s5 + $0xb0] sm:$0xff] }
 0x59a   :  { %v8761_v32 = vadd.f32 %v8673_v63, %v20081_v16  ;;  %v8675_v39 = vpop.f32.mrb[122].mxu1  ;;  %10406 = vmatpush1.bf16.msra.mxu1 %v15768_v21  ;;  %v15774_v16 = vld [vmem:[%s20764_s3 + $0x23e0] ss:$24 sps:$4 sm:$0xff]   ;;  %v13910_v21 = vpack.c.bf16 %v10976_v50, %v10975_v62 }
 0x59b   :  { %v8676_v44 = vpop.f32.mrb[123].mxu1  ;;  %10407 = vmatprep.subr.bf16.mxu1 %v15773_v5  ;;  %v20314_v9 = vadd.f32 %v20161_v17, %v8760_v18  ;;  %v15782_v17 = vld [vmem:[%s20764_s3 + $0x243c] ss:$24 sps:$4 sm:$0xff]  }
 0x59c   :  { %v20317_v45 = vadd.f32 %v20163_v19, %v8761_v32  ;;  %v15780_v19 = vld [vmem:[%s20764_s3 + $0x2438] ss:$24 sps:$4 sm:$0xff]  }
 0x59d   :  { %v10994_v18 = vld [vmem:[%s20766_s5 + $0xb8] sm:$0xff]  ;;  %v10977_v39 = vld [vmem:[%s20766_s5 + $0x30] sm:$0xff] }
 0x59e   :  { %10408 = vmatpush1.bf16.msra.mxu1 %v15771_v41  ;;  %v13912_v32 = vpack.c.bf16 %v10994_v18, %v10993_v53  ;;  %v10978_v41 = vld [vmem:[%s20766_s5 + $0x38] sm:$0xff] }
 0x59f   :  { %10409 = vmatprep.subr.bf16.mxu1 %v15776_v14  ;;  %v13914_v14 = vpack.c.bf16 %v10978_v41, %v10977_v39  ;;  %v11022_v18 = vld [vmem:[%s20766_s5 + $0x198] sm:$0xff]  ;;  %v11023_v41 = vld [vmem:[%s20766_s5 + $0x1a0] sm:$0xff] }
 0x5a0   :  { %v11006_v39 = vld [vmem:[%s20766_s5 + $0x118] sm:$0xff] }
 0x5a2   :  { %10410 = vmatpush1.bf16.msra.mxu1 %v15774_v16 }
 0x5a3   :  { %10773 = vmatprep.subr.bf16.mxu1 %v15779_v8 }
 0x5a5   :  { %10428 = vmatmul.mubr.bf16.vlgmr.msra.gmra.mrb[148].mxu1 %v19973_v56  ;;  %v15788_v56 = vld [vmem:[%s20764_s3 + $0x249c] ss:$24 sps:$4 sm:$0xff]  }
 0x5a6   :  { %10774 = vmatpush1.bf16.msra.mxu1 %v15777_v37  ;;  %10805 = vmatprep.mubr.bf16.mxu1 %v15807_v46  ;;  %v15786_v46 = vld [vmem:[%s20764_s3 + $0x2498] ss:$24 sps:$4 sm:$0xff]  }
 0x5a7   :  { %10775 = vmatprep.subr.bf16.mxu1 %v15782_v17 }
 0x5aa   :  { %10776 = vmatpush1.bf16.msra.mxu1 %v15780_v19  ;;  %v10995_v19 = vld [vmem:[%s20766_s5 + $0xc0] sm:$0xff] }
 0x5ab   :  { %10777 = vmatprep.subr.bf16.mxu1 %v15785_v35  ;;  %v10996_v35 = vld [vmem:[%s20766_s5 + $0xc8] sm:$0xff] }
 0x5ae   :  { %10778 = vmatpush1.bf16.msra.mxu1 %v15783_v15 }
 0x5af   :  { %10779 = vmatprep.subr.bf16.mxu1 %v15788_v56 }
 0x5b2   :  { %10780 = vmatpush1.bf16.msra.mxu1 %v15786_v46  ;;  %v13916_v46 = vpack.c.bf16 %v10996_v35, %v10995_v19  ;;  %v11026_v19 = vld [vmem:[%s20766_s5 + $0x1b8] sm:$0xff] }
 0x5b3   :  { %10781 = vmatprep.subr.bf16.mxu1 %v15791_v25 }
 0x5b4   :  { %v20357_v0 = vpop.f32.mrb[176].mxu0 }
 0x5b5   :  { %v20359_v29 = vpop.f32.mrb[177].mxu0 }
 0x5b6   :  { %v9932_v43 = vpop.f32.mrb[178].mxu0  ;;  %10782 = vmatpush1.bf16.msra.mxu1 %v15789_v28 }
 0x5b7   :  { %v9933_v55 = vpop.f32.mrb[179].mxu0  ;;  %10783 = vmatprep.subr.bf16.mxu1 %v15794_v24  ;;  %v10998_v24 = vld [vmem:[%s20766_s5 + $0xd8] sm:$0xff] }
 0x5b8   :  { %v8753_v7 = vpop.f32.mrb[124].mxu1 }
 0x5b9   :  { %v8764_v30 = vadd.f32 %v8753_v7, %v20189_v11  ;;  %v8755_v13 = vpop.f32.mrb[125].mxu1  ;;  %v11000_v7 = vld [vmem:[%s20766_s5 + $0xe8] sm:$0xff] }
 0x5ba   :  { %v8765_v60 = vadd.f32 %v8755_v13, %v20192_v27  ;;  %v8757_v23 = vpop.f32.mrb[126].mxu1  ;;  %10784 = vmatpush1.bf16.msra.mxu1 %v15792_v4  ;;  %v10987_v27 = vld [vmem:[%s20766_s5 + $0x80] sm:$0xff]  ;;  %v10981_v4 = vld [vmem:[%s20766_s5 + $0x50] sm:$0xff] }
 0x5bb   :  { %v8758_v33 = vpop.f32.mrb[127].mxu1  ;;  %10785 = vmatprep.subr.bf16.mxu1 %v15797_v48  ;;  %v20376_v26 = vadd.f32 %v20233_v22, %v8764_v30  ;;  %v13900_v51 = vpack.c.bf16 %v10988_v57, %v10987_v27  ;;  %v10971_v22 = vld [vmem:[%s20766_s5] sm:$0xff]  ;;  %v11001_v23 = vld [vmem:[%s20766_s5 + $0xf0] sm:$0xff]  ;;  %v10986_v57 = vld [vmem:[%s20766_s5 + $0x78] sm:$0xff] }
 0x5bc   :  { %v20379_v11 = vadd.f32 %v20235_v59, %v8765_v60  ;;  %v10972_v59 = vld [vmem:[%s20766_s5 + $0x8] sm:$0xff]  ;;  %v10999_v48 = vld [vmem:[%s20766_s5 + $0xe0] sm:$0xff]  ;;  %v10985_v27 = vld [vmem:[%s20766_s5 + $0x70] sm:$0xff] }
 0x5bd   :  { %v13902_v54 = vpack.c.bf16 %v10972_v59, %v10971_v22  ;;  %v10983_v30 = vld [vmem:[%s20766_s5 + $0x60] sm:$0xff]  ;;  %v13924_v13 = vpack.c.bf16 %v11000_v7, %v10999_v48  ;;  %v10984_v60 = vld [vmem:[%s20766_s5 + $0x68] sm:$0xff] }
 0x5be   :  { %10786 = vmatpush1.bf16.msra.mxu1 %v15795_v10  ;;  %v11002_v10 = vld [vmem:[%s20766_s5 + $0xf8] sm:$0xff]  ;;  %v13926_v33 = vpack.c.bf16 %v10984_v60, %v10983_v30  ;;  %v11052_v22 = vld [vmem:[%s20766_s5 + $0x288] sm:$0xff] }
 0x5bf   :  { %10787 = vmatprep.subr.bf16.mxu1 %v15800_v12  ;;  %v13928_v12 = vpack.c.bf16 %v11002_v10, %v11001_v23  ;;  %v11012_v60 = vld [vmem:[%s20766_s5 + $0x148] sm:$0xff] }
 0x5c2   :  { %10788 = vmatpush1.bf16.msra.mxu1 %v15798_v1  ;;  %v13930_v1 = vpack.c.bf16 %v10986_v57, %v10985_v27  ;;  %v11029_v57 = vld [vmem:[%s20766_s5 + $0x1d0] sm:$0xff] }
 0x5c3   :  { %13901 = vmatprep.subr.bf16.mxu1 %v13900_v51  ;;  %v11051_v51 = vld [vmem:[%s20766_s5 + $0x280] sm:$0xff] }
 0x5c4   :  { %v13964_v59 = vpack.c.bf16 %v11052_v22, %v11051_v51  ;;  %v11013_v51 = vld [vmem:[%s20766_s5 + $0x150] sm:$0xff]  ;;  %v11031_v22 = vld [vmem:[%s20766_s5 + $0x1e0] sm:$0xff] }
 0x5c5   :  { %10806 = vmatmul.mubr.bf16.vlgmr.msra.gmra.mrb[152].mxu1 %v20089_v20 }
 0x5c6   :  { %13903 = vmatpush3.bf16.msra.mxu1 %v13902_v54 }
 0x5c7   :  { %13905 = vmatprep.subr.bf16.mxu1 %v13904_v49 }
 0x5ca   :  { %13907 = vmatpush3.bf16.msra.mxu1 %v13906_v38 }
 0x5cb   :  { %13909 = vmatprep.subr.bf16.mxu1 %v13908_v58 }
 0x5ce   :  { %13911 = vmatpush3.bf16.msra.mxu1 %v13910_v21  ;;  %v11019_v21 = vld [vmem:[%s20766_s5 + $0x180] sm:$0xff] }
 0x5cf   :  { %13913 = vmatprep.subr.bf16.mxu1 %v13912_v32  ;;  %v11005_v32 = vld [vmem:[%s20766_s5 + $0x110] sm:$0xff] }
 0x5d2   :  { %13915 = vmatpush3.bf16.msra.mxu1 %v13914_v14  ;;  %v11024_v14 = vld [vmem:[%s20766_s5 + $0x1a8] sm:$0xff] }
 0x5d3   :  { %13917 = vmatprep.subr.bf16.mxu1 %v13916_v46 }
 0x5d4   :  { %v20421_v52 = vpop.f32.mrb[180].mxu0 }
 0x5d5   :  { %v20423_v5 = vpop.f32.mrb[181].mxu0 }
 0x5d6   :  { %v10014_v20 = vpop.f32.mrb[182].mxu0 }
 0x5d7   :  { %v10015_v63 = vpop.f32.mrb[183].mxu0  ;;  %v11020_v20 = vld [vmem:[%s20766_s5 + $0x188] sm:$0xff] }
 0x5d8   :  { %v9131_v44 = vpop.f32.mrb[128].mxu1 }
 0x5d9   :  { %v9181_v16 = vadd.f32 %v9131_v44, %v20252_v36  ;;  %v9133_v8 = vpop.f32.mrb[129].mxu1  ;;  %v10979_v36 = vld [vmem:[%s20766_s5 + $0x40] sm:$0xff]  ;;  %v13938_v44 = vpack.c.bf16 %v11006_v39, %v11005_v32 }
 0x5da   :  { %v9182_v37 = vadd.f32 %v9133_v8, %v20255_v34  ;;  %v9135_v17 = vpop.f32.mrb[130].mxu1  ;;  %v10980_v34 = vld [vmem:[%s20766_s5 + $0x48] sm:$0xff] }
 0x5db   :  { %v9136_v15 = vpop.f32.mrb[131].mxu1  ;;  %v20446_v56 = vadd.f32 %v20295_v42, %v9181_v16  ;;  %v13918_v28 = vpack.c.bf16 %v10980_v34, %v10979_v36  ;;  %v10997_v42 = vld [vmem:[%s20766_s5 + $0xd0] sm:$0xff]  ;;  %v11007_v16 = vld [vmem:[%s20766_s5 + $0x120] sm:$0xff]  ;;  %v11008_v8 = vld [vmem:[%s20766_s5 + $0x128] sm:$0xff] }
 0x5dc   :  { %v20455_v25 = vadd.f32 %v20297_v61, %v9182_v37  ;;  %v13920_v43 = vpack.c.bf16 %v10998_v24, %v10997_v42  ;;  %v10982_v61 = vld [vmem:[%s20766_s5 + $0x58] sm:$0xff]  ;;  %v13940_v37 = vpack.c.bf16 %v11024_v14, %v11023_v41  ;;  %v11025_v17 = vld [vmem:[%s20766_s5 + $0x1b0] sm:$0xff]  ;;  %v13942_v35 = vpack.c.bf16 %v11008_v8, %v11007_v16 }
 0x5dd   :  { %13919 = vmatpush3.bf16.msra.mxu1 %v13918_v28  ;;  %v13922_v55 = vpack.c.bf16 %v10982_v61, %v10981_v4  ;;  %v13944_v15 = vpack.c.bf16 %v11026_v19, %v11025_v17  ;;  %v11009_v34 = vld [vmem:[%s20766_s5 + $0x130] sm:$0xff]  ;;  %v11010_v28 = vld [vmem:[%s20766_s5 + $0x138] sm:$0xff]  ;;  %v11027_v61 = vld [vmem:[%s20766_s5 + $0x1c0] sm:$0xff]  ;;  %v10863_v16 = vlaneseq }
 0x5de   :  { %13921 = vmatprep.subr.bf16.mxu1 %v13920_v43  ;;  %v13946_v24 = vpack.c.bf16 %v11010_v28, %v11009_v34 }
 0x5df   :  { %v20631_v8 = vshrl.u32 %v10863_v16, 7 }
 0x5e1   :  { %13923 = vmatpush3.bf16.msra.mxu1 %v13922_v55  ;;  %v11028_v55 = vld [vmem:[%s20766_s5 + $0x1c8] sm:$0xff] }
 0x5e2   :  { %13925 = vmatprep.subr.bf16.mxu1 %v13924_v13  ;;  %v13948_v30 = vpack.c.bf16 %v11028_v55, %v11027_v61  ;;  %v11011_v13 = vld [vmem:[%s20766_s5 + $0x140] sm:$0xff] }
 0x5e5   :  { %13927 = vmatpush3.bf16.msra.mxu1 %v13926_v33  ;;  %v13950_v33 = vpack.c.bf16 %v11012_v60, %v11011_v13 }
 0x5e6   :  { %13929 = vmatprep.subr.bf16.mxu1 %v13928_v12 }
 0x5e9   :  { %13931 = vmatpush3.bf16.msra.mxu1 %v13930_v1  ;;  %v11030_v1 = vld [vmem:[%s20766_s5 + $0x1d8] sm:$0xff] }
 0x5ea   :  { %13965 = vmatprep.subr.bf16.mxu1 %v13964_v59  ;;  %v11032_v59 = vld [vmem:[%s20766_s5 + $0x1e8] sm:$0xff] }
 0x5f4   :  { %v20499_v31 = vpop.f32.mrb[184].mxu0 }
 0x5f5   :  { %v20501_v3 = vpop.f32.mrb[185].mxu0 }
 0x5f6   :  { %v10392_v54 = vpop.f32.mrb[186].mxu0 }
 0x5f7   :  { %v10393_v49 = vpop.f32.mrb[187].mxu0  ;;  %v13956_v54 = vpack.c.bf16 %v11032_v59, %v11031_v22  ;;  %v11037_v59 = vld [vmem:[%s20766_s5 + $0x210] sm:$0xff] }
 0x5f8   :  { %v9509_v40 = vpop.f32.mrb[132].mxu1  ;;  %v11015_v49 = vld [vmem:[%s20766_s5 + $0x160] sm:$0xff] }
 0x5f9   :  { %v9598_v2 = vadd.f32 %v9509_v40, %v20314_v9  ;;  %v9511_v47 = vpop.f32.mrb[133].mxu1  ;;  %v13932_v9 = vpack.c.bf16 %v11020_v20, %v11019_v21  ;;  %v11016_v40 = vld [vmem:[%s20766_s5 + $0x168] sm:$0xff] }
 0x5fa   :  { %v9599_v6 = vadd.f32 %v9511_v47, %v20317_v45  ;;  %v9513_v38 = vpop.f32.mrb[134].mxu1  ;;  %v11003_v45 = vld [vmem:[%s20766_s5 + $0x100] sm:$0xff]  ;;  %v13958_v47 = vpack.c.bf16 %v11016_v40, %v11015_v49  ;;  %v11056_v40 = vld [vmem:[%s20766_s5 + $0x2a8] sm:$0xff] }
 0x5fb   :  { %v9514_v58 = vpop.f32.mrb[135].mxu1  ;;  %v20506_v62 = vadd.f32 %v20357_v0, %v9598_v2  ;;  %v11004_v0 = vld [vmem:[%s20766_s5 + $0x108] sm:$0xff]  ;;  %13933 = vmatprep.subr.bf16.mxu0 %v13932_v9  ;;  %v11033_v2 = vld [vmem:[%s20766_s5 + $0x1f0] sm:$0xff]  ;;  %v11055_v49 = vld [vmem:[%s20766_s5 + $0x2a0] sm:$0xff] }
 0x5fc   :  { %v20509_v50 = vadd.f32 %v20359_v29, %v9599_v6  ;;  %v13934_v53 = vpack.c.bf16 %v11004_v0, %v11003_v45  ;;  %v11021_v29 = vld [vmem:[%s20766_s5 + $0x190] sm:$0xff]  ;;  %v11034_v6 = vld [vmem:[%s20766_s5 + $0x1f8] sm:$0xff] }
 0x5fd   :  { %v13936_v63 = vpack.c.bf16 %v11022_v18, %v11021_v29  ;;  %v11017_v38 = vld [vmem:[%s20766_s5 + $0x170] sm:$0xff]  ;;  %v11018_v58 = vld [vmem:[%s20766_s5 + $0x178] sm:$0xff]  ;;  %v13960_v21 = vpack.c.bf16 %v11034_v6, %v11033_v2  ;;  %v11039_v6 = vld [vmem:[%s20766_s5 + $0x220] sm:$0xff] }
 0x5fe   :  { %13935 = vmatpush3.bf16.msra.mxu0 %v13934_v53  ;;  %v13962_v20 = vpack.c.bf16 %v11018_v58, %v11017_v38  ;;  %v11040_v38 = vld [vmem:[%s20766_s5 + $0x228] sm:$0xff]  ;;  %v11057_v58 = vld [vmem:[%s20766_s5 + $0x2b0] sm:$0xff] }
 0x5ff   :  { %13937 = vmatprep.subr.bf16.mxu0 %v13936_v63 }
 0x602   :  { %13939 = vmatpush3.bf16.msra.mxu0 %v13938_v44 }
 0x603   :  { %13941 = vmatprep.subr.bf16.mxu0 %v13940_v37  ;;  %v10865_v37 = vsub.s32 0, %v20631_v8 }
 0x606   :  { %13943 = vmatpush3.bf16.msra.mxu0 %v13942_v35 }
 0x607   :  { %13945 = vmatprep.subr.bf16.mxu0 %v13944_v15 }
 0x60a   :  { %13947 = vmatpush3.bf16.msra.mxu0 %v13946_v24 }
 0x60b   :  { %13949 = vmatprep.subr.bf16.mxu0 %v13948_v30 }
 0x60e   :  { %13951 = vmatpush3.bf16.msra.mxu0 %v13950_v33 }
 0x614   :  { %v20553_v46 = vpop.f32.mrb[188].mxu0 }
 0x615   :  { %v20555_v36 = vpop.f32.mrb[189].mxu0 }
 0x616   :  { %v10770_v42 = vpop.f32.mrb[190].mxu0 }
 0x617   :  { %v10771_v43 = vpop.f32.mrb[191].mxu0 }
 0x618   :  { %v9591_v4 = vpop.f32.mrb[136].mxu1 }
 0x619   :  { %v9602_v48 = vadd.f32 %v9591_v4, %v20376_v26  ;;  %v9593_v7 = vpop.f32.mrb[137].mxu1 }
 0x61a   :  { %v9603_v23 = vadd.f32 %v9593_v7, %v20379_v11  ;;  %v9595_v10 = vpop.f32.mrb[138].mxu1  ;;  %v13952_v11 = vpack.c.bf16 %v11030_v1, %v11029_v57  ;;  %v11053_v1 = vld [vmem:[%s20766_s5 + $0x290] sm:$0xff] }
 0x61b   :  { %v9596_v12 = vpop.f32.mrb[139].mxu1  ;;  %v20578_v27 = vadd.f32 %v20421_v52, %v9602_v48  ;;  %v11014_v52 = vld [vmem:[%s20766_s5 + $0x158] sm:$0xff] }
 0x61c   :  { %v20581_v26 = vadd.f32 %v20423_v5, %v9603_v23  ;;  %v13954_v5 = vpack.c.bf16 %v11014_v52, %v11013_v51  ;;  %13953 = vmatprep.subr.bf16.mxu0 %v13952_v11  ;;  %v11054_v11 = vld [vmem:[%s20766_s5 + $0x298] sm:$0xff] }
 0x61d   :  { %v13968_v22 = vpack.c.bf16 %v11054_v11, %v11053_v1  ;;  %v11049_v1 = vld [vmem:[%s20766_s5 + $0x270] sm:$0xff]  ;;  %v11050_v11 = vld [vmem:[%s20766_s5 + $0x278] sm:$0xff] }
 0x61e   :  { %13955 = vmatpush3.bf16.msra.mxu0 %v13954_v5 }
 0x61f   :  { %13957 = vmatprep.subr.bf16.mxu0 %v13956_v54  ;;  %v11038_v54 = vld [vmem:[%s20766_s5 + $0x218] sm:$0xff] }
 0x620   :  { %v13970_v2 = vpack.c.bf16 %v11038_v54, %v11037_v59 }
 0x622   :  { %13959 = vmatpush3.bf16.msra.mxu0 %v13958_v47  ;;  %v13972_v47 = vpack.c.bf16 %v11056_v40, %v11055_v49  ;;  %v13994_v49 = vpack.c.bf16 %v11050_v11, %v11049_v1 }
 0x623   :  { %13961 = vmatprep.subr.bf16.mxu0 %v13960_v21  ;;  %v11058_v21 = vld [vmem:[%s20766_s5 + $0x2b8] sm:$0xff] }
 0x626   :  { %13963 = vmatpush3.bf16.msra.mxu0 %v13962_v20  ;;  %v13974_v20 = vpack.c.bf16 %v11040_v38, %v11039_v6 }
 0x634   :  { %v20619_v9 = vpop.f32.mrb[192].mxu0 }
 0x635   :  { %v20621_v45 = vpop.f32.mrb[193].mxu0 }
 0x636   :  { %v10852_v0 = vpop.f32.mrb[194].mxu0 }
 0x637   :  { %v10853_v53 = vpop.f32.mrb[195].mxu0  ;;  %v13976_v0 = vpack.c.bf16 %v11058_v21, %v11057_v58  ;;  %v10873_v21 = vsub.s32 2, %v20631_v8 }
 0x638   :  { %v9969_v29 = vpop.f32.mrb[140].mxu1  ;;  %v11041_v53 = vld [vmem:[%s20766_s5 + $0x230] sm:$0xff] }
 0x639   :  { %v10019_v18 = vadd.f32 %v9969_v29, %v20446_v56  ;;  %v9971_v63 = vpop.f32.mrb[141].mxu1  ;;  %v20637_v56 = vld [vmem:[%s20767_s4] sm:$0x3f]  ;;  %v11042_v29 = vld [vmem:[%s20766_s5 + $0x238] sm:$0xff] }
 0x63a   :  { %v10020_v32 = vadd.f32 %v9971_v63, %v20455_v25  ;;  %v9973_v39 = vpop.f32.mrb[142].mxu1  ;;  %v10869_v25 = vsub.s32 1, %v20631_v8  ;;  %v11060_v63 = vld [vmem:[%s20766_s5 + $0x2c8] sm:$0xff] }
 0x63b   :  { %v9974_v41 = vpop.f32.mrb[143].mxu1  ;;  %v20626_v44 = vadd.f32 %v20499_v31, %v10019_v18  ;;  %v10866_v31 = vrot.slane %v20637_v56, %v10865_v37  ;;  %v11059_v18 = vld [vmem:[%s20766_s5 + $0x2c0] sm:$0xff]  ;;  %v10885_v39 = vsub.s32 5, %v20631_v8 }
 0x63c   :  { %v20629_v14 = vadd.f32 %v20501_v3, %v10020_v32  ;;  %v10870_v15 = vrot.slane %v20637_v56, %v10869_v25  ;;  %v10881_v32 = vsub.s32 4, %v20631_v8  ;;  %v13978_v41 = vpack.c.bf16 %v11042_v29, %v11041_v53  ;;  %v11043_v37 = vld [vmem:[%s20766_s5 + $0x240] sm:$0xff]  ;;  %v11044_v25 = vld [vmem:[%s20766_s5 + $0x248] sm:$0xff] }
 0x63d   :  { %v13980_v16 = vpack.c.bf16 %v11060_v63, %v11059_v18 }
 0x658   :  { %v10347_v17 = vpop.f32.mrb[144].mxu1 }
 0x659   :  { %v10436_v19 = vadd.f32 %v10347_v17, %v20506_v62  ;;  %v10349_v35 = vpop.f32.mrb[145].mxu1 }
 0x65a   :  { %v10437_v3 = vadd.f32 %v10349_v35, %v20509_v50  ;;  %v10351_v34 = vpop.f32.mrb[146].mxu1 }
 0x65b   :  { %v10855_v28 = vadd.f32 %v20553_v46, %v10436_v19  ;;  %v10352_v42 = vpop.f32.mrb[147].mxu1  ;;  %v11035_v46 = vld [vmem:[%s20766_s5 + $0x200] sm:$0xff]  ;;  %v11061_v19 = vld [vmem:[%s20766_s5 + $0x2d0] sm:$0xff] }
 0x65c   :  { %v10856_v24 = vadd.f32 %v20555_v36, %v10437_v3  ;;  %v11036_v36 = vld [vmem:[%s20766_s5 + $0x208] sm:$0xff]  ;;  %v10882_v3 = vrot.slane %v20637_v56, %v10881_v32 }
 0x65d   :  { %v10893_v43 = vadd.f32 %v10866_v31, %v10855_v28  ;;  %v13966_v52 = vpack.c.bf16 %v11036_v36, %v11035_v46  ;;  %v11062_v31 = vld [vmem:[%s20766_s5 + $0x2d8] sm:$0xff]  ;;  %v10886_v28 = vrot.slane %v20637_v56, %v10885_v39 }
 0x65e   :  { %v10894_v4 = vadd.f32 %v10870_v15, %v10856_v24  ;;  %v13982_v24 = vpack.c.bf16 %v11044_v25, %v11043_v37 }
 0x65f   :  { %v10899_v61 = vmax.f32 %v10893_v43, 0.0 }
 0x660   :  { %v10900_v55 = vmax.f32 %v10894_v4, 0.0 }
 0x661   :  { %v10911_v48 = vrot.slane %v10899_v61, 2  ;;  %v10929_v30 = vrot.slane %v10899_v61, 4  ;;  %v10947_v50 = vrot.slane %v10899_v61, 6 }
 0x662   :  { %v10912_v7 = vrot.slane %v10900_v55, 2  ;;  %v10930_v60 = vrot.slane %v10900_v55, 4  ;;  %v10948_v33 = vrot.slane %v10900_v55, 6 }
 0x663   :  { %v10923_v62 = vadd.f32 %v10911_v48, %v10899_v61  ;;  %v13984_v61 = vpack.c.bf16 %v11062_v31, %v11061_v19  ;;  %v11063_v48 = vld [vmem:[%s20766_s5 + $0x2e0] sm:$0xff] }
 0x664   :  { %v10924_v13 = vadd.f32 %v10912_v7, %v10900_v55  ;;  %v11045_v55 = vld [vmem:[%s20766_s5 + $0x250] sm:$0xff] }
 0x665   :  { %v10941_v23 = vadd.f32 %v10929_v30, %v10923_v62 }
 0x666   :  { %v10942_v10 = vadd.f32 %v10930_v60, %v10924_v13 }
 0x667   :  { %v10959_v12 = vadd.f32 %v10947_v50, %v10941_v23  ;;  %v11047_v23 = vld [vmem:[%s20766_s5 + $0x260] sm:$0xff] }
 0x668   :  { %v10960_v57 = vadd.f32 %v10948_v33, %v10942_v10  ;;  %v11065_v10 = vld [vmem:[%s20766_s5 + $0x2f0] sm:$0xff]  ;;  %v11066_v33 = vld [vmem:[%s20766_s5 + $0x2f8] sm:$0xff] }
 0x669   :  { %v10965_v5 = vmul.f32 0.25, %v10959_v12 }
 0x66a   :  { %v10966_v51 = vmul.f32 0.25, %v10960_v57  ;;  %v13992_v57 = vpack.c.bf16 %v11066_v33, %v11065_v10  ;;  %v13758_v33 = vld [vmem:[%s20770_s8] ss:$0 sm:$0xff] }
 0x66c   :  { %11138 = vmatprep.mubr.f32.mxu1 %v10966_v51 }
 0x66d   :  { %11139 = vmatmul.mubr.f32.vlgmr.msra.gmra.mrb[156].mxu1 %v10965_v5 }
 0x66e   :  { %13967 = vmatpush3.bf16.msra.mxu1 %v13966_v52 }
 0x66f   :  { %13969 = vmatprep.subr.bf16.mxu1 %v13968_v22 }
 0x672   :  { %13971 = vmatpush3.bf16.msra.mxu1 %v13970_v2 }
 0x673   :  { %13973 = vmatprep.subr.bf16.mxu1 %v13972_v47 }
 0x676   :  { %13975 = vmatpush3.bf16.msra.mxu1 %v13974_v20  ;;  %v10877_v20 = vsub.s32 3, %v20631_v8 }
 0x677   :  { %13977 = vmatprep.subr.bf16.mxu1 %v13976_v0  ;;  %v10874_v0 = vrot.slane %v20637_v56, %v10873_v21 }
 0x678   :  { %v10429_v17 = vpop.f32.mrb[148].mxu1  ;;  %v10878_v29 = vrot.slane %v20637_v56, %v10877_v20 }
 0x679   :  { %v10440_v35 = vadd.f32 %v10429_v17, %v20578_v27  ;;  %v10431_v15 = vpop.f32.mrb[149].mxu1  ;;  %v11046_v27 = vld [vmem:[%s20766_s5 + $0x258] sm:$0xff] }
 0x67a   :  { %v10441_v34 = vadd.f32 %v10431_v15, %v20581_v26  ;;  %v10433_v42 = vpop.f32.mrb[150].mxu1  ;;  %13979 = vmatpush3.bf16.msra.mxu1 %v13978_v41  ;;  %v13986_v30 = vpack.c.bf16 %v11046_v27, %v11045_v55 }
 0x67b   :  { %v10859_v43 = vadd.f32 %v20619_v9, %v10440_v35  ;;  %v10434_v4 = vpop.f32.mrb[151].mxu1  ;;  %13981 = vmatprep.subr.bf16.mxu1 %v13980_v16  ;;  %v11064_v9 = vld [vmem:[%s20766_s5 + $0x2e8] sm:$0xff] }
 0x67c   :  { %v10860_v26 = vadd.f32 %v20621_v45, %v10441_v34  ;;  %v13988_v60 = vpack.c.bf16 %v11064_v9, %v11063_v48  ;;  %v11048_v45 = vld [vmem:[%s20766_s5 + $0x268] sm:$0xff]  ;;  %v15808_v4 = vmov 0.0  }
 0x67d   :  { %v10897_v7 = vadd.f32 %v10882_v3, %v10859_v43  ;;  %v13990_v46 = vpack.c.bf16 %v11048_v45, %v11047_v23  ;;  %13868 = vmatprep.subr.mxu0 %v15808_v4 }
 0x67e   :  { %v10898_v62 = vadd.f32 %v10886_v28, %v10860_v26  ;;  %13983 = vmatpush3.bf16.msra.mxu1 %v13982_v24 }
 0x67f   :  { %v10903_v13 = vmax.f32 %v10897_v7, 0.0  ;;  %13985 = vmatprep.subr.bf16.mxu1 %v13984_v61  ;;  %v11284_v61 = vld [vmem:[%s20768_s7] sm:$0xf]  ;;  %s15810_s7 = smov 118  }
 0x680   :  { %v10904_v50 = vmax.f32 %v10898_v62, 0.0  ;;  %v13757_v62 = vld [vmem:[%s20769_s6] ss:$0 sm:$0xff] }
 0x681   :  { %v10915_v12 = vrot.slane %v10903_v13, 2  ;;  %v10933_v52 = vrot.slane %v10903_v13, 4  ;;  %v10951_v54 = vrot.slane %v10903_v13, 6 }
 0x682   :  { %13987 = vmatpush3.bf16.msra.mxu1 %v13986_v30  ;;  %v10916_v36 = vrot.slane %v10904_v50, 2  ;;  %v10934_v22 = vrot.slane %v10904_v50, 4  ;;  %v10952_v2 = vrot.slane %v10904_v50, 6 }
 0x683   :  { %13989 = vmatprep.subr.bf16.mxu1 %v13988_v60  ;;  %v10927_v51 = vadd.f32 %v10915_v12, %v10903_v13 }
 0x684   :  { %v10928_v5 = vadd.f32 %v10916_v36, %v10904_v50 }
 0x685   :  { %v10945_v59 = vadd.f32 %v10933_v52, %v10927_v51 }
 0x686   :  { %13991 = vmatpush3.bf16.msra.mxu1 %v13990_v46  ;;  %v10946_v40 = vadd.f32 %v10934_v22, %v10928_v5 }
 0x687   :  { %13993 = vmatprep.subr.bf16.mxu1 %v13992_v57  ;;  %v10963_v47 = vadd.f32 %v10951_v54, %v10945_v59 }
 0x688   :  { %v10964_v6 = vadd.f32 %v10952_v2, %v10946_v40 }
 0x689   :  { %v10969_v58 = vmul.f32 0.25, %v10963_v47 }
 0x68a   :  { %13995 = vmatpush3.bf16.msra.mxu1 %v13994_v49  ;;  %v10970_v38 = vmul.f32 0.25, %v10964_v6 }
 0x68c   :  { %11278 = vmatprep.mubr.f32.mxu1 %v10970_v38 }
 0x68d   :  { %11279 = vmatmul.mubr.f32.vlgmr.msra.gmra.mrb[158].mxu1 %v10969_v58 }
 0x698   :  { %v10807_v53 = vpop.f32.mrb[152].mxu1 }
 0x699   :  { %v10857_v18 = vadd.f32 %v10807_v53, %v20626_v44  ;;  %v10809_v63 = vpop.f32.mrb[153].mxu1 }
 0x69a   :  { %v10858_v32 = vadd.f32 %v10809_v63, %v20629_v14  ;;  %v10811_v39 = vpop.f32.mrb[154].mxu1 }
 0x69b   :  { %v10895_v41 = vadd.f32 %v10874_v0, %v10857_v18  ;;  %v10812_v16 = vpop.f32.mrb[155].mxu1 }
 0x69c   :  { %v10896_v37 = vadd.f32 %v10878_v29, %v10858_v32 }
 0x69d   :  { %v10901_v25 = vmax.f32 %v10895_v41, 0.0 }
 0x69e   :  { %v10902_v17 = vmax.f32 %v10896_v37, 0.0 }
 0x69f   :  { %v10913_v19 = vrot.slane %v10901_v25, 2  ;;  %v10931_v8 = vrot.slane %v10901_v25, 4  ;;  %v10949_v28 = vrot.slane %v10901_v25, 6 }
 0x6a0   :  { %v10914_v31 = vrot.slane %v10902_v17, 2  ;;  %v10932_v15 = vrot.slane %v10902_v17, 4  ;;  %v10950_v42 = vrot.slane %v10902_v17, 6 }
 0x6a1   :  { %v10925_v35 = vadd.f32 %v10913_v19, %v10901_v25 }
 0x6a2   :  { %v10926_v3 = vadd.f32 %v10914_v31, %v10902_v17 }
 0x6a3   :  { %v10943_v34 = vadd.f32 %v10931_v8, %v10925_v35 }
 0x6a4   :  { %v10944_v56 = vadd.f32 %v10932_v15, %v10926_v3 }
 0x6a5   :  { %v10961_v44 = vadd.f32 %v10949_v28, %v10943_v34 }
 0x6a6   :  { %v10962_v24 = vadd.f32 %v10950_v42, %v10944_v56 }
 0x6a7   :  { %v10967_v14 = vmul.f32 0.25, %v10961_v44 }
 0x6a8   :  { %v10968_v43 = vmul.f32 0.25, %v10962_v24 }
 0x6aa   :  { %11208 = vmatprep.mubr.f32.mxu0 %v10968_v43 }
 0x6ab   :  { %11209 = vmatmul.mubr.f32.vlgmr.msra.gmra.mrb[50].mxu0 %v10967_v14 }
 0x6ac   :  { %13869 = vmatpush3.msk.msra.mxu0 %vm11298_vm1, %v11284_v61  ;;  %13870 = vmatprep.mubr.msk.f32.mxu0 %vm15809_vm2, %v15808_v4 }
 0x740   :  { %v13793_v55 = vpop.f32.mrb[156].mxu1 }
 0x741   :  { %v13794_v27 = vpop.f32.mrb[157].mxu1 }
 0x742   :  { %v13795_v26 = vadd.f32 %v13794_v27, %v13793_v55 }
 0x744   :  { %v11141_v60 = vadd.f32 %v13795_v26, %v13757_v62 }
 0x760   :  { %v13863_v48 = vpop.f32.mrb[158].mxu1 }
 0x761   :  { %v13864_v9 = vpop.f32.mrb[159].mxu1 }
 0x762   :  { %v13865_v7 = vadd.f32 %v13864_v9, %v13863_v48 }
 0x77e   :  { %v13828_v30 = vpop.f32.mrb[50].mxu0 }
 0x77f   :  { %v13829_v13 = vpop.f32.mrb[51].mxu0 }
 0x780   :  { %v13830_v23 = vadd.f32 %v13829_v13, %v13828_v30 }
 0x782   :  { %v11211_v45 = vadd.f32 %v13830_v23, %v11141_v60 }
 0x784   :  { %v11281_v50 = vadd.f32 %v13865_v7, %v11211_v45 }
 0x786   :  { %11293 = vrot.lane.b32.xlu0 %v11281_v50, %s15810_s7 }
 0x7f8   :  { %v11294_v10 = vpop.permute.xlu0 %11293 }
 0x7f9   :  { %13871 = vmatmul.mubr.msk.f32.vlgmr.msra.gmra.mrb[196].mxu0 %vm11295_vm3, %v11294_v10 }
 0x8cc   :  { %v11368_v12 = vpop.f32.mrb[196].mxu0 }
 0x8cd   :  { %v11369_v46 = vadd.f32 %v13758_v33, %v11368_v12  ;;  %v13872_v36 = vpop.f32.mrb[197].mxu0 }
 0x8cf   :  { %v11372_v57 = vadd.f32 %v11369_v46, %v11281_v50 }
 0x8d1   :  { %11374 = vst.msk [vmem:[%s20771_s9] sm:$0x3] %vm11373_vm4, %v11372_v57 }

</bundles_post_ra>
